<compile_context>
chip_gen: v7x
topology: tpu7x:2x2x1
jax: 0.10.0
libtpu: 0.0.40
codegen_flags: <defaults>
</compile_context>

<pallas_src>
import jax
import jax.numpy as jnp
from jax import lax
from jax.experimental import pallas as pl
from jax.experimental.pallas import tpu as pltpu

EPS = 1e-5
_ACC_BAND = 512          # flat rows accumulated in registers before one store


def _resnet_block_kernel(x_ref, w1_ref, b1_ref, w2_ref, b2_ref, o_ref,
                         pad_ref, acc_ref):
    """One batch element, NHWC.

    x_ref  : (1, H, W, C) f32
    w*_ref : (9, C, C)    bf16   tap-major (k = dy*3+dx), [C_in, C_out]
    b*_ref : (1, C)       f32
    o_ref  : (1, H, W, C) f32
    pad_ref: ((H+2)*(W+2), C) f32  reflection-padded image, flat rows
    acc_ref: (H*(W+2)-2, C)   f32  conv output in padded-width flat coords
    """
    _, H, W, C = x_ref.shape
    Wp = W + 2
    M = H * Wp - 2                # flat index h*Wp + w for every valid (h, w)
    inv_hw = 1.0 / float(H * W)

    # ---- reflection pad: write the padded image once into the flat scratch ----
    def write_padded(get_row):
        # get_row(h) -> (W, C) f32 row h of the *unpadded* image
        for h in range(H):
            row = get_row(h)
            base = (h + 1) * Wp
            pad_ref[pl.ds(base + 1, W), :] = row
            pad_ref[pl.ds(base, 1), :] = row[1:2, :]                   # left  reflect
            pad_ref[pl.ds(base + W + 1, 1), :] = row[W - 2:W - 1, :]   # right reflect
        # top / bottom padded rows (copies carry the reflected corners too)
        top = pad_ref[pl.ds(2 * Wp, Wp), :]
        pad_ref[pl.ds(0, Wp), :] = top
        bot = pad_ref[pl.ds((H - 1) * Wp, Wp), :]
        pad_ref[pl.ds((H + 1) * Wp, Wp), :] = bot

    # ---- 3x3 conv: 9 shifted (band, C) x (C, C) MXU matmuls, banded over M ----
    def conv3x3(w_ref, b_ref):
        bias = b_ref[...]                                    # (1, C) f32
        for m0 in range(0, M, _ACC_BAND):
            mlen = min(_ACC_BAND, M - m0)
            acc = jnp.broadcast_to(bias, (mlen, C))
            for dy in range(3):
                for dx in range(3):
                    lhs = pad_ref[pl.ds(m0 + dy * Wp + dx, mlen), :]
                    acc = acc + jnp.dot(lhs.astype(jnp.bfloat16),
                                        w_ref[dy * 3 + dx, :, :],
                                        preferred_element_type=jnp.float32)
            acc_ref[pl.ds(m0, mlen), :] = acc                # one store per band

    # ---- InstanceNorm stats: single pass, sum & sum-of-squares (valid cols) ----
    def in_stats():
        s = jnp.zeros((1, C), jnp.float32)
        ss = jnp.zeros((1, C), jnp.float32)
        for h in range(H):
            a = acc_ref[pl.ds(h * Wp, W), :]
            s = s + jnp.sum(a, axis=0, keepdims=True)
            ss = ss + jnp.sum(a * a, axis=0, keepdims=True)
        mean = s * inv_hw
        var = ss * inv_hw - mean * mean
        return mean, lax.rsqrt(var + EPS)

    # ------------------------------ block body ------------------------------
    write_padded(lambda h: x_ref[0, h, :, :])        # pad(x)
    conv3x3(w1_ref, b1_ref)                          # conv1 -> acc

    mean1, rstd1 = in_stats()                        # IN1 stats (one pass)

    def relu_norm_row(h):                            # IN1 + ReLU, row by row
        a = acc_ref[pl.ds(h * Wp, W), :]
        return jnp.maximum((a - mean1) * rstd1, 0.0)

    write_padded(relu_norm_row)                      # pad scratch reused for conv2
    conv3x3(w2_ref, b2_ref)                          # conv2 -> acc (overwrites)

    mean2, rstd2 = in_stats()                        # IN2 stats
    for h in range(H):                               # IN2 + residual + ReLU
        a = acc_ref[pl.ds(h * Wp, W), :]
        y = (a - mean2) * rstd2
        o_ref[0, h, :, :] = jnp.maximum(x_ref[0, h, :, :] + y, 0.0)


def resnet_block_pallas(x_nchw, w1, b1, w2, b2):
    """x_nchw: (N, C, H, W) f32. w*: (C_out, C_in, 3, 3) torch layout. b*: (C,)."""
    N, C, H, W = x_nchw.shape
    assert H >= 2 and W >= 2, "ReflectionPad2d(1) requires H >= 2 and W >= 2"

    x = jnp.transpose(x_nchw, (0, 2, 3, 1)).astype(jnp.float32)      # NHWC

    # torch (O, I, 3, 3) -> (3, 3, I, O) -> (9, I, O); bf16 MXU operands.
    def prep_w(w):
        return jnp.transpose(w, (2, 3, 1, 0)).reshape(9, C, C).astype(jnp.bfloat16)

    w1k, w2k = prep_w(w1), prep_w(w2)
    b1k = b1.reshape(1, C).astype(jnp.float32)
    b2k = b2.reshape(1, C).astype(jnp.float32)

    cost = pl.CostEstimate(
        flops=int(N * 2 * 2 * 9 * H * W * C * C),
        transcendentals=int(2 * N * C),
        bytes_accessed=int(2 * N * H * W * C * 4 + 2 * 9 * C * C * 2 + 2 * C * 4),
    )

    out = pl.pallas_call(
        _resnet_block_kernel,
        out_shape=jax.ShapeDtypeStruct((N, H, W, C), jnp.float32),
        grid_spec=pltpu.PrefetchScalarGridSpec(
            num_scalar_prefetch=0,
            grid=(N,),
            in_specs=[
                pl.BlockSpec((1, H, W, C), lambda n: (n, 0, 0, 0)),
                pl.BlockSpec((9, C, C), lambda n: (0, 0, 0)),
                pl.BlockSpec((1, C), lambda n: (0, 0)),
                pl.BlockSpec((9, C, C), lambda n: (0, 0, 0)),
                pl.BlockSpec((1, C), lambda n: (0, 0)),
            ],
            out_specs=pl.BlockSpec((1, H, W, C), lambda n: (n, 0, 0, 0)),
            scratch_shapes=[
                pltpu.VMEM(((H + 2) * (W + 2), C), jnp.float32),   # padded image
                pltpu.VMEM((H * (W + 2) - 2, C), jnp.float32),     # conv accumulator
            ],
        ),
        compiler_params=pltpu.CompilerParams(
            dimension_semantics=("parallel",),
            vmem_limit_bytes=48 * 1024 * 1024),
        cost_estimate=cost,
    )(x, w1k, b1k, w2k, b2k)

    # NOTE: for a chain of ResnetBlocks keep activations NHWC end-to-end and
    # drop these transposes; they exist only to match the torch NCHW API.
    return jnp.transpose(out, (0, 3, 1, 2))


# ---------------- pure-JAX reference (precision-matched: bf16 MXU operands,
# f32 accumulation and norm math — same policy as the kernel) ----------------
def _conv3x3_ref(x, w, b):
    xp = jnp.pad(x, ((0, 0), (0, 0), (1, 1), (1, 1)), mode="reflect")
    y = lax.conv_general_dilated(
        xp.astype(jnp.bfloat16), w.astype(jnp.bfloat16),
        window_strides=(1, 1), padding="VALID",
        dimension_numbers=("NCHW", "OIHW", "NCHW"),
        preferred_element_type=jnp.float32)
    return y + b.reshape(1, -1, 1, 1)


def _inorm_ref(x):
    mean = jnp.mean(x, axis=(2, 3), keepdims=True)
    var = jnp.mean((x - mean) ** 2, axis=(2, 3), keepdims=True)
    return (x - mean) * lax.rsqrt(var + EPS)


def resnet_block_ref(x, w1, b1, w2, b2):
    h = _conv3x3_ref(x, w1, b1)
    h = jnp.maximum(_inorm_ref(h), 0.0)
    h = _conv3x3_ref(h, w2, b2)
    h = _inorm_ref(h)
    return jnp.maximum(x + h, 0.0)


if __name__ == "__main__":
    N, C, H, W = 2, 4, 16, 16
    key = jax.random.PRNGKey(0)
    kx, kw1, kw2 = jax.random.split(key, 3)

    x = jax.random.normal(kx, (N, C, H, W), dtype=jnp.float32)
    # Conv2d.__init__: weight ~ N(0, 1), bias filled with 0.0
    w1 = jax.random.normal(kw1, (C, C, 3, 3), dtype=jnp.float32)
    w2 = jax.random.normal(kw2, (C, C, 3, 3), dtype=jnp.float32)
    b1 = jnp.zeros((C,), jnp.float32)
    b2 = jnp.zeros((C,), jnp.float32)

    out = jax.block_until_ready(resnet_block_pallas(x, w1, b1, w2, b2))
    ref = jax.block_until_ready(resnet_block_ref(x, w1, b1, w2, b2))

    assert out.shape == (N, C, H, W)
    max_err = float(jnp.max(jnp.abs(out - ref)))
    assert jnp.allclose(out, ref, atol=2e-2, rtol=2e-2), f"max abs err {max_err}"

    print("KERNEL_OK")
</pallas_src>

<mosaic_0001>
module attributes {stable_mosaic.version = 11 : i64} {
  func.func @_resnet_block_kernel(%arg0: i32, %arg1: memref<1x16x16x4xf32, #tpu.memory_space<vmem>>, %arg2: memref<9x4x4xbf16, #tpu.memory_space<vmem>>, %arg3: memref<1x4xf32, #tpu.memory_space<vmem>>, %arg4: memref<9x4x4xbf16, #tpu.memory_space<vmem>>, %arg5: memref<1x4xf32, #tpu.memory_space<vmem>>, %arg6: memref<1x16x16x4xf32, #tpu.memory_space<vmem>>, %arg7: memref<324x4xf32, #tpu.memory_space<vmem>>, %arg8: memref<286x4xf32, #tpu.memory_space<vmem>>) attributes {dimension_semantics = [#tpu.dimension_semantics<parallel>], iteration_bounds = array<i64: 2>, scalar_prefetch = 0 : i64, scratch_operands = 2 : i64, tpu.core_type = #tpu.core_type<tc>, window_params = [{transform_indices = @transform_0, window_bounds = array<i64: 1, 16, 16, 4>}, {pipeline_mode = #tpu.pipeline_mode<synchronous>, transform_indices = @transform_1, window_bounds = array<i64: 9, 4, 4>}, {pipeline_mode = #tpu.pipeline_mode<synchronous>, transform_indices = @transform_2, window_bounds = array<i64: 1, 4>}, {pipeline_mode = #tpu.pipeline_mode<synchronous>, transform_indices = @transform_3, window_bounds = array<i64: 9, 4, 4>}, {pipeline_mode = #tpu.pipeline_mode<synchronous>, transform_indices = @transform_4, window_bounds = array<i64: 1, 4>}, {transform_indices = @transform_5, window_bounds = array<i64: 1, 16, 16, 4>}]} {
    %c0 = arith.constant 0 : index
    %c0_0 = arith.constant 0 : index
    %c0_1 = arith.constant 0 : index
    %c0_2 = arith.constant 0 : index
    %0 = vector.load %arg1[%c0, %c0_0, %c0_1, %c0_2] : memref<1x16x16x4xf32, #tpu.memory_space<vmem>>, vector<1x1x16x4xf32>
    %1 = vector.shape_cast %0 : vector<1x1x16x4xf32> to vector<16x4xf32>
    %c19 = arith.constant 19 : index
    %c0_3 = arith.constant 0 : index
    %2 = vector.load %arg7[%c19, %c0_3] : memref<324x4xf32, #tpu.memory_space<vmem>>, vector<16x4xf32>
    tpu.vector_store %arg7[%c19, %c0_3], %1 {strides = array<i32>} : memref<324x4xf32, #tpu.memory_space<vmem>>, vector<16x4xf32>,
    %3 = vector.extract_strided_slice %1 {offsets = [1, 0], sizes = [1, 4], strides = [1, 1]} : vector<16x4xf32> to vector<1x4xf32>
    %c18 = arith.constant 18 : index
    %c0_4 = arith.constant 0 : index
    %4 = vector.load %arg7[%c18, %c0_4] : memref<324x4xf32, #tpu.memory_space<vmem>>, vector<1x4xf32>
    tpu.vector_store %arg7[%c18, %c0_4], %3 {strides = array<i32>} : memref<324x4xf32, #tpu.memory_space<vmem>>, vector<1x4xf32>,
    %5 = vector.extract_strided_slice %1 {offsets = [14, 0], sizes = [1, 4], strides = [1, 1]} : vector<16x4xf32> to vector<1x4xf32>
    %c35 = arith.constant 35 : index
    %c0_5 = arith.constant 0 : index
    %6 = vector.load %arg7[%c35, %c0_5] : memref<324x4xf32, #tpu.memory_space<vmem>>, vector<1x4xf32>
    tpu.vector_store %arg7[%c35, %c0_5], %5 {strides = array<i32>} : memref<324x4xf32, #tpu.memory_space<vmem>>, vector<1x4xf32>,
    %c0_6 = arith.constant 0 : index
    %c1 = arith.constant 1 : index
    %c0_7 = arith.constant 0 : index
    %c0_8 = arith.constant 0 : index
    %7 = vector.load %arg1[%c0_6, %c1, %c0_7, %c0_8] : memref<1x16x16x4xf32, #tpu.memory_space<vmem>>, vector<1x1x16x4xf32>
    %8 = vector.shape_cast %7 : vector<1x1x16x4xf32> to vector<16x4xf32>
    %c37 = arith.constant 37 : index
    %c0_9 = arith.constant 0 : index
    %9 = vector.load %arg7[%c37, %c0_9] : memref<324x4xf32, #tpu.memory_space<vmem>>, vector<16x4xf32>
    tpu.vector_store %arg7[%c37, %c0_9], %8 {strides = array<i32>} : memref<324x4xf32, #tpu.memory_space<vmem>>, vector<16x4xf32>,
    %10 = vector.extract_strided_slice %8 {offsets = [1, 0], sizes = [1, 4], strides = [1, 1]} : vector<16x4xf32> to vector<1x4xf32>
    %c36 = arith.constant 36 : index
    %c0_10 = arith.constant 0 : index
    %11 = vector.load %arg7[%c36, %c0_10] : memref<324x4xf32, #tpu.memory_space<vmem>>, vector<1x4xf32>
    tpu.vector_store %arg7[%c36, %c0_10], %10 {strides = array<i32>} : memref<324x4xf32, #tpu.memory_space<vmem>>, vector<1x4xf32>,
    %12 = vector.extract_strided_slice %8 {offsets = [14, 0], sizes = [1, 4], strides = [1, 1]} : vector<16x4xf32> to vector<1x4xf32>
    %c53 = arith.constant 53 : index
    %c0_11 = arith.constant 0 : index
    %13 = vector.load %arg7[%c53, %c0_11] : memref<324x4xf32, #tpu.memory_space<vmem>>, vector<1x4xf32>
    tpu.vector_store %arg7[%c53, %c0_11], %12 {strides = array<i32>} : memref<324x4xf32, #tpu.memory_space<vmem>>, vector<1x4xf32>,
    %c0_12 = arith.constant 0 : index
    %c2 = arith.constant 2 : index
    %c0_13 = arith.constant 0 : index
    %c0_14 = arith.constant 0 : index
    %14 = vector.load %arg1[%c0_12, %c2, %c0_13, %c0_14] : memref<1x16x16x4xf32, #tpu.memory_space<vmem>>, vector<1x1x16x4xf32>
    %15 = vector.shape_cast %14 : vector<1x1x16x4xf32> to vector<16x4xf32>
    %c55 = arith.constant 55 : index
    %c0_15 = arith.constant 0 : index
    %16 = vector.load %arg7[%c55, %c0_15] : memref<324x4xf32, #tpu.memory_space<vmem>>, vector<16x4xf32>
    tpu.vector_store %arg7[%c55, %c0_15], %15 {strides = array<i32>} : memref<324x4xf32, #tpu.memory_space<vmem>>, vector<16x4xf32>,
    %17 = vector.extract_strided_slice %15 {offsets = [1, 0], sizes = [1, 4], strides = [1, 1]} : vector<16x4xf32> to vector<1x4xf32>
    %c54 = arith.constant 54 : index
    %c0_16 = arith.constant 0 : index
    %18 = vector.load %arg7[%c54, %c0_16] : memref<324x4xf32, #tpu.memory_space<vmem>>, vector<1x4xf32>
    tpu.vector_store %arg7[%c54, %c0_16], %17 {strides = array<i32>} : memref<324x4xf32, #tpu.memory_space<vmem>>, vector<1x4xf32>,
    %19 = vector.extract_strided_slice %15 {offsets = [14, 0], sizes = [1, 4], strides = [1, 1]} : vector<16x4xf32> to vector<1x4xf32>
    %c71 = arith.constant 71 : index
    %c0_17 = arith.constant 0 : index
    %20 = vector.load %arg7[%c71, %c0_17] : memref<324x4xf32, #tpu.memory_space<vmem>>, vector<1x4xf32>
    tpu.vector_store %arg7[%c71, %c0_17], %19 {strides = array<i32>} : memref<324x4xf32, #tpu.memory_space<vmem>>, vector<1x4xf32>,
    %c0_18 = arith.constant 0 : index
    %c3 = arith.constant 3 : index
    %c0_19 = arith.constant 0 : index
    %c0_20 = arith.constant 0 : index
    %21 = vector.load %arg1[%c0_18, %c3, %c0_19, %c0_20] : memref<1x16x16x4xf32, #tpu.memory_space<vmem>>, vector<1x1x16x4xf32>
    %22 = vector.shape_cast %21 : vector<1x1x16x4xf32> to vector<16x4xf32>
    %c73 = arith.constant 73 : index
    %c0_21 = arith.constant 0 : index
    %23 = vector.load %arg7[%c73, %c0_21] : memref<324x4xf32, #tpu.memory_space<vmem>>, vector<16x4xf32>
    tpu.vector_store %arg7[%c73, %c0_21], %22 {strides = array<i32>} : memref<324x4xf32, #tpu.memory_space<vmem>>, vector<16x4xf32>,
    %24 = vector.extract_strided_slice %22 {offsets = [1, 0], sizes = [1, 4], strides = [1, 1]} : vector<16x4xf32> to vector<1x4xf32>
    %c72 = arith.constant 72 : index
    %c0_22 = arith.constant 0 : index
    %25 = vector.load %arg7[%c72, %c0_22] : memref<324x4xf32, #tpu.memory_space<vmem>>, vector<1x4xf32>
    tpu.vector_store %arg7[%c72, %c0_22], %24 {strides = array<i32>} : memref<324x4xf32, #tpu.memory_space<vmem>>, vector<1x4xf32>,
    %26 = vector.extract_strided_slice %22 {offsets = [14, 0], sizes = [1, 4], strides = [1, 1]} : vector<16x4xf32> to vector<1x4xf32>
    %c89 = arith.constant 89 : index
    %c0_23 = arith.constant 0 : index
    %27 = vector.load %arg7[%c89, %c0_23] : memref<324x4xf32, #tpu.memory_space<vmem>>, vector<1x4xf32>
    tpu.vector_store %arg7[%c89, %c0_23], %26 {strides = array<i32>} : memref<324x4xf32, #tpu.memory_space<vmem>>, vector<1x4xf32>,
    %c0_24 = arith.constant 0 : index
    %c4 = arith.constant 4 : index
    %c0_25 = arith.constant 0 : index
    %c0_26 = arith.constant 0 : index
    %28 = vector.load %arg1[%c0_24, %c4, %c0_25, %c0_26] : memref<1x16x16x4xf32, #tpu.memory_space<vmem>>, vector<1x1x16x4xf32>
    %29 = vector.shape_cast %28 : vector<1x1x16x4xf32> to vector<16x4xf32>
    %c91 = arith.constant 91 : index
    %c0_27 = arith.constant 0 : index
    %30 = vector.load %arg7[%c91, %c0_27] : memref<324x4xf32, #tpu.memory_space<vmem>>, vector<16x4xf32>
    tpu.vector_store %arg7[%c91, %c0_27], %29 {strides = array<i32>} : memref<324x4xf32, #tpu.memory_space<vmem>>, vector<16x4xf32>,
    %31 = vector.extract_strided_slice %29 {offsets = [1, 0], sizes = [1, 4], strides = [1, 1]} : vector<16x4xf32> to vector<1x4xf32>
    %c90 = arith.constant 90 : index
    %c0_28 = arith.constant 0 : index
    %32 = vector.load %arg7[%c90, %c0_28] : memref<324x4xf32, #tpu.memory_space<vmem>>, vector<1x4xf32>
    tpu.vector_store %arg7[%c90, %c0_28], %31 {strides = array<i32>} : memref<324x4xf32, #tpu.memory_space<vmem>>, vector<1x4xf32>,
    %33 = vector.extract_strided_slice %29 {offsets = [14, 0], sizes = [1, 4], strides = [1, 1]} : vector<16x4xf32> to vector<1x4xf32>
    %c107 = arith.constant 107 : index
    %c0_29 = arith.constant 0 : index
    %34 = vector.load %arg7[%c107, %c0_29] : memref<324x4xf32, #tpu.memory_space<vmem>>, vector<1x4xf32>
    tpu.vector_store %arg7[%c107, %c0_29], %33 {strides = array<i32>} : memref<324x4xf32, #tpu.memory_space<vmem>>, vector<1x4xf32>,
    %c0_30 = arith.constant 0 : index
    %c5 = arith.constant 5 : index
    %c0_31 = arith.constant 0 : index
    %c0_32 = arith.constant 0 : index
    %35 = vector.load %arg1[%c0_30, %c5, %c0_31, %c0_32] : memref<1x16x16x4xf32, #tpu.memory_space<vmem>>, vector<1x1x16x4xf32>
    %36 = vector.shape_cast %35 : vector<1x1x16x4xf32> to vector<16x4xf32>
    %c109 = arith.constant 109 : index
    %c0_33 = arith.constant 0 : index
    %37 = vector.load %arg7[%c109, %c0_33] : memref<324x4xf32, #tpu.memory_space<vmem>>, vector<16x4xf32>
    tpu.vector_store %arg7[%c109, %c0_33], %36 {strides = array<i32>} : memref<324x4xf32, #tpu.memory_space<vmem>>, vector<16x4xf32>,
    %38 = vector.extract_strided_slice %36 {offsets = [1, 0], sizes = [1, 4], strides = [1, 1]} : vector<16x4xf32> to vector<1x4xf32>
    %c108 = arith.constant 108 : index
    %c0_34 = arith.constant 0 : index
    %39 = vector.load %arg7[%c108, %c0_34] : memref<324x4xf32, #tpu.memory_space<vmem>>, vector<1x4xf32>
    tpu.vector_store %arg7[%c108, %c0_34], %38 {strides = array<i32>} : memref<324x4xf32, #tpu.memory_space<vmem>>, vector<1x4xf32>,
    %40 = vector.extract_strided_slice %36 {offsets = [14, 0], sizes = [1, 4], strides = [1, 1]} : vector<16x4xf32> to vector<1x4xf32>
    %c125 = arith.constant 125 : index
    %c0_35 = arith.constant 0 : index
    %41 = vector.load %arg7[%c125, %c0_35] : memref<324x4xf32, #tpu.memory_space<vmem>>, vector<1x4xf32>
    tpu.vector_store %arg7[%c125, %c0_35], %40 {strides = array<i32>} : memref<324x4xf32, #tpu.memory_space<vmem>>, vector<1x4xf32>,
    %c0_36 = arith.constant 0 : index
    %c6 = arith.constant 6 : index
    %c0_37 = arith.constant 0 : index
    %c0_38 = arith.constant 0 : index
    %42 = vector.load %arg1[%c0_36, %c6, %c0_37, %c0_38] : memref<1x16x16x4xf32, #tpu.memory_space<vmem>>, vector<1x1x16x4xf32>
    %43 = vector.shape_cast %42 : vector<1x1x16x4xf32> to vector<16x4xf32>
    %c127 = arith.constant 127 : index
    %c0_39 = arith.constant 0 : index
    %44 = vector.load %arg7[%c127, %c0_39] : memref<324x4xf32, #tpu.memory_space<vmem>>, vector<16x4xf32>
    tpu.vector_store %arg7[%c127, %c0_39], %43 {strides = array<i32>} : memref<324x4xf32, #tpu.memory_space<vmem>>, vector<16x4xf32>,
    %45 = vector.extract_strided_slice %43 {offsets = [1, 0], sizes = [1, 4], strides = [1, 1]} : vector<16x4xf32> to vector<1x4xf32>
    %c126 = arith.constant 126 : index
    %c0_40 = arith.constant 0 : index
    %46 = vector.load %arg7[%c126, %c0_40] : memref<324x4xf32, #tpu.memory_space<vmem>>, vector<1x4xf32>
    tpu.vector_store %arg7[%c126, %c0_40], %45 {strides = array<i32>} : memref<324x4xf32, #tpu.memory_space<vmem>>, vector<1x4xf32>,
    %47 = vector.extract_strided_slice %43 {offsets = [14, 0], sizes = [1, 4], strides = [1, 1]} : vector<16x4xf32> to vector<1x4xf32>
    %c143 = arith.constant 143 : index
    %c0_41 = arith.constant 0 : index
    %48 = vector.load %arg7[%c143, %c0_41] : memref<324x4xf32, #tpu.memory_space<vmem>>, vector<1x4xf32>
    tpu.vector_store %arg7[%c143, %c0_41], %47 {strides = array<i32>} : memref<324x4xf32, #tpu.memory_space<vmem>>, vector<1x4xf32>,
    %c0_42 = arith.constant 0 : index
    %c7 = arith.constant 7 : index
    %c0_43 = arith.constant 0 : index
    %c0_44 = arith.constant 0 : index
    %49 = vector.load %arg1[%c0_42, %c7, %c0_43, %c0_44] : memref<1x16x16x4xf32, #tpu.memory_space<vmem>>, vector<1x1x16x4xf32>
    %50 = vector.shape_cast %49 : vector<1x1x16x4xf32> to vector<16x4xf32>
    %c145 = arith.constant 145 : index
    %c0_45 = arith.constant 0 : index
    %51 = vector.load %arg7[%c145, %c0_45] : memref<324x4xf32, #tpu.memory_space<vmem>>, vector<16x4xf32>
    tpu.vector_store %arg7[%c145, %c0_45], %50 {strides = array<i32>} : memref<324x4xf32, #tpu.memory_space<vmem>>, vector<16x4xf32>,
    %52 = vector.extract_strided_slice %50 {offsets = [1, 0], sizes = [1, 4], strides = [1, 1]} : vector<16x4xf32> to vector<1x4xf32>
    %c144 = arith.constant 144 : index
    %c0_46 = arith.constant 0 : index
    %53 = vector.load %arg7[%c144, %c0_46] : memref<324x4xf32, #tpu.memory_space<vmem>>, vector<1x4xf32>
    tpu.vector_store %arg7[%c144, %c0_46], %52 {strides = array<i32>} : memref<324x4xf32, #tpu.memory_space<vmem>>, vector<1x4xf32>,
    %54 = vector.extract_strided_slice %50 {offsets = [14, 0], sizes = [1, 4], strides = [1, 1]} : vector<16x4xf32> to vector<1x4xf32>
    %c161 = arith.constant 161 : index
    %c0_47 = arith.constant 0 : index
    %55 = vector.load %arg7[%c161, %c0_47] : memref<324x4xf32, #tpu.memory_space<vmem>>, vector<1x4xf32>
    tpu.vector_store %arg7[%c161, %c0_47], %54 {strides = array<i32>} : memref<324x4xf32, #tpu.memory_space<vmem>>, vector<1x4xf32>,
    %c0_48 = arith.constant 0 : index
    %c8 = arith.constant 8 : index
    %c0_49 = arith.constant 0 : index
    %c0_50 = arith.constant 0 : index
    %56 = vector.load %arg1[%c0_48, %c8, %c0_49, %c0_50] : memref<1x16x16x4xf32, #tpu.memory_space<vmem>>, vector<1x1x16x4xf32>
    %57 = vector.shape_cast %56 : vector<1x1x16x4xf32> to vector<16x4xf32>
    %c163 = arith.constant 163 : index
    %c0_51 = arith.constant 0 : index
    %58 = vector.load %arg7[%c163, %c0_51] : memref<324x4xf32, #tpu.memory_space<vmem>>, vector<16x4xf32>
    tpu.vector_store %arg7[%c163, %c0_51], %57 {strides = array<i32>} : memref<324x4xf32, #tpu.memory_space<vmem>>, vector<16x4xf32>,
    %59 = vector.extract_strided_slice %57 {offsets = [1, 0], sizes = [1, 4], strides = [1, 1]} : vector<16x4xf32> to vector<1x4xf32>
    %c162 = arith.constant 162 : index
    %c0_52 = arith.constant 0 : index
    %60 = vector.load %arg7[%c162, %c0_52] : memref<324x4xf32, #tpu.memory_space<vmem>>, vector<1x4xf32>
    tpu.vector_store %arg7[%c162, %c0_52], %59 {strides = array<i32>} : memref<324x4xf32, #tpu.memory_space<vmem>>, vector<1x4xf32>,
    %61 = vector.extract_strided_slice %57 {offsets = [14, 0], sizes = [1, 4], strides = [1, 1]} : vector<16x4xf32> to vector<1x4xf32>
    %c179 = arith.constant 179 : index
    %c0_53 = arith.constant 0 : index
    %62 = vector.load %arg7[%c179, %c0_53] : memref<324x4xf32, #tpu.memory_space<vmem>>, vector<1x4xf32>
    tpu.vector_store %arg7[%c179, %c0_53], %61 {strides = array<i32>} : memref<324x4xf32, #tpu.memory_space<vmem>>, vector<1x4xf32>,
    %c0_54 = arith.constant 0 : index
    %c9 = arith.constant 9 : index
    %c0_55 = arith.constant 0 : index
    %c0_56 = arith.constant 0 : index
    %63 = vector.load %arg1[%c0_54, %c9, %c0_55, %c0_56] : memref<1x16x16x4xf32, #tpu.memory_space<vmem>>, vector<1x1x16x4xf32>
    %64 = vector.shape_cast %63 : vector<1x1x16x4xf32> to vector<16x4xf32>
    %c181 = arith.constant 181 : index
    %c0_57 = arith.constant 0 : index
    %65 = vector.load %arg7[%c181, %c0_57] : memref<324x4xf32, #tpu.memory_space<vmem>>, vector<16x4xf32>
    tpu.vector_store %arg7[%c181, %c0_57], %64 {strides = array<i32>} : memref<324x4xf32, #tpu.memory_space<vmem>>, vector<16x4xf32>,
    %66 = vector.extract_strided_slice %64 {offsets = [1, 0], sizes = [1, 4], strides = [1, 1]} : vector<16x4xf32> to vector<1x4xf32>
    %c180 = arith.constant 180 : index
    %c0_58 = arith.constant 0 : index
    %67 = vector.load %arg7[%c180, %c0_58] : memref<324x4xf32, #tpu.memory_space<vmem>>, vector<1x4xf32>
    tpu.vector_store %arg7[%c180, %c0_58], %66 {strides = array<i32>} : memref<324x4xf32, #tpu.memory_space<vmem>>, vector<1x4xf32>,
    %68 = vector.extract_strided_slice %64 {offsets = [14, 0], sizes = [1, 4], strides = [1, 1]} : vector<16x4xf32> to vector<1x4xf32>
    %c197 = arith.constant 197 : index
    %c0_59 = arith.constant 0 : index
    %69 = vector.load %arg7[%c197, %c0_59] : memref<324x4xf32, #tpu.memory_space<vmem>>, vector<1x4xf32>
    tpu.vector_store %arg7[%c197, %c0_59], %68 {strides = array<i32>} : memref<324x4xf32, #tpu.memory_space<vmem>>, vector<1x4xf32>,
    %c0_60 = arith.constant 0 : index
    %c10 = arith.constant 10 : index
    %c0_61 = arith.constant 0 : index
    %c0_62 = arith.constant 0 : index
    %70 = vector.load %arg1[%c0_60, %c10, %c0_61, %c0_62] : memref<1x16x16x4xf32, #tpu.memory_space<vmem>>, vector<1x1x16x4xf32>
    %71 = vector.shape_cast %70 : vector<1x1x16x4xf32> to vector<16x4xf32>
    %c199 = arith.constant 199 : index
    %c0_63 = arith.constant 0 : index
    %72 = vector.load %arg7[%c199, %c0_63] : memref<324x4xf32, #tpu.memory_space<vmem>>, vector<16x4xf32>
    tpu.vector_store %arg7[%c199, %c0_63], %71 {strides = array<i32>} : memref<324x4xf32, #tpu.memory_space<vmem>>, vector<16x4xf32>,
    %73 = vector.extract_strided_slice %71 {offsets = [1, 0], sizes = [1, 4], strides = [1, 1]} : vector<16x4xf32> to vector<1x4xf32>
    %c198 = arith.constant 198 : index
    %c0_64 = arith.constant 0 : index
    %74 = vector.load %arg7[%c198, %c0_64] : memref<324x4xf32, #tpu.memory_space<vmem>>, vector<1x4xf32>
    tpu.vector_store %arg7[%c198, %c0_64], %73 {strides = array<i32>} : memref<324x4xf32, #tpu.memory_space<vmem>>, vector<1x4xf32>,
    %75 = vector.extract_strided_slice %71 {offsets = [14, 0], sizes = [1, 4], strides = [1, 1]} : vector<16x4xf32> to vector<1x4xf32>
    %c215 = arith.constant 215 : index
    %c0_65 = arith.constant 0 : index
    %76 = vector.load %arg7[%c215, %c0_65] : memref<324x4xf32, #tpu.memory_space<vmem>>, vector<1x4xf32>
    tpu.vector_store %arg7[%c215, %c0_65], %75 {strides = array<i32>} : memref<324x4xf32, #tpu.memory_space<vmem>>, vector<1x4xf32>,
    %c0_66 = arith.constant 0 : index
    %c11 = arith.constant 11 : index
    %c0_67 = arith.constant 0 : index
    %c0_68 = arith.constant 0 : index
    %77 = vector.load %arg1[%c0_66, %c11, %c0_67, %c0_68] : memref<1x16x16x4xf32, #tpu.memory_space<vmem>>, vector<1x1x16x4xf32>
    %78 = vector.shape_cast %77 : vector<1x1x16x4xf32> to vector<16x4xf32>
    %c217 = arith.constant 217 : index
    %c0_69 = arith.constant 0 : index
    %79 = vector.load %arg7[%c217, %c0_69] : memref<324x4xf32, #tpu.memory_space<vmem>>, vector<16x4xf32>
    tpu.vector_store %arg7[%c217, %c0_69], %78 {strides = array<i32>} : memref<324x4xf32, #tpu.memory_space<vmem>>, vector<16x4xf32>,
    %80 = vector.extract_strided_slice %78 {offsets = [1, 0], sizes = [1, 4], strides = [1, 1]} : vector<16x4xf32> to vector<1x4xf32>
    %c216 = arith.constant 216 : index
    %c0_70 = arith.constant 0 : index
    %81 = vector.load %arg7[%c216, %c0_70] : memref<324x4xf32, #tpu.memory_space<vmem>>, vector<1x4xf32>
    tpu.vector_store %arg7[%c216, %c0_70], %80 {strides = array<i32>} : memref<324x4xf32, #tpu.memory_space<vmem>>, vector<1x4xf32>,
    %82 = vector.extract_strided_slice %78 {offsets = [14, 0], sizes = [1, 4], strides = [1, 1]} : vector<16x4xf32> to vector<1x4xf32>
    %c233 = arith.constant 233 : index
    %c0_71 = arith.constant 0 : index
    %83 = vector.load %arg7[%c233, %c0_71] : memref<324x4xf32, #tpu.memory_space<vmem>>, vector<1x4xf32>
    tpu.vector_store %arg7[%c233, %c0_71], %82 {strides = array<i32>} : memref<324x4xf32, #tpu.memory_space<vmem>>, vector<1x4xf32>,
    %c0_72 = arith.constant 0 : index
    %c12 = arith.constant 12 : index
    %c0_73 = arith.constant 0 : index
    %c0_74 = arith.constant 0 : index
    %84 = vector.load %arg1[%c0_72, %c12, %c0_73, %c0_74] : memref<1x16x16x4xf32, #tpu.memory_space<vmem>>, vector<1x1x16x4xf32>
    %85 = vector.shape_cast %84 : vector<1x1x16x4xf32> to vector<16x4xf32>
    %c235 = arith.constant 235 : index
    %c0_75 = arith.constant 0 : index
    %86 = vector.load %arg7[%c235, %c0_75] : memref<324x4xf32, #tpu.memory_space<vmem>>, vector<16x4xf32>
    tpu.vector_store %arg7[%c235, %c0_75], %85 {strides = array<i32>} : memref<324x4xf32, #tpu.memory_space<vmem>>, vector<16x4xf32>,
    %87 = vector.extract_strided_slice %85 {offsets = [1, 0], sizes = [1, 4], strides = [1, 1]} : vector<16x4xf32> to vector<1x4xf32>
    %c234 = arith.constant 234 : index
    %c0_76 = arith.constant 0 : index
    %88 = vector.load %arg7[%c234, %c0_76] : memref<324x4xf32, #tpu.memory_space<vmem>>, vector<1x4xf32>
    tpu.vector_store %arg7[%c234, %c0_76], %87 {strides = array<i32>} : memref<324x4xf32, #tpu.memory_space<vmem>>, vector<1x4xf32>,
    %89 = vector.extract_strided_slice %85 {offsets = [14, 0], sizes = [1, 4], strides = [1, 1]} : vector<16x4xf32> to vector<1x4xf32>
    %c251 = arith.constant 251 : index
    %c0_77 = arith.constant 0 : index
    %90 = vector.load %arg7[%c251, %c0_77] : memref<324x4xf32, #tpu.memory_space<vmem>>, vector<1x4xf32>
    tpu.vector_store %arg7[%c251, %c0_77], %89 {strides = array<i32>} : memref<324x4xf32, #tpu.memory_space<vmem>>, vector<1x4xf32>,
    %c0_78 = arith.constant 0 : index
    %c13 = arith.constant 13 : index
    %c0_79 = arith.constant 0 : index
    %c0_80 = arith.constant 0 : index
    %91 = vector.load %arg1[%c0_78, %c13, %c0_79, %c0_80] : memref<1x16x16x4xf32, #tpu.memory_space<vmem>>, vector<1x1x16x4xf32>
    %92 = vector.shape_cast %91 : vector<1x1x16x4xf32> to vector<16x4xf32>
    %c253 = arith.constant 253 : index
    %c0_81 = arith.constant 0 : index
    %93 = vector.load %arg7[%c253, %c0_81] : memref<324x4xf32, #tpu.memory_space<vmem>>, vector<16x4xf32>
    tpu.vector_store %arg7[%c253, %c0_81], %92 {strides = array<i32>} : memref<324x4xf32, #tpu.memory_space<vmem>>, vector<16x4xf32>,
    %94 = vector.extract_strided_slice %92 {offsets = [1, 0], sizes = [1, 4], strides = [1, 1]} : vector<16x4xf32> to vector<1x4xf32>
    %c252 = arith.constant 252 : index
    %c0_82 = arith.constant 0 : index
    %95 = vector.load %arg7[%c252, %c0_82] : memref<324x4xf32, #tpu.memory_space<vmem>>, vector<1x4xf32>
    tpu.vector_store %arg7[%c252, %c0_82], %94 {strides = array<i32>} : memref<324x4xf32, #tpu.memory_space<vmem>>, vector<1x4xf32>,
    %96 = vector.extract_strided_slice %92 {offsets = [14, 0], sizes = [1, 4], strides = [1, 1]} : vector<16x4xf32> to vector<1x4xf32>
    %c269 = arith.constant 269 : index
    %c0_83 = arith.constant 0 : index
    %97 = vector.load %arg7[%c269, %c0_83] : memref<324x4xf32, #tpu.memory_space<vmem>>, vector<1x4xf32>
    tpu.vector_store %arg7[%c269, %c0_83], %96 {strides = array<i32>} : memref<324x4xf32, #tpu.memory_space<vmem>>, vector<1x4xf32>,
    %c0_84 = arith.constant 0 : index
    %c14 = arith.constant 14 : index
    %c0_85 = arith.constant 0 : index
    %c0_86 = arith.constant 0 : index
    %98 = vector.load %arg1[%c0_84, %c14, %c0_85, %c0_86] : memref<1x16x16x4xf32, #tpu.memory_space<vmem>>, vector<1x1x16x4xf32>
    %99 = vector.shape_cast %98 : vector<1x1x16x4xf32> to vector<16x4xf32>
    %c271 = arith.constant 271 : index
    %c0_87 = arith.constant 0 : index
    %100 = vector.load %arg7[%c271, %c0_87] : memref<324x4xf32, #tpu.memory_space<vmem>>, vector<16x4xf32>
    tpu.vector_store %arg7[%c271, %c0_87], %99 {strides = array<i32>} : memref<324x4xf32, #tpu.memory_space<vmem>>, vector<16x4xf32>,
    %101 = vector.extract_strided_slice %99 {offsets = [1, 0], sizes = [1, 4], strides = [1, 1]} : vector<16x4xf32> to vector<1x4xf32>
    %c270 = arith.constant 270 : index
    %c0_88 = arith.constant 0 : index
    %102 = vector.load %arg7[%c270, %c0_88] : memref<324x4xf32, #tpu.memory_space<vmem>>, vector<1x4xf32>
    tpu.vector_store %arg7[%c270, %c0_88], %101 {strides = array<i32>} : memref<324x4xf32, #tpu.memory_space<vmem>>, vector<1x4xf32>,
    %103 = vector.extract_strided_slice %99 {offsets = [14, 0], sizes = [1, 4], strides = [1, 1]} : vector<16x4xf32> to vector<1x4xf32>
    %c287 = arith.constant 287 : index
    %c0_89 = arith.constant 0 : index
    %104 = vector.load %arg7[%c287, %c0_89] : memref<324x4xf32, #tpu.memory_space<vmem>>, vector<1x4xf32>
    tpu.vector_store %arg7[%c287, %c0_89], %103 {strides = array<i32>} : memref<324x4xf32, #tpu.memory_space<vmem>>, vector<1x4xf32>,
    %c0_90 = arith.constant 0 : index
    %c15 = arith.constant 15 : index
    %c0_91 = arith.constant 0 : index
    %c0_92 = arith.constant 0 : index
    %105 = vector.load %arg1[%c0_90, %c15, %c0_91, %c0_92] : memref<1x16x16x4xf32, #tpu.memory_space<vmem>>, vector<1x1x16x4xf32>
    %106 = vector.shape_cast %105 : vector<1x1x16x4xf32> to vector<16x4xf32>
    %c289 = arith.constant 289 : index
    %c0_93 = arith.constant 0 : index
    %107 = vector.load %arg7[%c289, %c0_93] : memref<324x4xf32, #tpu.memory_space<vmem>>, vector<16x4xf32>
    tpu.vector_store %arg7[%c289, %c0_93], %106 {strides = array<i32>} : memref<324x4xf32, #tpu.memory_space<vmem>>, vector<16x4xf32>,
    %108 = vector.extract_strided_slice %106 {offsets = [1, 0], sizes = [1, 4], strides = [1, 1]} : vector<16x4xf32> to vector<1x4xf32>
    %c288 = arith.constant 288 : index
    %c0_94 = arith.constant 0 : index
    %109 = vector.load %arg7[%c288, %c0_94] : memref<324x4xf32, #tpu.memory_space<vmem>>, vector<1x4xf32>
    tpu.vector_store %arg7[%c288, %c0_94], %108 {strides = array<i32>} : memref<324x4xf32, #tpu.memory_space<vmem>>, vector<1x4xf32>,
    %110 = vector.extract_strided_slice %106 {offsets = [14, 0], sizes = [1, 4], strides = [1, 1]} : vector<16x4xf32> to vector<1x4xf32>
    %c305 = arith.constant 305 : index
    %c0_95 = arith.constant 0 : index
    %111 = vector.load %arg7[%c305, %c0_95] : memref<324x4xf32, #tpu.memory_space<vmem>>, vector<1x4xf32>
    tpu.vector_store %arg7[%c305, %c0_95], %110 {strides = array<i32>} : memref<324x4xf32, #tpu.memory_space<vmem>>, vector<1x4xf32>,
    %c36_96 = arith.constant 36 : index
    %c0_97 = arith.constant 0 : index
    %112 = vector.load %arg7[%c36_96, %c0_97] : memref<324x4xf32, #tpu.memory_space<vmem>>, vector<18x4xf32>
    %c0_98 = arith.constant 0 : index
    %c0_99 = arith.constant 0 : index
    %113 = vector.load %arg7[%c0_98, %c0_99] : memref<324x4xf32, #tpu.memory_space<vmem>>, vector<18x4xf32>
    tpu.vector_store %arg7[%c0_98, %c0_99], %112 {strides = array<i32>} : memref<324x4xf32, #tpu.memory_space<vmem>>, vector<18x4xf32>,
    %c270_100 = arith.constant 270 : index
    %c0_101 = arith.constant 0 : index
    %114 = vector.load %arg7[%c270_100, %c0_101] : memref<324x4xf32, #tpu.memory_space<vmem>>, vector<18x4xf32>
    %c306 = arith.constant 306 : index
    %c0_102 = arith.constant 0 : index
    %115 = vector.load %arg7[%c306, %c0_102] : memref<324x4xf32, #tpu.memory_space<vmem>>, vector<18x4xf32>
    tpu.vector_store %arg7[%c306, %c0_102], %114 {strides = array<i32>} : memref<324x4xf32, #tpu.memory_space<vmem>>, vector<18x4xf32>,
    %c0_103 = arith.constant 0 : index
    %c0_104 = arith.constant 0 : index
    %116 = vector.load %arg3[%c0_103, %c0_104] : memref<1x4xf32, #tpu.memory_space<vmem>>, vector<1x4xf32>
    %117 = vector.shape_cast %116 : vector<1x4xf32> to vector<1x4xf32>
    %118 = vector.broadcast %117 : vector<1x4xf32> to vector<286x4xf32>
    %c0_105 = arith.constant 0 : index
    %c0_106 = arith.constant 0 : index
    %119 = vector.load %arg7[%c0_105, %c0_106] : memref<324x4xf32, #tpu.memory_space<vmem>>, vector<286x4xf32>
    %120 = arith.truncf %119 : vector<286x4xf32> to vector<286x4xbf16>
    %c0_107 = arith.constant 0 : index
    %c0_108 = arith.constant 0 : index
    %c0_109 = arith.constant 0 : index
    %121 = vector.load %arg2[%c0_107, %c0_108, %c0_109] : memref<9x4x4xbf16, #tpu.memory_space<vmem>>, vector<1x4x4xbf16>
    %122 = vector.shape_cast %121 : vector<1x4x4xbf16> to vector<4x4xbf16>
    %cst = arith.constant dense<0.000000e+00> : vector<286x4xf32>
    %123 = tpu.matmul %120, %122, %cst {dimension_numbers = #tpu.dot_dimension_numbers<[1], [0], [0], [1], [0, 0, 1, 1], [], []>} : vector<286x4xbf16>, vector<4x4xbf16>, vector<286x4xf32> -> vector<286x4xf32>
    %124 = arith.addf %118, %123 : vector<286x4xf32>
    %c1_110 = arith.constant 1 : index
    %c0_111 = arith.constant 0 : index
    %125 = vector.load %arg7[%c1_110, %c0_111] : memref<324x4xf32, #tpu.memory_space<vmem>>, vector<286x4xf32>
    %126 = arith.truncf %125 : vector<286x4xf32> to vector<286x4xbf16>
    %c1_112 = arith.constant 1 : index
    %c0_113 = arith.constant 0 : index
    %c0_114 = arith.constant 0 : index
    %127 = vector.load %arg2[%c1_112, %c0_113, %c0_114] : memref<9x4x4xbf16, #tpu.memory_space<vmem>>, vector<1x4x4xbf16>
    %128 = vector.shape_cast %127 : vector<1x4x4xbf16> to vector<4x4xbf16>
    %cst_115 = arith.constant dense<0.000000e+00> : vector<286x4xf32>
    %129 = tpu.matmul %126, %128, %cst_115 {dimension_numbers = #tpu.dot_dimension_numbers<[1], [0], [0], [1], [0, 0, 1, 1], [], []>} : vector<286x4xbf16>, vector<4x4xbf16>, vector<286x4xf32> -> vector<286x4xf32>
    %130 = arith.addf %124, %129 : vector<286x4xf32>
    %c2_116 = arith.constant 2 : index
    %c0_117 = arith.constant 0 : index
    %131 = vector.load %arg7[%c2_116, %c0_117] : memref<324x4xf32, #tpu.memory_space<vmem>>, vector<286x4xf32>
    %132 = arith.truncf %131 : vector<286x4xf32> to vector<286x4xbf16>
    %c2_118 = arith.constant 2 : index
    %c0_119 = arith.constant 0 : index
    %c0_120 = arith.constant 0 : index
    %133 = vector.load %arg2[%c2_118, %c0_119, %c0_120] : memref<9x4x4xbf16, #tpu.memory_space<vmem>>, vector<1x4x4xbf16>
    %134 = vector.shape_cast %133 : vector<1x4x4xbf16> to vector<4x4xbf16>
    %cst_121 = arith.constant dense<0.000000e+00> : vector<286x4xf32>
    %135 = tpu.matmul %132, %134, %cst_121 {dimension_numbers = #tpu.dot_dimension_numbers<[1], [0], [0], [1], [0, 0, 1, 1], [], []>} : vector<286x4xbf16>, vector<4x4xbf16>, vector<286x4xf32> -> vector<286x4xf32>
    %136 = arith.addf %130, %135 : vector<286x4xf32>
    %c18_122 = arith.constant 18 : index
    %c0_123 = arith.constant 0 : index
    %137 = vector.load %arg7[%c18_122, %c0_123] : memref<324x4xf32, #tpu.memory_space<vmem>>, vector<286x4xf32>
    %138 = arith.truncf %137 : vector<286x4xf32> to vector<286x4xbf16>
    %c3_124 = arith.constant 3 : index
    %c0_125 = arith.constant 0 : index
    %c0_126 = arith.constant 0 : index
    %139 = vector.load %arg2[%c3_124, %c0_125, %c0_126] : memref<9x4x4xbf16, #tpu.memory_space<vmem>>, vector<1x4x4xbf16>
    %140 = vector.shape_cast %139 : vector<1x4x4xbf16> to vector<4x4xbf16>
    %cst_127 = arith.constant dense<0.000000e+00> : vector<286x4xf32>
    %141 = tpu.matmul %138, %140, %cst_127 {dimension_numbers = #tpu.dot_dimension_numbers<[1], [0], [0], [1], [0, 0, 1, 1], [], []>} : vector<286x4xbf16>, vector<4x4xbf16>, vector<286x4xf32> -> vector<286x4xf32>
    %142 = arith.addf %136, %141 : vector<286x4xf32>
    %c19_128 = arith.constant 19 : index
    %c0_129 = arith.constant 0 : index
    %143 = vector.load %arg7[%c19_128, %c0_129] : memref<324x4xf32, #tpu.memory_space<vmem>>, vector<286x4xf32>
    %144 = arith.truncf %143 : vector<286x4xf32> to vector<286x4xbf16>
    %c4_130 = arith.constant 4 : index
    %c0_131 = arith.constant 0 : index
    %c0_132 = arith.constant 0 : index
    %145 = vector.load %arg2[%c4_130, %c0_131, %c0_132] : memref<9x4x4xbf16, #tpu.memory_space<vmem>>, vector<1x4x4xbf16>
    %146 = vector.shape_cast %145 : vector<1x4x4xbf16> to vector<4x4xbf16>
    %cst_133 = arith.constant dense<0.000000e+00> : vector<286x4xf32>
    %147 = tpu.matmul %144, %146, %cst_133 {dimension_numbers = #tpu.dot_dimension_numbers<[1], [0], [0], [1], [0, 0, 1, 1], [], []>} : vector<286x4xbf16>, vector<4x4xbf16>, vector<286x4xf32> -> vector<286x4xf32>
    %148 = arith.addf %142, %147 : vector<286x4xf32>
    %c20 = arith.constant 20 : index
    %c0_134 = arith.constant 0 : index
    %149 = vector.load %arg7[%c20, %c0_134] : memref<324x4xf32, #tpu.memory_space<vmem>>, vector<286x4xf32>
    %150 = arith.truncf %149 : vector<286x4xf32> to vector<286x4xbf16>
    %c5_135 = arith.constant 5 : index
    %c0_136 = arith.constant 0 : index
    %c0_137 = arith.constant 0 : index
    %151 = vector.load %arg2[%c5_135, %c0_136, %c0_137] : memref<9x4x4xbf16, #tpu.memory_space<vmem>>, vector<1x4x4xbf16>
    %152 = vector.shape_cast %151 : vector<1x4x4xbf16> to vector<4x4xbf16>
    %cst_138 = arith.constant dense<0.000000e+00> : vector<286x4xf32>
    %153 = tpu.matmul %150, %152, %cst_138 {dimension_numbers = #tpu.dot_dimension_numbers<[1], [0], [0], [1], [0, 0, 1, 1], [], []>} : vector<286x4xbf16>, vector<4x4xbf16>, vector<286x4xf32> -> vector<286x4xf32>
    %154 = arith.addf %148, %153 : vector<286x4xf32>
    %c36_139 = arith.constant 36 : index
    %c0_140 = arith.constant 0 : index
    %155 = vector.load %arg7[%c36_139, %c0_140] : memref<324x4xf32, #tpu.memory_space<vmem>>, vector<286x4xf32>
    %156 = arith.truncf %155 : vector<286x4xf32> to vector<286x4xbf16>
    %c6_141 = arith.constant 6 : index
    %c0_142 = arith.constant 0 : index
    %c0_143 = arith.constant 0 : index
    %157 = vector.load %arg2[%c6_141, %c0_142, %c0_143] : memref<9x4x4xbf16, #tpu.memory_space<vmem>>, vector<1x4x4xbf16>
    %158 = vector.shape_cast %157 : vector<1x4x4xbf16> to vector<4x4xbf16>
    %cst_144 = arith.constant dense<0.000000e+00> : vector<286x4xf32>
    %159 = tpu.matmul %156, %158, %cst_144 {dimension_numbers = #tpu.dot_dimension_numbers<[1], [0], [0], [1], [0, 0, 1, 1], [], []>} : vector<286x4xbf16>, vector<4x4xbf16>, vector<286x4xf32> -> vector<286x4xf32>
    %160 = arith.addf %154, %159 : vector<286x4xf32>
    %c37_145 = arith.constant 37 : index
    %c0_146 = arith.constant 0 : index
    %161 = vector.load %arg7[%c37_145, %c0_146] : memref<324x4xf32, #tpu.memory_space<vmem>>, vector<286x4xf32>
    %162 = arith.truncf %161 : vector<286x4xf32> to vector<286x4xbf16>
    %c7_147 = arith.constant 7 : index
    %c0_148 = arith.constant 0 : index
    %c0_149 = arith.constant 0 : index
    %163 = vector.load %arg2[%c7_147, %c0_148, %c0_149] : memref<9x4x4xbf16, #tpu.memory_space<vmem>>, vector<1x4x4xbf16>
    %164 = vector.shape_cast %163 : vector<1x4x4xbf16> to vector<4x4xbf16>
    %cst_150 = arith.constant dense<0.000000e+00> : vector<286x4xf32>
    %165 = tpu.matmul %162, %164, %cst_150 {dimension_numbers = #tpu.dot_dimension_numbers<[1], [0], [0], [1], [0, 0, 1, 1], [], []>} : vector<286x4xbf16>, vector<4x4xbf16>, vector<286x4xf32> -> vector<286x4xf32>
    %166 = arith.addf %160, %165 : vector<286x4xf32>
    %c38 = arith.constant 38 : index
    %c0_151 = arith.constant 0 : index
    %167 = vector.load %arg7[%c38, %c0_151] : memref<324x4xf32, #tpu.memory_space<vmem>>, vector<286x4xf32>
    %168 = arith.truncf %167 : vector<286x4xf32> to vector<286x4xbf16>
    %c8_152 = arith.constant 8 : index
    %c0_153 = arith.constant 0 : index
    %c0_154 = arith.constant 0 : index
    %169 = vector.load %arg2[%c8_152, %c0_153, %c0_154] : memref<9x4x4xbf16, #tpu.memory_space<vmem>>, vector<1x4x4xbf16>
    %170 = vector.shape_cast %169 : vector<1x4x4xbf16> to vector<4x4xbf16>
    %cst_155 = arith.constant dense<0.000000e+00> : vector<286x4xf32>
    %171 = tpu.matmul %168, %170, %cst_155 {dimension_numbers = #tpu.dot_dimension_numbers<[1], [0], [0], [1], [0, 0, 1, 1], [], []>} : vector<286x4xbf16>, vector<4x4xbf16>, vector<286x4xf32> -> vector<286x4xf32>
    %172 = arith.addf %166, %171 : vector<286x4xf32>
    %c0_156 = arith.constant 0 : index
    %c0_157 = arith.constant 0 : index
    %173 = vector.load %arg8[%c0_156, %c0_157] : memref<286x4xf32, #tpu.memory_space<vmem>>, vector<286x4xf32>
    tpu.vector_store %arg8[%c0_156, %c0_157], %172 {strides = array<i32>} : memref<286x4xf32, #tpu.memory_space<vmem>>, vector<286x4xf32>,
    %cst_158 = arith.constant 0.000000e+00 : f32
    %174 = vector.broadcast %cst_158 : f32 to vector<1x4xf32>
    %cst_159 = arith.constant 0.000000e+00 : f32
    %175 = vector.broadcast %cst_159 : f32 to vector<1x4xf32>
    %c0_160 = arith.constant 0 : index
    %c0_161 = arith.constant 0 : index
    %176 = vector.load %arg8[%c0_160, %c0_161] : memref<286x4xf32, #tpu.memory_space<vmem>>, vector<16x4xf32>
    %cst_162 = arith.constant dense<0.000000e+00> : vector<4xf32>
    %177 = vector.multi_reduction <add>, %176, %cst_162 [0] : vector<16x4xf32> to vector<4xf32>
    %178 = vector.shape_cast %177 : vector<4xf32> to vector<1x4xf32>
    %179 = arith.addf %174, %178 : vector<1x4xf32>
    %180 = arith.mulf %176, %176 : vector<16x4xf32>
    %cst_163 = arith.constant dense<0.000000e+00> : vector<4xf32>
    %181 = vector.multi_reduction <add>, %180, %cst_163 [0] : vector<16x4xf32> to vector<4xf32>
    %182 = vector.shape_cast %181 : vector<4xf32> to vector<1x4xf32>
    %183 = arith.addf %175, %182 : vector<1x4xf32>
    %c18_164 = arith.constant 18 : index
    %c0_165 = arith.constant 0 : index
    %184 = vector.load %arg8[%c18_164, %c0_165] : memref<286x4xf32, #tpu.memory_space<vmem>>, vector<16x4xf32>
    %cst_166 = arith.constant dense<0.000000e+00> : vector<4xf32>
    %185 = vector.multi_reduction <add>, %184, %cst_166 [0] : vector<16x4xf32> to vector<4xf32>
    %186 = vector.shape_cast %185 : vector<4xf32> to vector<1x4xf32>
    %187 = arith.addf %179, %186 : vector<1x4xf32>
    %188 = arith.mulf %184, %184 : vector<16x4xf32>
    %cst_167 = arith.constant dense<0.000000e+00> : vector<4xf32>
    %189 = vector.multi_reduction <add>, %188, %cst_167 [0] : vector<16x4xf32> to vector<4xf32>
    %190 = vector.shape_cast %189 : vector<4xf32> to vector<1x4xf32>
    %191 = arith.addf %183, %190 : vector<1x4xf32>
    %c36_168 = arith.constant 36 : index
    %c0_169 = arith.constant 0 : index
    %192 = vector.load %arg8[%c36_168, %c0_169] : memref<286x4xf32, #tpu.memory_space<vmem>>, vector<16x4xf32>
    %cst_170 = arith.constant dense<0.000000e+00> : vector<4xf32>
    %193 = vector.multi_reduction <add>, %192, %cst_170 [0] : vector<16x4xf32> to vector<4xf32>
    %194 = vector.shape_cast %193 : vector<4xf32> to vector<1x4xf32>
    %195 = arith.addf %187, %194 : vector<1x4xf32>
    %196 = arith.mulf %192, %192 : vector<16x4xf32>
    %cst_171 = arith.constant dense<0.000000e+00> : vector<4xf32>
    %197 = vector.multi_reduction <add>, %196, %cst_171 [0] : vector<16x4xf32> to vector<4xf32>
    %198 = vector.shape_cast %197 : vector<4xf32> to vector<1x4xf32>
    %199 = arith.addf %191, %198 : vector<1x4xf32>
    %c54_172 = arith.constant 54 : index
    %c0_173 = arith.constant 0 : index
    %200 = vector.load %arg8[%c54_172, %c0_173] : memref<286x4xf32, #tpu.memory_space<vmem>>, vector<16x4xf32>
    %cst_174 = arith.constant dense<0.000000e+00> : vector<4xf32>
    %201 = vector.multi_reduction <add>, %200, %cst_174 [0] : vector<16x4xf32> to vector<4xf32>
    %202 = vector.shape_cast %201 : vector<4xf32> to vector<1x4xf32>
    %203 = arith.addf %195, %202 : vector<1x4xf32>
    %204 = arith.mulf %200, %200 : vector<16x4xf32>
    %cst_175 = arith.constant dense<0.000000e+00> : vector<4xf32>
    %205 = vector.multi_reduction <add>, %204, %cst_175 [0] : vector<16x4xf32> to vector<4xf32>
    %206 = vector.shape_cast %205 : vector<4xf32> to vector<1x4xf32>
    %207 = arith.addf %199, %206 : vector<1x4xf32>
    %c72_176 = arith.constant 72 : index
    %c0_177 = arith.constant 0 : index
    %208 = vector.load %arg8[%c72_176, %c0_177] : memref<286x4xf32, #tpu.memory_space<vmem>>, vector<16x4xf32>
    %cst_178 = arith.constant dense<0.000000e+00> : vector<4xf32>
    %209 = vector.multi_reduction <add>, %208, %cst_178 [0] : vector<16x4xf32> to vector<4xf32>
    %210 = vector.shape_cast %209 : vector<4xf32> to vector<1x4xf32>
    %211 = arith.addf %203, %210 : vector<1x4xf32>
    %212 = arith.mulf %208, %208 : vector<16x4xf32>
    %cst_179 = arith.constant dense<0.000000e+00> : vector<4xf32>
    %213 = vector.multi_reduction <add>, %212, %cst_179 [0] : vector<16x4xf32> to vector<4xf32>
    %214 = vector.shape_cast %213 : vector<4xf32> to vector<1x4xf32>
    %215 = arith.addf %207, %214 : vector<1x4xf32>
    %c90_180 = arith.constant 90 : index
    %c0_181 = arith.constant 0 : index
    %216 = vector.load %arg8[%c90_180, %c0_181] : memref<286x4xf32, #tpu.memory_space<vmem>>, vector<16x4xf32>
    %cst_182 = arith.constant dense<0.000000e+00> : vector<4xf32>
    %217 = vector.multi_reduction <add>, %216, %cst_182 [0] : vector<16x4xf32> to vector<4xf32>
    %218 = vector.shape_cast %217 : vector<4xf32> to vector<1x4xf32>
    %219 = arith.addf %211, %218 : vector<1x4xf32>
    %220 = arith.mulf %216, %216 : vector<16x4xf32>
    %cst_183 = arith.constant dense<0.000000e+00> : vector<4xf32>
    %221 = vector.multi_reduction <add>, %220, %cst_183 [0] : vector<16x4xf32> to vector<4xf32>
    %222 = vector.shape_cast %221 : vector<4xf32> to vector<1x4xf32>
    %223 = arith.addf %215, %222 : vector<1x4xf32>
    %c108_184 = arith.constant 108 : index
    %c0_185 = arith.constant 0 : index
    %224 = vector.load %arg8[%c108_184, %c0_185] : memref<286x4xf32, #tpu.memory_space<vmem>>, vector<16x4xf32>
    %cst_186 = arith.constant dense<0.000000e+00> : vector<4xf32>
    %225 = vector.multi_reduction <add>, %224, %cst_186 [0] : vector<16x4xf32> to vector<4xf32>
    %226 = vector.shape_cast %225 : vector<4xf32> to vector<1x4xf32>
    %227 = arith.addf %219, %226 : vector<1x4xf32>
    %228 = arith.mulf %224, %224 : vector<16x4xf32>
    %cst_187 = arith.constant dense<0.000000e+00> : vector<4xf32>
    %229 = vector.multi_reduction <add>, %228, %cst_187 [0] : vector<16x4xf32> to vector<4xf32>
    %230 = vector.shape_cast %229 : vector<4xf32> to vector<1x4xf32>
    %231 = arith.addf %223, %230 : vector<1x4xf32>
    %c126_188 = arith.constant 126 : index
    %c0_189 = arith.constant 0 : index
    %232 = vector.load %arg8[%c126_188, %c0_189] : memref<286x4xf32, #tpu.memory_space<vmem>>, vector<16x4xf32>
    %cst_190 = arith.constant dense<0.000000e+00> : vector<4xf32>
    %233 = vector.multi_reduction <add>, %232, %cst_190 [0] : vector<16x4xf32> to vector<4xf32>
    %234 = vector.shape_cast %233 : vector<4xf32> to vector<1x4xf32>
    %235 = arith.addf %227, %234 : vector<1x4xf32>
    %236 = arith.mulf %232, %232 : vector<16x4xf32>
    %cst_191 = arith.constant dense<0.000000e+00> : vector<4xf32>
    %237 = vector.multi_reduction <add>, %236, %cst_191 [0] : vector<16x4xf32> to vector<4xf32>
    %238 = vector.shape_cast %237 : vector<4xf32> to vector<1x4xf32>
    %239 = arith.addf %231, %238 : vector<1x4xf32>
    %c144_192 = arith.constant 144 : index
    %c0_193 = arith.constant 0 : index
    %240 = vector.load %arg8[%c144_192, %c0_193] : memref<286x4xf32, #tpu.memory_space<vmem>>, vector<16x4xf32>
    %cst_194 = arith.constant dense<0.000000e+00> : vector<4xf32>
    %241 = vector.multi_reduction <add>, %240, %cst_194 [0] : vector<16x4xf32> to vector<4xf32>
    %242 = vector.shape_cast %241 : vector<4xf32> to vector<1x4xf32>
    %243 = arith.addf %235, %242 : vector<1x4xf32>
    %244 = arith.mulf %240, %240 : vector<16x4xf32>
    %cst_195 = arith.constant dense<0.000000e+00> : vector<4xf32>
    %245 = vector.multi_reduction <add>, %244, %cst_195 [0] : vector<16x4xf32> to vector<4xf32>
    %246 = vector.shape_cast %245 : vector<4xf32> to vector<1x4xf32>
    %247 = arith.addf %239, %246 : vector<1x4xf32>
    %c162_196 = arith.constant 162 : index
    %c0_197 = arith.constant 0 : index
    %248 = vector.load %arg8[%c162_196, %c0_197] : memref<286x4xf32, #tpu.memory_space<vmem>>, vector<16x4xf32>
    %cst_198 = arith.constant dense<0.000000e+00> : vector<4xf32>
    %249 = vector.multi_reduction <add>, %248, %cst_198 [0] : vector<16x4xf32> to vector<4xf32>
    %250 = vector.shape_cast %249 : vector<4xf32> to vector<1x4xf32>
    %251 = arith.addf %243, %250 : vector<1x4xf32>
    %252 = arith.mulf %248, %248 : vector<16x4xf32>
    %cst_199 = arith.constant dense<0.000000e+00> : vector<4xf32>
    %253 = vector.multi_reduction <add>, %252, %cst_199 [0] : vector<16x4xf32> to vector<4xf32>
    %254 = vector.shape_cast %253 : vector<4xf32> to vector<1x4xf32>
    %255 = arith.addf %247, %254 : vector<1x4xf32>
    %c180_200 = arith.constant 180 : index
    %c0_201 = arith.constant 0 : index
    %256 = vector.load %arg8[%c180_200, %c0_201] : memref<286x4xf32, #tpu.memory_space<vmem>>, vector<16x4xf32>
    %cst_202 = arith.constant dense<0.000000e+00> : vector<4xf32>
    %257 = vector.multi_reduction <add>, %256, %cst_202 [0] : vector<16x4xf32> to vector<4xf32>
    %258 = vector.shape_cast %257 : vector<4xf32> to vector<1x4xf32>
    %259 = arith.addf %251, %258 : vector<1x4xf32>
    %260 = arith.mulf %256, %256 : vector<16x4xf32>
    %cst_203 = arith.constant dense<0.000000e+00> : vector<4xf32>
    %261 = vector.multi_reduction <add>, %260, %cst_203 [0] : vector<16x4xf32> to vector<4xf32>
    %262 = vector.shape_cast %261 : vector<4xf32> to vector<1x4xf32>
    %263 = arith.addf %255, %262 : vector<1x4xf32>
    %c198_204 = arith.constant 198 : index
    %c0_205 = arith.constant 0 : index
    %264 = vector.load %arg8[%c198_204, %c0_205] : memref<286x4xf32, #tpu.memory_space<vmem>>, vector<16x4xf32>
    %cst_206 = arith.constant dense<0.000000e+00> : vector<4xf32>
    %265 = vector.multi_reduction <add>, %264, %cst_206 [0] : vector<16x4xf32> to vector<4xf32>
    %266 = vector.shape_cast %265 : vector<4xf32> to vector<1x4xf32>
    %267 = arith.addf %259, %266 : vector<1x4xf32>
    %268 = arith.mulf %264, %264 : vector<16x4xf32>
    %cst_207 = arith.constant dense<0.000000e+00> : vector<4xf32>
    %269 = vector.multi_reduction <add>, %268, %cst_207 [0] : vector<16x4xf32> to vector<4xf32>
    %270 = vector.shape_cast %269 : vector<4xf32> to vector<1x4xf32>
    %271 = arith.addf %263, %270 : vector<1x4xf32>
    %c216_208 = arith.constant 216 : index
    %c0_209 = arith.constant 0 : index
    %272 = vector.load %arg8[%c216_208, %c0_209] : memref<286x4xf32, #tpu.memory_space<vmem>>, vector<16x4xf32>
    %cst_210 = arith.constant dense<0.000000e+00> : vector<4xf32>
    %273 = vector.multi_reduction <add>, %272, %cst_210 [0] : vector<16x4xf32> to vector<4xf32>
    %274 = vector.shape_cast %273 : vector<4xf32> to vector<1x4xf32>
    %275 = arith.addf %267, %274 : vector<1x4xf32>
    %276 = arith.mulf %272, %272 : vector<16x4xf32>
    %cst_211 = arith.constant dense<0.000000e+00> : vector<4xf32>
    %277 = vector.multi_reduction <add>, %276, %cst_211 [0] : vector<16x4xf32> to vector<4xf32>
    %278 = vector.shape_cast %277 : vector<4xf32> to vector<1x4xf32>
    %279 = arith.addf %271, %278 : vector<1x4xf32>
    %c234_212 = arith.constant 234 : index
    %c0_213 = arith.constant 0 : index
    %280 = vector.load %arg8[%c234_212, %c0_213] : memref<286x4xf32, #tpu.memory_space<vmem>>, vector<16x4xf32>
    %cst_214 = arith.constant dense<0.000000e+00> : vector<4xf32>
    %281 = vector.multi_reduction <add>, %280, %cst_214 [0] : vector<16x4xf32> to vector<4xf32>
    %282 = vector.shape_cast %281 : vector<4xf32> to vector<1x4xf32>
    %283 = arith.addf %275, %282 : vector<1x4xf32>
    %284 = arith.mulf %280, %280 : vector<16x4xf32>
    %cst_215 = arith.constant dense<0.000000e+00> : vector<4xf32>
    %285 = vector.multi_reduction <add>, %284, %cst_215 [0] : vector<16x4xf32> to vector<4xf32>
    %286 = vector.shape_cast %285 : vector<4xf32> to vector<1x4xf32>
    %287 = arith.addf %279, %286 : vector<1x4xf32>
    %c252_216 = arith.constant 252 : index
    %c0_217 = arith.constant 0 : index
    %288 = vector.load %arg8[%c252_216, %c0_217] : memref<286x4xf32, #tpu.memory_space<vmem>>, vector<16x4xf32>
    %cst_218 = arith.constant dense<0.000000e+00> : vector<4xf32>
    %289 = vector.multi_reduction <add>, %288, %cst_218 [0] : vector<16x4xf32> to vector<4xf32>
    %290 = vector.shape_cast %289 : vector<4xf32> to vector<1x4xf32>
    %291 = arith.addf %283, %290 : vector<1x4xf32>
    %292 = arith.mulf %288, %288 : vector<16x4xf32>
    %cst_219 = arith.constant dense<0.000000e+00> : vector<4xf32>
    %293 = vector.multi_reduction <add>, %292, %cst_219 [0] : vector<16x4xf32> to vector<4xf32>
    %294 = vector.shape_cast %293 : vector<4xf32> to vector<1x4xf32>
    %295 = arith.addf %287, %294 : vector<1x4xf32>
    %c270_220 = arith.constant 270 : index
    %c0_221 = arith.constant 0 : index
    %296 = vector.load %arg8[%c270_220, %c0_221] : memref<286x4xf32, #tpu.memory_space<vmem>>, vector<16x4xf32>
    %cst_222 = arith.constant dense<0.000000e+00> : vector<4xf32>
    %297 = vector.multi_reduction <add>, %296, %cst_222 [0] : vector<16x4xf32> to vector<4xf32>
    %298 = vector.shape_cast %297 : vector<4xf32> to vector<1x4xf32>
    %299 = arith.addf %291, %298 : vector<1x4xf32>
    %300 = arith.mulf %296, %296 : vector<16x4xf32>
    %cst_223 = arith.constant dense<0.000000e+00> : vector<4xf32>
    %301 = vector.multi_reduction <add>, %300, %cst_223 [0] : vector<16x4xf32> to vector<4xf32>
    %302 = vector.shape_cast %301 : vector<4xf32> to vector<1x4xf32>
    %303 = arith.addf %295, %302 : vector<1x4xf32>
    %cst_224 = arith.constant 3.906250e-03 : f32
    %304 = vector.broadcast %cst_224 : f32 to vector<1x4xf32>
    %305 = arith.mulf %299, %304 : vector<1x4xf32>
    %cst_225 = arith.constant 3.906250e-03 : f32
    %306 = vector.broadcast %cst_225 : f32 to vector<1x4xf32>
    %307 = arith.mulf %303, %306 : vector<1x4xf32>
    %308 = arith.mulf %305, %305 : vector<1x4xf32>
    %309 = arith.subf %307, %308 : vector<1x4xf32>
    %cst_226 = arith.constant 9.99999974E-6 : f32
    %310 = vector.broadcast %cst_226 : f32 to vector<1x4xf32>
    %311 = arith.addf %309, %310 : vector<1x4xf32>
    %312 = math.rsqrt %311 : vector<1x4xf32>
    %c0_227 = arith.constant 0 : index
    %c0_228 = arith.constant 0 : index
    %313 = vector.load %arg8[%c0_227, %c0_228] : memref<286x4xf32, #tpu.memory_space<vmem>>, vector<16x4xf32>
    %314 = vector.broadcast %305 : vector<1x4xf32> to vector<16x4xf32>
    %315 = arith.subf %313, %314 : vector<16x4xf32>
    %316 = vector.broadcast %312 : vector<1x4xf32> to vector<16x4xf32>
    %317 = arith.mulf %315, %316 : vector<16x4xf32>
    %cst_229 = arith.constant 0.000000e+00 : f32
    %318 = vector.broadcast %cst_229 : f32 to vector<16x4xf32>
    %319 = arith.maximumf %317, %318 : vector<16x4xf32>
    %c19_230 = arith.constant 19 : index
    %c0_231 = arith.constant 0 : index
    %320 = vector.load %arg7[%c19_230, %c0_231] : memref<324x4xf32, #tpu.memory_space<vmem>>, vector<16x4xf32>
    tpu.vector_store %arg7[%c19_230, %c0_231], %319 {strides = array<i32>} : memref<324x4xf32, #tpu.memory_space<vmem>>, vector<16x4xf32>,
    %321 = vector.extract_strided_slice %319 {offsets = [1, 0], sizes = [1, 4], strides = [1, 1]} : vector<16x4xf32> to vector<1x4xf32>
    %c18_232 = arith.constant 18 : index
    %c0_233 = arith.constant 0 : index
    %322 = vector.load %arg7[%c18_232, %c0_233] : memref<324x4xf32, #tpu.memory_space<vmem>>, vector<1x4xf32>
    tpu.vector_store %arg7[%c18_232, %c0_233], %321 {strides = array<i32>} : memref<324x4xf32, #tpu.memory_space<vmem>>, vector<1x4xf32>,
    %323 = vector.extract_strided_slice %319 {offsets = [14, 0], sizes = [1, 4], strides = [1, 1]} : vector<16x4xf32> to vector<1x4xf32>
    %c35_234 = arith.constant 35 : index
    %c0_235 = arith.constant 0 : index
    %324 = vector.load %arg7[%c35_234, %c0_235] : memref<324x4xf32, #tpu.memory_space<vmem>>, vector<1x4xf32>
    tpu.vector_store %arg7[%c35_234, %c0_235], %323 {strides = array<i32>} : memref<324x4xf32, #tpu.memory_space<vmem>>, vector<1x4xf32>,
    %c18_236 = arith.constant 18 : index
    %c0_237 = arith.constant 0 : index
    %325 = vector.load %arg8[%c18_236, %c0_237] : memref<286x4xf32, #tpu.memory_space<vmem>>, vector<16x4xf32>
    %326 = vector.broadcast %305 : vector<1x4xf32> to vector<16x4xf32>
    %327 = arith.subf %325, %326 : vector<16x4xf32>
    %328 = vector.broadcast %312 : vector<1x4xf32> to vector<16x4xf32>
    %329 = arith.mulf %327, %328 : vector<16x4xf32>
    %cst_238 = arith.constant 0.000000e+00 : f32
    %330 = vector.broadcast %cst_238 : f32 to vector<16x4xf32>
    %331 = arith.maximumf %329, %330 : vector<16x4xf32>
    %c37_239 = arith.constant 37 : index
    %c0_240 = arith.constant 0 : index
    %332 = vector.load %arg7[%c37_239, %c0_240] : memref<324x4xf32, #tpu.memory_space<vmem>>, vector<16x4xf32>
    tpu.vector_store %arg7[%c37_239, %c0_240], %331 {strides = array<i32>} : memref<324x4xf32, #tpu.memory_space<vmem>>, vector<16x4xf32>,
    %333 = vector.extract_strided_slice %331 {offsets = [1, 0], sizes = [1, 4], strides = [1, 1]} : vector<16x4xf32> to vector<1x4xf32>
    %c36_241 = arith.constant 36 : index
    %c0_242 = arith.constant 0 : index
    %334 = vector.load %arg7[%c36_241, %c0_242] : memref<324x4xf32, #tpu.memory_space<vmem>>, vector<1x4xf32>
    tpu.vector_store %arg7[%c36_241, %c0_242], %333 {strides = array<i32>} : memref<324x4xf32, #tpu.memory_space<vmem>>, vector<1x4xf32>,
    %335 = vector.extract_strided_slice %331 {offsets = [14, 0], sizes = [1, 4], strides = [1, 1]} : vector<16x4xf32> to vector<1x4xf32>
    %c53_243 = arith.constant 53 : index
    %c0_244 = arith.constant 0 : index
    %336 = vector.load %arg7[%c53_243, %c0_244] : memref<324x4xf32, #tpu.memory_space<vmem>>, vector<1x4xf32>
    tpu.vector_store %arg7[%c53_243, %c0_244], %335 {strides = array<i32>} : memref<324x4xf32, #tpu.memory_space<vmem>>, vector<1x4xf32>,
    %c36_245 = arith.constant 36 : index
    %c0_246 = arith.constant 0 : index
    %337 = vector.load %arg8[%c36_245, %c0_246] : memref<286x4xf32, #tpu.memory_space<vmem>>, vector<16x4xf32>
    %338 = vector.broadcast %305 : vector<1x4xf32> to vector<16x4xf32>
    %339 = arith.subf %337, %338 : vector<16x4xf32>
    %340 = vector.broadcast %312 : vector<1x4xf32> to vector<16x4xf32>
    %341 = arith.mulf %339, %340 : vector<16x4xf32>
    %cst_247 = arith.constant 0.000000e+00 : f32
    %342 = vector.broadcast %cst_247 : f32 to vector<16x4xf32>
    %343 = arith.maximumf %341, %342 : vector<16x4xf32>
    %c55_248 = arith.constant 55 : index
    %c0_249 = arith.constant 0 : index
    %344 = vector.load %arg7[%c55_248, %c0_249] : memref<324x4xf32, #tpu.memory_space<vmem>>, vector<16x4xf32>
    tpu.vector_store %arg7[%c55_248, %c0_249], %343 {strides = array<i32>} : memref<324x4xf32, #tpu.memory_space<vmem>>, vector<16x4xf32>,
    %345 = vector.extract_strided_slice %343 {offsets = [1, 0], sizes = [1, 4], strides = [1, 1]} : vector<16x4xf32> to vector<1x4xf32>
    %c54_250 = arith.constant 54 : index
    %c0_251 = arith.constant 0 : index
    %346 = vector.load %arg7[%c54_250, %c0_251] : memref<324x4xf32, #tpu.memory_space<vmem>>, vector<1x4xf32>
    tpu.vector_store %arg7[%c54_250, %c0_251], %345 {strides = array<i32>} : memref<324x4xf32, #tpu.memory_space<vmem>>, vector<1x4xf32>,
    %347 = vector.extract_strided_slice %343 {offsets = [14, 0], sizes = [1, 4], strides = [1, 1]} : vector<16x4xf32> to vector<1x4xf32>
    %c71_252 = arith.constant 71 : index
    %c0_253 = arith.constant 0 : index
    %348 = vector.load %arg7[%c71_252, %c0_253] : memref<324x4xf32, #tpu.memory_space<vmem>>, vector<1x4xf32>
    tpu.vector_store %arg7[%c71_252, %c0_253], %347 {strides = array<i32>} : memref<324x4xf32, #tpu.memory_space<vmem>>, vector<1x4xf32>,
    %c54_254 = arith.constant 54 : index
    %c0_255 = arith.constant 0 : index
    %349 = vector.load %arg8[%c54_254, %c0_255] : memref<286x4xf32, #tpu.memory_space<vmem>>, vector<16x4xf32>
    %350 = vector.broadcast %305 : vector<1x4xf32> to vector<16x4xf32>
    %351 = arith.subf %349, %350 : vector<16x4xf32>
    %352 = vector.broadcast %312 : vector<1x4xf32> to vector<16x4xf32>
    %353 = arith.mulf %351, %352 : vector<16x4xf32>
    %cst_256 = arith.constant 0.000000e+00 : f32
    %354 = vector.broadcast %cst_256 : f32 to vector<16x4xf32>
    %355 = arith.maximumf %353, %354 : vector<16x4xf32>
    %c73_257 = arith.constant 73 : index
    %c0_258 = arith.constant 0 : index
    %356 = vector.load %arg7[%c73_257, %c0_258] : memref<324x4xf32, #tpu.memory_space<vmem>>, vector<16x4xf32>
    tpu.vector_store %arg7[%c73_257, %c0_258], %355 {strides = array<i32>} : memref<324x4xf32, #tpu.memory_space<vmem>>, vector<16x4xf32>,
    %357 = vector.extract_strided_slice %355 {offsets = [1, 0], sizes = [1, 4], strides = [1, 1]} : vector<16x4xf32> to vector<1x4xf32>
    %c72_259 = arith.constant 72 : index
    %c0_260 = arith.constant 0 : index
    %358 = vector.load %arg7[%c72_259, %c0_260] : memref<324x4xf32, #tpu.memory_space<vmem>>, vector<1x4xf32>
    tpu.vector_store %arg7[%c72_259, %c0_260], %357 {strides = array<i32>} : memref<324x4xf32, #tpu.memory_space<vmem>>, vector<1x4xf32>,
    %359 = vector.extract_strided_slice %355 {offsets = [14, 0], sizes = [1, 4], strides = [1, 1]} : vector<16x4xf32> to vector<1x4xf32>
    %c89_261 = arith.constant 89 : index
    %c0_262 = arith.constant 0 : index
    %360 = vector.load %arg7[%c89_261, %c0_262] : memref<324x4xf32, #tpu.memory_space<vmem>>, vector<1x4xf32>
    tpu.vector_store %arg7[%c89_261, %c0_262], %359 {strides = array<i32>} : memref<324x4xf32, #tpu.memory_space<vmem>>, vector<1x4xf32>,
    %c72_263 = arith.constant 72 : index
    %c0_264 = arith.constant 0 : index
    %361 = vector.load %arg8[%c72_263, %c0_264] : memref<286x4xf32, #tpu.memory_space<vmem>>, vector<16x4xf32>
    %362 = vector.broadcast %305 : vector<1x4xf32> to vector<16x4xf32>
    %363 = arith.subf %361, %362 : vector<16x4xf32>
    %364 = vector.broadcast %312 : vector<1x4xf32> to vector<16x4xf32>
    %365 = arith.mulf %363, %364 : vector<16x4xf32>
    %cst_265 = arith.constant 0.000000e+00 : f32
    %366 = vector.broadcast %cst_265 : f32 to vector<16x4xf32>
    %367 = arith.maximumf %365, %366 : vector<16x4xf32>
    %c91_266 = arith.constant 91 : index
    %c0_267 = arith.constant 0 : index
    %368 = vector.load %arg7[%c91_266, %c0_267] : memref<324x4xf32, #tpu.memory_space<vmem>>, vector<16x4xf32>
    tpu.vector_store %arg7[%c91_266, %c0_267], %367 {strides = array<i32>} : memref<324x4xf32, #tpu.memory_space<vmem>>, vector<16x4xf32>,
    %369 = vector.extract_strided_slice %367 {offsets = [1, 0], sizes = [1, 4], strides = [1, 1]} : vector<16x4xf32> to vector<1x4xf32>
    %c90_268 = arith.constant 90 : index
    %c0_269 = arith.constant 0 : index
    %370 = vector.load %arg7[%c90_268, %c0_269] : memref<324x4xf32, #tpu.memory_space<vmem>>, vector<1x4xf32>
    tpu.vector_store %arg7[%c90_268, %c0_269], %369 {strides = array<i32>} : memref<324x4xf32, #tpu.memory_space<vmem>>, vector<1x4xf32>,
    %371 = vector.extract_strided_slice %367 {offsets = [14, 0], sizes = [1, 4], strides = [1, 1]} : vector<16x4xf32> to vector<1x4xf32>
    %c107_270 = arith.constant 107 : index
    %c0_271 = arith.constant 0 : index
    %372 = vector.load %arg7[%c107_270, %c0_271] : memref<324x4xf32, #tpu.memory_space<vmem>>, vector<1x4xf32>
    tpu.vector_store %arg7[%c107_270, %c0_271], %371 {strides = array<i32>} : memref<324x4xf32, #tpu.memory_space<vmem>>, vector<1x4xf32>,
    %c90_272 = arith.constant 90 : index
    %c0_273 = arith.constant 0 : index
    %373 = vector.load %arg8[%c90_272, %c0_273] : memref<286x4xf32, #tpu.memory_space<vmem>>, vector<16x4xf32>
    %374 = vector.broadcast %305 : vector<1x4xf32> to vector<16x4xf32>
    %375 = arith.subf %373, %374 : vector<16x4xf32>
    %376 = vector.broadcast %312 : vector<1x4xf32> to vector<16x4xf32>
    %377 = arith.mulf %375, %376 : vector<16x4xf32>
    %cst_274 = arith.constant 0.000000e+00 : f32
    %378 = vector.broadcast %cst_274 : f32 to vector<16x4xf32>
    %379 = arith.maximumf %377, %378 : vector<16x4xf32>
    %c109_275 = arith.constant 109 : index
    %c0_276 = arith.constant 0 : index
    %380 = vector.load %arg7[%c109_275, %c0_276] : memref<324x4xf32, #tpu.memory_space<vmem>>, vector<16x4xf32>
    tpu.vector_store %arg7[%c109_275, %c0_276], %379 {strides = array<i32>} : memref<324x4xf32, #tpu.memory_space<vmem>>, vector<16x4xf32>,
    %381 = vector.extract_strided_slice %379 {offsets = [1, 0], sizes = [1, 4], strides = [1, 1]} : vector<16x4xf32> to vector<1x4xf32>
    %c108_277 = arith.constant 108 : index
    %c0_278 = arith.constant 0 : index
    %382 = vector.load %arg7[%c108_277, %c0_278] : memref<324x4xf32, #tpu.memory_space<vmem>>, vector<1x4xf32>
    tpu.vector_store %arg7[%c108_277, %c0_278], %381 {strides = array<i32>} : memref<324x4xf32, #tpu.memory_space<vmem>>, vector<1x4xf32>,
    %383 = vector.extract_strided_slice %379 {offsets = [14, 0], sizes = [1, 4], strides = [1, 1]} : vector<16x4xf32> to vector<1x4xf32>
    %c125_279 = arith.constant 125 : index
    %c0_280 = arith.constant 0 : index
    %384 = vector.load %arg7[%c125_279, %c0_280] : memref<324x4xf32, #tpu.memory_space<vmem>>, vector<1x4xf32>
    tpu.vector_store %arg7[%c125_279, %c0_280], %383 {strides = array<i32>} : memref<324x4xf32, #tpu.memory_space<vmem>>, vector<1x4xf32>,
    %c108_281 = arith.constant 108 : index
    %c0_282 = arith.constant 0 : index
    %385 = vector.load %arg8[%c108_281, %c0_282] : memref<286x4xf32, #tpu.memory_space<vmem>>, vector<16x4xf32>
    %386 = vector.broadcast %305 : vector<1x4xf32> to vector<16x4xf32>
    %387 = arith.subf %385, %386 : vector<16x4xf32>
    %388 = vector.broadcast %312 : vector<1x4xf32> to vector<16x4xf32>
    %389 = arith.mulf %387, %388 : vector<16x4xf32>
    %cst_283 = arith.constant 0.000000e+00 : f32
    %390 = vector.broadcast %cst_283 : f32 to vector<16x4xf32>
    %391 = arith.maximumf %389, %390 : vector<16x4xf32>
    %c127_284 = arith.constant 127 : index
    %c0_285 = arith.constant 0 : index
    %392 = vector.load %arg7[%c127_284, %c0_285] : memref<324x4xf32, #tpu.memory_space<vmem>>, vector<16x4xf32>
    tpu.vector_store %arg7[%c127_284, %c0_285], %391 {strides = array<i32>} : memref<324x4xf32, #tpu.memory_space<vmem>>, vector<16x4xf32>,
    %393 = vector.extract_strided_slice %391 {offsets = [1, 0], sizes = [1, 4], strides = [1, 1]} : vector<16x4xf32> to vector<1x4xf32>
    %c126_286 = arith.constant 126 : index
    %c0_287 = arith.constant 0 : index
    %394 = vector.load %arg7[%c126_286, %c0_287] : memref<324x4xf32, #tpu.memory_space<vmem>>, vector<1x4xf32>
    tpu.vector_store %arg7[%c126_286, %c0_287], %393 {strides = array<i32>} : memref<324x4xf32, #tpu.memory_space<vmem>>, vector<1x4xf32>,
    %395 = vector.extract_strided_slice %391 {offsets = [14, 0], sizes = [1, 4], strides = [1, 1]} : vector<16x4xf32> to vector<1x4xf32>
    %c143_288 = arith.constant 143 : index
    %c0_289 = arith.constant 0 : index
    %396 = vector.load %arg7[%c143_288, %c0_289] : memref<324x4xf32, #tpu.memory_space<vmem>>, vector<1x4xf32>
    tpu.vector_store %arg7[%c143_288, %c0_289], %395 {strides = array<i32>} : memref<324x4xf32, #tpu.memory_space<vmem>>, vector<1x4xf32>,
    %c126_290 = arith.constant 126 : index
    %c0_291 = arith.constant 0 : index
    %397 = vector.load %arg8[%c126_290, %c0_291] : memref<286x4xf32, #tpu.memory_space<vmem>>, vector<16x4xf32>
    %398 = vector.broadcast %305 : vector<1x4xf32> to vector<16x4xf32>
    %399 = arith.subf %397, %398 : vector<16x4xf32>
    %400 = vector.broadcast %312 : vector<1x4xf32> to vector<16x4xf32>
    %401 = arith.mulf %399, %400 : vector<16x4xf32>
    %cst_292 = arith.constant 0.000000e+00 : f32
    %402 = vector.broadcast %cst_292 : f32 to vector<16x4xf32>
    %403 = arith.maximumf %401, %402 : vector<16x4xf32>
    %c145_293 = arith.constant 145 : index
    %c0_294 = arith.constant 0 : index
    %404 = vector.load %arg7[%c145_293, %c0_294] : memref<324x4xf32, #tpu.memory_space<vmem>>, vector<16x4xf32>
    tpu.vector_store %arg7[%c145_293, %c0_294], %403 {strides = array<i32>} : memref<324x4xf32, #tpu.memory_space<vmem>>, vector<16x4xf32>,
    %405 = vector.extract_strided_slice %403 {offsets = [1, 0], sizes = [1, 4], strides = [1, 1]} : vector<16x4xf32> to vector<1x4xf32>
    %c144_295 = arith.constant 144 : index
    %c0_296 = arith.constant 0 : index
    %406 = vector.load %arg7[%c144_295, %c0_296] : memref<324x4xf32, #tpu.memory_space<vmem>>, vector<1x4xf32>
    tpu.vector_store %arg7[%c144_295, %c0_296], %405 {strides = array<i32>} : memref<324x4xf32, #tpu.memory_space<vmem>>, vector<1x4xf32>,
    %407 = vector.extract_strided_slice %403 {offsets = [14, 0], sizes = [1, 4], strides = [1, 1]} : vector<16x4xf32> to vector<1x4xf32>
    %c161_297 = arith.constant 161 : index
    %c0_298 = arith.constant 0 : index
    %408 = vector.load %arg7[%c161_297, %c0_298] : memref<324x4xf32, #tpu.memory_space<vmem>>, vector<1x4xf32>
    tpu.vector_store %arg7[%c161_297, %c0_298], %407 {strides = array<i32>} : memref<324x4xf32, #tpu.memory_space<vmem>>, vector<1x4xf32>,
    %c144_299 = arith.constant 144 : index
    %c0_300 = arith.constant 0 : index
    %409 = vector.load %arg8[%c144_299, %c0_300] : memref<286x4xf32, #tpu.memory_space<vmem>>, vector<16x4xf32>
    %410 = vector.broadcast %305 : vector<1x4xf32> to vector<16x4xf32>
    %411 = arith.subf %409, %410 : vector<16x4xf32>
    %412 = vector.broadcast %312 : vector<1x4xf32> to vector<16x4xf32>
    %413 = arith.mulf %411, %412 : vector<16x4xf32>
    %cst_301 = arith.constant 0.000000e+00 : f32
    %414 = vector.broadcast %cst_301 : f32 to vector<16x4xf32>
    %415 = arith.maximumf %413, %414 : vector<16x4xf32>
    %c163_302 = arith.constant 163 : index
    %c0_303 = arith.constant 0 : index
    %416 = vector.load %arg7[%c163_302, %c0_303] : memref<324x4xf32, #tpu.memory_space<vmem>>, vector<16x4xf32>
    tpu.vector_store %arg7[%c163_302, %c0_303], %415 {strides = array<i32>} : memref<324x4xf32, #tpu.memory_space<vmem>>, vector<16x4xf32>,
    %417 = vector.extract_strided_slice %415 {offsets = [1, 0], sizes = [1, 4], strides = [1, 1]} : vector<16x4xf32> to vector<1x4xf32>
    %c162_304 = arith.constant 162 : index
    %c0_305 = arith.constant 0 : index
    %418 = vector.load %arg7[%c162_304, %c0_305] : memref<324x4xf32, #tpu.memory_space<vmem>>, vector<1x4xf32>
    tpu.vector_store %arg7[%c162_304, %c0_305], %417 {strides = array<i32>} : memref<324x4xf32, #tpu.memory_space<vmem>>, vector<1x4xf32>,
    %419 = vector.extract_strided_slice %415 {offsets = [14, 0], sizes = [1, 4], strides = [1, 1]} : vector<16x4xf32> to vector<1x4xf32>
    %c179_306 = arith.constant 179 : index
    %c0_307 = arith.constant 0 : index
    %420 = vector.load %arg7[%c179_306, %c0_307] : memref<324x4xf32, #tpu.memory_space<vmem>>, vector<1x4xf32>
    tpu.vector_store %arg7[%c179_306, %c0_307], %419 {strides = array<i32>} : memref<324x4xf32, #tpu.memory_space<vmem>>, vector<1x4xf32>,
    %c162_308 = arith.constant 162 : index
    %c0_309 = arith.constant 0 : index
    %421 = vector.load %arg8[%c162_308, %c0_309] : memref<286x4xf32, #tpu.memory_space<vmem>>, vector<16x4xf32>
    %422 = vector.broadcast %305 : vector<1x4xf32> to vector<16x4xf32>
    %423 = arith.subf %421, %422 : vector<16x4xf32>
    %424 = vector.broadcast %312 : vector<1x4xf32> to vector<16x4xf32>
    %425 = arith.mulf %423, %424 : vector<16x4xf32>
    %cst_310 = arith.constant 0.000000e+00 : f32
    %426 = vector.broadcast %cst_310 : f32 to vector<16x4xf32>
    %427 = arith.maximumf %425, %426 : vector<16x4xf32>
    %c181_311 = arith.constant 181 : index
    %c0_312 = arith.constant 0 : index
    %428 = vector.load %arg7[%c181_311, %c0_312] : memref<324x4xf32, #tpu.memory_space<vmem>>, vector<16x4xf32>
    tpu.vector_store %arg7[%c181_311, %c0_312], %427 {strides = array<i32>} : memref<324x4xf32, #tpu.memory_space<vmem>>, vector<16x4xf32>,
    %429 = vector.extract_strided_slice %427 {offsets = [1, 0], sizes = [1, 4], strides = [1, 1]} : vector<16x4xf32> to vector<1x4xf32>
    %c180_313 = arith.constant 180 : index
    %c0_314 = arith.constant 0 : index
    %430 = vector.load %arg7[%c180_313, %c0_314] : memref<324x4xf32, #tpu.memory_space<vmem>>, vector<1x4xf32>
    tpu.vector_store %arg7[%c180_313, %c0_314], %429 {strides = array<i32>} : memref<324x4xf32, #tpu.memory_space<vmem>>, vector<1x4xf32>,
    %431 = vector.extract_strided_slice %427 {offsets = [14, 0], sizes = [1, 4], strides = [1, 1]} : vector<16x4xf32> to vector<1x4xf32>
    %c197_315 = arith.constant 197 : index
    %c0_316 = arith.constant 0 : index
    %432 = vector.load %arg7[%c197_315, %c0_316] : memref<324x4xf32, #tpu.memory_space<vmem>>, vector<1x4xf32>
    tpu.vector_store %arg7[%c197_315, %c0_316], %431 {strides = array<i32>} : memref<324x4xf32, #tpu.memory_space<vmem>>, vector<1x4xf32>,
    %c180_317 = arith.constant 180 : index
    %c0_318 = arith.constant 0 : index
    %433 = vector.load %arg8[%c180_317, %c0_318] : memref<286x4xf32, #tpu.memory_space<vmem>>, vector<16x4xf32>
    %434 = vector.broadcast %305 : vector<1x4xf32> to vector<16x4xf32>
    %435 = arith.subf %433, %434 : vector<16x4xf32>
    %436 = vector.broadcast %312 : vector<1x4xf32> to vector<16x4xf32>
    %437 = arith.mulf %435, %436 : vector<16x4xf32>
    %cst_319 = arith.constant 0.000000e+00 : f32
    %438 = vector.broadcast %cst_319 : f32 to vector<16x4xf32>
    %439 = arith.maximumf %437, %438 : vector<16x4xf32>
    %c199_320 = arith.constant 199 : index
    %c0_321 = arith.constant 0 : index
    %440 = vector.load %arg7[%c199_320, %c0_321] : memref<324x4xf32, #tpu.memory_space<vmem>>, vector<16x4xf32>
    tpu.vector_store %arg7[%c199_320, %c0_321], %439 {strides = array<i32>} : memref<324x4xf32, #tpu.memory_space<vmem>>, vector<16x4xf32>,
    %441 = vector.extract_strided_slice %439 {offsets = [1, 0], sizes = [1, 4], strides = [1, 1]} : vector<16x4xf32> to vector<1x4xf32>
    %c198_322 = arith.constant 198 : index
    %c0_323 = arith.constant 0 : index
    %442 = vector.load %arg7[%c198_322, %c0_323] : memref<324x4xf32, #tpu.memory_space<vmem>>, vector<1x4xf32>
    tpu.vector_store %arg7[%c198_322, %c0_323], %441 {strides = array<i32>} : memref<324x4xf32, #tpu.memory_space<vmem>>, vector<1x4xf32>,
    %443 = vector.extract_strided_slice %439 {offsets = [14, 0], sizes = [1, 4], strides = [1, 1]} : vector<16x4xf32> to vector<1x4xf32>
    %c215_324 = arith.constant 215 : index
    %c0_325 = arith.constant 0 : index
    %444 = vector.load %arg7[%c215_324, %c0_325] : memref<324x4xf32, #tpu.memory_space<vmem>>, vector<1x4xf32>
    tpu.vector_store %arg7[%c215_324, %c0_325], %443 {strides = array<i32>} : memref<324x4xf32, #tpu.memory_space<vmem>>, vector<1x4xf32>,
    %c198_326 = arith.constant 198 : index
    %c0_327 = arith.constant 0 : index
    %445 = vector.load %arg8[%c198_326, %c0_327] : memref<286x4xf32, #tpu.memory_space<vmem>>, vector<16x4xf32>
    %446 = vector.broadcast %305 : vector<1x4xf32> to vector<16x4xf32>
    %447 = arith.subf %445, %446 : vector<16x4xf32>
    %448 = vector.broadcast %312 : vector<1x4xf32> to vector<16x4xf32>
    %449 = arith.mulf %447, %448 : vector<16x4xf32>
    %cst_328 = arith.constant 0.000000e+00 : f32
    %450 = vector.broadcast %cst_328 : f32 to vector<16x4xf32>
    %451 = arith.maximumf %449, %450 : vector<16x4xf32>
    %c217_329 = arith.constant 217 : index
    %c0_330 = arith.constant 0 : index
    %452 = vector.load %arg7[%c217_329, %c0_330] : memref<324x4xf32, #tpu.memory_space<vmem>>, vector<16x4xf32>
    tpu.vector_store %arg7[%c217_329, %c0_330], %451 {strides = array<i32>} : memref<324x4xf32, #tpu.memory_space<vmem>>, vector<16x4xf32>,
    %453 = vector.extract_strided_slice %451 {offsets = [1, 0], sizes = [1, 4], strides = [1, 1]} : vector<16x4xf32> to vector<1x4xf32>
    %c216_331 = arith.constant 216 : index
    %c0_332 = arith.constant 0 : index
    %454 = vector.load %arg7[%c216_331, %c0_332] : memref<324x4xf32, #tpu.memory_space<vmem>>, vector<1x4xf32>
    tpu.vector_store %arg7[%c216_331, %c0_332], %453 {strides = array<i32>} : memref<324x4xf32, #tpu.memory_space<vmem>>, vector<1x4xf32>,
    %455 = vector.extract_strided_slice %451 {offsets = [14, 0], sizes = [1, 4], strides = [1, 1]} : vector<16x4xf32> to vector<1x4xf32>
    %c233_333 = arith.constant 233 : index
    %c0_334 = arith.constant 0 : index
    %456 = vector.load %arg7[%c233_333, %c0_334] : memref<324x4xf32, #tpu.memory_space<vmem>>, vector<1x4xf32>
    tpu.vector_store %arg7[%c233_333, %c0_334], %455 {strides = array<i32>} : memref<324x4xf32, #tpu.memory_space<vmem>>, vector<1x4xf32>,
    %c216_335 = arith.constant 216 : index
    %c0_336 = arith.constant 0 : index
    %457 = vector.load %arg8[%c216_335, %c0_336] : memref<286x4xf32, #tpu.memory_space<vmem>>, vector<16x4xf32>
    %458 = vector.broadcast %305 : vector<1x4xf32> to vector<16x4xf32>
    %459 = arith.subf %457, %458 : vector<16x4xf32>
    %460 = vector.broadcast %312 : vector<1x4xf32> to vector<16x4xf32>
    %461 = arith.mulf %459, %460 : vector<16x4xf32>
    %cst_337 = arith.constant 0.000000e+00 : f32
    %462 = vector.broadcast %cst_337 : f32 to vector<16x4xf32>
    %463 = arith.maximumf %461, %462 : vector<16x4xf32>
    %c235_338 = arith.constant 235 : index
    %c0_339 = arith.constant 0 : index
    %464 = vector.load %arg7[%c235_338, %c0_339] : memref<324x4xf32, #tpu.memory_space<vmem>>, vector<16x4xf32>
    tpu.vector_store %arg7[%c235_338, %c0_339], %463 {strides = array<i32>} : memref<324x4xf32, #tpu.memory_space<vmem>>, vector<16x4xf32>,
    %465 = vector.extract_strided_slice %463 {offsets = [1, 0], sizes = [1, 4], strides = [1, 1]} : vector<16x4xf32> to vector<1x4xf32>
    %c234_340 = arith.constant 234 : index
    %c0_341 = arith.constant 0 : index
    %466 = vector.load %arg7[%c234_340, %c0_341] : memref<324x4xf32, #tpu.memory_space<vmem>>, vector<1x4xf32>
    tpu.vector_store %arg7[%c234_340, %c0_341], %465 {strides = array<i32>} : memref<324x4xf32, #tpu.memory_space<vmem>>, vector<1x4xf32>,
    %467 = vector.extract_strided_slice %463 {offsets = [14, 0], sizes = [1, 4], strides = [1, 1]} : vector<16x4xf32> to vector<1x4xf32>
    %c251_342 = arith.constant 251 : index
    %c0_343 = arith.constant 0 : index
    %468 = vector.load %arg7[%c251_342, %c0_343] : memref<324x4xf32, #tpu.memory_space<vmem>>, vector<1x4xf32>
    tpu.vector_store %arg7[%c251_342, %c0_343], %467 {strides = array<i32>} : memref<324x4xf32, #tpu.memory_space<vmem>>, vector<1x4xf32>,
    %c234_344 = arith.constant 234 : index
    %c0_345 = arith.constant 0 : index
    %469 = vector.load %arg8[%c234_344, %c0_345] : memref<286x4xf32, #tpu.memory_space<vmem>>, vector<16x4xf32>
    %470 = vector.broadcast %305 : vector<1x4xf32> to vector<16x4xf32>
    %471 = arith.subf %469, %470 : vector<16x4xf32>
    %472 = vector.broadcast %312 : vector<1x4xf32> to vector<16x4xf32>
    %473 = arith.mulf %471, %472 : vector<16x4xf32>
    %cst_346 = arith.constant 0.000000e+00 : f32
    %474 = vector.broadcast %cst_346 : f32 to vector<16x4xf32>
    %475 = arith.maximumf %473, %474 : vector<16x4xf32>
    %c253_347 = arith.constant 253 : index
    %c0_348 = arith.constant 0 : index
    %476 = vector.load %arg7[%c253_347, %c0_348] : memref<324x4xf32, #tpu.memory_space<vmem>>, vector<16x4xf32>
    tpu.vector_store %arg7[%c253_347, %c0_348], %475 {strides = array<i32>} : memref<324x4xf32, #tpu.memory_space<vmem>>, vector<16x4xf32>,
    %477 = vector.extract_strided_slice %475 {offsets = [1, 0], sizes = [1, 4], strides = [1, 1]} : vector<16x4xf32> to vector<1x4xf32>
    %c252_349 = arith.constant 252 : index
    %c0_350 = arith.constant 0 : index
    %478 = vector.load %arg7[%c252_349, %c0_350] : memref<324x4xf32, #tpu.memory_space<vmem>>, vector<1x4xf32>
    tpu.vector_store %arg7[%c252_349, %c0_350], %477 {strides = array<i32>} : memref<324x4xf32, #tpu.memory_space<vmem>>, vector<1x4xf32>,
    %479 = vector.extract_strided_slice %475 {offsets = [14, 0], sizes = [1, 4], strides = [1, 1]} : vector<16x4xf32> to vector<1x4xf32>
    %c269_351 = arith.constant 269 : index
    %c0_352 = arith.constant 0 : index
    %480 = vector.load %arg7[%c269_351, %c0_352] : memref<324x4xf32, #tpu.memory_space<vmem>>, vector<1x4xf32>
    tpu.vector_store %arg7[%c269_351, %c0_352], %479 {strides = array<i32>} : memref<324x4xf32, #tpu.memory_space<vmem>>, vector<1x4xf32>,
    %c252_353 = arith.constant 252 : index
    %c0_354 = arith.constant 0 : index
    %481 = vector.load %arg8[%c252_353, %c0_354] : memref<286x4xf32, #tpu.memory_space<vmem>>, vector<16x4xf32>
    %482 = vector.broadcast %305 : vector<1x4xf32> to vector<16x4xf32>
    %483 = arith.subf %481, %482 : vector<16x4xf32>
    %484 = vector.broadcast %312 : vector<1x4xf32> to vector<16x4xf32>
    %485 = arith.mulf %483, %484 : vector<16x4xf32>
    %cst_355 = arith.constant 0.000000e+00 : f32
    %486 = vector.broadcast %cst_355 : f32 to vector<16x4xf32>
    %487 = arith.maximumf %485, %486 : vector<16x4xf32>
    %c271_356 = arith.constant 271 : index
    %c0_357 = arith.constant 0 : index
    %488 = vector.load %arg7[%c271_356, %c0_357] : memref<324x4xf32, #tpu.memory_space<vmem>>, vector<16x4xf32>
    tpu.vector_store %arg7[%c271_356, %c0_357], %487 {strides = array<i32>} : memref<324x4xf32, #tpu.memory_space<vmem>>, vector<16x4xf32>,
    %489 = vector.extract_strided_slice %487 {offsets = [1, 0], sizes = [1, 4], strides = [1, 1]} : vector<16x4xf32> to vector<1x4xf32>
    %c270_358 = arith.constant 270 : index
    %c0_359 = arith.constant 0 : index
    %490 = vector.load %arg7[%c270_358, %c0_359] : memref<324x4xf32, #tpu.memory_space<vmem>>, vector<1x4xf32>
    tpu.vector_store %arg7[%c270_358, %c0_359], %489 {strides = array<i32>} : memref<324x4xf32, #tpu.memory_space<vmem>>, vector<1x4xf32>,
    %491 = vector.extract_strided_slice %487 {offsets = [14, 0], sizes = [1, 4], strides = [1, 1]} : vector<16x4xf32> to vector<1x4xf32>
    %c287_360 = arith.constant 287 : index
    %c0_361 = arith.constant 0 : index
    %492 = vector.load %arg7[%c287_360, %c0_361] : memref<324x4xf32, #tpu.memory_space<vmem>>, vector<1x4xf32>
    tpu.vector_store %arg7[%c287_360, %c0_361], %491 {strides = array<i32>} : memref<324x4xf32, #tpu.memory_space<vmem>>, vector<1x4xf32>,
    %c270_362 = arith.constant 270 : index
    %c0_363 = arith.constant 0 : index
    %493 = vector.load %arg8[%c270_362, %c0_363] : memref<286x4xf32, #tpu.memory_space<vmem>>, vector<16x4xf32>
    %494 = vector.broadcast %305 : vector<1x4xf32> to vector<16x4xf32>
    %495 = arith.subf %493, %494 : vector<16x4xf32>
    %496 = vector.broadcast %312 : vector<1x4xf32> to vector<16x4xf32>
    %497 = arith.mulf %495, %496 : vector<16x4xf32>
    %cst_364 = arith.constant 0.000000e+00 : f32
    %498 = vector.broadcast %cst_364 : f32 to vector<16x4xf32>
    %499 = arith.maximumf %497, %498 : vector<16x4xf32>
    %c289_365 = arith.constant 289 : index
    %c0_366 = arith.constant 0 : index
    %500 = vector.load %arg7[%c289_365, %c0_366] : memref<324x4xf32, #tpu.memory_space<vmem>>, vector<16x4xf32>
    tpu.vector_store %arg7[%c289_365, %c0_366], %499 {strides = array<i32>} : memref<324x4xf32, #tpu.memory_space<vmem>>, vector<16x4xf32>,
    %501 = vector.extract_strided_slice %499 {offsets = [1, 0], sizes = [1, 4], strides = [1, 1]} : vector<16x4xf32> to vector<1x4xf32>
    %c288_367 = arith.constant 288 : index
    %c0_368 = arith.constant 0 : index
    %502 = vector.load %arg7[%c288_367, %c0_368] : memref<324x4xf32, #tpu.memory_space<vmem>>, vector<1x4xf32>
    tpu.vector_store %arg7[%c288_367, %c0_368], %501 {strides = array<i32>} : memref<324x4xf32, #tpu.memory_space<vmem>>, vector<1x4xf32>,
    %503 = vector.extract_strided_slice %499 {offsets = [14, 0], sizes = [1, 4], strides = [1, 1]} : vector<16x4xf32> to vector<1x4xf32>
    %c305_369 = arith.constant 305 : index
    %c0_370 = arith.constant 0 : index
    %504 = vector.load %arg7[%c305_369, %c0_370] : memref<324x4xf32, #tpu.memory_space<vmem>>, vector<1x4xf32>
    tpu.vector_store %arg7[%c305_369, %c0_370], %503 {strides = array<i32>} : memref<324x4xf32, #tpu.memory_space<vmem>>, vector<1x4xf32>,
    %c36_371 = arith.constant 36 : index
    %c0_372 = arith.constant 0 : index
    %505 = vector.load %arg7[%c36_371, %c0_372] : memref<324x4xf32, #tpu.memory_space<vmem>>, vector<18x4xf32>
    %c0_373 = arith.constant 0 : index
    %c0_374 = arith.constant 0 : index
    %506 = vector.load %arg7[%c0_373, %c0_374] : memref<324x4xf32, #tpu.memory_space<vmem>>, vector<18x4xf32>
    tpu.vector_store %arg7[%c0_373, %c0_374], %505 {strides = array<i32>} : memref<324x4xf32, #tpu.memory_space<vmem>>, vector<18x4xf32>,
    %c270_375 = arith.constant 270 : index
    %c0_376 = arith.constant 0 : index
    %507 = vector.load %arg7[%c270_375, %c0_376] : memref<324x4xf32, #tpu.memory_space<vmem>>, vector<18x4xf32>
    %c306_377 = arith.constant 306 : index
    %c0_378 = arith.constant 0 : index
    %508 = vector.load %arg7[%c306_377, %c0_378] : memref<324x4xf32, #tpu.memory_space<vmem>>, vector<18x4xf32>
    tpu.vector_store %arg7[%c306_377, %c0_378], %507 {strides = array<i32>} : memref<324x4xf32, #tpu.memory_space<vmem>>, vector<18x4xf32>,
    %c0_379 = arith.constant 0 : index
    %c0_380 = arith.constant 0 : index
    %509 = vector.load %arg5[%c0_379, %c0_380] : memref<1x4xf32, #tpu.memory_space<vmem>>, vector<1x4xf32>
    %510 = vector.shape_cast %509 : vector<1x4xf32> to vector<1x4xf32>
    %511 = vector.broadcast %510 : vector<1x4xf32> to vector<286x4xf32>
    %c0_381 = arith.constant 0 : index
    %c0_382 = arith.constant 0 : index
    %512 = vector.load %arg7[%c0_381, %c0_382] : memref<324x4xf32, #tpu.memory_space<vmem>>, vector<286x4xf32>
    %513 = arith.truncf %512 : vector<286x4xf32> to vector<286x4xbf16>
    %c0_383 = arith.constant 0 : index
    %c0_384 = arith.constant 0 : index
    %c0_385 = arith.constant 0 : index
    %514 = vector.load %arg4[%c0_383, %c0_384, %c0_385] : memref<9x4x4xbf16, #tpu.memory_space<vmem>>, vector<1x4x4xbf16>
    %515 = vector.shape_cast %514 : vector<1x4x4xbf16> to vector<4x4xbf16>
    %cst_386 = arith.constant dense<0.000000e+00> : vector<286x4xf32>
    %516 = tpu.matmul %513, %515, %cst_386 {dimension_numbers = #tpu.dot_dimension_numbers<[1], [0], [0], [1], [0, 0, 1, 1], [], []>} : vector<286x4xbf16>, vector<4x4xbf16>, vector<286x4xf32> -> vector<286x4xf32>
    %517 = arith.addf %511, %516 : vector<286x4xf32>
    %c1_387 = arith.constant 1 : index
    %c0_388 = arith.constant 0 : index
    %518 = vector.load %arg7[%c1_387, %c0_388] : memref<324x4xf32, #tpu.memory_space<vmem>>, vector<286x4xf32>
    %519 = arith.truncf %518 : vector<286x4xf32> to vector<286x4xbf16>
    %c1_389 = arith.constant 1 : index
    %c0_390 = arith.constant 0 : index
    %c0_391 = arith.constant 0 : index
    %520 = vector.load %arg4[%c1_389, %c0_390, %c0_391] : memref<9x4x4xbf16, #tpu.memory_space<vmem>>, vector<1x4x4xbf16>
    %521 = vector.shape_cast %520 : vector<1x4x4xbf16> to vector<4x4xbf16>
    %cst_392 = arith.constant dense<0.000000e+00> : vector<286x4xf32>
    %522 = tpu.matmul %519, %521, %cst_392 {dimension_numbers = #tpu.dot_dimension_numbers<[1], [0], [0], [1], [0, 0, 1, 1], [], []>} : vector<286x4xbf16>, vector<4x4xbf16>, vector<286x4xf32> -> vector<286x4xf32>
    %523 = arith.addf %517, %522 : vector<286x4xf32>
    %c2_393 = arith.constant 2 : index
    %c0_394 = arith.constant 0 : index
    %524 = vector.load %arg7[%c2_393, %c0_394] : memref<324x4xf32, #tpu.memory_space<vmem>>, vector<286x4xf32>
    %525 = arith.truncf %524 : vector<286x4xf32> to vector<286x4xbf16>
    %c2_395 = arith.constant 2 : index
    %c0_396 = arith.constant 0 : index
    %c0_397 = arith.constant 0 : index
    %526 = vector.load %arg4[%c2_395, %c0_396, %c0_397] : memref<9x4x4xbf16, #tpu.memory_space<vmem>>, vector<1x4x4xbf16>
    %527 = vector.shape_cast %526 : vector<1x4x4xbf16> to vector<4x4xbf16>
    %cst_398 = arith.constant dense<0.000000e+00> : vector<286x4xf32>
    %528 = tpu.matmul %525, %527, %cst_398 {dimension_numbers = #tpu.dot_dimension_numbers<[1], [0], [0], [1], [0, 0, 1, 1], [], []>} : vector<286x4xbf16>, vector<4x4xbf16>, vector<286x4xf32> -> vector<286x4xf32>
    %529 = arith.addf %523, %528 : vector<286x4xf32>
    %c18_399 = arith.constant 18 : index
    %c0_400 = arith.constant 0 : index
    %530 = vector.load %arg7[%c18_399, %c0_400] : memref<324x4xf32, #tpu.memory_space<vmem>>, vector<286x4xf32>
    %531 = arith.truncf %530 : vector<286x4xf32> to vector<286x4xbf16>
    %c3_401 = arith.constant 3 : index
    %c0_402 = arith.constant 0 : index
    %c0_403 = arith.constant 0 : index
    %532 = vector.load %arg4[%c3_401, %c0_402, %c0_403] : memref<9x4x4xbf16, #tpu.memory_space<vmem>>, vector<1x4x4xbf16>
    %533 = vector.shape_cast %532 : vector<1x4x4xbf16> to vector<4x4xbf16>
    %cst_404 = arith.constant dense<0.000000e+00> : vector<286x4xf32>
    %534 = tpu.matmul %531, %533, %cst_404 {dimension_numbers = #tpu.dot_dimension_numbers<[1], [0], [0], [1], [0, 0, 1, 1], [], []>} : vector<286x4xbf16>, vector<4x4xbf16>, vector<286x4xf32> -> vector<286x4xf32>
    %535 = arith.addf %529, %534 : vector<286x4xf32>
    %c19_405 = arith.constant 19 : index
    %c0_406 = arith.constant 0 : index
    %536 = vector.load %arg7[%c19_405, %c0_406] : memref<324x4xf32, #tpu.memory_space<vmem>>, vector<286x4xf32>
    %537 = arith.truncf %536 : vector<286x4xf32> to vector<286x4xbf16>
    %c4_407 = arith.constant 4 : index
    %c0_408 = arith.constant 0 : index
    %c0_409 = arith.constant 0 : index
    %538 = vector.load %arg4[%c4_407, %c0_408, %c0_409] : memref<9x4x4xbf16, #tpu.memory_space<vmem>>, vector<1x4x4xbf16>
    %539 = vector.shape_cast %538 : vector<1x4x4xbf16> to vector<4x4xbf16>
    %cst_410 = arith.constant dense<0.000000e+00> : vector<286x4xf32>
    %540 = tpu.matmul %537, %539, %cst_410 {dimension_numbers = #tpu.dot_dimension_numbers<[1], [0], [0], [1], [0, 0, 1, 1], [], []>} : vector<286x4xbf16>, vector<4x4xbf16>, vector<286x4xf32> -> vector<286x4xf32>
    %541 = arith.addf %535, %540 : vector<286x4xf32>
    %c20_411 = arith.constant 20 : index
    %c0_412 = arith.constant 0 : index
    %542 = vector.load %arg7[%c20_411, %c0_412] : memref<324x4xf32, #tpu.memory_space<vmem>>, vector<286x4xf32>
    %543 = arith.truncf %542 : vector<286x4xf32> to vector<286x4xbf16>
    %c5_413 = arith.constant 5 : index
    %c0_414 = arith.constant 0 : index
    %c0_415 = arith.constant 0 : index
    %544 = vector.load %arg4[%c5_413, %c0_414, %c0_415] : memref<9x4x4xbf16, #tpu.memory_space<vmem>>, vector<1x4x4xbf16>
    %545 = vector.shape_cast %544 : vector<1x4x4xbf16> to vector<4x4xbf16>
    %cst_416 = arith.constant dense<0.000000e+00> : vector<286x4xf32>
    %546 = tpu.matmul %543, %545, %cst_416 {dimension_numbers = #tpu.dot_dimension_numbers<[1], [0], [0], [1], [0, 0, 1, 1], [], []>} : vector<286x4xbf16>, vector<4x4xbf16>, vector<286x4xf32> -> vector<286x4xf32>
    %547 = arith.addf %541, %546 : vector<286x4xf32>
    %c36_417 = arith.constant 36 : index
    %c0_418 = arith.constant 0 : index
    %548 = vector.load %arg7[%c36_417, %c0_418] : memref<324x4xf32, #tpu.memory_space<vmem>>, vector<286x4xf32>
    %549 = arith.truncf %548 : vector<286x4xf32> to vector<286x4xbf16>
    %c6_419 = arith.constant 6 : index
    %c0_420 = arith.constant 0 : index
    %c0_421 = arith.constant 0 : index
    %550 = vector.load %arg4[%c6_419, %c0_420, %c0_421] : memref<9x4x4xbf16, #tpu.memory_space<vmem>>, vector<1x4x4xbf16>
    %551 = vector.shape_cast %550 : vector<1x4x4xbf16> to vector<4x4xbf16>
    %cst_422 = arith.constant dense<0.000000e+00> : vector<286x4xf32>
    %552 = tpu.matmul %549, %551, %cst_422 {dimension_numbers = #tpu.dot_dimension_numbers<[1], [0], [0], [1], [0, 0, 1, 1], [], []>} : vector<286x4xbf16>, vector<4x4xbf16>, vector<286x4xf32> -> vector<286x4xf32>
    %553 = arith.addf %547, %552 : vector<286x4xf32>
    %c37_423 = arith.constant 37 : index
    %c0_424 = arith.constant 0 : index
    %554 = vector.load %arg7[%c37_423, %c0_424] : memref<324x4xf32, #tpu.memory_space<vmem>>, vector<286x4xf32>
    %555 = arith.truncf %554 : vector<286x4xf32> to vector<286x4xbf16>
    %c7_425 = arith.constant 7 : index
    %c0_426 = arith.constant 0 : index
    %c0_427 = arith.constant 0 : index
    %556 = vector.load %arg4[%c7_425, %c0_426, %c0_427] : memref<9x4x4xbf16, #tpu.memory_space<vmem>>, vector<1x4x4xbf16>
    %557 = vector.shape_cast %556 : vector<1x4x4xbf16> to vector<4x4xbf16>
    %cst_428 = arith.constant dense<0.000000e+00> : vector<286x4xf32>
    %558 = tpu.matmul %555, %557, %cst_428 {dimension_numbers = #tpu.dot_dimension_numbers<[1], [0], [0], [1], [0, 0, 1, 1], [], []>} : vector<286x4xbf16>, vector<4x4xbf16>, vector<286x4xf32> -> vector<286x4xf32>
    %559 = arith.addf %553, %558 : vector<286x4xf32>
    %c38_429 = arith.constant 38 : index
    %c0_430 = arith.constant 0 : index
    %560 = vector.load %arg7[%c38_429, %c0_430] : memref<324x4xf32, #tpu.memory_space<vmem>>, vector<286x4xf32>
    %561 = arith.truncf %560 : vector<286x4xf32> to vector<286x4xbf16>
    %c8_431 = arith.constant 8 : index
    %c0_432 = arith.constant 0 : index
    %c0_433 = arith.constant 0 : index
    %562 = vector.load %arg4[%c8_431, %c0_432, %c0_433] : memref<9x4x4xbf16, #tpu.memory_space<vmem>>, vector<1x4x4xbf16>
    %563 = vector.shape_cast %562 : vector<1x4x4xbf16> to vector<4x4xbf16>
    %cst_434 = arith.constant dense<0.000000e+00> : vector<286x4xf32>
    %564 = tpu.matmul %561, %563, %cst_434 {dimension_numbers = #tpu.dot_dimension_numbers<[1], [0], [0], [1], [0, 0, 1, 1], [], []>} : vector<286x4xbf16>, vector<4x4xbf16>, vector<286x4xf32> -> vector<286x4xf32>
    %565 = arith.addf %559, %564 : vector<286x4xf32>
    %c0_435 = arith.constant 0 : index
    %c0_436 = arith.constant 0 : index
    %566 = vector.load %arg8[%c0_435, %c0_436] : memref<286x4xf32, #tpu.memory_space<vmem>>, vector<286x4xf32>
    tpu.vector_store %arg8[%c0_435, %c0_436], %565 {strides = array<i32>} : memref<286x4xf32, #tpu.memory_space<vmem>>, vector<286x4xf32>,
    %cst_437 = arith.constant 0.000000e+00 : f32
    %567 = vector.broadcast %cst_437 : f32 to vector<1x4xf32>
    %cst_438 = arith.constant 0.000000e+00 : f32
    %568 = vector.broadcast %cst_438 : f32 to vector<1x4xf32>
    %c0_439 = arith.constant 0 : index
    %c0_440 = arith.constant 0 : index
    %569 = vector.load %arg8[%c0_439, %c0_440] : memref<286x4xf32, #tpu.memory_space<vmem>>, vector<16x4xf32>
    %cst_441 = arith.constant dense<0.000000e+00> : vector<4xf32>
    %570 = vector.multi_reduction <add>, %569, %cst_441 [0] : vector<16x4xf32> to vector<4xf32>
    %571 = vector.shape_cast %570 : vector<4xf32> to vector<1x4xf32>
    %572 = arith.addf %567, %571 : vector<1x4xf32>
    %573 = arith.mulf %569, %569 : vector<16x4xf32>
    %cst_442 = arith.constant dense<0.000000e+00> : vector<4xf32>
    %574 = vector.multi_reduction <add>, %573, %cst_442 [0] : vector<16x4xf32> to vector<4xf32>
    %575 = vector.shape_cast %574 : vector<4xf32> to vector<1x4xf32>
    %576 = arith.addf %568, %575 : vector<1x4xf32>
    %c18_443 = arith.constant 18 : index
    %c0_444 = arith.constant 0 : index
    %577 = vector.load %arg8[%c18_443, %c0_444] : memref<286x4xf32, #tpu.memory_space<vmem>>, vector<16x4xf32>
    %cst_445 = arith.constant dense<0.000000e+00> : vector<4xf32>
    %578 = vector.multi_reduction <add>, %577, %cst_445 [0] : vector<16x4xf32> to vector<4xf32>
    %579 = vector.shape_cast %578 : vector<4xf32> to vector<1x4xf32>
    %580 = arith.addf %572, %579 : vector<1x4xf32>
    %581 = arith.mulf %577, %577 : vector<16x4xf32>
    %cst_446 = arith.constant dense<0.000000e+00> : vector<4xf32>
    %582 = vector.multi_reduction <add>, %581, %cst_446 [0] : vector<16x4xf32> to vector<4xf32>
    %583 = vector.shape_cast %582 : vector<4xf32> to vector<1x4xf32>
    %584 = arith.addf %576, %583 : vector<1x4xf32>
    %c36_447 = arith.constant 36 : index
    %c0_448 = arith.constant 0 : index
    %585 = vector.load %arg8[%c36_447, %c0_448] : memref<286x4xf32, #tpu.memory_space<vmem>>, vector<16x4xf32>
    %cst_449 = arith.constant dense<0.000000e+00> : vector<4xf32>
    %586 = vector.multi_reduction <add>, %585, %cst_449 [0] : vector<16x4xf32> to vector<4xf32>
    %587 = vector.shape_cast %586 : vector<4xf32> to vector<1x4xf32>
    %588 = arith.addf %580, %587 : vector<1x4xf32>
    %589 = arith.mulf %585, %585 : vector<16x4xf32>
    %cst_450 = arith.constant dense<0.000000e+00> : vector<4xf32>
    %590 = vector.multi_reduction <add>, %589, %cst_450 [0] : vector<16x4xf32> to vector<4xf32>
    %591 = vector.shape_cast %590 : vector<4xf32> to vector<1x4xf32>
    %592 = arith.addf %584, %591 : vector<1x4xf32>
    %c54_451 = arith.constant 54 : index
    %c0_452 = arith.constant 0 : index
    %593 = vector.load %arg8[%c54_451, %c0_452] : memref<286x4xf32, #tpu.memory_space<vmem>>, vector<16x4xf32>
    %cst_453 = arith.constant dense<0.000000e+00> : vector<4xf32>
    %594 = vector.multi_reduction <add>, %593, %cst_453 [0] : vector<16x4xf32> to vector<4xf32>
    %595 = vector.shape_cast %594 : vector<4xf32> to vector<1x4xf32>
    %596 = arith.addf %588, %595 : vector<1x4xf32>
    %597 = arith.mulf %593, %593 : vector<16x4xf32>
    %cst_454 = arith.constant dense<0.000000e+00> : vector<4xf32>
    %598 = vector.multi_reduction <add>, %597, %cst_454 [0] : vector<16x4xf32> to vector<4xf32>
    %599 = vector.shape_cast %598 : vector<4xf32> to vector<1x4xf32>
    %600 = arith.addf %592, %599 : vector<1x4xf32>
    %c72_455 = arith.constant 72 : index
    %c0_456 = arith.constant 0 : index
    %601 = vector.load %arg8[%c72_455, %c0_456] : memref<286x4xf32, #tpu.memory_space<vmem>>, vector<16x4xf32>
    %cst_457 = arith.constant dense<0.000000e+00> : vector<4xf32>
    %602 = vector.multi_reduction <add>, %601, %cst_457 [0] : vector<16x4xf32> to vector<4xf32>
    %603 = vector.shape_cast %602 : vector<4xf32> to vector<1x4xf32>
    %604 = arith.addf %596, %603 : vector<1x4xf32>
    %605 = arith.mulf %601, %601 : vector<16x4xf32>
    %cst_458 = arith.constant dense<0.000000e+00> : vector<4xf32>
    %606 = vector.multi_reduction <add>, %605, %cst_458 [0] : vector<16x4xf32> to vector<4xf32>
    %607 = vector.shape_cast %606 : vector<4xf32> to vector<1x4xf32>
    %608 = arith.addf %600, %607 : vector<1x4xf32>
    %c90_459 = arith.constant 90 : index
    %c0_460 = arith.constant 0 : index
    %609 = vector.load %arg8[%c90_459, %c0_460] : memref<286x4xf32, #tpu.memory_space<vmem>>, vector<16x4xf32>
    %cst_461 = arith.constant dense<0.000000e+00> : vector<4xf32>
    %610 = vector.multi_reduction <add>, %609, %cst_461 [0] : vector<16x4xf32> to vector<4xf32>
    %611 = vector.shape_cast %610 : vector<4xf32> to vector<1x4xf32>
    %612 = arith.addf %604, %611 : vector<1x4xf32>
    %613 = arith.mulf %609, %609 : vector<16x4xf32>
    %cst_462 = arith.constant dense<0.000000e+00> : vector<4xf32>
    %614 = vector.multi_reduction <add>, %613, %cst_462 [0] : vector<16x4xf32> to vector<4xf32>
    %615 = vector.shape_cast %614 : vector<4xf32> to vector<1x4xf32>
    %616 = arith.addf %608, %615 : vector<1x4xf32>
    %c108_463 = arith.constant 108 : index
    %c0_464 = arith.constant 0 : index
    %617 = vector.load %arg8[%c108_463, %c0_464] : memref<286x4xf32, #tpu.memory_space<vmem>>, vector<16x4xf32>
    %cst_465 = arith.constant dense<0.000000e+00> : vector<4xf32>
    %618 = vector.multi_reduction <add>, %617, %cst_465 [0] : vector<16x4xf32> to vector<4xf32>
    %619 = vector.shape_cast %618 : vector<4xf32> to vector<1x4xf32>
    %620 = arith.addf %612, %619 : vector<1x4xf32>
    %621 = arith.mulf %617, %617 : vector<16x4xf32>
    %cst_466 = arith.constant dense<0.000000e+00> : vector<4xf32>
    %622 = vector.multi_reduction <add>, %621, %cst_466 [0] : vector<16x4xf32> to vector<4xf32>
    %623 = vector.shape_cast %622 : vector<4xf32> to vector<1x4xf32>
    %624 = arith.addf %616, %623 : vector<1x4xf32>
    %c126_467 = arith.constant 126 : index
    %c0_468 = arith.constant 0 : index
    %625 = vector.load %arg8[%c126_467, %c0_468] : memref<286x4xf32, #tpu.memory_space<vmem>>, vector<16x4xf32>
    %cst_469 = arith.constant dense<0.000000e+00> : vector<4xf32>
    %626 = vector.multi_reduction <add>, %625, %cst_469 [0] : vector<16x4xf32> to vector<4xf32>
    %627 = vector.shape_cast %626 : vector<4xf32> to vector<1x4xf32>
    %628 = arith.addf %620, %627 : vector<1x4xf32>
    %629 = arith.mulf %625, %625 : vector<16x4xf32>
    %cst_470 = arith.constant dense<0.000000e+00> : vector<4xf32>
    %630 = vector.multi_reduction <add>, %629, %cst_470 [0] : vector<16x4xf32> to vector<4xf32>
    %631 = vector.shape_cast %630 : vector<4xf32> to vector<1x4xf32>
    %632 = arith.addf %624, %631 : vector<1x4xf32>
    %c144_471 = arith.constant 144 : index
    %c0_472 = arith.constant 0 : index
    %633 = vector.load %arg8[%c144_471, %c0_472] : memref<286x4xf32, #tpu.memory_space<vmem>>, vector<16x4xf32>
    %cst_473 = arith.constant dense<0.000000e+00> : vector<4xf32>
    %634 = vector.multi_reduction <add>, %633, %cst_473 [0] : vector<16x4xf32> to vector<4xf32>
    %635 = vector.shape_cast %634 : vector<4xf32> to vector<1x4xf32>
    %636 = arith.addf %628, %635 : vector<1x4xf32>
    %637 = arith.mulf %633, %633 : vector<16x4xf32>
    %cst_474 = arith.constant dense<0.000000e+00> : vector<4xf32>
    %638 = vector.multi_reduction <add>, %637, %cst_474 [0] : vector<16x4xf32> to vector<4xf32>
    %639 = vector.shape_cast %638 : vector<4xf32> to vector<1x4xf32>
    %640 = arith.addf %632, %639 : vector<1x4xf32>
    %c162_475 = arith.constant 162 : index
    %c0_476 = arith.constant 0 : index
    %641 = vector.load %arg8[%c162_475, %c0_476] : memref<286x4xf32, #tpu.memory_space<vmem>>, vector<16x4xf32>
    %cst_477 = arith.constant dense<0.000000e+00> : vector<4xf32>
    %642 = vector.multi_reduction <add>, %641, %cst_477 [0] : vector<16x4xf32> to vector<4xf32>
    %643 = vector.shape_cast %642 : vector<4xf32> to vector<1x4xf32>
    %644 = arith.addf %636, %643 : vector<1x4xf32>
    %645 = arith.mulf %641, %641 : vector<16x4xf32>
    %cst_478 = arith.constant dense<0.000000e+00> : vector<4xf32>
    %646 = vector.multi_reduction <add>, %645, %cst_478 [0] : vector<16x4xf32> to vector<4xf32>
    %647 = vector.shape_cast %646 : vector<4xf32> to vector<1x4xf32>
    %648 = arith.addf %640, %647 : vector<1x4xf32>
    %c180_479 = arith.constant 180 : index
    %c0_480 = arith.constant 0 : index
    %649 = vector.load %arg8[%c180_479, %c0_480] : memref<286x4xf32, #tpu.memory_space<vmem>>, vector<16x4xf32>
    %cst_481 = arith.constant dense<0.000000e+00> : vector<4xf32>
    %650 = vector.multi_reduction <add>, %649, %cst_481 [0] : vector<16x4xf32> to vector<4xf32>
    %651 = vector.shape_cast %650 : vector<4xf32> to vector<1x4xf32>
    %652 = arith.addf %644, %651 : vector<1x4xf32>
    %653 = arith.mulf %649, %649 : vector<16x4xf32>
    %cst_482 = arith.constant dense<0.000000e+00> : vector<4xf32>
    %654 = vector.multi_reduction <add>, %653, %cst_482 [0] : vector<16x4xf32> to vector<4xf32>
    %655 = vector.shape_cast %654 : vector<4xf32> to vector<1x4xf32>
    %656 = arith.addf %648, %655 : vector<1x4xf32>
    %c198_483 = arith.constant 198 : index
    %c0_484 = arith.constant 0 : index
    %657 = vector.load %arg8[%c198_483, %c0_484] : memref<286x4xf32, #tpu.memory_space<vmem>>, vector<16x4xf32>
    %cst_485 = arith.constant dense<0.000000e+00> : vector<4xf32>
    %658 = vector.multi_reduction <add>, %657, %cst_485 [0] : vector<16x4xf32> to vector<4xf32>
    %659 = vector.shape_cast %658 : vector<4xf32> to vector<1x4xf32>
    %660 = arith.addf %652, %659 : vector<1x4xf32>
    %661 = arith.mulf %657, %657 : vector<16x4xf32>
    %cst_486 = arith.constant dense<0.000000e+00> : vector<4xf32>
    %662 = vector.multi_reduction <add>, %661, %cst_486 [0] : vector<16x4xf32> to vector<4xf32>
    %663 = vector.shape_cast %662 : vector<4xf32> to vector<1x4xf32>
    %664 = arith.addf %656, %663 : vector<1x4xf32>
    %c216_487 = arith.constant 216 : index
    %c0_488 = arith.constant 0 : index
    %665 = vector.load %arg8[%c216_487, %c0_488] : memref<286x4xf32, #tpu.memory_space<vmem>>, vector<16x4xf32>
    %cst_489 = arith.constant dense<0.000000e+00> : vector<4xf32>
    %666 = vector.multi_reduction <add>, %665, %cst_489 [0] : vector<16x4xf32> to vector<4xf32>
    %667 = vector.shape_cast %666 : vector<4xf32> to vector<1x4xf32>
    %668 = arith.addf %660, %667 : vector<1x4xf32>
    %669 = arith.mulf %665, %665 : vector<16x4xf32>
    %cst_490 = arith.constant dense<0.000000e+00> : vector<4xf32>
    %670 = vector.multi_reduction <add>, %669, %cst_490 [0] : vector<16x4xf32> to vector<4xf32>
    %671 = vector.shape_cast %670 : vector<4xf32> to vector<1x4xf32>
    %672 = arith.addf %664, %671 : vector<1x4xf32>
    %c234_491 = arith.constant 234 : index
    %c0_492 = arith.constant 0 : index
    %673 = vector.load %arg8[%c234_491, %c0_492] : memref<286x4xf32, #tpu.memory_space<vmem>>, vector<16x4xf32>
    %cst_493 = arith.constant dense<0.000000e+00> : vector<4xf32>
    %674 = vector.multi_reduction <add>, %673, %cst_493 [0] : vector<16x4xf32> to vector<4xf32>
    %675 = vector.shape_cast %674 : vector<4xf32> to vector<1x4xf32>
    %676 = arith.addf %668, %675 : vector<1x4xf32>
    %677 = arith.mulf %673, %673 : vector<16x4xf32>
    %cst_494 = arith.constant dense<0.000000e+00> : vector<4xf32>
    %678 = vector.multi_reduction <add>, %677, %cst_494 [0] : vector<16x4xf32> to vector<4xf32>
    %679 = vector.shape_cast %678 : vector<4xf32> to vector<1x4xf32>
    %680 = arith.addf %672, %679 : vector<1x4xf32>
    %c252_495 = arith.constant 252 : index
    %c0_496 = arith.constant 0 : index
    %681 = vector.load %arg8[%c252_495, %c0_496] : memref<286x4xf32, #tpu.memory_space<vmem>>, vector<16x4xf32>
    %cst_497 = arith.constant dense<0.000000e+00> : vector<4xf32>
    %682 = vector.multi_reduction <add>, %681, %cst_497 [0] : vector<16x4xf32> to vector<4xf32>
    %683 = vector.shape_cast %682 : vector<4xf32> to vector<1x4xf32>
    %684 = arith.addf %676, %683 : vector<1x4xf32>
    %685 = arith.mulf %681, %681 : vector<16x4xf32>
    %cst_498 = arith.constant dense<0.000000e+00> : vector<4xf32>
    %686 = vector.multi_reduction <add>, %685, %cst_498 [0] : vector<16x4xf32> to vector<4xf32>
    %687 = vector.shape_cast %686 : vector<4xf32> to vector<1x4xf32>
    %688 = arith.addf %680, %687 : vector<1x4xf32>
    %c270_499 = arith.constant 270 : index
    %c0_500 = arith.constant 0 : index
    %689 = vector.load %arg8[%c270_499, %c0_500] : memref<286x4xf32, #tpu.memory_space<vmem>>, vector<16x4xf32>
    %cst_501 = arith.constant dense<0.000000e+00> : vector<4xf32>
    %690 = vector.multi_reduction <add>, %689, %cst_501 [0] : vector<16x4xf32> to vector<4xf32>
    %691 = vector.shape_cast %690 : vector<4xf32> to vector<1x4xf32>
    %692 = arith.addf %684, %691 : vector<1x4xf32>
    %693 = arith.mulf %689, %689 : vector<16x4xf32>
    %cst_502 = arith.constant dense<0.000000e+00> : vector<4xf32>
    %694 = vector.multi_reduction <add>, %693, %cst_502 [0] : vector<16x4xf32> to vector<4xf32>
    %695 = vector.shape_cast %694 : vector<4xf32> to vector<1x4xf32>
    %696 = arith.addf %688, %695 : vector<1x4xf32>
    %cst_503 = arith.constant 3.906250e-03 : f32
    %697 = vector.broadcast %cst_503 : f32 to vector<1x4xf32>
    %698 = arith.mulf %692, %697 : vector<1x4xf32>
    %cst_504 = arith.constant 3.906250e-03 : f32
    %699 = vector.broadcast %cst_504 : f32 to vector<1x4xf32>
    %700 = arith.mulf %696, %699 : vector<1x4xf32>
    %701 = arith.mulf %698, %698 : vector<1x4xf32>
    %702 = arith.subf %700, %701 : vector<1x4xf32>
    %cst_505 = arith.constant 9.99999974E-6 : f32
    %703 = vector.broadcast %cst_505 : f32 to vector<1x4xf32>
    %704 = arith.addf %702, %703 : vector<1x4xf32>
    %705 = math.rsqrt %704 : vector<1x4xf32>
    %c0_506 = arith.constant 0 : index
    %c0_507 = arith.constant 0 : index
    %706 = vector.load %arg8[%c0_506, %c0_507] : memref<286x4xf32, #tpu.memory_space<vmem>>, vector<16x4xf32>
    %707 = vector.broadcast %698 : vector<1x4xf32> to vector<16x4xf32>
    %708 = arith.subf %706, %707 : vector<16x4xf32>
    %709 = vector.broadcast %705 : vector<1x4xf32> to vector<16x4xf32>
    %710 = arith.mulf %708, %709 : vector<16x4xf32>
    %c0_508 = arith.constant 0 : index
    %c0_509 = arith.constant 0 : index
    %c0_510 = arith.constant 0 : index
    %c0_511 = arith.constant 0 : index
    %711 = vector.load %arg1[%c0_508, %c0_509, %c0_510, %c0_511] : memref<1x16x16x4xf32, #tpu.memory_space<vmem>>, vector<1x1x16x4xf32>
    %712 = vector.shape_cast %711 : vector<1x1x16x4xf32> to vector<16x4xf32>
    %713 = arith.addf %712, %710 : vector<16x4xf32>
    %cst_512 = arith.constant 0.000000e+00 : f32
    %714 = vector.broadcast %cst_512 : f32 to vector<16x4xf32>
    %715 = arith.maximumf %713, %714 : vector<16x4xf32>
    %c0_513 = arith.constant 0 : index
    %c0_514 = arith.constant 0 : index
    %c0_515 = arith.constant 0 : index
    %c0_516 = arith.constant 0 : index
    %716 = vector.load %arg6[%c0_513, %c0_514, %c0_515, %c0_516] : memref<1x16x16x4xf32, #tpu.memory_space<vmem>>, vector<1x1x16x4xf32>
    %717 = vector.shape_cast %716 : vector<1x1x16x4xf32> to vector<16x4xf32>
    %718 = vector.shape_cast %715 : vector<16x4xf32> to vector<1x1x16x4xf32>
    tpu.vector_store %arg6[%c0_513, %c0_514, %c0_515, %c0_516], %718 {strides = array<i32>} : memref<1x16x16x4xf32, #tpu.memory_space<vmem>>, vector<1x1x16x4xf32>,
    %c18_517 = arith.constant 18 : index
    %c0_518 = arith.constant 0 : index
    %719 = vector.load %arg8[%c18_517, %c0_518] : memref<286x4xf32, #tpu.memory_space<vmem>>, vector<16x4xf32>
    %720 = vector.broadcast %698 : vector<1x4xf32> to vector<16x4xf32>
    %721 = arith.subf %719, %720 : vector<16x4xf32>
    %722 = vector.broadcast %705 : vector<1x4xf32> to vector<16x4xf32>
    %723 = arith.mulf %721, %722 : vector<16x4xf32>
    %c0_519 = arith.constant 0 : index
    %c1_520 = arith.constant 1 : index
    %c0_521 = arith.constant 0 : index
    %c0_522 = arith.constant 0 : index
    %724 = vector.load %arg1[%c0_519, %c1_520, %c0_521, %c0_522] : memref<1x16x16x4xf32, #tpu.memory_space<vmem>>, vector<1x1x16x4xf32>
    %725 = vector.shape_cast %724 : vector<1x1x16x4xf32> to vector<16x4xf32>
    %726 = arith.addf %725, %723 : vector<16x4xf32>
    %cst_523 = arith.constant 0.000000e+00 : f32
    %727 = vector.broadcast %cst_523 : f32 to vector<16x4xf32>
    %728 = arith.maximumf %726, %727 : vector<16x4xf32>
    %c0_524 = arith.constant 0 : index
    %c1_525 = arith.constant 1 : index
    %c0_526 = arith.constant 0 : index
    %c0_527 = arith.constant 0 : index
    %729 = vector.load %arg6[%c0_524, %c1_525, %c0_526, %c0_527] : memref<1x16x16x4xf32, #tpu.memory_space<vmem>>, vector<1x1x16x4xf32>
    %730 = vector.shape_cast %729 : vector<1x1x16x4xf32> to vector<16x4xf32>
    %731 = vector.shape_cast %728 : vector<16x4xf32> to vector<1x1x16x4xf32>
    tpu.vector_store %arg6[%c0_524, %c1_525, %c0_526, %c0_527], %731 {strides = array<i32>} : memref<1x16x16x4xf32, #tpu.memory_space<vmem>>, vector<1x1x16x4xf32>,
    %c36_528 = arith.constant 36 : index
    %c0_529 = arith.constant 0 : index
    %732 = vector.load %arg8[%c36_528, %c0_529] : memref<286x4xf32, #tpu.memory_space<vmem>>, vector<16x4xf32>
    %733 = vector.broadcast %698 : vector<1x4xf32> to vector<16x4xf32>
    %734 = arith.subf %732, %733 : vector<16x4xf32>
    %735 = vector.broadcast %705 : vector<1x4xf32> to vector<16x4xf32>
    %736 = arith.mulf %734, %735 : vector<16x4xf32>
    %c0_530 = arith.constant 0 : index
    %c2_531 = arith.constant 2 : index
    %c0_532 = arith.constant 0 : index
    %c0_533 = arith.constant 0 : index
    %737 = vector.load %arg1[%c0_530, %c2_531, %c0_532, %c0_533] : memref<1x16x16x4xf32, #tpu.memory_space<vmem>>, vector<1x1x16x4xf32>
    %738 = vector.shape_cast %737 : vector<1x1x16x4xf32> to vector<16x4xf32>
    %739 = arith.addf %738, %736 : vector<16x4xf32>
    %cst_534 = arith.constant 0.000000e+00 : f32
    %740 = vector.broadcast %cst_534 : f32 to vector<16x4xf32>
    %741 = arith.maximumf %739, %740 : vector<16x4xf32>
    %c0_535 = arith.constant 0 : index
    %c2_536 = arith.constant 2 : index
    %c0_537 = arith.constant 0 : index
    %c0_538 = arith.constant 0 : index
    %742 = vector.load %arg6[%c0_535, %c2_536, %c0_537, %c0_538] : memref<1x16x16x4xf32, #tpu.memory_space<vmem>>, vector<1x1x16x4xf32>
    %743 = vector.shape_cast %742 : vector<1x1x16x4xf32> to vector<16x4xf32>
    %744 = vector.shape_cast %741 : vector<16x4xf32> to vector<1x1x16x4xf32>
    tpu.vector_store %arg6[%c0_535, %c2_536, %c0_537, %c0_538], %744 {strides = array<i32>} : memref<1x16x16x4xf32, #tpu.memory_space<vmem>>, vector<1x1x16x4xf32>,
    %c54_539 = arith.constant 54 : index
    %c0_540 = arith.constant 0 : index
    %745 = vector.load %arg8[%c54_539, %c0_540] : memref<286x4xf32, #tpu.memory_space<vmem>>, vector<16x4xf32>
    %746 = vector.broadcast %698 : vector<1x4xf32> to vector<16x4xf32>
    %747 = arith.subf %745, %746 : vector<16x4xf32>
    %748 = vector.broadcast %705 : vector<1x4xf32> to vector<16x4xf32>
    %749 = arith.mulf %747, %748 : vector<16x4xf32>
    %c0_541 = arith.constant 0 : index
    %c3_542 = arith.constant 3 : index
    %c0_543 = arith.constant 0 : index
    %c0_544 = arith.constant 0 : index
    %750 = vector.load %arg1[%c0_541, %c3_542, %c0_543, %c0_544] : memref<1x16x16x4xf32, #tpu.memory_space<vmem>>, vector<1x1x16x4xf32>
    %751 = vector.shape_cast %750 : vector<1x1x16x4xf32> to vector<16x4xf32>
    %752 = arith.addf %751, %749 : vector<16x4xf32>
    %cst_545 = arith.constant 0.000000e+00 : f32
    %753 = vector.broadcast %cst_545 : f32 to vector<16x4xf32>
    %754 = arith.maximumf %752, %753 : vector<16x4xf32>
    %c0_546 = arith.constant 0 : index
    %c3_547 = arith.constant 3 : index
    %c0_548 = arith.constant 0 : index
    %c0_549 = arith.constant 0 : index
    %755 = vector.load %arg6[%c0_546, %c3_547, %c0_548, %c0_549] : memref<1x16x16x4xf32, #tpu.memory_space<vmem>>, vector<1x1x16x4xf32>
    %756 = vector.shape_cast %755 : vector<1x1x16x4xf32> to vector<16x4xf32>
    %757 = vector.shape_cast %754 : vector<16x4xf32> to vector<1x1x16x4xf32>
    tpu.vector_store %arg6[%c0_546, %c3_547, %c0_548, %c0_549], %757 {strides = array<i32>} : memref<1x16x16x4xf32, #tpu.memory_space<vmem>>, vector<1x1x16x4xf32>,
    %c72_550 = arith.constant 72 : index
    %c0_551 = arith.constant 0 : index
    %758 = vector.load %arg8[%c72_550, %c0_551] : memref<286x4xf32, #tpu.memory_space<vmem>>, vector<16x4xf32>
    %759 = vector.broadcast %698 : vector<1x4xf32> to vector<16x4xf32>
    %760 = arith.subf %758, %759 : vector<16x4xf32>
    %761 = vector.broadcast %705 : vector<1x4xf32> to vector<16x4xf32>
    %762 = arith.mulf %760, %761 : vector<16x4xf32>
    %c0_552 = arith.constant 0 : index
    %c4_553 = arith.constant 4 : index
    %c0_554 = arith.constant 0 : index
    %c0_555 = arith.constant 0 : index
    %763 = vector.load %arg1[%c0_552, %c4_553, %c0_554, %c0_555] : memref<1x16x16x4xf32, #tpu.memory_space<vmem>>, vector<1x1x16x4xf32>
    %764 = vector.shape_cast %763 : vector<1x1x16x4xf32> to vector<16x4xf32>
    %765 = arith.addf %764, %762 : vector<16x4xf32>
    %cst_556 = arith.constant 0.000000e+00 : f32
    %766 = vector.broadcast %cst_556 : f32 to vector<16x4xf32>
    %767 = arith.maximumf %765, %766 : vector<16x4xf32>
    %c0_557 = arith.constant 0 : index
    %c4_558 = arith.constant 4 : index
    %c0_559 = arith.constant 0 : index
    %c0_560 = arith.constant 0 : index
    %768 = vector.load %arg6[%c0_557, %c4_558, %c0_559, %c0_560] : memref<1x16x16x4xf32, #tpu.memory_space<vmem>>, vector<1x1x16x4xf32>
    %769 = vector.shape_cast %768 : vector<1x1x16x4xf32> to vector<16x4xf32>
    %770 = vector.shape_cast %767 : vector<16x4xf32> to vector<1x1x16x4xf32>
    tpu.vector_store %arg6[%c0_557, %c4_558, %c0_559, %c0_560], %770 {strides = array<i32>} : memref<1x16x16x4xf32, #tpu.memory_space<vmem>>, vector<1x1x16x4xf32>,
    %c90_561 = arith.constant 90 : index
    %c0_562 = arith.constant 0 : index
    %771 = vector.load %arg8[%c90_561, %c0_562] : memref<286x4xf32, #tpu.memory_space<vmem>>, vector<16x4xf32>
    %772 = vector.broadcast %698 : vector<1x4xf32> to vector<16x4xf32>
    %773 = arith.subf %771, %772 : vector<16x4xf32>
    %774 = vector.broadcast %705 : vector<1x4xf32> to vector<16x4xf32>
    %775 = arith.mulf %773, %774 : vector<16x4xf32>
    %c0_563 = arith.constant 0 : index
    %c5_564 = arith.constant 5 : index
    %c0_565 = arith.constant 0 : index
    %c0_566 = arith.constant 0 : index
    %776 = vector.load %arg1[%c0_563, %c5_564, %c0_565, %c0_566] : memref<1x16x16x4xf32, #tpu.memory_space<vmem>>, vector<1x1x16x4xf32>
    %777 = vector.shape_cast %776 : vector<1x1x16x4xf32> to vector<16x4xf32>
    %778 = arith.addf %777, %775 : vector<16x4xf32>
    %cst_567 = arith.constant 0.000000e+00 : f32
    %779 = vector.broadcast %cst_567 : f32 to vector<16x4xf32>
    %780 = arith.maximumf %778, %779 : vector<16x4xf32>
    %c0_568 = arith.constant 0 : index
    %c5_569 = arith.constant 5 : index
    %c0_570 = arith.constant 0 : index
    %c0_571 = arith.constant 0 : index
    %781 = vector.load %arg6[%c0_568, %c5_569, %c0_570, %c0_571] : memref<1x16x16x4xf32, #tpu.memory_space<vmem>>, vector<1x1x16x4xf32>
    %782 = vector.shape_cast %781 : vector<1x1x16x4xf32> to vector<16x4xf32>
    %783 = vector.shape_cast %780 : vector<16x4xf32> to vector<1x1x16x4xf32>
    tpu.vector_store %arg6[%c0_568, %c5_569, %c0_570, %c0_571], %783 {strides = array<i32>} : memref<1x16x16x4xf32, #tpu.memory_space<vmem>>, vector<1x1x16x4xf32>,
    %c108_572 = arith.constant 108 : index
    %c0_573 = arith.constant 0 : index
    %784 = vector.load %arg8[%c108_572, %c0_573] : memref<286x4xf32, #tpu.memory_space<vmem>>, vector<16x4xf32>
    %785 = vector.broadcast %698 : vector<1x4xf32> to vector<16x4xf32>
    %786 = arith.subf %784, %785 : vector<16x4xf32>
    %787 = vector.broadcast %705 : vector<1x4xf32> to vector<16x4xf32>
    %788 = arith.mulf %786, %787 : vector<16x4xf32>
    %c0_574 = arith.constant 0 : index
    %c6_575 = arith.constant 6 : index
    %c0_576 = arith.constant 0 : index
    %c0_577 = arith.constant 0 : index
    %789 = vector.load %arg1[%c0_574, %c6_575, %c0_576, %c0_577] : memref<1x16x16x4xf32, #tpu.memory_space<vmem>>, vector<1x1x16x4xf32>
    %790 = vector.shape_cast %789 : vector<1x1x16x4xf32> to vector<16x4xf32>
    %791 = arith.addf %790, %788 : vector<16x4xf32>
    %cst_578 = arith.constant 0.000000e+00 : f32
    %792 = vector.broadcast %cst_578 : f32 to vector<16x4xf32>
    %793 = arith.maximumf %791, %792 : vector<16x4xf32>
    %c0_579 = arith.constant 0 : index
    %c6_580 = arith.constant 6 : index
    %c0_581 = arith.constant 0 : index
    %c0_582 = arith.constant 0 : index
    %794 = vector.load %arg6[%c0_579, %c6_580, %c0_581, %c0_582] : memref<1x16x16x4xf32, #tpu.memory_space<vmem>>, vector<1x1x16x4xf32>
    %795 = vector.shape_cast %794 : vector<1x1x16x4xf32> to vector<16x4xf32>
    %796 = vector.shape_cast %793 : vector<16x4xf32> to vector<1x1x16x4xf32>
    tpu.vector_store %arg6[%c0_579, %c6_580, %c0_581, %c0_582], %796 {strides = array<i32>} : memref<1x16x16x4xf32, #tpu.memory_space<vmem>>, vector<1x1x16x4xf32>,
    %c126_583 = arith.constant 126 : index
    %c0_584 = arith.constant 0 : index
    %797 = vector.load %arg8[%c126_583, %c0_584] : memref<286x4xf32, #tpu.memory_space<vmem>>, vector<16x4xf32>
    %798 = vector.broadcast %698 : vector<1x4xf32> to vector<16x4xf32>
    %799 = arith.subf %797, %798 : vector<16x4xf32>
    %800 = vector.broadcast %705 : vector<1x4xf32> to vector<16x4xf32>
    %801 = arith.mulf %799, %800 : vector<16x4xf32>
    %c0_585 = arith.constant 0 : index
    %c7_586 = arith.constant 7 : index
    %c0_587 = arith.constant 0 : index
    %c0_588 = arith.constant 0 : index
    %802 = vector.load %arg1[%c0_585, %c7_586, %c0_587, %c0_588] : memref<1x16x16x4xf32, #tpu.memory_space<vmem>>, vector<1x1x16x4xf32>
    %803 = vector.shape_cast %802 : vector<1x1x16x4xf32> to vector<16x4xf32>
    %804 = arith.addf %803, %801 : vector<16x4xf32>
    %cst_589 = arith.constant 0.000000e+00 : f32
    %805 = vector.broadcast %cst_589 : f32 to vector<16x4xf32>
    %806 = arith.maximumf %804, %805 : vector<16x4xf32>
    %c0_590 = arith.constant 0 : index
    %c7_591 = arith.constant 7 : index
    %c0_592 = arith.constant 0 : index
    %c0_593 = arith.constant 0 : index
    %807 = vector.load %arg6[%c0_590, %c7_591, %c0_592, %c0_593] : memref<1x16x16x4xf32, #tpu.memory_space<vmem>>, vector<1x1x16x4xf32>
    %808 = vector.shape_cast %807 : vector<1x1x16x4xf32> to vector<16x4xf32>
    %809 = vector.shape_cast %806 : vector<16x4xf32> to vector<1x1x16x4xf32>
    tpu.vector_store %arg6[%c0_590, %c7_591, %c0_592, %c0_593], %809 {strides = array<i32>} : memref<1x16x16x4xf32, #tpu.memory_space<vmem>>, vector<1x1x16x4xf32>,
    %c144_594 = arith.constant 144 : index
    %c0_595 = arith.constant 0 : index
    %810 = vector.load %arg8[%c144_594, %c0_595] : memref<286x4xf32, #tpu.memory_space<vmem>>, vector<16x4xf32>
    %811 = vector.broadcast %698 : vector<1x4xf32> to vector<16x4xf32>
    %812 = arith.subf %810, %811 : vector<16x4xf32>
    %813 = vector.broadcast %705 : vector<1x4xf32> to vector<16x4xf32>
    %814 = arith.mulf %812, %813 : vector<16x4xf32>
    %c0_596 = arith.constant 0 : index
    %c8_597 = arith.constant 8 : index
    %c0_598 = arith.constant 0 : index
    %c0_599 = arith.constant 0 : index
    %815 = vector.load %arg1[%c0_596, %c8_597, %c0_598, %c0_599] : memref<1x16x16x4xf32, #tpu.memory_space<vmem>>, vector<1x1x16x4xf32>
    %816 = vector.shape_cast %815 : vector<1x1x16x4xf32> to vector<16x4xf32>
    %817 = arith.addf %816, %814 : vector<16x4xf32>
    %cst_600 = arith.constant 0.000000e+00 : f32
    %818 = vector.broadcast %cst_600 : f32 to vector<16x4xf32>
    %819 = arith.maximumf %817, %818 : vector<16x4xf32>
    %c0_601 = arith.constant 0 : index
    %c8_602 = arith.constant 8 : index
    %c0_603 = arith.constant 0 : index
    %c0_604 = arith.constant 0 : index
    %820 = vector.load %arg6[%c0_601, %c8_602, %c0_603, %c0_604] : memref<1x16x16x4xf32, #tpu.memory_space<vmem>>, vector<1x1x16x4xf32>
    %821 = vector.shape_cast %820 : vector<1x1x16x4xf32> to vector<16x4xf32>
    %822 = vector.shape_cast %819 : vector<16x4xf32> to vector<1x1x16x4xf32>
    tpu.vector_store %arg6[%c0_601, %c8_602, %c0_603, %c0_604], %822 {strides = array<i32>} : memref<1x16x16x4xf32, #tpu.memory_space<vmem>>, vector<1x1x16x4xf32>,
    %c162_605 = arith.constant 162 : index
    %c0_606 = arith.constant 0 : index
    %823 = vector.load %arg8[%c162_605, %c0_606] : memref<286x4xf32, #tpu.memory_space<vmem>>, vector<16x4xf32>
    %824 = vector.broadcast %698 : vector<1x4xf32> to vector<16x4xf32>
    %825 = arith.subf %823, %824 : vector<16x4xf32>
    %826 = vector.broadcast %705 : vector<1x4xf32> to vector<16x4xf32>
    %827 = arith.mulf %825, %826 : vector<16x4xf32>
    %c0_607 = arith.constant 0 : index
    %c9_608 = arith.constant 9 : index
    %c0_609 = arith.constant 0 : index
    %c0_610 = arith.constant 0 : index
    %828 = vector.load %arg1[%c0_607, %c9_608, %c0_609, %c0_610] : memref<1x16x16x4xf32, #tpu.memory_space<vmem>>, vector<1x1x16x4xf32>
    %829 = vector.shape_cast %828 : vector<1x1x16x4xf32> to vector<16x4xf32>
    %830 = arith.addf %829, %827 : vector<16x4xf32>
    %cst_611 = arith.constant 0.000000e+00 : f32
    %831 = vector.broadcast %cst_611 : f32 to vector<16x4xf32>
    %832 = arith.maximumf %830, %831 : vector<16x4xf32>
    %c0_612 = arith.constant 0 : index
    %c9_613 = arith.constant 9 : index
    %c0_614 = arith.constant 0 : index
    %c0_615 = arith.constant 0 : index
    %833 = vector.load %arg6[%c0_612, %c9_613, %c0_614, %c0_615] : memref<1x16x16x4xf32, #tpu.memory_space<vmem>>, vector<1x1x16x4xf32>
    %834 = vector.shape_cast %833 : vector<1x1x16x4xf32> to vector<16x4xf32>
    %835 = vector.shape_cast %832 : vector<16x4xf32> to vector<1x1x16x4xf32>
    tpu.vector_store %arg6[%c0_612, %c9_613, %c0_614, %c0_615], %835 {strides = array<i32>} : memref<1x16x16x4xf32, #tpu.memory_space<vmem>>, vector<1x1x16x4xf32>,
    %c180_616 = arith.constant 180 : index
    %c0_617 = arith.constant 0 : index
    %836 = vector.load %arg8[%c180_616, %c0_617] : memref<286x4xf32, #tpu.memory_space<vmem>>, vector<16x4xf32>
    %837 = vector.broadcast %698 : vector<1x4xf32> to vector<16x4xf32>
    %838 = arith.subf %836, %837 : vector<16x4xf32>
    %839 = vector.broadcast %705 : vector<1x4xf32> to vector<16x4xf32>
    %840 = arith.mulf %838, %839 : vector<16x4xf32>
    %c0_618 = arith.constant 0 : index
    %c10_619 = arith.constant 10 : index
    %c0_620 = arith.constant 0 : index
    %c0_621 = arith.constant 0 : index
    %841 = vector.load %arg1[%c0_618, %c10_619, %c0_620, %c0_621] : memref<1x16x16x4xf32, #tpu.memory_space<vmem>>, vector<1x1x16x4xf32>
    %842 = vector.shape_cast %841 : vector<1x1x16x4xf32> to vector<16x4xf32>
    %843 = arith.addf %842, %840 : vector<16x4xf32>
    %cst_622 = arith.constant 0.000000e+00 : f32
    %844 = vector.broadcast %cst_622 : f32 to vector<16x4xf32>
    %845 = arith.maximumf %843, %844 : vector<16x4xf32>
    %c0_623 = arith.constant 0 : index
    %c10_624 = arith.constant 10 : index
    %c0_625 = arith.constant 0 : index
    %c0_626 = arith.constant 0 : index
    %846 = vector.load %arg6[%c0_623, %c10_624, %c0_625, %c0_626] : memref<1x16x16x4xf32, #tpu.memory_space<vmem>>, vector<1x1x16x4xf32>
    %847 = vector.shape_cast %846 : vector<1x1x16x4xf32> to vector<16x4xf32>
    %848 = vector.shape_cast %845 : vector<16x4xf32> to vector<1x1x16x4xf32>
    tpu.vector_store %arg6[%c0_623, %c10_624, %c0_625, %c0_626], %848 {strides = array<i32>} : memref<1x16x16x4xf32, #tpu.memory_space<vmem>>, vector<1x1x16x4xf32>,
    %c198_627 = arith.constant 198 : index
    %c0_628 = arith.constant 0 : index
    %849 = vector.load %arg8[%c198_627, %c0_628] : memref<286x4xf32, #tpu.memory_space<vmem>>, vector<16x4xf32>
    %850 = vector.broadcast %698 : vector<1x4xf32> to vector<16x4xf32>
    %851 = arith.subf %849, %850 : vector<16x4xf32>
    %852 = vector.broadcast %705 : vector<1x4xf32> to vector<16x4xf32>
    %853 = arith.mulf %851, %852 : vector<16x4xf32>
    %c0_629 = arith.constant 0 : index
    %c11_630 = arith.constant 11 : index
    %c0_631 = arith.constant 0 : index
    %c0_632 = arith.constant 0 : index
    %854 = vector.load %arg1[%c0_629, %c11_630, %c0_631, %c0_632] : memref<1x16x16x4xf32, #tpu.memory_space<vmem>>, vector<1x1x16x4xf32>
    %855 = vector.shape_cast %854 : vector<1x1x16x4xf32> to vector<16x4xf32>
    %856 = arith.addf %855, %853 : vector<16x4xf32>
    %cst_633 = arith.constant 0.000000e+00 : f32
    %857 = vector.broadcast %cst_633 : f32 to vector<16x4xf32>
    %858 = arith.maximumf %856, %857 : vector<16x4xf32>
    %c0_634 = arith.constant 0 : index
    %c11_635 = arith.constant 11 : index
    %c0_636 = arith.constant 0 : index
    %c0_637 = arith.constant 0 : index
    %859 = vector.load %arg6[%c0_634, %c11_635, %c0_636, %c0_637] : memref<1x16x16x4xf32, #tpu.memory_space<vmem>>, vector<1x1x16x4xf32>
    %860 = vector.shape_cast %859 : vector<1x1x16x4xf32> to vector<16x4xf32>
    %861 = vector.shape_cast %858 : vector<16x4xf32> to vector<1x1x16x4xf32>
    tpu.vector_store %arg6[%c0_634, %c11_635, %c0_636, %c0_637], %861 {strides = array<i32>} : memref<1x16x16x4xf32, #tpu.memory_space<vmem>>, vector<1x1x16x4xf32>,
    %c216_638 = arith.constant 216 : index
    %c0_639 = arith.constant 0 : index
    %862 = vector.load %arg8[%c216_638, %c0_639] : memref<286x4xf32, #tpu.memory_space<vmem>>, vector<16x4xf32>
    %863 = vector.broadcast %698 : vector<1x4xf32> to vector<16x4xf32>
    %864 = arith.subf %862, %863 : vector<16x4xf32>
    %865 = vector.broadcast %705 : vector<1x4xf32> to vector<16x4xf32>
    %866 = arith.mulf %864, %865 : vector<16x4xf32>
    %c0_640 = arith.constant 0 : index
    %c12_641 = arith.constant 12 : index
    %c0_642 = arith.constant 0 : index
    %c0_643 = arith.constant 0 : index
    %867 = vector.load %arg1[%c0_640, %c12_641, %c0_642, %c0_643] : memref<1x16x16x4xf32, #tpu.memory_space<vmem>>, vector<1x1x16x4xf32>
    %868 = vector.shape_cast %867 : vector<1x1x16x4xf32> to vector<16x4xf32>
    %869 = arith.addf %868, %866 : vector<16x4xf32>
    %cst_644 = arith.constant 0.000000e+00 : f32
    %870 = vector.broadcast %cst_644 : f32 to vector<16x4xf32>
    %871 = arith.maximumf %869, %870 : vector<16x4xf32>
    %c0_645 = arith.constant 0 : index
    %c12_646 = arith.constant 12 : index
    %c0_647 = arith.constant 0 : index
    %c0_648 = arith.constant 0 : index
    %872 = vector.load %arg6[%c0_645, %c12_646, %c0_647, %c0_648] : memref<1x16x16x4xf32, #tpu.memory_space<vmem>>, vector<1x1x16x4xf32>
    %873 = vector.shape_cast %872 : vector<1x1x16x4xf32> to vector<16x4xf32>
    %874 = vector.shape_cast %871 : vector<16x4xf32> to vector<1x1x16x4xf32>
    tpu.vector_store %arg6[%c0_645, %c12_646, %c0_647, %c0_648], %874 {strides = array<i32>} : memref<1x16x16x4xf32, #tpu.memory_space<vmem>>, vector<1x1x16x4xf32>,
    %c234_649 = arith.constant 234 : index
    %c0_650 = arith.constant 0 : index
    %875 = vector.load %arg8[%c234_649, %c0_650] : memref<286x4xf32, #tpu.memory_space<vmem>>, vector<16x4xf32>
    %876 = vector.broadcast %698 : vector<1x4xf32> to vector<16x4xf32>
    %877 = arith.subf %875, %876 : vector<16x4xf32>
    %878 = vector.broadcast %705 : vector<1x4xf32> to vector<16x4xf32>
    %879 = arith.mulf %877, %878 : vector<16x4xf32>
    %c0_651 = arith.constant 0 : index
    %c13_652 = arith.constant 13 : index
    %c0_653 = arith.constant 0 : index
    %c0_654 = arith.constant 0 : index
    %880 = vector.load %arg1[%c0_651, %c13_652, %c0_653, %c0_654] : memref<1x16x16x4xf32, #tpu.memory_space<vmem>>, vector<1x1x16x4xf32>
    %881 = vector.shape_cast %880 : vector<1x1x16x4xf32> to vector<16x4xf32>
    %882 = arith.addf %881, %879 : vector<16x4xf32>
    %cst_655 = arith.constant 0.000000e+00 : f32
    %883 = vector.broadcast %cst_655 : f32 to vector<16x4xf32>
    %884 = arith.maximumf %882, %883 : vector<16x4xf32>
    %c0_656 = arith.constant 0 : index
    %c13_657 = arith.constant 13 : index
    %c0_658 = arith.constant 0 : index
    %c0_659 = arith.constant 0 : index
    %885 = vector.load %arg6[%c0_656, %c13_657, %c0_658, %c0_659] : memref<1x16x16x4xf32, #tpu.memory_space<vmem>>, vector<1x1x16x4xf32>
    %886 = vector.shape_cast %885 : vector<1x1x16x4xf32> to vector<16x4xf32>
    %887 = vector.shape_cast %884 : vector<16x4xf32> to vector<1x1x16x4xf32>
    tpu.vector_store %arg6[%c0_656, %c13_657, %c0_658, %c0_659], %887 {strides = array<i32>} : memref<1x16x16x4xf32, #tpu.memory_space<vmem>>, vector<1x1x16x4xf32>,
    %c252_660 = arith.constant 252 : index
    %c0_661 = arith.constant 0 : index
    %888 = vector.load %arg8[%c252_660, %c0_661] : memref<286x4xf32, #tpu.memory_space<vmem>>, vector<16x4xf32>
    %889 = vector.broadcast %698 : vector<1x4xf32> to vector<16x4xf32>
    %890 = arith.subf %888, %889 : vector<16x4xf32>
    %891 = vector.broadcast %705 : vector<1x4xf32> to vector<16x4xf32>
    %892 = arith.mulf %890, %891 : vector<16x4xf32>
    %c0_662 = arith.constant 0 : index
    %c14_663 = arith.constant 14 : index
    %c0_664 = arith.constant 0 : index
    %c0_665 = arith.constant 0 : index
    %893 = vector.load %arg1[%c0_662, %c14_663, %c0_664, %c0_665] : memref<1x16x16x4xf32, #tpu.memory_space<vmem>>, vector<1x1x16x4xf32>
    %894 = vector.shape_cast %893 : vector<1x1x16x4xf32> to vector<16x4xf32>
    %895 = arith.addf %894, %892 : vector<16x4xf32>
    %cst_666 = arith.constant 0.000000e+00 : f32
    %896 = vector.broadcast %cst_666 : f32 to vector<16x4xf32>
    %897 = arith.maximumf %895, %896 : vector<16x4xf32>
    %c0_667 = arith.constant 0 : index
    %c14_668 = arith.constant 14 : index
    %c0_669 = arith.constant 0 : index
    %c0_670 = arith.constant 0 : index
    %898 = vector.load %arg6[%c0_667, %c14_668, %c0_669, %c0_670] : memref<1x16x16x4xf32, #tpu.memory_space<vmem>>, vector<1x1x16x4xf32>
    %899 = vector.shape_cast %898 : vector<1x1x16x4xf32> to vector<16x4xf32>
    %900 = vector.shape_cast %897 : vector<16x4xf32> to vector<1x1x16x4xf32>
    tpu.vector_store %arg6[%c0_667, %c14_668, %c0_669, %c0_670], %900 {strides = array<i32>} : memref<1x16x16x4xf32, #tpu.memory_space<vmem>>, vector<1x1x16x4xf32>,
    %c270_671 = arith.constant 270 : index
    %c0_672 = arith.constant 0 : index
    %901 = vector.load %arg8[%c270_671, %c0_672] : memref<286x4xf32, #tpu.memory_space<vmem>>, vector<16x4xf32>
    %902 = vector.broadcast %698 : vector<1x4xf32> to vector<16x4xf32>
    %903 = arith.subf %901, %902 : vector<16x4xf32>
    %904 = vector.broadcast %705 : vector<1x4xf32> to vector<16x4xf32>
    %905 = arith.mulf %903, %904 : vector<16x4xf32>
    %c0_673 = arith.constant 0 : index
    %c15_674 = arith.constant 15 : index
    %c0_675 = arith.constant 0 : index
    %c0_676 = arith.constant 0 : index
    %906 = vector.load %arg1[%c0_673, %c15_674, %c0_675, %c0_676] : memref<1x16x16x4xf32, #tpu.memory_space<vmem>>, vector<1x1x16x4xf32>
    %907 = vector.shape_cast %906 : vector<1x1x16x4xf32> to vector<16x4xf32>
    %908 = arith.addf %907, %905 : vector<16x4xf32>
    %cst_677 = arith.constant 0.000000e+00 : f32
    %909 = vector.broadcast %cst_677 : f32 to vector<16x4xf32>
    %910 = arith.maximumf %908, %909 : vector<16x4xf32>
    %c0_678 = arith.constant 0 : index
    %c15_679 = arith.constant 15 : index
    %c0_680 = arith.constant 0 : index
    %c0_681 = arith.constant 0 : index
    %911 = vector.load %arg6[%c0_678, %c15_679, %c0_680, %c0_681] : memref<1x16x16x4xf32, #tpu.memory_space<vmem>>, vector<1x1x16x4xf32>
    %912 = vector.shape_cast %911 : vector<1x1x16x4xf32> to vector<16x4xf32>
    %913 = vector.shape_cast %910 : vector<16x4xf32> to vector<1x1x16x4xf32>
    tpu.vector_store %arg6[%c0_678, %c15_679, %c0_680, %c0_681], %913 {strides = array<i32>} : memref<1x16x16x4xf32, #tpu.memory_space<vmem>>, vector<1x1x16x4xf32>,
    return
  }
  func.func @transform_0(%arg0: i32) -> (i32, i32, i32, i32) {
    %c0_i32 = arith.constant 0 : i32
    %c0_i32_0 = arith.constant 0 : i32
    %c0_i32_1 = arith.constant 0 : i32
    %c0_i32_2 = arith.constant 0 : i32
    return %arg0, %c0_i32, %c0_i32_0, %c0_i32_1 : i32, i32, i32, i32
  }
  func.func @transform_1(%arg0: i32) -> (i32, i32, i32) {
    %c0_i32 = arith.constant 0 : i32
    %c0_i32_0 = arith.constant 0 : i32
    %c0_i32_1 = arith.constant 0 : i32
    %c0_i32_2 = arith.constant 0 : i32
    return %c0_i32, %c0_i32_0, %c0_i32_1 : i32, i32, i32
  }
  func.func @transform_2(%arg0: i32) -> (i32, i32) {
    %c0_i32 = arith.constant 0 : i32
    %c0_i32_0 = arith.constant 0 : i32
    %c0_i32_1 = arith.constant 0 : i32
    return %c0_i32, %c0_i32_0 : i32, i32
  }
  func.func @transform_3(%arg0: i32) -> (i32, i32, i32) {
    %c0_i32 = arith.constant 0 : i32
    %c0_i32_0 = arith.constant 0 : i32
    %c0_i32_1 = arith.constant 0 : i32
    %c0_i32_2 = arith.constant 0 : i32
    return %c0_i32, %c0_i32_0, %c0_i32_1 : i32, i32, i32
  }
  func.func @transform_4(%arg0: i32) -> (i32, i32) {
    %c0_i32 = arith.constant 0 : i32
    %c0_i32_0 = arith.constant 0 : i32
    %c0_i32_1 = arith.constant 0 : i32
    return %c0_i32, %c0_i32_0 : i32, i32
  }
  func.func @transform_5(%arg0: i32) -> (i32, i32, i32, i32) {
    %c0_i32 = arith.constant 0 : i32
    %c0_i32_0 = arith.constant 0 : i32
    %c0_i32_1 = arith.constant 0 : i32
    %c0_i32_2 = arith.constant 0 : i32
    return %arg0, %c0_i32, %c0_i32_0, %c0_i32_1 : i32, i32, i32, i32
  }
}

</mosaic_0001>

<bundles_post_ra>
// kernel: tpu_custom_call.1
= control target key start
LH: loop header
LB: loop body
LE: loop exit
PB: predicated region body
PF: predicated region fallthrough
CT: control target
= control target key end

     0   :  { %s9769_s18 = smov 0   ;;  %s11634_s0 = inlined_call_operand.vmem [shape: f32[2,16,16,4], index: 0, kind: input, shape index: {}]   ;;  %s11635_s1 = inlined_call_operand.vmem [shape: bf16[9,4,4], index: 1, kind: input, shape index: {}]   ;;  %s11636_s2 = inlined_call_operand.vmem [shape: f32[1,4], index: 2, kind: input, shape index: {}]   ;;  %s11637_s3 = inlined_call_operand.vmem [shape: bf16[9,4,4], index: 3, kind: input, shape index: {}]   ;;  %s11638_s4 = inlined_call_operand.vmem [shape: f32[1,4], index: 4, kind: input, shape index: {}]   ;;  %s11639_s5 = inlined_call_operand.vmem [shape: f32[2,16,16,4], index: 5, kind: output, shape index: {}]  }
   0x1 LB: > { %s7581_s19 = sadd.s32 4294967295, %s9737_s18   ;;  %p7585_p0 = scmp.ge.s32.totalorder %s9737_s18, 1  ;;  %s9737_s18 = sphi %s9769_s18, %s15_s18  }
   0x2   : > { %p187_p1 = scmp.lt.s32.totalorder %s9737_s18, 3 }
   0x4   : > { %p188_p2 = pnand %p7585_p0, %p187_p1 }
   0x6   : > { %191 = sbr.rel (%p188_p2) target bundleno = 1971 (0x7b3), region = 40 }
   0xd   : > { %v414_v0 = vld [vmem:[%s11635_s1] sm:$0x3]  ;;  %vm469_vm0 = vcmask 1041408   ;;  %p215_p3 = scmp.lt.s32.totalorder %s7581_s19, 1  ;;  %v9785_v2 = vld [vmem:[%s11635_s1 + $0x2] sm:$0x3] }
   0xe   : > { %9700 = vmatprep.subr.msk.bf16.mxu0 %vm469_vm0, %v414_v0  ;;  %v471_v1 = vsel %vm469_vm0, %v414_v0, 0  ;;  %vm228_vm1 = vcmask 31744   ;;  %vm231_vm2 = vcmask 25601   ;;  %vm233_vm3 = vcmask 30726   ;;  %v9886_v41 = vld [vmem:[%s11635_s1 + $0x4] sm:$0x3] }
   0xf   : > { %8369 = vmatpush3.bf16.msra.mxu0 %v471_v1  ;;  %s11716_s19 = smov (!%p215_p3, %s7581_s19), 1  ;;  %vm345_vm4 = vcmask 25600   ;;  %v797_v39 = vsel %vm469_vm0, %v9785_v2, 0  ;;  %vm3329_vm5 = vcmask 29696  }
  0x10   : > { %9701 = vmatprep.subr.msk.bf16.mxu0 %vm469_vm0, %v9785_v2  ;;  %s8024_s24 = sshll.u32 %s11716_s19, 8 }
  0x11   : > { %s9797_s27 = scalar_lea.vmem %s11634_s0, %s8024_s24  ;;  %s11445_s25 = scalar_lea.vmem %s11639_s5, %s8024_s24 }
  0x12   : > { %v7590_v3 = vld [vmem:[%s9797_s27 + $0x10] sm:$0xff]  ;;  %v7591_v4 = vld [vmem:[%s9797_s27 + $0x18] sm:$0xff]  ;;  %v226_v5 = vld [vmem:[%s9797_s27] sm:$0xff] }
  0x13   : > { %238 = vst.msk [vmem:[#allocation2 + $0x25] sm:$0xff] %vm228_vm1, %v7590_v3  ;;  %239 = vst.msk [vmem:[#allocation2 + $0x2d] sm:$0xff] %vm228_vm1, %v7591_v4  ;;  %v227_v6 = vld [vmem:[%s9797_s27 + $0x8] sm:$0xff]  ;;  %v7592_v7 = vld [vmem:[%s9797_s27 + $0x20] sm:$0xff] }
  0x14   : > { %240 = vst.msk [vmem:[#allocation2 + $0x23] sm:$0x2] %vm231_vm2, %v7590_v3  ;;  %232 = vst.msk [vmem:[#allocation2 + $0x11] sm:$0x2] %vm231_vm2, %v226_v5  ;;  %v7593_v8 = vld [vmem:[%s9797_s27 + $0x28] sm:$0xff]  ;;  %v7594_v9 = vld [vmem:[%s9797_s27 + $0x30] sm:$0xff] }
  0x15   : > { %241 = vst.msk [vmem:[#allocation2 + $0x2f] sm:$0x40] %vm233_vm3, %v7591_v4  ;;  %234 = vst.msk [vmem:[#allocation2 + $0x1d] sm:$0x40] %vm233_vm3, %v227_v6  ;;  %v7595_v10 = vld [vmem:[%s9797_s27 + $0x38] sm:$0xff]  ;;  %v7596_v11 = vld [vmem:[%s9797_s27 + $0x40] sm:$0xff] }
  0x16   : > { %229 = vst.msk [vmem:[#allocation2 + $0x13] sm:$0xff] %vm228_vm1, %v226_v5  ;;  %230 = vst.msk [vmem:[#allocation2 + $0x1b] sm:$0xff] %vm228_vm1, %v227_v6  ;;  %v7597_v12 = vld [vmem:[%s9797_s27 + $0x48] sm:$0xff]  ;;  %v7598_v13 = vld [vmem:[%s9797_s27 + $0x50] sm:$0xff] }
  0x17   : > { %245 = vst.msk [vmem:[#allocation2 + $0x37] sm:$0xff] %vm228_vm1, %v7592_v7  ;;  %246 = vst.msk [vmem:[#allocation2 + $0x3f] sm:$0xff] %vm228_vm1, %v7593_v8  ;;  %v7599_v14 = vld [vmem:[%s9797_s27 + $0x58] sm:$0xff]  ;;  %v7600_v15 = vld [vmem:[%s9797_s27 + $0x60] sm:$0xff] }
  0x18   : > { %247 = vst.msk [vmem:[#allocation2 + $0x35] sm:$0x2] %vm231_vm2, %v7592_v7  ;;  %254 = vst.msk [vmem:[#allocation2 + $0x47] sm:$0x2] %vm231_vm2, %v7594_v9  ;;  %v7601_v16 = vld [vmem:[%s9797_s27 + $0x68] sm:$0xff]  ;;  %v7602_v17 = vld [vmem:[%s9797_s27 + $0x70] sm:$0xff] }
  0x19   : > { %248 = vst.msk [vmem:[#allocation2 + $0x41] sm:$0x40] %vm233_vm3, %v7593_v8  ;;  %255 = vst.msk [vmem:[#allocation2 + $0x53] sm:$0x40] %vm233_vm3, %v7595_v10  ;;  %v7603_v18 = vld [vmem:[%s9797_s27 + $0x78] sm:$0xff]  ;;  %v7604_v19 = vld [vmem:[%s9797_s27 + $0x80] sm:$0xff] }
  0x1a   : > { %252 = vst.msk [vmem:[#allocation2 + $0x49] sm:$0xff] %vm228_vm1, %v7594_v9  ;;  %253 = vst.msk [vmem:[#allocation2 + $0x51] sm:$0xff] %vm228_vm1, %v7595_v10  ;;  %v7605_v20 = vld [vmem:[%s9797_s27 + $0x88] sm:$0xff]  ;;  %v7606_v21 = vld [vmem:[%s9797_s27 + $0x90] sm:$0xff] }
  0x1b   : > { %259 = vst.msk [vmem:[#allocation2 + $0x5b] sm:$0xff] %vm228_vm1, %v7596_v11  ;;  %260 = vst.msk [vmem:[#allocation2 + $0x63] sm:$0xff] %vm228_vm1, %v7597_v12  ;;  %v7607_v22 = vld [vmem:[%s9797_s27 + $0x98] sm:$0xff]  ;;  %v7608_v23 = vld [vmem:[%s9797_s27 + $0xa0] sm:$0xff] }
  0x1c   : > { %261 = vst.msk [vmem:[#allocation2 + $0x59] sm:$0x2] %vm231_vm2, %v7596_v11  ;;  %268 = vst.msk [vmem:[#allocation2 + $0x6b] sm:$0x2] %vm231_vm2, %v7598_v13  ;;  %v7609_v24 = vld [vmem:[%s9797_s27 + $0xa8] sm:$0xff]  ;;  %v7610_v25 = vld [vmem:[%s9797_s27 + $0xb0] sm:$0xff] }
  0x1d   : > { %262 = vst.msk [vmem:[#allocation2 + $0x65] sm:$0x40] %vm233_vm3, %v7597_v12  ;;  %269 = vst.msk [vmem:[#allocation2 + $0x77] sm:$0x40] %vm233_vm3, %v7599_v14  ;;  %v7611_v26 = vld [vmem:[%s9797_s27 + $0xb8] sm:$0xff]  ;;  %v9865_v27 = vld [vmem:[#allocation2 + $0x24] sm:$0xff] }
  0x1e   : > { %266 = vst.msk [vmem:[#allocation2 + $0x6d] sm:$0xff] %vm228_vm1, %v7598_v13  ;;  %267 = vst.msk [vmem:[#allocation2 + $0x75] sm:$0xff] %vm228_vm1, %v7599_v14  ;;  %v9867_v28 = vld [vmem:[#allocation2 + $0x2c] sm:$0xff]  ;;  %v342_v29 = vld [vmem:[#allocation2 + $0x34] sm:$0x3] }
  0x1f   : > { %273 = vst.msk [vmem:[#allocation2 + $0x7f] sm:$0xff] %vm228_vm1, %v7600_v15  ;;  %274 = vst.msk [vmem:[#allocation2 + $0x87] sm:$0xff] %vm228_vm1, %v7601_v16  ;;  %v363_v30 = vld [vmem:[#allocation2 + $0x18] sm:$0xff]  ;;  %v364_v31 = vld [vmem:[#allocation2 + $0x20] sm:$0xff] }
  0x20   : > { %275 = vst.msk [vmem:[#allocation2 + $0x7d] sm:$0x2] %vm231_vm2, %v7600_v15  ;;  %282 = vst.msk [vmem:[#allocation2 + $0x8f] sm:$0x2] %vm231_vm2, %v7602_v17  ;;  %v365_v32 = vld [vmem:[#allocation2 + $0x28] sm:$0xff]  ;;  %v7612_v40 = vld [vmem:[%s9797_s27 + $0xc0] sm:$0xff] }
  0x21   : > { %276 = vst.msk [vmem:[#allocation2 + $0x89] sm:$0x40] %vm233_vm3, %v7601_v16  ;;  %283 = vst.msk [vmem:[#allocation2 + $0x9b] sm:$0x40] %vm233_vm3, %v7603_v18  ;;  %v398_v38 = vpack.c.bf16 %v365_v32, %v364_v31  ;;  %v7613_v42 = vld [vmem:[%s9797_s27 + $0xc8] sm:$0xff]  ;;  %v7614_v43 = vld [vmem:[%s9797_s27 + $0xd0] sm:$0xff] }
  0x22   : > { %280 = vst.msk [vmem:[#allocation2 + $0x91] sm:$0xff] %vm228_vm1, %v7602_v17  ;;  %281 = vst.msk [vmem:[#allocation2 + $0x99] sm:$0xff] %vm228_vm1, %v7603_v18  ;;  %v7615_v44 = vld [vmem:[%s9797_s27 + $0xd8] sm:$0xff]  ;;  %v7616_v45 = vld [vmem:[%s9797_s27 + $0xe0] sm:$0xff] }
  0x23   : > { %287 = vst.msk [vmem:[#allocation2 + $0xa3] sm:$0xff] %vm228_vm1, %v7604_v19  ;;  %288 = vst.msk [vmem:[#allocation2 + $0xab] sm:$0xff] %vm228_vm1, %v7605_v20  ;;  %v7617_v46 = vld [vmem:[%s9797_s27 + $0xe8] sm:$0xff]  ;;  %v366_v47 = vld [vmem:[#allocation2 + $0x30] sm:$0xff] }
  0x24   : > { %289 = vst.msk [vmem:[#allocation2 + $0xa1] sm:$0x2] %vm231_vm2, %v7604_v19  ;;  %296 = vst.msk [vmem:[#allocation2 + $0xb3] sm:$0x2] %vm231_vm2, %v7606_v21  ;;  %v367_v48 = vld [vmem:[#allocation2 + $0x38] sm:$0xff]  ;;  %v368_v49 = vld [vmem:[#allocation2 + $0x40] sm:$0xff] }
  0x25   : > { %290 = vst.msk [vmem:[#allocation2 + $0xad] sm:$0x40] %vm233_vm3, %v7605_v20  ;;  %297 = vst.msk [vmem:[#allocation2 + $0xbf] sm:$0x40] %vm233_vm3, %v7607_v22  ;;  %v369_v50 = vld [vmem:[#allocation2 + $0x48] sm:$0xff]  ;;  %v399_v51 = vpack.c.bf16 %v367_v48, %v366_v47  ;;  %v370_v53 = vld [vmem:[#allocation2 + $0x50] sm:$0xff] }
  0x26   : > { %294 = vst.msk [vmem:[#allocation2 + $0xb5] sm:$0xff] %vm228_vm1, %v7606_v21  ;;  %295 = vst.msk [vmem:[#allocation2 + $0xbd] sm:$0xff] %vm228_vm1, %v7607_v22  ;;  %v400_v52 = vpack.c.bf16 %v369_v50, %v368_v49  ;;  %v371_v54 = vld [vmem:[#allocation2 + $0x58] sm:$0xff]  ;;  %v372_v55 = vld [vmem:[#allocation2 + $0x60] sm:$0xff] }
  0x27   : > { %301 = vst.msk [vmem:[#allocation2 + $0xc7] sm:$0xff] %vm228_vm1, %v7608_v23  ;;  %302 = vst.msk [vmem:[#allocation2 + $0xcf] sm:$0xff] %vm228_vm1, %v7609_v24  ;;  %v373_v56 = vld [vmem:[#allocation2 + $0x68] sm:$0xff]  ;;  %v401_v57 = vpack.c.bf16 %v371_v54, %v370_v53  ;;  %v374_v59 = vld [vmem:[#allocation2 + $0x70] sm:$0xff] }
  0x28   : > { %303 = vst.msk [vmem:[#allocation2 + $0xc5] sm:$0x2] %vm231_vm2, %v7608_v23  ;;  %310 = vst.msk [vmem:[#allocation2 + $0xd7] sm:$0x2] %vm231_vm2, %v7610_v25  ;;  %v402_v58 = vpack.c.bf16 %v373_v56, %v372_v55  ;;  %v375_v60 = vld [vmem:[#allocation2 + $0x78] sm:$0xff]  ;;  %v376_v61 = vld [vmem:[#allocation2 + $0x80] sm:$0xff] }
  0x29   : > { %304 = vst.msk [vmem:[#allocation2 + $0xd1] sm:$0x40] %vm233_vm3, %v7609_v24  ;;  %311 = vst.msk [vmem:[#allocation2 + $0xe3] sm:$0x40] %vm233_vm3, %v7611_v26  ;;  %v377_v62 = vld [vmem:[#allocation2 + $0x88] sm:$0xff]  ;;  %v403_v63 = vpack.c.bf16 %v375_v60, %v374_v59  ;;  %v378_v1 = vld [vmem:[#allocation2 + $0x90] sm:$0xff] }
  0x2a   : > { %308 = vst.msk [vmem:[#allocation2 + $0xd9] sm:$0xff] %vm228_vm1, %v7610_v25  ;;  %309 = vst.msk [vmem:[#allocation2 + $0xe1] sm:$0xff] %vm228_vm1, %v7611_v26  ;;  %v404_v0 = vpack.c.bf16 %v377_v62, %v376_v61  ;;  %v379_v2 = vld [vmem:[#allocation2 + $0x98] sm:$0xff]  ;;  %v381_v4 = vld [vmem:[#allocation2 + $0xa8] sm:$0xff] }
  0x2b   : > { %343 = vst.msk [vmem:[#allocation2] sm:$0xff] %vm228_vm1, %v9865_v27  ;;  %344 = vst.msk [vmem:[#allocation2 + $0x8] sm:$0xff] %vm228_vm1, %v9867_v28  ;;  %v380_v3 = vld [vmem:[#allocation2 + $0xa0] sm:$0xff]  ;;  %v405_v5 = vpack.c.bf16 %v379_v2, %v378_v1  ;;  %v699_v50 = vld [vmem:[#allocation2 + $0x69] sm:$0xff] }
  0x2c   : > { %346 = vst.msk [vmem:[#allocation2 + $0x10] sm:$0x3] %vm345_vm4, %v342_v29  ;;  %v406_v6 = vpack.c.bf16 %v381_v4, %v380_v3  ;;  %v697_v48 = vld [vmem:[#allocation2 + $0x59] sm:$0xff]  ;;  %v698_v49 = vld [vmem:[#allocation2 + $0x61] sm:$0xff]  ;;  %v700_v53 = vld [vmem:[#allocation2 + $0x71] sm:$0xff] }
  0x2d   : > { %315 = vst.msk [vmem:[#allocation2 + $0xeb] sm:$0xff] %vm228_vm1, %v7612_v40  ;;  %316 = vst.msk [vmem:[#allocation2 + $0xf3] sm:$0xff] %vm228_vm1, %v7613_v42  ;;  %v382_v7 = vld [vmem:[#allocation2 + $0xb0] sm:$0xff]  ;;  %v383_v8 = vld [vmem:[#allocation2 + $0xb8] sm:$0xff] }
  0x2e   : > { %317 = vst.msk [vmem:[#allocation2 + $0xe9] sm:$0x2] %vm231_vm2, %v7612_v40  ;;  %324 = vst.msk [vmem:[#allocation2 + $0xfb] sm:$0x2] %vm231_vm2, %v7614_v43  ;;  %v385_v10 = vld [vmem:[#allocation2 + $0xc8] sm:$0xff]  ;;  %v407_v11 = vpack.c.bf16 %v383_v8, %v382_v7  ;;  %v701_v54 = vld [vmem:[#allocation2 + $0x79] sm:$0xff] }
  0x2f   : > { %318 = vst.msk [vmem:[#allocation2 + $0xf5] sm:$0x40] %vm233_vm3, %v7613_v42  ;;  %325 = vst.msk [vmem:[#allocation2 + $0x107] sm:$0x40] %vm233_vm3, %v7615_v44  ;;  %v384_v9 = vld [vmem:[#allocation2 + $0xc0] sm:$0xff]  ;;  %v692_v42 = vld [vmem:[#allocation2 + $0x31] sm:$0xff] }
  0x30   : > { %322 = vst.msk [vmem:[#allocation2 + $0xfd] sm:$0xff] %vm228_vm1, %v7614_v43  ;;  %323 = vst.msk [vmem:[#allocation2 + $0x105] sm:$0xff] %vm228_vm1, %v7615_v44  ;;  %v408_v12 = vpack.c.bf16 %v385_v10, %v384_v9  ;;  %v386_v13 = vld [vmem:[#allocation2 + $0xd0] sm:$0xff]  ;;  %v9931_v40 = vld [vmem:[%s11635_s1 + $0x6] sm:$0x3] }
  0x31   : > { %329 = vst.msk [vmem:[#allocation2 + $0x10f] sm:$0xff] %vm228_vm1, %v7616_v45  ;;  %330 = vst.msk [vmem:[#allocation2 + $0x117] sm:$0xff] %vm228_vm1, %v7617_v46  ;;  %v387_v14 = vld [vmem:[#allocation2 + $0xd8] sm:$0xff]  ;;  %v388_v15 = vld [vmem:[#allocation2 + $0xe0] sm:$0xff] }
  0x32   : > { %v360_v33 = vld [vmem:[#allocation2] sm:$0xff]  ;;  %v361_v34 = vld [vmem:[#allocation2 + $0x8] sm:$0xff]  ;;  %331 = vst.msk [vmem:[#allocation2 + $0x10d] sm:$0x2] %vm231_vm2, %v7616_v45  ;;  %v409_v17 = vpack.c.bf16 %v387_v14, %v386_v13  ;;  %v704_v59 = vld [vmem:[#allocation2 + $0x91] sm:$0xff] }
  0x33   : > { %v362_v35 = vld [vmem:[#allocation2 + $0x10] sm:$0xff]  ;;  %v396_v36 = vpack.c.bf16 %v361_v34, %v360_v33  ;;  %332 = vst.msk [vmem:[#allocation2 + $0x119] sm:$0x40] %vm233_vm3, %v7617_v46  ;;  %v686_v29 = vld [vmem:[#allocation2 + $0x1] sm:$0xff]  ;;  %v689_v34 = vld [vmem:[#allocation2 + $0x19] sm:$0xff] }
  0x34   : > { %v397_v37 = vpack.c.bf16 %v363_v30, %v362_v35  ;;  %v390_v19 = vld [vmem:[#allocation2 + $0xf0] sm:$0xff]  ;;  %v690_v35 = vld [vmem:[#allocation2 + $0x21] sm:$0xff]  ;;  %v693_v43 = vld [vmem:[#allocation2 + $0x39] sm:$0xff] }
  0x35   : > { %8370 = vmatprep.mubr.msk.bf16.mxu0 %vm228_vm1, %v396_v36  ;;  %v389_v16 = vld [vmem:[#allocation2 + $0xe8] sm:$0xff]  ;;  %v688_v33 = vld [vmem:[#allocation2 + $0x11] sm:$0xff]  ;;  %v725_v46 = vpack.c.bf16 %v693_v43, %v692_v42  ;;  %v705_v60 = vld [vmem:[#allocation2 + $0x99] sm:$0xff] }
  0x36   : > { %8371 = vmatmul.mubr.msk.bf16.vlgmr.msra.gmra.mrb[0].mxu0 %vm228_vm1, %v397_v37  ;;  %v410_v18 = vpack.c.bf16 %v389_v16, %v388_v15  ;;  %v687_v30 = vld [vmem:[#allocation2 + $0x9] sm:$0xff]  ;;  %v723_v37 = vpack.c.bf16 %v689_v34, %v688_v33  ;;  %v694_v44 = vld [vmem:[#allocation2 + $0x41] sm:$0xff]  ;;  %v708_v1 = vld [vmem:[#allocation2 + $0xb1] sm:$0xff] }
  0x37   : > { %8407 = vmatpush3.bf16.msra.mxu0 %v797_v39  ;;  %8374 = vmatprep.mubr.msk.bf16.mxu0 %vm228_vm1, %v398_v38  ;;  %v391_v20 = vld [vmem:[#allocation2 + $0xf8] sm:$0xff]  ;;  %v392_v21 = vld [vmem:[#allocation2 + $0x100] sm:$0xff]  ;;  %v722_v32 = vpack.c.bf16 %v687_v30, %v686_v29  ;;  %v691_v36 = vld [vmem:[#allocation2 + $0x29] sm:$0xff]  ;;  %v1123_v39 = vsel %vm469_vm0, %v9886_v41, 0 }
  0x38   : > { %9702 = vmatprep.subr.msk.bf16.mxu0 %vm469_vm0, %v9886_v41  ;;  %v411_v23 = vpack.c.bf16 %v391_v20, %v390_v19  ;;  %v394_v25 = vld [vmem:[#allocation2 + $0x110] sm:$0xff]  ;;  %v395_v26 = vld [vmem:[#allocation2 + $0x118] sm:$0x3f]  ;;  %v724_v38 = vpack.c.bf16 %v691_v36, %v690_v35  ;;  %v702_v55 = vld [vmem:[#allocation2 + $0x81] sm:$0xff]  ;;  %v1449_v35 = vsel %vm469_vm0, %v9931_v40, 0 }
  0x39   : > { %v393_v22 = vld [vmem:[#allocation2 + $0x108] sm:$0xff]  ;;  %v413_v31 = vpack.c.bf16 %v395_v26, %v394_v25  ;;  %v696_v41 = vld [vmem:[#allocation2 + $0x51] sm:$0xff]  ;;  %v709_v2 = vld [vmem:[#allocation2 + $0xb9] sm:$0xff] }
  0x3a   : > { %v412_v24 = vpack.c.bf16 %v393_v22, %v392_v21  ;;  %v695_v45 = vld [vmem:[#allocation2 + $0x49] sm:$0xff]  ;;  %v706_v61 = vld [vmem:[#allocation2 + $0xa1] sm:$0xff]  ;;  %v712_v7 = vld [vmem:[#allocation2 + $0xd1] sm:$0xff] }
  0x3b   : > { %v726_v47 = vpack.c.bf16 %v695_v45, %v694_v44  ;;  %v703_v56 = vld [vmem:[#allocation2 + $0x89] sm:$0xff]  ;;  %v710_v3 = vld [vmem:[#allocation2 + $0xc1] sm:$0xff]  ;;  %v713_v8 = vld [vmem:[#allocation2 + $0xd9] sm:$0xff] }
  0x3c   : > { %v707_v62 = vld [vmem:[#allocation2 + $0xa9] sm:$0xff]  ;;  %v714_v9 = vld [vmem:[#allocation2 + $0xe1] sm:$0xff]  ;;  %v716_v13 = vld [vmem:[#allocation2 + $0xf1] sm:$0xff] }
  0x3d   : > { %v711_v4 = vld [vmem:[#allocation2 + $0xc9] sm:$0xff]  ;;  %v717_v14 = vld [vmem:[#allocation2 + $0xf9] sm:$0xff]  ;;  %v718_v15 = vld [vmem:[#allocation2 + $0x101] sm:$0xff] }
  0x3e   : > { %8375 = vmatmul.mubr.msk.bf16.gmra.mrb[4].mxu0 %vm228_vm1, %v399_v51  ;;  %v727_v51 = vpack.c.bf16 %v697_v48, %v696_v41  ;;  %v715_v10 = vld [vmem:[#allocation2 + $0xe9] sm:$0xff]  ;;  %v720_v19 = vld [vmem:[#allocation2 + $0x111] sm:$0xff]  ;;  %v721_v20 = vld [vmem:[#allocation2 + $0x119] sm:$0x3f] }
  0x3f   : > { %8378 = vmatprep.mubr.msk.bf16.mxu0 %vm228_vm1, %v400_v52  ;;  %v728_v52 = vpack.c.bf16 %v699_v50, %v698_v49  ;;  %v719_v16 = vld [vmem:[#allocation2 + $0x109] sm:$0xff]  ;;  %v1014_v25 = vld [vmem:[#allocation2 + $0x12] sm:$0xff]  ;;  %v1015_v26 = vld [vmem:[#allocation2 + $0x1a] sm:$0xff] }
  0x40   : > { %v1012_v21 = vld [vmem:[#allocation2 + $0x2] sm:$0xff]  ;;  %v1013_v22 = vld [vmem:[#allocation2 + $0xa] sm:$0xff]  ;;  %v7619_v34 = vld [vmem:[%s9797_s27 + $0xf8] sm:$0xff] }
  0x41   : > { %v1016_v29 = vld [vmem:[#allocation2 + $0x22] sm:$0xff]  ;;  %v1017_v30 = vld [vmem:[#allocation2 + $0x2a] sm:$0xff]  ;;  %337 = vst.msk [vmem:[#allocation2 + $0x129] sm:$0xff] %vm228_vm1, %v7619_v34  ;;  %v1022_v44 = vld [vmem:[#allocation2 + $0x52] sm:$0xff] }
  0x42   : > { %v9956_v33 = vpack.c.bf16 %v1017_v30, %v1016_v29  ;;  %339 = vst.msk [vmem:[#allocation2 + $0x12b] sm:$0x40] %vm233_vm3, %v7619_v34  ;;  %v9968_v36 = vld [vmem:[%s11635_s1 + $0x8] sm:$0x3]  ;;  %v1023_v45 = vld [vmem:[#allocation2 + $0x5a] sm:$0xff]  ;;  %v1026_v49 = vld [vmem:[#allocation2 + $0x72] sm:$0xff] }
  0x43   : > { %v1053_v41 = vpack.c.bf16 %v1023_v45, %v1022_v44  ;;  %v1027_v50 = vld [vmem:[#allocation2 + $0x7a] sm:$0xff]  ;;  %v1666_v30 = vld [vmem:[#allocation2 + $0x23] sm:$0xff] }
  0x44   : > { %v1674_v45 = vld [vmem:[#allocation2 + $0x63] sm:$0xff] }
  0x46   : > { %8379 = vmatmul.mubr.msk.bf16.gmra.mrb[8].mxu0 %vm228_vm1, %v401_v57  ;;  %v729_v57 = vpack.c.bf16 %v701_v54, %v700_v53  ;;  %v1055_v53 = vpack.c.bf16 %v1027_v50, %v1026_v49  ;;  %v1678_v50 = vld [vmem:[#allocation2 + $0x83] sm:$0xff] }
  0x47   : > { %8382 = vmatprep.mubr.msk.bf16.mxu0 %vm228_vm1, %v402_v58  ;;  %v730_v58 = vpack.c.bf16 %v703_v56, %v702_v55  ;;  %v1030_v55 = vld [vmem:[#allocation2 + $0x92] sm:$0xff]  ;;  %v1031_v56 = vld [vmem:[#allocation2 + $0x9a] sm:$0xff] }
  0x4e   : > { %8383 = vmatmul.mubr.msk.bf16.gmra.mrb[12].mxu0 %vm228_vm1, %v403_v63  ;;  %v731_v63 = vpack.c.bf16 %v705_v60, %v704_v59  ;;  %v1057_v59 = vpack.c.bf16 %v1031_v56, %v1030_v55  ;;  %v1682_v56 = vld [vmem:[#allocation2 + $0xa3] sm:$0xff] }
  0x4f   : > { %8386 = vmatprep.mubr.msk.bf16.mxu0 %vm228_vm1, %v404_v0  ;;  %v732_v0 = vpack.c.bf16 %v707_v62, %v706_v61  ;;  %v1034_v61 = vld [vmem:[#allocation2 + $0xb2] sm:$0xff]  ;;  %v1035_v62 = vld [vmem:[#allocation2 + $0xba] sm:$0xff] }
  0x56   : > { %8387 = vmatmul.mubr.msk.bf16.gmra.mrb[16].mxu0 %vm228_vm1, %v405_v5  ;;  %v733_v5 = vpack.c.bf16 %v709_v2, %v708_v1  ;;  %v1059_v1 = vpack.c.bf16 %v1035_v62, %v1034_v61  ;;  %v1686_v62 = vld [vmem:[#allocation2 + $0xc3] sm:$0xff] }
  0x57   : > { %8390 = vmatprep.mubr.msk.bf16.mxu0 %vm228_vm1, %v406_v6  ;;  %v734_v6 = vpack.c.bf16 %v711_v4, %v710_v3  ;;  %v1038_v3 = vld [vmem:[#allocation2 + $0xd2] sm:$0xff]  ;;  %v1039_v4 = vld [vmem:[#allocation2 + $0xda] sm:$0xff] }
  0x5e   : > { %8391 = vmatmul.mubr.msk.bf16.gmra.mrb[20].mxu0 %vm228_vm1, %v407_v11  ;;  %v735_v11 = vpack.c.bf16 %v713_v8, %v712_v7  ;;  %v1061_v7 = vpack.c.bf16 %v1039_v4, %v1038_v3  ;;  %v1690_v4 = vld [vmem:[#allocation2 + $0xe3] sm:$0xff] }
  0x5f   : > { %8394 = vmatprep.mubr.msk.bf16.mxu0 %vm228_vm1, %v408_v12  ;;  %v736_v12 = vpack.c.bf16 %v715_v10, %v714_v9  ;;  %v1042_v9 = vld [vmem:[#allocation2 + $0xf2] sm:$0xff]  ;;  %v1043_v10 = vld [vmem:[#allocation2 + $0xfa] sm:$0xff] }
  0x66   : > { %8395 = vmatmul.mubr.msk.bf16.gmra.mrb[24].mxu0 %vm228_vm1, %v409_v17  ;;  %v737_v17 = vpack.c.bf16 %v717_v14, %v716_v13  ;;  %v1063_v13 = vpack.c.bf16 %v1043_v10, %v1042_v9  ;;  %v1694_v10 = vld [vmem:[#allocation2 + $0x103] sm:$0xff] }
  0x67   : > { %8398 = vmatprep.mubr.msk.bf16.mxu0 %vm228_vm1, %v410_v18  ;;  %v738_v18 = vpack.c.bf16 %v719_v16, %v718_v15  ;;  %v1046_v15 = vld [vmem:[#allocation2 + $0x112] sm:$0xff]  ;;  %v1047_v16 = vld [vmem:[#allocation2 + $0x11a] sm:$0x3f] }
  0x6e   : > { %8399 = vmatmul.mubr.msk.bf16.gmra.mrb[28].mxu0 %vm228_vm1, %v411_v23  ;;  %v739_v23 = vpack.c.bf16 %v721_v20, %v720_v19  ;;  %v7715_v19 = vld [vmem:[%s11635_s1 + $0xa] sm:$0x3] }
  0x6f   : > { %8402 = vmatprep.mubr.msk.bf16.mxu0 %vm228_vm1, %v412_v24  ;;  %v1048_v24 = vpack.c.bf16 %v1013_v22, %v1012_v21 }
  0x76   : > { %8403 = vmatmul.mubr.msk.bf16.gmra.mrb[32].mxu0 %vm228_vm1, %v413_v31  ;;  %v9953_v31 = vpack.c.bf16 %v1015_v26, %v1014_v25  ;;  %v1665_v25 = vld [vmem:[#allocation2 + $0x1b] sm:$0xff] }
  0x77   : > { %8408 = vmatprep.mubr.msk.bf16.mxu0 %vm228_vm1, %v722_v32  ;;  %v7618_v32 = vld [vmem:[%s9797_s27 + $0xf0] sm:$0xff] }
  0x78   : > { %336 = vst.msk [vmem:[#allocation2 + $0x121] sm:$0xff] %vm228_vm1, %v7618_v32 }
  0x79   : > { %338 = vst.msk [vmem:[#allocation2 + $0x11f] sm:$0x2] %vm231_vm2, %v7618_v32  ;;  %v1668_v32 = vld [vmem:[#allocation2 + $0x33] sm:$0xff] }
  0x7e   : > { %8409 = vmatmul.mubr.msk.bf16.vlgmr.msra.gmra.mrb[0].mxu0 %vm228_vm1, %v723_v37  ;;  %v1018_v37 = vld [vmem:[#allocation2 + $0x32] sm:$0xff] }
  0x7f   : > { %8445 = vmatpush3.bf16.msra.mxu0 %v1123_v39  ;;  %8412 = vmatprep.mubr.msk.bf16.mxu0 %vm228_vm1, %v724_v38  ;;  %v1019_v38 = vld [vmem:[#allocation2 + $0x3a] sm:$0xff]  ;;  %v1020_v39 = vld [vmem:[#allocation2 + $0x42] sm:$0xff] }
  0x80   : > { %9703 = vmatprep.subr.msk.bf16.mxu0 %vm469_vm0, %v9931_v40  ;;  %v1021_v40 = vld [vmem:[#allocation2 + $0x4a] sm:$0xff]  ;;  %v1051_v42 = vpack.c.bf16 %v1019_v38, %v1018_v37  ;;  %v1371_v20 = vld [vmem:[#allocation2 + $0x11a] sm:$0xff]  ;;  %v1372_v22 = vld [vmem:[#allocation2 + $0x122] sm:$0xff] }
  0x81   : > { %v1052_v43 = vpack.c.bf16 %v1021_v40, %v1020_v39  ;;  %v1390_v21 = vpack.c.bf16 %v1371_v20, %v1046_v15  ;;  %v10022_v37 = vld [vmem:[%s11635_s1 + $0xc] sm:$0x3]  ;;  %v1670_v38 = vld [vmem:[#allocation2 + $0x43] sm:$0xff]  ;;  %v1672_v40 = vld [vmem:[#allocation2 + $0x53] sm:$0xff] }
  0x82   : > { %v1671_v39 = vld [vmem:[#allocation2 + $0x4b] sm:$0xff] }
  0x86   : > { %8413 = vmatmul.mubr.msk.bf16.gmra.mrb[4].mxu0 %vm228_vm1, %v725_v46  ;;  %v1024_v46 = vld [vmem:[#allocation2 + $0x62] sm:$0xff] }
  0x87   : > { %8416 = vmatprep.mubr.msk.bf16.mxu0 %vm228_vm1, %v726_v47  ;;  %v1025_v47 = vld [vmem:[#allocation2 + $0x6a] sm:$0xff] }
  0x88   : > { %v1054_v48 = vpack.c.bf16 %v1025_v47, %v1024_v46  ;;  %v1675_v46 = vld [vmem:[#allocation2 + $0x6b] sm:$0xff]  ;;  %v1676_v47 = vld [vmem:[#allocation2 + $0x73] sm:$0xff] }
  0x8e   : > { %8417 = vmatmul.mubr.msk.bf16.gmra.mrb[8].mxu0 %vm228_vm1, %v727_v51  ;;  %v1028_v51 = vld [vmem:[#allocation2 + $0x82] sm:$0xff] }
  0x8f   : > { %8420 = vmatprep.mubr.msk.bf16.mxu0 %vm228_vm1, %v728_v52  ;;  %v1029_v52 = vld [vmem:[#allocation2 + $0x8a] sm:$0xff] }
  0x90   : > { %v1056_v54 = vpack.c.bf16 %v1029_v52, %v1028_v51  ;;  %v1679_v51 = vld [vmem:[#allocation2 + $0x8b] sm:$0xff]  ;;  %v1680_v52 = vld [vmem:[#allocation2 + $0x93] sm:$0xff] }
  0x96   : > { %8421 = vmatmul.mubr.msk.bf16.gmra.mrb[12].mxu0 %vm228_vm1, %v729_v57  ;;  %v1032_v57 = vld [vmem:[#allocation2 + $0xa2] sm:$0xff] }
  0x97   : > { %8424 = vmatprep.mubr.msk.bf16.mxu0 %vm228_vm1, %v730_v58  ;;  %v1033_v58 = vld [vmem:[#allocation2 + $0xaa] sm:$0xff] }
  0x98   : > { %v1058_v60 = vpack.c.bf16 %v1033_v58, %v1032_v57  ;;  %v1683_v57 = vld [vmem:[#allocation2 + $0xab] sm:$0xff]  ;;  %v1684_v58 = vld [vmem:[#allocation2 + $0xb3] sm:$0xff] }
  0x9e   : > { %8425 = vmatmul.mubr.msk.bf16.gmra.mrb[16].mxu0 %vm228_vm1, %v731_v63  ;;  %v1036_v63 = vld [vmem:[#allocation2 + $0xc2] sm:$0xff] }
  0x9f   : > { %8428 = vmatprep.mubr.msk.bf16.mxu0 %vm228_vm1, %v732_v0  ;;  %v1037_v0 = vld [vmem:[#allocation2 + $0xca] sm:$0xff] }
  0xa0   : > { %v1060_v2 = vpack.c.bf16 %v1037_v0, %v1036_v63  ;;  %v1687_v63 = vld [vmem:[#allocation2 + $0xcb] sm:$0xff]  ;;  %v1688_v0 = vld [vmem:[#allocation2 + $0xd3] sm:$0xff] }
  0xa6   : > { %8429 = vmatmul.mubr.msk.bf16.gmra.mrb[20].mxu0 %vm228_vm1, %v733_v5  ;;  %v1040_v5 = vld [vmem:[#allocation2 + $0xe2] sm:$0xff] }
  0xa7   : > { %8432 = vmatprep.mubr.msk.bf16.mxu0 %vm228_vm1, %v734_v6  ;;  %v1041_v6 = vld [vmem:[#allocation2 + $0xea] sm:$0xff] }
  0xa8   : > { %v1062_v8 = vpack.c.bf16 %v1041_v6, %v1040_v5  ;;  %v1691_v5 = vld [vmem:[#allocation2 + $0xeb] sm:$0xff]  ;;  %v1692_v6 = vld [vmem:[#allocation2 + $0xf3] sm:$0xff] }
  0xae   : > { %8433 = vmatmul.mubr.msk.bf16.gmra.mrb[24].mxu0 %vm228_vm1, %v735_v11  ;;  %v1044_v11 = vld [vmem:[#allocation2 + $0x102] sm:$0xff] }
  0xaf   : > { %8436 = vmatprep.mubr.msk.bf16.mxu0 %vm228_vm1, %v736_v12  ;;  %v1045_v12 = vld [vmem:[#allocation2 + $0x10a] sm:$0xff] }
  0xb0   : > { %v1064_v14 = vpack.c.bf16 %v1045_v12, %v1044_v11  ;;  %v1695_v11 = vld [vmem:[#allocation2 + $0x10b] sm:$0xff]  ;;  %v1696_v12 = vld [vmem:[#allocation2 + $0x113] sm:$0xff] }
  0xb6   : > { %8437 = vmatmul.mubr.msk.bf16.gmra.mrb[28].mxu0 %vm228_vm1, %v737_v17  ;;  %v1065_v17 = vpack.c.bf16 %v1047_v16, %v1046_v15  ;;  %v1698_v16 = vld [vmem:[#allocation2 + $0x123] sm:$0xff] }
  0xb7   : > { %8440 = vmatprep.mubr.msk.bf16.mxu0 %vm228_vm1, %v738_v18  ;;  %v1775_v18 = vsel %vm469_vm0, %v9968_v36, 0 }
  0xbe   : > { %8441 = vmatmul.mubr.msk.bf16.gmra.mrb[32].mxu0 %vm228_vm1, %v739_v23  ;;  %v1373_v23 = vld [vmem:[#allocation2 + $0x12a] sm:$0x3f] }
  0xbf   : > { %8446 = vmatprep.mubr.msk.bf16.mxu0 %vm228_vm1, %v1048_v24  ;;  %v1664_v24 = vld [vmem:[#allocation2 + $0x13] sm:$0xff]  ;;  %v1391_v26 = vpack.c.bf16 %v1373_v23, %v1372_v22  ;;  %v1995_v23 = vld [vmem:[#allocation2 + $0x3c] sm:$0xff] }
  0xc0   : > { %v1700_v29 = vpack.c.bf16 %v1665_v25, %v1664_v24  ;;  %v1994_v22 = vld [vmem:[#allocation2 + $0x34] sm:$0xff]  ;;  %v2027_v24 = vpack.c.bf16 %v9867_v28, %v9865_v27  ;;  %v1996_v27 = vld [vmem:[#allocation2 + $0x44] sm:$0xff]  ;;  %v1997_v28 = vld [vmem:[#allocation2 + $0x4c] sm:$0xff] }
  0xc1   : > { %v10046_v25 = vld [vmem:[#allocation2 + $0x10e] sm:$0xff] }
  0xc2   : > { %350 = vst.msk [vmem:[#allocation2 + $0x132] sm:$0xff] %vm228_vm1, %v10046_v25 }
  0xc6   : > { %8447 = vmatmul.mubr.msk.bf16.vlgmr.msra.gmra.mrb[0].mxu0 %vm228_vm1, %v9953_v31 }
  0xc7   : > { %8483 = vmatpush3.bf16.msra.mxu0 %v1449_v35  ;;  %8450 = vmatprep.mubr.msk.bf16.mxu0 %vm228_vm1, %v9956_v33 }
  0xc8   : > { %9704 = vmatprep.subr.msk.bf16.mxu0 %vm469_vm0, %v9968_v36  ;;  %v2101_v36 = vsel %vm469_vm0, %v7715_v19, 0 }
  0xce   : > { %8451 = vmatmul.mubr.msk.bf16.gmra.mrb[4].mxu0 %vm228_vm1, %v1051_v42 }
  0xcf   : > { %8454 = vmatprep.mubr.msk.bf16.mxu0 %vm228_vm1, %v1052_v43 }
  0xd6   : > { %8455 = vmatmul.mubr.msk.bf16.gmra.mrb[8].mxu0 %vm228_vm1, %v1053_v41 }
  0xd7   : > { %8458 = vmatprep.mubr.msk.bf16.mxu0 %vm228_vm1, %v1054_v48 }
  0xde   : > { %8459 = vmatmul.mubr.msk.bf16.gmra.mrb[12].mxu0 %vm228_vm1, %v1055_v53 }
  0xdf   : > { %8462 = vmatprep.mubr.msk.bf16.mxu0 %vm228_vm1, %v1056_v54 }
  0xe6   : > { %8463 = vmatmul.mubr.msk.bf16.gmra.mrb[16].mxu0 %vm228_vm1, %v1057_v59 }
  0xe7   : > { %8466 = vmatprep.mubr.msk.bf16.mxu0 %vm228_vm1, %v1058_v60 }
  0xee   : > { %8467 = vmatmul.mubr.msk.bf16.gmra.mrb[20].mxu0 %vm228_vm1, %v1059_v1 }
  0xef   : > { %8470 = vmatprep.mubr.msk.bf16.mxu0 %vm228_vm1, %v1060_v2 }
  0xf6   : > { %8471 = vmatmul.mubr.msk.bf16.gmra.mrb[24].mxu0 %vm228_vm1, %v1061_v7 }
  0xf7   : > { %8474 = vmatprep.mubr.msk.bf16.mxu0 %vm228_vm1, %v1062_v8 }
  0xfe   : > { %8475 = vmatmul.mubr.msk.bf16.gmra.mrb[28].mxu0 %vm228_vm1, %v1063_v13 }
  0xff   : > { %8478 = vmatprep.mubr.msk.bf16.mxu0 %vm228_vm1, %v1064_v14 }
 0x106   : > { %8479 = vmatmul.mubr.msk.bf16.gmra.mrb[32].mxu0 %vm228_vm1, %v1065_v17  ;;  %v1699_v17 = vld [vmem:[#allocation2 + $0x12b] sm:$0x3f] }
 0x107   : > { %8484 = vmatprep.mubr.msk.bf16.mxu0 %vm228_vm1, %v9953_v31  ;;  %v1667_v31 = vld [vmem:[#allocation2 + $0x2b] sm:$0xff]  ;;  %v1717_v20 = vpack.c.bf16 %v1699_v17, %v1698_v16 }
 0x108   : > { %v1701_v34 = vpack.c.bf16 %v1667_v31, %v1666_v30  ;;  %v2427_v30 = vsel %vm469_vm0, %v10022_v37, 0  ;;  %v10061_v31 = vld [vmem:[%s11635_s1 + $0xe] sm:$0x3]  ;;  %v7772_v16 = vld [vmem:[%s11635_s1 + $0x10] sm:$0x3] }
 0x109   : > { %v2349_v17 = vld [vmem:[#allocation2 + $0x12c] sm:$0xff] }
 0x10e   : > { %8485 = vmatmul.mubr.msk.bf16.vlgmr.msra.gmra.mrb[0].mxu0 %vm228_vm1, %v9956_v33  ;;  %v1669_v33 = vld [vmem:[#allocation2 + $0x3b] sm:$0xff] }
 0x10f   : > { %8521 = vmatpush3.bf16.msra.mxu0 %v1775_v18  ;;  %8488 = vmatprep.mubr.msk.bf16.mxu0 %vm228_vm1, %v1051_v42  ;;  %v1702_v35 = vpack.c.bf16 %v1669_v33, %v1668_v32  ;;  %v1673_v42 = vld [vmem:[#allocation2 + $0x5b] sm:$0xff] }
 0x110   : > { %9705 = vmatprep.subr.msk.bf16.mxu0 %vm469_vm0, %v7715_v19  ;;  %v1704_v44 = vpack.c.bf16 %v1673_v42, %v1672_v40  ;;  %v1990_v18 = vld [vmem:[#allocation2 + $0x14] sm:$0xff]  ;;  %v1991_v19 = vld [vmem:[#allocation2 + $0x1c] sm:$0xff] }
 0x111   : > { %v1998_v32 = vld [vmem:[#allocation2 + $0x54] sm:$0xff]  ;;  %v1999_v33 = vld [vmem:[#allocation2 + $0x5c] sm:$0xff] }
 0x116   : > { %8489 = vmatmul.mubr.msk.bf16.gmra.mrb[4].mxu0 %vm228_vm1, %v1052_v43  ;;  %v1703_v43 = vpack.c.bf16 %v1671_v39, %v1670_v38  ;;  %v2002_v38 = vld [vmem:[#allocation2 + $0x74] sm:$0xff]  ;;  %v2003_v39 = vld [vmem:[#allocation2 + $0x7c] sm:$0xff] }
 0x117   : > { %8492 = vmatprep.mubr.msk.bf16.mxu0 %vm228_vm1, %v1053_v41  ;;  %v1677_v41 = vld [vmem:[#allocation2 + $0x7b] sm:$0xff]  ;;  %v2032_v42 = vpack.c.bf16 %v2003_v39, %v2002_v38 }
 0x118   : > { %v1706_v49 = vpack.c.bf16 %v1677_v41, %v1676_v47 }
 0x11e   : > { %8493 = vmatmul.mubr.msk.bf16.gmra.mrb[8].mxu0 %vm228_vm1, %v1054_v48  ;;  %v1705_v48 = vpack.c.bf16 %v1675_v46, %v1674_v45  ;;  %v2006_v45 = vld [vmem:[#allocation2 + $0x94] sm:$0xff]  ;;  %v2007_v46 = vld [vmem:[#allocation2 + $0x9c] sm:$0xff] }
 0x11f   : > { %8496 = vmatprep.mubr.msk.bf16.mxu0 %vm228_vm1, %v1055_v53  ;;  %v1681_v53 = vld [vmem:[#allocation2 + $0x9b] sm:$0xff]  ;;  %v2034_v41 = vpack.c.bf16 %v2007_v46, %v2006_v45 }
 0x120   : > { %v1708_v55 = vpack.c.bf16 %v1681_v53, %v1680_v52 }
 0x126   : > { %8497 = vmatmul.mubr.msk.bf16.gmra.mrb[12].mxu0 %vm228_vm1, %v1056_v54  ;;  %v1707_v54 = vpack.c.bf16 %v1679_v51, %v1678_v50  ;;  %v2010_v50 = vld [vmem:[#allocation2 + $0xb4] sm:$0xff]  ;;  %v2011_v51 = vld [vmem:[#allocation2 + $0xbc] sm:$0xff] }
 0x127   : > { %8500 = vmatprep.mubr.msk.bf16.mxu0 %vm228_vm1, %v1057_v59  ;;  %v1685_v59 = vld [vmem:[#allocation2 + $0xbb] sm:$0xff]  ;;  %v2036_v53 = vpack.c.bf16 %v2011_v51, %v2010_v50 }
 0x128   : > { %v1710_v61 = vpack.c.bf16 %v1685_v59, %v1684_v58 }
 0x12e   : > { %8501 = vmatmul.mubr.msk.bf16.gmra.mrb[16].mxu0 %vm228_vm1, %v1058_v60  ;;  %v1709_v60 = vpack.c.bf16 %v1683_v57, %v1682_v56  ;;  %v2014_v56 = vld [vmem:[#allocation2 + $0xd4] sm:$0xff]  ;;  %v2015_v57 = vld [vmem:[#allocation2 + $0xdc] sm:$0xff] }
 0x12f   : > { %8504 = vmatprep.mubr.msk.bf16.mxu0 %vm228_vm1, %v1059_v1  ;;  %v1689_v1 = vld [vmem:[#allocation2 + $0xdb] sm:$0xff]  ;;  %v2038_v59 = vpack.c.bf16 %v2015_v57, %v2014_v56 }
 0x130   : > { %v1712_v3 = vpack.c.bf16 %v1689_v1, %v1688_v0 }
 0x136   : > { %8505 = vmatmul.mubr.msk.bf16.gmra.mrb[20].mxu0 %vm228_vm1, %v1060_v2  ;;  %v1711_v2 = vpack.c.bf16 %v1687_v63, %v1686_v62  ;;  %v2018_v62 = vld [vmem:[#allocation2 + $0xf4] sm:$0xff]  ;;  %v2019_v63 = vld [vmem:[#allocation2 + $0xfc] sm:$0xff] }
 0x137   : > { %8508 = vmatprep.mubr.msk.bf16.mxu0 %vm228_vm1, %v1061_v7  ;;  %v1693_v7 = vld [vmem:[#allocation2 + $0xfb] sm:$0xff]  ;;  %v2040_v1 = vpack.c.bf16 %v2019_v63, %v2018_v62 }
 0x138   : > { %v1714_v9 = vpack.c.bf16 %v1693_v7, %v1692_v6 }
 0x13e   : > { %8509 = vmatmul.mubr.msk.bf16.gmra.mrb[24].mxu0 %vm228_vm1, %v1062_v8  ;;  %v1713_v8 = vpack.c.bf16 %v1691_v5, %v1690_v4  ;;  %v2022_v4 = vld [vmem:[#allocation2 + $0x114] sm:$0xff]  ;;  %v2023_v5 = vld [vmem:[#allocation2 + $0x11c] sm:$0xff] }
 0x13f   : > { %8512 = vmatprep.mubr.msk.bf16.mxu0 %vm228_vm1, %v1063_v13  ;;  %v1697_v13 = vld [vmem:[#allocation2 + $0x11b] sm:$0xff]  ;;  %v2042_v7 = vpack.c.bf16 %v2023_v5, %v2022_v4 }
 0x140   : > { %v1716_v15 = vpack.c.bf16 %v1697_v13, %v1696_v12 }
 0x146   : > { %8513 = vmatmul.mubr.msk.bf16.gmra.mrb[28].mxu0 %vm228_vm1, %v1064_v14  ;;  %v1715_v14 = vpack.c.bf16 %v1695_v11, %v1694_v10  ;;  %v2316_v10 = vld [vmem:[#allocation2 + $0x24] sm:$0xff]  ;;  %v2317_v11 = vld [vmem:[#allocation2 + $0x2c] sm:$0xff] }
 0x147   : > { %8516 = vmatprep.mubr.msk.bf16.mxu0 %vm228_vm1, %v1390_v21  ;;  %v2026_v21 = vpack.c.bf16 %v1991_v19, %v1990_v18  ;;  %v2352_v13 = vpack.c.bf16 %v2317_v11, %v2316_v10 }
 0x14e   : > { %8517 = vmatmul.mubr.msk.bf16.gmra.mrb[32].mxu0 %vm228_vm1, %v1391_v26  ;;  %v10048_v26 = vpack.c.bf16 %v1995_v23, %v1994_v22  ;;  %v2643_v22 = vld [vmem:[#allocation2 + $0x2d] sm:$0xff] }
 0x14f   : > { %8522 = vmatprep.mubr.msk.bf16.mxu0 %vm228_vm1, %v1700_v29  ;;  %v10052_v29 = vld [vmem:[#allocation2 + $0x116] sm:$0xff] }
 0x150   : > { %351 = vst.msk [vmem:[#allocation2 + $0x13a] sm:$0xff] %vm228_vm1, %v10052_v29 }
 0x156   : > { %8523 = vmatmul.mubr.msk.bf16.vlgmr.msra.gmra.mrb[0].mxu0 %vm228_vm1, %v1701_v34  ;;  %v10068_v34 = vpack.c.bf16 %v1997_v28, %v1996_v27  ;;  %v2647_v27 = vld [vmem:[#allocation2 + $0x4d] sm:$0xff] }
 0x157   : > { %8559 = vmatpush3.bf16.msra.mxu0 %v2101_v36  ;;  %8526 = vmatprep.mubr.msk.bf16.mxu0 %vm228_vm1, %v1702_v35  ;;  %v10070_v35 = vpack.c.bf16 %v1999_v33, %v1998_v32  ;;  %v2000_v36 = vld [vmem:[#allocation2 + $0x64] sm:$0xff]  ;;  %v2350_v19 = vld [vmem:[#allocation2 + $0x134] sm:$0xff]  ;;  %v3079_v33 = vsel %vm469_vm0, %v7772_v16, 0 }
 0x158   : > { %9706 = vmatprep.subr.msk.bf16.mxu0 %vm469_vm0, %v10022_v37  ;;  %v2001_v37 = vld [vmem:[#allocation2 + $0x6c] sm:$0xff] }
 0x159   : > { %v2031_v40 = vpack.c.bf16 %v2001_v37, %v2000_v36  ;;  %v2650_v36 = vld [vmem:[#allocation2 + $0x65] sm:$0xff]  ;;  %v2651_v37 = vld [vmem:[#allocation2 + $0x6d] sm:$0xff] }
 0x15a   : > { %v2682_v39 = vpack.c.bf16 %v2651_v37, %v2650_v36 }
 0x15e   : > { %8527 = vmatmul.mubr.msk.bf16.gmra.mrb[4].mxu0 %vm228_vm1, %v1703_v43  ;;  %v2004_v43 = vld [vmem:[#allocation2 + $0x84] sm:$0xff] }
 0x15f   : > { %8530 = vmatprep.mubr.msk.bf16.mxu0 %vm228_vm1, %v1704_v44  ;;  %v2005_v44 = vld [vmem:[#allocation2 + $0x8c] sm:$0xff] }
 0x160   : > { %v2033_v47 = vpack.c.bf16 %v2005_v44, %v2004_v43  ;;  %v2654_v43 = vld [vmem:[#allocation2 + $0x85] sm:$0xff]  ;;  %v2655_v44 = vld [vmem:[#allocation2 + $0x8d] sm:$0xff] }
 0x161   : > { %v2684_v46 = vpack.c.bf16 %v2655_v44, %v2654_v43 }
 0x166   : > { %8531 = vmatmul.mubr.msk.bf16.gmra.mrb[8].mxu0 %vm228_vm1, %v1705_v48  ;;  %v2008_v48 = vld [vmem:[#allocation2 + $0xa4] sm:$0xff] }
 0x167   : > { %8534 = vmatprep.mubr.msk.bf16.mxu0 %vm228_vm1, %v1706_v49  ;;  %v2009_v49 = vld [vmem:[#allocation2 + $0xac] sm:$0xff] }
 0x168   : > { %v2035_v52 = vpack.c.bf16 %v2009_v49, %v2008_v48  ;;  %v2658_v48 = vld [vmem:[#allocation2 + $0xa5] sm:$0xff]  ;;  %v2659_v49 = vld [vmem:[#allocation2 + $0xad] sm:$0xff] }
 0x169   : > { %v2686_v51 = vpack.c.bf16 %v2659_v49, %v2658_v48 }
 0x16e   : > { %8535 = vmatmul.mubr.msk.bf16.gmra.mrb[12].mxu0 %vm228_vm1, %v1707_v54  ;;  %v2012_v54 = vld [vmem:[#allocation2 + $0xc4] sm:$0xff] }
 0x16f   : > { %8538 = vmatprep.mubr.msk.bf16.mxu0 %vm228_vm1, %v1708_v55  ;;  %v2013_v55 = vld [vmem:[#allocation2 + $0xcc] sm:$0xff] }
 0x170   : > { %v2037_v58 = vpack.c.bf16 %v2013_v55, %v2012_v54  ;;  %v2662_v54 = vld [vmem:[#allocation2 + $0xc5] sm:$0xff]  ;;  %v2663_v55 = vld [vmem:[#allocation2 + $0xcd] sm:$0xff] }
 0x171   : > { %v2688_v57 = vpack.c.bf16 %v2663_v55, %v2662_v54 }
 0x176   : > { %8539 = vmatmul.mubr.msk.bf16.gmra.mrb[16].mxu0 %vm228_vm1, %v1709_v60  ;;  %v2016_v60 = vld [vmem:[#allocation2 + $0xe4] sm:$0xff] }
 0x177   : > { %8542 = vmatprep.mubr.msk.bf16.mxu0 %vm228_vm1, %v1710_v61  ;;  %v2017_v61 = vld [vmem:[#allocation2 + $0xec] sm:$0xff] }
 0x178   : > { %v2039_v0 = vpack.c.bf16 %v2017_v61, %v2016_v60  ;;  %v2666_v60 = vld [vmem:[#allocation2 + $0xe5] sm:$0xff]  ;;  %v2667_v61 = vld [vmem:[#allocation2 + $0xed] sm:$0xff] }
 0x179   : > { %v2690_v63 = vpack.c.bf16 %v2667_v61, %v2666_v60  ;;  %v2999_v61 = vld [vmem:[#allocation2 + $0x11e] sm:$0xff] }
 0x17e   : > { %8543 = vmatmul.mubr.msk.bf16.gmra.mrb[20].mxu0 %vm228_vm1, %v1711_v2  ;;  %v2020_v2 = vld [vmem:[#allocation2 + $0x104] sm:$0xff] }
 0x17f   : > { %8546 = vmatprep.mubr.msk.bf16.mxu0 %vm228_vm1, %v1712_v3  ;;  %v2021_v3 = vld [vmem:[#allocation2 + $0x10c] sm:$0xff] }
 0x180   : > { %v2041_v6 = vpack.c.bf16 %v2021_v3, %v2020_v2  ;;  %v2670_v2 = vld [vmem:[#allocation2 + $0x105] sm:$0xff]  ;;  %v2671_v3 = vld [vmem:[#allocation2 + $0x10d] sm:$0xff] }
 0x181   : > { %v2692_v5 = vpack.c.bf16 %v2671_v3, %v2670_v2  ;;  %v3002_v2 = vld [vmem:[#allocation2 + $0x136] sm:$0xff] }
 0x186   : > { %8547 = vmatmul.mubr.msk.bf16.gmra.mrb[24].mxu0 %vm228_vm1, %v1713_v8  ;;  %v2024_v8 = vld [vmem:[#allocation2 + $0x124] sm:$0xff] }
 0x187   : > { %8550 = vmatprep.mubr.msk.bf16.mxu0 %vm228_vm1, %v1714_v9  ;;  %v2025_v9 = vld [vmem:[#allocation2 + $0x12c] sm:$0x3f]  ;;  %v2368_v18 = vpack.c.bf16 %v2349_v17, %v2024_v8 }
 0x188   : > { %v2043_v12 = vpack.c.bf16 %v2025_v9, %v2024_v8  ;;  %v2674_v8 = vld [vmem:[#allocation2 + $0x125] sm:$0xff]  ;;  %v2675_v9 = vld [vmem:[#allocation2 + $0x12d] sm:$0xff] }
 0x189   : > { %v2694_v11 = vpack.c.bf16 %v2675_v9, %v2674_v8 }
 0x18e   : > { %8551 = vmatmul.mubr.msk.bf16.gmra.mrb[28].mxu0 %vm228_vm1, %v1715_v14  ;;  %v349_v14 = vld [vmem:[#allocation2 + $0x11e] sm:$0x3] }
 0x18f   : > { %8554 = vmatprep.mubr.msk.bf16.mxu0 %vm228_vm1, %v1716_v15  ;;  %v2753_v15 = vsel %vm469_vm0, %v10061_v31, 0  ;;  %352 = vst.msk [vmem:[#allocation2 + $0x142] sm:$0x3] %vm345_vm4, %v349_v14  ;;  %v2968_v14 = vld [vmem:[#allocation2 + $0x26] sm:$0xff] }
 0x196   : > { %8555 = vmatmul.mubr.msk.bf16.gmra.mrb[32].mxu0 %vm228_vm1, %v1717_v20  ;;  %v2351_v20 = vld [vmem:[#allocation2 + $0x13c] sm:$0x3f] }
 0x197   : > { %8560 = vmatprep.mubr.msk.bf16.mxu0 %vm228_vm1, %v2026_v21  ;;  %v2642_v21 = vld [vmem:[#allocation2 + $0x25] sm:$0xff]  ;;  %v2369_v23 = vpack.c.bf16 %v2351_v20, %v2350_v19  ;;  %v3003_v3 = vld [vmem:[#allocation2 + $0x13e] sm:$0x3f] }
 0x198   : > { %v2971_v19 = vld [vmem:[#allocation2 + $0x3e] sm:$0xff]  ;;  %v2972_v20 = vld [vmem:[#allocation2 + $0x46] sm:$0xff] }
 0x19e   : > { %8561 = vmatmul.mubr.msk.bf16.vlgmr.msra.gmra.mrb[0].mxu0 %vm228_vm1, %v2027_v24  ;;  %v2678_v24 = vpack.c.bf16 %v2643_v22, %v2642_v21  ;;  %v2973_v21 = vld [vmem:[#allocation2 + $0x4e] sm:$0xff] }
 0x19f   : > { %8597 = vmatpush3.bf16.msra.mxu0 %v2427_v30  ;;  %8564 = vmatprep.mubr.msk.bf16.mxu0 %vm228_vm1, %v10048_v26  ;;  %v2645_v30 = vld [vmem:[#allocation2 + $0x3d] sm:$0xff] }
 0x1a0   : > { %9707 = vmatprep.subr.msk.bf16.mxu0 %vm469_vm0, %v10061_v31  ;;  %v2646_v31 = vld [vmem:[#allocation2 + $0x45] sm:$0xff] }
 0x1a1   : > { %v2680_v32 = vpack.c.bf16 %v2647_v27, %v2646_v31  ;;  %v2977_v31 = vld [vmem:[#allocation2 + $0x6e] sm:$0xff] }
 0x1a6   : > { %8565 = vmatmul.mubr.msk.bf16.gmra.mrb[4].mxu0 %vm228_vm1, %v10068_v34 }
 0x1a7   : > { %8568 = vmatprep.mubr.msk.bf16.mxu0 %vm228_vm1, %v10070_v35 }
 0x1ae   : > { %8569 = vmatmul.mubr.msk.bf16.gmra.mrb[8].mxu0 %vm228_vm1, %v2031_v40 }
 0x1af   : > { %8572 = vmatprep.mubr.msk.bf16.mxu0 %vm228_vm1, %v2032_v42 }
 0x1b6   : > { %8573 = vmatmul.mubr.msk.bf16.gmra.mrb[12].mxu0 %vm228_vm1, %v2033_v47 }
 0x1b7   : > { %8576 = vmatprep.mubr.msk.bf16.mxu0 %vm228_vm1, %v2034_v41 }
 0x1be   : > { %8577 = vmatmul.mubr.msk.bf16.gmra.mrb[16].mxu0 %vm228_vm1, %v2035_v52 }
 0x1bf   : > { %8580 = vmatprep.mubr.msk.bf16.mxu0 %vm228_vm1, %v2036_v53 }
 0x1c6   : > { %8581 = vmatmul.mubr.msk.bf16.gmra.mrb[20].mxu0 %vm228_vm1, %v2037_v58 }
 0x1c7   : > { %8584 = vmatprep.mubr.msk.bf16.mxu0 %vm228_vm1, %v2038_v59 }
 0x1ce   : > { %8585 = vmatmul.mubr.msk.bf16.gmra.mrb[24].mxu0 %vm228_vm1, %v2039_v0 }
 0x1cf   : > { %8588 = vmatprep.mubr.msk.bf16.mxu0 %vm228_vm1, %v2040_v1 }
 0x1d6   : > { %8589 = vmatmul.mubr.msk.bf16.gmra.mrb[28].mxu0 %vm228_vm1, %v2041_v6 }
 0x1d7   : > { %8592 = vmatprep.mubr.msk.bf16.mxu0 %vm228_vm1, %v2042_v7 }
 0x1de   : > { %8593 = vmatmul.mubr.msk.bf16.gmra.mrb[32].mxu0 %vm228_vm1, %v2043_v12  ;;  %v2676_v12 = vld [vmem:[#allocation2 + $0x135] sm:$0xff] }
 0x1df   : > { %8598 = vmatprep.mubr.msk.bf16.mxu0 %vm228_vm1, %v2352_v13  ;;  %v2677_v13 = vld [vmem:[#allocation2 + $0x13d] sm:$0x3f] }
 0x1e6   : > { %8599 = vmatmul.mubr.msk.bf16.vlgmr.msra.gmra.mrb[0].mxu0 %vm228_vm1, %v10048_v26  ;;  %v2644_v26 = vld [vmem:[#allocation2 + $0x35] sm:$0xff] }
 0x1e7   : > { %8635 = vmatpush3.bf16.msra.mxu0 %v2753_v15  ;;  %8602 = vmatprep.mubr.msk.bf16.mxu0 %vm228_vm1, %v10068_v34  ;;  %v2679_v28 = vpack.c.bf16 %v2645_v30, %v2644_v26  ;;  %v2648_v34 = vld [vmem:[#allocation2 + $0x55] sm:$0xff]  ;;  %v2975_v26 = vld [vmem:[#allocation2 + $0x5e] sm:$0xff]  ;;  %v2976_v30 = vld [vmem:[#allocation2 + $0x66] sm:$0xff] }
 0x1e8   : > { %9708 = vmatprep.subr.msk.bf16.mxu0 %vm469_vm0, %v7772_v16  ;;  %v2969_v15 = vld [vmem:[#allocation2 + $0x2e] sm:$0xff]  ;;  %v2695_v16 = vpack.c.bf16 %v2677_v13, %v2676_v12 }
 0x1e9   : > { %v3004_v17 = vpack.c.bf16 %v2969_v15, %v2968_v14 }
 0x1ee   : > { %8603 = vmatmul.mubr.msk.bf16.gmra.mrb[4].mxu0 %vm228_vm1, %v10070_v35  ;;  %v2649_v35 = vld [vmem:[#allocation2 + $0x5d] sm:$0xff] }
 0x1ef   : > { %8606 = vmatprep.mubr.msk.bf16.mxu0 %vm228_vm1, %v2031_v40  ;;  %v2681_v38 = vpack.c.bf16 %v2649_v35, %v2648_v34  ;;  %v2652_v40 = vld [vmem:[#allocation2 + $0x75] sm:$0xff]  ;;  %v2980_v34 = vld [vmem:[#allocation2 + $0x86] sm:$0xff] }
 0x1f0   : > { %v2981_v35 = vld [vmem:[#allocation2 + $0x8e] sm:$0xff] }
 0x1f1   : > { %v3010_v37 = vpack.c.bf16 %v2981_v35, %v2980_v34 }
 0x1f6   : > { %8607 = vmatmul.mubr.msk.bf16.gmra.mrb[8].mxu0 %vm228_vm1, %v2032_v42  ;;  %v2653_v42 = vld [vmem:[#allocation2 + $0x7d] sm:$0xff] }
 0x1f7   : > { %8610 = vmatprep.mubr.msk.bf16.mxu0 %vm228_vm1, %v2033_v47  ;;  %v2683_v45 = vpack.c.bf16 %v2653_v42, %v2652_v40  ;;  %v2656_v47 = vld [vmem:[#allocation2 + $0x95] sm:$0xff]  ;;  %v2984_v40 = vld [vmem:[#allocation2 + $0xa6] sm:$0xff] }
 0x1f8   : > { %v2985_v42 = vld [vmem:[#allocation2 + $0xae] sm:$0xff] }
 0x1f9   : > { %v3012_v44 = vpack.c.bf16 %v2985_v42, %v2984_v40 }
 0x1fe   : > { %8611 = vmatmul.mubr.msk.bf16.gmra.mrb[12].mxu0 %vm228_vm1, %v2034_v41  ;;  %v2657_v41 = vld [vmem:[#allocation2 + $0x9d] sm:$0xff] }
 0x1ff   : > { %8614 = vmatprep.mubr.msk.bf16.mxu0 %vm228_vm1, %v2035_v52  ;;  %v2685_v50 = vpack.c.bf16 %v2657_v41, %v2656_v47  ;;  %v2660_v52 = vld [vmem:[#allocation2 + $0xb5] sm:$0xff]  ;;  %v2988_v47 = vld [vmem:[#allocation2 + $0xc6] sm:$0xff] }
 0x200   : > { %v2989_v41 = vld [vmem:[#allocation2 + $0xce] sm:$0xff] }
 0x201   : > { %v3014_v49 = vpack.c.bf16 %v2989_v41, %v2988_v47 }
 0x206   : > { %8615 = vmatmul.mubr.msk.bf16.gmra.mrb[16].mxu0 %vm228_vm1, %v2036_v53  ;;  %v2661_v53 = vld [vmem:[#allocation2 + $0xbd] sm:$0xff] }
 0x207   : > { %8618 = vmatprep.mubr.msk.bf16.mxu0 %vm228_vm1, %v2037_v58  ;;  %v2687_v56 = vpack.c.bf16 %v2661_v53, %v2660_v52  ;;  %v2664_v58 = vld [vmem:[#allocation2 + $0xd5] sm:$0xff]  ;;  %v2992_v52 = vld [vmem:[#allocation2 + $0xe6] sm:$0xff] }
 0x208   : > { %v2993_v53 = vld [vmem:[#allocation2 + $0xee] sm:$0xff] }
 0x209   : > { %v3016_v55 = vpack.c.bf16 %v2993_v53, %v2992_v52 }
 0x20e   : > { %8619 = vmatmul.mubr.msk.bf16.gmra.mrb[20].mxu0 %vm228_vm1, %v2038_v59  ;;  %v2665_v59 = vld [vmem:[#allocation2 + $0xdd] sm:$0xff] }
 0x20f   : > { %8622 = vmatprep.mubr.msk.bf16.mxu0 %vm228_vm1, %v2039_v0  ;;  %v2689_v62 = vpack.c.bf16 %v2665_v59, %v2664_v58  ;;  %v2668_v0 = vld [vmem:[#allocation2 + $0xf5] sm:$0xff]  ;;  %v2996_v58 = vld [vmem:[#allocation2 + $0x106] sm:$0xff] }
 0x210   : > { %v3018_v60 = vpack.c.bf16 %v10046_v25, %v2996_v58  ;;  %v10159_v25 = vld [vmem:[%s11636_s2] ss:$0 sm:$0xff] }
 0x216   : > { %8623 = vmatmul.mubr.msk.bf16.gmra.mrb[24].mxu0 %vm228_vm1, %v2040_v1  ;;  %v2669_v1 = vld [vmem:[#allocation2 + $0xfd] sm:$0xff] }
 0x217   : > { %8626 = vmatprep.mubr.msk.bf16.mxu0 %vm228_vm1, %v2041_v6  ;;  %v2691_v4 = vpack.c.bf16 %v2669_v1, %v2668_v0  ;;  %v2672_v6 = vld [vmem:[#allocation2 + $0x115] sm:$0xff]  ;;  %v3019_v0 = vpack.c.bf16 %v2999_v61, %v10052_v29 }
 0x21e   : > { %8627 = vmatmul.mubr.msk.bf16.gmra.mrb[28].mxu0 %vm228_vm1, %v2042_v7  ;;  %v2673_v7 = vld [vmem:[#allocation2 + $0x11d] sm:$0xff] }
 0x21f   : > { %8630 = vmatprep.mubr.msk.bf16.mxu0 %vm228_vm1, %v2368_v18  ;;  %v2693_v10 = vpack.c.bf16 %v2673_v7, %v2672_v6  ;;  %v2970_v18 = vld [vmem:[#allocation2 + $0x36] sm:$0xff] }
 0x220   : > { %v3005_v22 = vpack.c.bf16 %v2971_v19, %v2970_v18 }
 0x226   : > { %8631 = vmatmul.mubr.msk.bf16.gmra.mrb[32].mxu0 %vm228_vm1, %v2369_v23  ;;  %v3006_v23 = vpack.c.bf16 %v2973_v21, %v2972_v20 }
 0x227   : > { %8636 = vmatprep.mubr.msk.bf16.mxu0 %vm228_vm1, %v2678_v24  ;;  %v2974_v24 = vld [vmem:[#allocation2 + $0x56] sm:$0xff] }
 0x228   : > { %v3007_v27 = vpack.c.bf16 %v2975_v26, %v2974_v24 }
 0x22e   : > { %8637 = vmatmul.mubr.msk.bf16.vlgmr.msra.gmra.mrb[0].mxu0 %vm228_vm1, %v2679_v28  ;;  %v3008_v28 = vpack.c.bf16 %v2977_v31, %v2976_v30 }
 0x22f   : > { %8673 = vmatpush3.bf16.msra.mxu0 %v3079_v33  ;;  %8640 = vmatprep.mubr.msk.bf16.mxu0 %vm228_vm1, %v2680_v32  ;;  %v2978_v32 = vld [vmem:[#allocation2 + $0x76] sm:$0xff]  ;;  %v2979_v33 = vld [vmem:[#allocation2 + $0x7e] sm:$0xff] }
 0x230   : > { %v3009_v36 = vpack.c.bf16 %v2979_v33, %v2978_v32 }
 0x236   : > { %8641 = vmatmul.mubr.msk.bf16.gmra.mrb[4].mxu0 %vm228_vm1, %v2681_v38  ;;  %v2982_v38 = vld [vmem:[#allocation2 + $0x96] sm:$0xff] }
 0x237   : > { %8644 = vmatprep.mubr.msk.bf16.mxu0 %vm228_vm1, %v2682_v39  ;;  %v2983_v39 = vld [vmem:[#allocation2 + $0x9e] sm:$0xff] }
 0x238   : > { %v3011_v43 = vpack.c.bf16 %v2983_v39, %v2982_v38 }
 0x23e   : > { %8645 = vmatmul.mubr.msk.bf16.gmra.mrb[8].mxu0 %vm228_vm1, %v2683_v45  ;;  %v2986_v45 = vld [vmem:[#allocation2 + $0xb6] sm:$0xff] }
 0x23f   : > { %8648 = vmatprep.mubr.msk.bf16.mxu0 %vm228_vm1, %v2684_v46  ;;  %v2987_v46 = vld [vmem:[#allocation2 + $0xbe] sm:$0xff] }
 0x240   : > { %v3013_v48 = vpack.c.bf16 %v2987_v46, %v2986_v45 }
 0x246   : > { %8649 = vmatmul.mubr.msk.bf16.gmra.mrb[12].mxu0 %vm228_vm1, %v2685_v50  ;;  %v2990_v50 = vld [vmem:[#allocation2 + $0xd6] sm:$0xff] }
 0x247   : > { %8652 = vmatprep.mubr.msk.bf16.mxu0 %vm228_vm1, %v2686_v51  ;;  %v2991_v51 = vld [vmem:[#allocation2 + $0xde] sm:$0xff] }
 0x248   : > { %v3015_v54 = vpack.c.bf16 %v2991_v51, %v2990_v50 }
 0x24e   : > { %8653 = vmatmul.mubr.msk.bf16.gmra.mrb[16].mxu0 %vm228_vm1, %v2687_v56  ;;  %v2994_v56 = vld [vmem:[#allocation2 + $0xf6] sm:$0xff] }
 0x24f   : > { %8656 = vmatprep.mubr.msk.bf16.mxu0 %vm228_vm1, %v2688_v57  ;;  %v2995_v57 = vld [vmem:[#allocation2 + $0xfe] sm:$0xff] }
 0x250   : > { %v3017_v59 = vpack.c.bf16 %v2995_v57, %v2994_v56 }
 0x256   : > { %8657 = vmatmul.mubr.msk.bf16.gmra.mrb[20].mxu0 %vm228_vm1, %v2689_v62  ;;  %v3000_v62 = vld [vmem:[#allocation2 + $0x126] sm:$0xff] }
 0x257   : > { %8660 = vmatprep.mubr.msk.bf16.mxu0 %vm228_vm1, %v2690_v63  ;;  %v3001_v63 = vld [vmem:[#allocation2 + $0x12e] sm:$0xff] }
 0x258   : > { %v3020_v1 = vpack.c.bf16 %v3001_v63, %v3000_v62 }
 0x25e   : > { %8661 = vmatmul.mubr.msk.bf16.gmra.mrb[24].mxu0 %vm228_vm1, %v2691_v4  ;;  %v3021_v4 = vpack.c.bf16 %v3003_v3, %v3002_v2 }
 0x25f   : > { %8664 = vmatprep.mubr.msk.bf16.mxu0 %vm228_vm1, %v2692_v5 }
 0x266   : > { %8665 = vmatmul.mubr.msk.bf16.gmra.mrb[28].mxu0 %vm228_vm1, %v2693_v10 }
 0x267   : > { %8668 = vmatprep.mubr.msk.bf16.mxu0 %vm228_vm1, %v2694_v11 }
 0x26e   : > { %8669 = vmatmul.mubr.msk.bf16.gmra.mrb[32].mxu0 %vm228_vm1, %v2695_v16 }
 0x26f   : > { %8674 = vmatprep.mubr.msk.bf16.mxu0 %vm228_vm1, %v3004_v17 }
 0x276   : > { %8675 = vmatmul.mubr.msk.bf16.vlgmr.msra.gmra.mrb[0].mxu0 %vm228_vm1, %v3005_v22 }
 0x277   : > { %8678 = vmatprep.mubr.msk.bf16.mxu0 %vm228_vm1, %v3006_v23 }
 0x27e   : > { %8679 = vmatmul.mubr.msk.bf16.gmra.mrb[4].mxu0 %vm228_vm1, %v3007_v27 }
 0x27f   : > { %8682 = vmatprep.mubr.msk.bf16.mxu0 %vm228_vm1, %v3008_v28 }
 0x286   : > { %8683 = vmatmul.mubr.msk.bf16.gmra.mrb[8].mxu0 %vm228_vm1, %v3009_v36 }
 0x287   : > { %8686 = vmatprep.mubr.msk.bf16.mxu0 %vm228_vm1, %v3010_v37 }
 0x28e   : > { %8687 = vmatmul.mubr.msk.bf16.gmra.mrb[12].mxu0 %vm228_vm1, %v3011_v43 }
 0x28f   : > { %8690 = vmatprep.mubr.msk.bf16.mxu0 %vm228_vm1, %v3012_v44 }
 0x296   : > { %8691 = vmatmul.mubr.msk.bf16.gmra.mrb[16].mxu0 %vm228_vm1, %v3013_v48 }
 0x297   : > { %8694 = vmatprep.mubr.msk.bf16.mxu0 %vm228_vm1, %v3014_v49 }
 0x29e   : > { %8695 = vmatmul.mubr.msk.bf16.gmra.mrb[20].mxu0 %vm228_vm1, %v3015_v54 }
 0x29f   : > { %8698 = vmatprep.mubr.msk.bf16.mxu0 %vm228_vm1, %v3016_v55 }
 0x2a6   : > { %8699 = vmatmul.mubr.msk.bf16.gmra.mrb[24].mxu0 %vm228_vm1, %v3017_v59 }
 0x2a7   : > { %8702 = vmatprep.mubr.msk.bf16.mxu0 %vm228_vm1, %v3018_v60 }
 0x2ae   : > { %8703 = vmatmul.mubr.msk.bf16.gmra.mrb[28].mxu0 %vm228_vm1, %v3019_v0 }
 0x2af   : > { %8706 = vmatprep.mubr.msk.bf16.mxu0 %vm228_vm1, %v3020_v1 }
 0x2b6   : > { %8707 = vmatmul.mubr.msk.bf16.gmra.mrb[32].mxu0 %vm228_vm1, %v3021_v4 }
 0x349   : > { %v8676_v5 = vpop.f32.mrb[0].mxu0 }
 0x34a   : > { %v9052_v6 = vadd.f32 %v8676_v5, %v10159_v25  ;;  %v3115_v7 = vpop.f32.mrb[1].mxu0 }
 0x34b   : > { %v9053_v29 = vadd.f32 %v10159_v25, %v3115_v7  ;;  %v8677_v8 = vpop.f32.mrb[2].mxu0 }
 0x34c   : > { %3296 = vst.msk [vmem:[#allocation3 + $0x10] sm:$0xff] %vm228_vm1, %v9052_v6  ;;  %v9054_v9 = vadd.f32 %v8677_v8, %v10159_v25  ;;  %v3118_v10 = vpop.f32.mrb[3].mxu0 }
 0x34d   : > { %3294 = vst.msk [vmem:[#allocation3] sm:$0xff] %vm228_vm1, %v9053_v29  ;;  %v9055_v11 = vadd.f32 %v10159_v25, %v3118_v10 }
 0x34e   : > { %3297 = vst.msk [vmem:[#allocation3 + $0x18] sm:$0xff] %vm228_vm1, %v9054_v9 }
 0x34f   : > { %3295 = vst.msk [vmem:[#allocation3 + $0x8] sm:$0xff] %vm228_vm1, %v9055_v11 }
 0x351   : > { %v8680_v12 = vpop.f32.mrb[4].mxu0 }
 0x352   : > { %v9056_v13 = vadd.f32 %v8680_v12, %v10159_v25  ;;  %v3131_v14 = vpop.f32.mrb[5].mxu0 }
 0x353   : > { %v9057_v15 = vadd.f32 %v10159_v25, %v3131_v14  ;;  %v8681_v16 = vpop.f32.mrb[6].mxu0 }
 0x354   : > { %v10171_v17 = vld [vmem:[#allocation3] sm:$0xff]  ;;  %3300 = vst.msk [vmem:[#allocation3 + $0x30] sm:$0xff] %vm228_vm1, %v9056_v13  ;;  %v9058_v18 = vadd.f32 %v8681_v16, %v10159_v25  ;;  %v3134_v19 = vpop.f32.mrb[7].mxu0 }
 0x355   : > { %3298 = vst.msk [vmem:[#allocation3 + $0x20] sm:$0xff] %vm228_vm1, %v9057_v15  ;;  %v9059_v20 = vadd.f32 %v10159_v25, %v3134_v19  ;;  %v3333_v22 = vsel %vm228_vm1, %v10171_v17, 0.0  ;;  %v3343_v26 = vmul.f32 %v10171_v17, %v10171_v17  ;;  %v10189_v30 = vld [vmem:[#allocation3 + $0x12] sm:$0xff] }
 0x356   : > { %v10177_v21 = vld [vmem:[#allocation3 + $0x8] sm:$0xff]  ;;  %3301 = vst.msk [vmem:[#allocation3 + $0x38] sm:$0xff] %vm228_vm1, %v9058_v18  ;;  %v3367_v34 = vmul.f32 %v10189_v30, %v10189_v30  ;;  %v3357_v38 = vsel %vm228_vm1, %v10189_v30, 0.0 }
 0x357   : > { %v3334_v23 = vsel %vm228_vm1, %v10177_v21, 0.0  ;;  %v3344_v24 = vmul.f32 %v10177_v21, %v10177_v21  ;;  %3299 = vst.msk [vmem:[#allocation3 + $0x28] sm:$0xff] %vm228_vm1, %v9059_v20  ;;  %v3345_v37 = vsel %vm228_vm1, %v3343_v26, 0.0 }
 0x358   : > { %v3335_v31 = vadd.f32 %v3334_v23, %v3333_v22  ;;  %v3369_v50 = vsel %vm228_vm1, %v3367_v34, 0.0  ;;  %v10246_v22 = vld [vmem:[%s11637_s3] sm:$0x3] }
 0x359   : > { %v8684_v27 = vpop.f32.mrb[8].mxu0  ;;  %v3346_v28 = vsel %vm228_vm1, %v3344_v24, 0.0  ;;  %9709 = vmatprep.subr.msk.bf16.mxu1 %vm469_vm0, %v10246_v22 }
 0x35a   : > { %v9060_v32 = vadd.f32 %v8684_v27, %v10159_v25  ;;  %v3147_v33 = vpop.f32.mrb[9].mxu0  ;;  %v3336_v39 = vrot.slane %v3335_v31, 4  ;;  %v3347_v44 = vadd.f32 %v3346_v28, %v3345_v37 }
 0x35b   : > { %v9061_v35 = vadd.f32 %v10159_v25, %v3147_v33  ;;  %v8685_v36 = vpop.f32.mrb[10].mxu0 }
 0x35c   : > { %v10199_v40 = vld [vmem:[#allocation3 + $0x1a] sm:$0xff]  ;;  %3304 = vst.msk [vmem:[#allocation3 + $0x50] sm:$0xff] %vm228_vm1, %v9060_v32  ;;  %v9062_v42 = vadd.f32 %v8685_v36, %v10159_v25  ;;  %v3150_v43 = vpop.f32.mrb[11].mxu0  ;;  %v3337_v54 = vadd.f32 %v3336_v39, %v3335_v31  ;;  %v3348_v57 = vrot.slane %v3347_v44, 4 }
 0x35d   : > { %v3358_v45 = vsel %vm228_vm1, %v10199_v40, 0.0  ;;  %v3368_v46 = vmul.f32 %v10199_v40, %v10199_v40  ;;  %3302 = vst.msk [vmem:[#allocation3 + $0x40] sm:$0xff] %vm228_vm1, %v9061_v35  ;;  %v9063_v47 = vadd.f32 %v10159_v25, %v3150_v43  ;;  %v10225_v1 = vld [vmem:[#allocation3 + $0x36] sm:$0xff] }
 0x35e   : > { %v3359_v41 = vadd.f32 %v3358_v45, %v3357_v38  ;;  %v10209_v48 = vld [vmem:[#allocation3 + $0x24] sm:$0xff]  ;;  %v10211_v49 = vld [vmem:[#allocation3 + $0x2c] sm:$0xff]  ;;  %3305 = vst.msk [vmem:[#allocation3 + $0x58] sm:$0xff] %vm228_vm1, %v9062_v42  ;;  %v3338_v7 = vrot.slane %v3337_v54, 2  ;;  %v3349_v11 = vadd.f32 %v3348_v57, %v3347_v44  ;;  %v3405_v16 = vsel %vm228_vm1, %v10225_v1, 0.0 }
 0x35f   : > { %v3370_v51 = vsel %vm228_vm1, %v3368_v46, 0.0  ;;  %v3381_v52 = vsel %vm228_vm1, %v10209_v48, 0.0  ;;  %v3382_v53 = vsel %vm228_vm1, %v10211_v49, 0.0  ;;  %3303 = vst.msk [vmem:[#allocation3 + $0x48] sm:$0xff] %vm228_vm1, %v9063_v47  ;;  %v3391_v59 = vmul.f32 %v10209_v48, %v10209_v48 }
 0x360   : > { %v3360_v55 = vrot.slane %v3359_v41, 4  ;;  %v3371_v56 = vadd.f32 %v3370_v51, %v3369_v50  ;;  %v3383_v58 = vadd.f32 %v3382_v53, %v3381_v52  ;;  %v3392_v60 = vmul.f32 %v10211_v49, %v10211_v49 }
 0x361   : > { %v8688_v61 = vpop.f32.mrb[12].mxu0  ;;  %v3393_v3 = vsel %vm228_vm1, %v3391_v59, 0.0  ;;  %v3415_v18 = vmul.f32 %v10225_v1, %v10225_v1  ;;  %v3339_v27 = vadd.f32 %v3338_v7, %v3337_v54  ;;  %v3350_v39 = vrot.slane %v3349_v11, 2 }
 0x362   : > { %v3361_v62 = vadd.f32 %v3360_v55, %v3359_v41  ;;  %v3372_v63 = vrot.slane %v3371_v56, 4  ;;  %v3163_v0 = vpop.f32.mrb[13].mxu0  ;;  %v3384_v2 = vrot.slane %v3383_v58, 4  ;;  %v3394_v4 = vsel %vm228_vm1, %v3392_v60, 0.0 }
 0x363   : > { %v9064_v5 = vadd.f32 %v8688_v61, %v10159_v25  ;;  %v8689_v6 = vpop.f32.mrb[14].mxu0  ;;  %v3395_v13 = vadd.f32 %v3394_v4, %v3393_v3  ;;  %v10232_v14 = vld [vmem:[#allocation3 + $0x50] sm:$0xff]  ;;  %v3417_v42 = vsel %vm228_vm1, %v3415_v18, 0.0  ;;  %v3351_v60 = vadd.f32 %v3350_v39, %v3349_v11  ;;  %v7810_v39 = vld [vmem:[%s11637_s3 + $0x2] sm:$0x3] }
 0x364   : > { %v3362_v29 = vrot.slane %v3361_v62, 2  ;;  %v3373_v8 = vadd.f32 %v3372_v63, %v3371_v56  ;;  %v10230_v9 = vld [vmem:[#allocation3 + $0x3e] sm:$0xff]  ;;  %v3166_v10 = vpop.f32.mrb[15].mxu0  ;;  %v3385_v12 = vadd.f32 %v3384_v2, %v3383_v58  ;;  %v3430_v28 = vsel %vm228_vm1, %v10232_v14, 0.0 }
 0x365   : > { %3308 = vst.msk [vmem:[#allocation3 + $0x70] sm:$0xff] %vm228_vm1, %v9064_v5  ;;  %v3406_v19 = vsel %vm228_vm1, %v10230_v9, 0.0  ;;  %v3396_v26 = vrot.slane %v3395_v13, 4  ;;  %v3416_v32 = vmul.f32 %v10230_v9, %v10230_v9  ;;  %v3440_v35 = vmul.f32 %v10232_v14, %v10232_v14 }
 0x366   : > { %v3363_v15 = vadd.f32 %v3362_v29, %v3361_v62  ;;  %v10241_v20 = vld [vmem:[#allocation3 + $0x48] sm:$0xff]  ;;  %v3374_v23 = vrot.slane %v3373_v8, 2  ;;  %v3386_v24 = vrot.slane %v3385_v12, 2  ;;  %v3407_v31 = vadd.f32 %v3406_v19, %v3405_v16 }
 0x367   : > { %v3429_v33 = vsel %vm228_vm1, %v10241_v20, 0.0  ;;  %v3397_v34 = vadd.f32 %v3396_v26, %v3395_v13  ;;  %v3418_v43 = vsel %vm228_vm1, %v3416_v32, 0.0  ;;  %v3439_v44 = vmul.f32 %v10241_v20, %v10241_v20 }
 0x368   : > { %v3408_v36 = vrot.slane %v3407_v31, 4  ;;  %v3431_v37 = vadd.f32 %v3430_v28, %v3429_v33  ;;  %v3364_v46 = vrot.slane %v3363_v15, 1  ;;  %v3375_v47 = vadd.f32 %v3374_v23, %v3373_v8 }
 0x369   : > { %v8692_v38 = vpop.f32.mrb[16].mxu0  ;;  %v3387_v41 = vadd.f32 %v3386_v24, %v3385_v12  ;;  %v3419_v50 = vadd.f32 %v3418_v43, %v3417_v42  ;;  %v3398_v52 = vrot.slane %v3397_v34, 2  ;;  %v3441_v54 = vsel %vm228_vm1, %v3439_v44, 0.0 }
 0x36a   : > { %v3179_v45 = vpop.f32.mrb[17].mxu0  ;;  %v3409_v53 = vadd.f32 %v3408_v36, %v3407_v31  ;;  %v3340_v56 = vrot.slane %v3339_v27, 1  ;;  %v3442_v57 = vsel %vm228_vm1, %v3440_v35, 0.0  ;;  %v3432_v59 = vrot.slane %v3431_v37, 4 }
 0x36b   : > { %v8693_v51 = vpop.f32.mrb[18].mxu0  ;;  %v3420_v58 = vrot.slane %v3419_v50, 4  ;;  %v3443_v61 = vadd.f32 %v3442_v57, %v3441_v54  ;;  %v9065_v62 = vadd.f32 %v10159_v25, %v3163_v0  ;;  %v3365_v63 = vadd.f32 %v3364_v46, %v3363_v15 }
 0x36c   : > { %v3182_v55 = vpop.f32.mrb[19].mxu0  ;;  %v3376_v2 = vrot.slane %v3375_v47, 1  ;;  %v3388_v3 = vrot.slane %v3387_v41, 1  ;;  %v3399_v4 = vadd.f32 %v3398_v52, %v3397_v34  ;;  %v3410_v5 = vrot.slane %v3409_v53, 2 }
 0x36d   : > { %3306 = vst.msk [vmem:[#allocation3 + $0x60] sm:$0xff] %vm228_vm1, %v9065_v62  ;;  %v9066_v7 = vadd.f32 %v8689_v6, %v10159_v25  ;;  %v9067_v29 = vadd.f32 %v10159_v25, %v3166_v10  ;;  %v3341_v8 = vadd.f32 %v3340_v56, %v3339_v27  ;;  %v3421_v12 = vadd.f32 %v3420_v58, %v3419_v50 }
 0x36e   : > { %v3433_v13 = vadd.f32 %v3432_v59, %v3431_v37  ;;  %v9068_v16 = vadd.f32 %v8692_v38, %v10159_v25  ;;  %v3352_v18 = vrot.slane %v3351_v60, 1  ;;  %v3444_v19 = vrot.slane %v3443_v61, 4 }
 0x36f   : > { %3309 = vst.msk [vmem:[#allocation3 + $0x78] sm:$0xff] %vm228_vm1, %v9066_v7  ;;  %3307 = vst.msk [vmem:[#allocation3 + $0x68] sm:$0xff] %vm228_vm1, %v9067_v29  ;;  %v9069_v0 = vadd.f32 %v10159_v25, %v3179_v45  ;;  %v9070_v15 = vadd.f32 %v8693_v51, %v10159_v25  ;;  %v3366_v6 = vadd.f32 %v3365_v63, %v3341_v8  ;;  %v3400_v27 = vrot.slane %v3399_v4, 1 }
 0x370   : > { %v3377_v24 = vadd.f32 %v3376_v2, %v3375_v47  ;;  %v3389_v10 = vadd.f32 %v3388_v3, %v3387_v41  ;;  %3312 = vst.msk [vmem:[#allocation3 + $0x90] sm:$0xff] %vm228_vm1, %v9068_v16  ;;  %v9071_v26 = vadd.f32 %v10159_v25, %v3182_v55  ;;  %v3411_v28 = vadd.f32 %v3410_v5, %v3409_v53 }
 0x371   : > { %v8696_v11 = vpop.f32.mrb[20].mxu0  ;;  %3310 = vst.msk [vmem:[#allocation3 + $0x80] sm:$0xff] %vm228_vm1, %v9069_v0  ;;  %3313 = vst.msk [vmem:[#allocation3 + $0x98] sm:$0xff] %vm228_vm1, %v9070_v15  ;;  %v3422_v35 = vrot.slane %v3421_v12, 2  ;;  %v3434_v36 = vrot.slane %v3433_v13, 2  ;;  %v3353_v42 = vadd.f32 %v3352_v18, %v3351_v60  ;;  %v3445_v43 = vadd.f32 %v3444_v19, %v3443_v61 }
 0x372   : > { %v3195_v23 = vpop.f32.mrb[21].mxu0  ;;  %v9072_v32 = vadd.f32 %v8696_v11, %v10159_v25  ;;  %3311 = vst.msk [vmem:[#allocation3 + $0x88] sm:$0xff] %vm228_vm1, %v9071_v26  ;;  %v4040_v44 = vsel %vm469_vm0, %v10246_v22, 0  ;;  %v10295_v47 = vadd.f32 %v3389_v10, %v3366_v6  ;;  %v3412_v41 = vrot.slane %v3411_v28, 1 }
 0x373   : > { %v8697_v31 = vpop.f32.mrb[22].mxu0  ;;  %v9073_v33 = vadd.f32 %v10159_v25, %v3195_v23  ;;  %8711 = vmatpush3.bf16.msra.mxu1 %v4040_v44  ;;  %v10293_v46 = vadd.f32 %v3377_v24, %v3353_v42  ;;  %v10298_v50 = vadd.f32 %v3400_v27, %v3399_v4  ;;  %v3423_v51 = vadd.f32 %v3422_v35, %v3421_v12 }
 0x374   : > { %v3198_v34 = vpop.f32.mrb[23].mxu0  ;;  %v9074_v37 = vadd.f32 %v8697_v31, %v10159_v25  ;;  %3316 = vst.msk [vmem:[#allocation3 + $0xb0] sm:$0xff] %vm228_vm1, %v9072_v32  ;;  %v10289_v45 = vld [vmem:[#allocation3 + $0x5a] sm:$0xff]  ;;  %9710 = vmatprep.subr.msk.bf16.mxu1 %vm469_vm0, %v7810_v39  ;;  %v10300_v52 = vadd.f32 %v3434_v36, %v3433_v13  ;;  %v3446_v57 = vrot.slane %v3445_v43, 2  ;;  %v3413_v5 = vadd.f32 %v3412_v41, %v3411_v28 }
 0x375   : > { %v9075_v38 = vadd.f32 %v10159_v25, %v3198_v34  ;;  %3314 = vst.msk [vmem:[#allocation3 + $0xa0] sm:$0xff] %vm228_vm1, %v9073_v33  ;;  %v3463_v22 = vmul.f32 %v10289_v45, %v10289_v45  ;;  %v3453_v58 = vsel %vm228_vm1, %v10289_v45, 0.0  ;;  %v3424_v31 = vrot.slane %v3423_v51, 1 }
 0x376   : > { %3317 = vst.msk [vmem:[#allocation3 + $0xb8] sm:$0xff] %vm228_vm1, %v9074_v37  ;;  %v10304_v53 = vld [vmem:[#allocation3 + $0x74] sm:$0xff]  ;;  %v10306_v54 = vld [vmem:[#allocation3 + $0x62] sm:$0xff]  ;;  %v10308_v55 = vld [vmem:[#allocation3 + $0x6c] sm:$0xff]  ;;  %v3436_v11 = vrot.slane %v10300_v52, 1  ;;  %v3447_v27 = vadd.f32 %v3446_v57, %v3445_v43 }
 0x377   : > { %3315 = vst.msk [vmem:[#allocation3 + $0xa8] sm:$0xff] %vm228_vm1, %v9075_v38  ;;  %v3478_v59 = vsel %vm228_vm1, %v10304_v53, 0.0  ;;  %v3488_v60 = vmul.f32 %v10304_v53, %v10304_v53  ;;  %v3454_v62 = vsel %vm228_vm1, %v10306_v54, 0.0  ;;  %v3464_v63 = vmul.f32 %v10306_v54, %v10306_v54  ;;  %v10331_v12 = vld [vmem:[#allocation3 + $0x90] sm:$0xff] }
 0x378   : > { %v3477_v2 = vsel %vm228_vm1, %v10308_v55, 0.0  ;;  %v3487_v3 = vmul.f32 %v10308_v55, %v10308_v55  ;;  %v3455_v29 = vadd.f32 %v3454_v62, %v3453_v58  ;;  %11672 = vst [vmem:[#allocation4_spill] sm:$0xff] %v10331_v12  ;;  %v10333_v13 = vld [vmem:[#allocation3 + $0x98] sm:$0xff]  ;;  %v3465_v18 = vsel %vm228_vm1, %v3463_v22, 0.0 }
 0x379   : > { %v10310_v56 = vpop.f32.mrb[24].mxu0  ;;  %v3490_v7 = vsel %vm228_vm1, %v3488_v60, 0.0  ;;  %v3479_v8 = vadd.f32 %v3478_v59, %v3477_v2  ;;  %11673 = vst [vmem:[#allocation5_spill] sm:$0xff] %v10333_v13  ;;  %v3466_v19 = vsel %vm228_vm1, %v3464_v63, 0.0  ;;  %v10341_v10 = vld [vmem:[#allocation3 + $0x7e] sm:$0xff]  ;;  %v10343_v26 = vld [vmem:[#allocation3 + $0x86] sm:$0xff]  ;;  %v3535_v36 = vmul.f32 %v10331_v12, %v10331_v12 }
 0x37a   : > { %v10318_v61 = vpop.f32.mrb[25].mxu0  ;;  %v3489_v0 = vsel %vm228_vm1, %v3487_v3, 0.0  ;;  %v3456_v15 = vrot.slane %v3455_v29, 4  ;;  %v3467_v23 = vadd.f32 %v3466_v19, %v3465_v18  ;;  %v3525_v28 = vsel %vm228_vm1, %v10331_v12, 0.0 }
 0x37b   : > { %v10328_v4 = vpop.f32.mrb[26].mxu0  ;;  %v3480_v6 = vrot.slane %v3479_v8, 4  ;;  %v3491_v24 = vadd.f32 %v3490_v7, %v3489_v0  ;;  %v3526_v32 = vsel %vm228_vm1, %v10333_v13, 0.0  ;;  %v3501_v37 = vsel %vm228_vm1, %v10341_v10, 0.0 }
 0x37c   : > { %v10335_v16 = vpop.f32.mrb[27].mxu0  ;;  %v3457_v33 = vadd.f32 %v3456_v15, %v3455_v29  ;;  %v3468_v34 = vrot.slane %v3467_v23, 4  ;;  %v3527_v38 = vadd.f32 %v3526_v32, %v3525_v28  ;;  %v3536_v39 = vmul.f32 %v10333_v13, %v10333_v13 }
 0x37d   : > { %v3492_v35 = vrot.slane %v3491_v24, 4  ;;  %v3502_v42 = vsel %vm228_vm1, %v10343_v26, 0.0  ;;  %v3481_v22 = vadd.f32 %v3480_v6, %v3479_v8  ;;  %v3511_v57 = vmul.f32 %v10341_v10, %v10341_v10 }
 0x37e   : > { %v3458_v44 = vrot.slane %v3457_v33, 2  ;;  %v3469_v41 = vadd.f32 %v3468_v34, %v3467_v23  ;;  %v3538_v60 = vsel %vm228_vm1, %v3536_v39, 0.0  ;;  %v3503_v62 = vadd.f32 %v3502_v42, %v3501_v37  ;;  %v10377_v12 = vld [vmem:[#allocation3 + $0xa2] sm:$0xff] }
 0x37f   : > { %v3493_v59 = vadd.f32 %v3492_v35, %v3491_v24  ;;  %v3512_v63 = vmul.f32 %v10343_v26, %v10343_v26  ;;  %v3425_v3 = vadd.f32 %v3424_v31, %v3423_v51  ;;  %v3448_v7 = vrot.slane %v3447_v27, 1 }
 0x380   : > { %v3537_v29 = vsel %vm228_vm1, %v3535_v36, 0.0  ;;  %v3528_v18 = vrot.slane %v3527_v38, 4  ;;  %v3470_v19 = vrot.slane %v3469_v41, 2  ;;  %v3504_v15 = vrot.slane %v3503_v62, 4 }
 0x381   : > { %v10357_v43 = vpop.f32.mrb[28].mxu0  ;;  %v3539_v0 = vadd.f32 %v3538_v60, %v3537_v29  ;;  %v3514_v23 = vsel %vm228_vm1, %v3512_v63, 0.0  ;;  %v3402_v6 = vadd.f32 %v10298_v50, %v10293_v46  ;;  %v3459_v24 = vadd.f32 %v3458_v44, %v3457_v33 }
 0x382   : > { %v10361_v58 = vpop.f32.mrb[29].mxu0  ;;  %v3482_v28 = vrot.slane %v3481_v22, 2  ;;  %v3513_v32 = vsel %vm228_vm1, %v3511_v57, 0.0  ;;  %v3494_v34 = vrot.slane %v3493_v59, 2  ;;  %v3505_v31 = vadd.f32 %v3504_v15, %v3503_v62 }
 0x383   : > { %v10366_v2 = vpop.f32.mrb[30].mxu0  ;;  %v3540_v51 = vrot.slane %v3539_v0, 4  ;;  %v3515_v35 = vadd.f32 %v3514_v23, %v3513_v32  ;;  %v3414_v36 = vadd.f32 %v3413_v5, %v10295_v47  ;;  %v3426_v37 = vadd.f32 %v3425_v3, %v3402_v6  ;;  %v10381_v23 = vld [vmem:[#allocation3 + $0xaa] sm:$0xff] }
 0x384   : > { %v10369_v8 = vpop.f32.mrb[31].mxu0  ;;  %v3437_v39 = vadd.f32 %v3436_v11, %v10300_v52  ;;  %v3449_v42 = vadd.f32 %v3448_v7, %v3447_v27  ;;  %v3471_v60 = vadd.f32 %v3470_v19, %v3469_v41  ;;  %v3529_v29 = vadd.f32 %v3528_v18, %v3527_v38 }
 0x385   : > { %v3541_v63 = vadd.f32 %v3540_v51, %v3539_v0  ;;  %v3516_v13 = vrot.slane %v3515_v35, 4  ;;  %v3460_v50 = vrot.slane %v3459_v24, 1  ;;  %v3483_v33 = vadd.f32 %v3482_v28, %v3481_v22 }
 0x386   : > { %v10379_v57 = vadd.f32 %v3494_v34, %v3493_v59  ;;  %v3506_v62 = vrot.slane %v3505_v31, 2  ;;  %v3438_v5 = vadd.f32 %v3437_v39, %v3414_v36  ;;  %v3549_v52 = vsel %vm228_vm1, %v10377_v12, 0.0 }
 0x387   : > { %v3517_v15 = vadd.f32 %v3516_v13, %v3515_v35  ;;  %v3450_v27 = vadd.f32 %v3449_v42, %v3426_v37  ;;  %v3472_v38 = vrot.slane %v3471_v60, 1  ;;  %v3530_v41 = vrot.slane %v3529_v29, 2 }
 0x388   : > { %v3542_v3 = vrot.slane %v3541_v63, 2  ;;  %v3461_v7 = vadd.f32 %v3460_v50, %v3459_v24  ;;  %v3484_v22 = vrot.slane %v3483_v33, 1  ;;  %v3550_v59 = vsel %vm228_vm1, %v10381_v23, 0.0  ;;  %v10406_v50 = vld [vmem:[#allocation3 + $0xb4] sm:$0xff] }
 0x389   : > { %v8708_v46 = vpop.f32.mrb[32].mxu0  ;;  %v3559_v13 = vmul.f32 %v10377_v12, %v10377_v12  ;;  %v3496_v18 = vrot.slane %v10379_v57, 1  ;;  %v3507_v19 = vadd.f32 %v3506_v62, %v3505_v31  ;;  %v3518_v0 = vrot.slane %v3517_v15, 2 }
 0x38a   : > { %v3243_v44 = vpop.f32.mrb[33].mxu0  ;;  %v3551_v6 = vadd.f32 %v3550_v59, %v3549_v52  ;;  %v3560_v28 = vmul.f32 %v10381_v23, %v10381_v23  ;;  %v9076_v24 = vadd.f32 %v10310_v56, %v10159_v25  ;;  %v9077_v34 = vadd.f32 %v10159_v25, %v10318_v61 }
 0x38b   : > { %v8709_v47 = vpop.f32.mrb[34].mxu0  ;;  %v3561_v32 = vsel %vm228_vm1, %v3559_v13, 0.0  ;;  %v3473_v51 = vadd.f32 %v3472_v38, %v3471_v60  ;;  %v3531_v35 = vadd.f32 %v3530_v41, %v3529_v29  ;;  %v3543_v36 = vadd.f32 %v3542_v3, %v3541_v63 }
 0x38c   : > { %v3246_v11 = vpop.f32.mrb[35].mxu0  ;;  %v3552_v37 = vrot.slane %v3551_v6, 4  ;;  %v3562_v39 = vsel %vm228_vm1, %v3560_v28, 0.0  ;;  %3320 = vst.msk [vmem:[#allocation3 + $0xd0] sm:$0xff] %vm228_vm1, %v9076_v24  ;;  %3318 = vst.msk [vmem:[#allocation3 + $0xc0] sm:$0xff] %vm228_vm1, %v9077_v34  ;;  %v9078_v31 = vadd.f32 %v10328_v4, %v10159_v25  ;;  %v9079_v42 = vadd.f32 %v10159_v25, %v10335_v16 }
 0x38d   : > { %v9080_v56 = vadd.f32 %v10357_v43, %v10159_v25  ;;  %v3508_v61 = vrot.slane %v3507_v19, 1  ;;  %v3519_v60 = vadd.f32 %v3518_v0, %v3517_v15  ;;  %v3563_v63 = vadd.f32 %v3562_v39, %v3561_v32 }
 0x38e   : > { %v3553_v29 = vadd.f32 %v3552_v37, %v3551_v6  ;;  %3321 = vst.msk [vmem:[#allocation3 + $0xd8] sm:$0xff] %vm228_vm1, %v9078_v31  ;;  %3319 = vst.msk [vmem:[#allocation3 + $0xc8] sm:$0xff] %vm228_vm1, %v9079_v42  ;;  %v9081_v4 = vadd.f32 %v10159_v25, %v10361_v58  ;;  %v9082_v16 = vadd.f32 %v10366_v2, %v10159_v25  ;;  %v3532_v59 = vrot.slane %v3531_v35, 1 }
 0x38f   : > { %3324 = vst.msk [vmem:[#allocation3 + $0xf0] sm:$0xff] %vm228_vm1, %v9080_v56  ;;  %v9083_v43 = vadd.f32 %v10159_v25, %v10369_v8  ;;  %v9084_v62 = vadd.f32 %v8708_v46, %v10159_v25  ;;  %v3462_v15 = vadd.f32 %v3461_v7, %v3438_v5  ;;  %v3564_v38 = vrot.slane %v3563_v63, 4 }
 0x390   : > { %v3554_v52 = vrot.slane %v3553_v29, 2  ;;  %v9085_v41 = vadd.f32 %v10159_v25, %v3243_v44  ;;  %v3474_v3 = vadd.f32 %v3473_v51, %v3450_v27  ;;  %3322 = vst.msk [vmem:[#allocation3 + $0xe0] sm:$0xff] %vm228_vm1, %v9081_v4  ;;  %3325 = vst.msk [vmem:[#allocation3 + $0xf8] sm:$0xff] %vm228_vm1, %v9082_v16  ;;  %v9086_v58 = vadd.f32 %v8709_v47, %v10159_v25 }
 0x391   : > { %3323 = vst.msk [vmem:[#allocation3 + $0xe8] sm:$0xff] %vm228_vm1, %v9083_v43  ;;  %3328 = vst.msk [vmem:[#allocation3 + $0x110] sm:$0xff] %vm228_vm1, %v9084_v62  ;;  %v9087_v2 = vadd.f32 %v10159_v25, %v3246_v11  ;;  %v3485_v8 = vadd.f32 %v3484_v22, %v3483_v33  ;;  %v3544_v46 = vrot.slane %v3543_v36, 1  ;;  %v3583_v5 = vmul.f32 %v10406_v50, %v10406_v50 }
 0x392   : > { %v3565_v44 = vadd.f32 %v3564_v38, %v3563_v63  ;;  %3326 = vst.msk [vmem:[#allocation3 + $0x100] sm:$0xff] %vm228_vm1, %v9085_v41  ;;  %v3497_v27 = vadd.f32 %v3496_v18, %v10379_v57  ;;  %v3509_v7 = vadd.f32 %v3508_v61, %v3507_v19  ;;  %v3520_v13 = vrot.slane %v3519_v60, 1 }
 0x393   : > { %3330 = vst.msk [vmem:[#allocation3 + $0x118] sm:$0x3f] %vm3329_vm5, %v9086_v58  ;;  %v3486_v0 = vadd.f32 %v3485_v8, %v3462_v15  ;;  %v3573_v25 = vsel %vm228_vm1, %v10406_v50, 0.0  ;;  %v3555_v33 = vadd.f32 %v3554_v52, %v3553_v29  ;;  %v10433_v11 = vld [vmem:[#allocation3 + $0xbc] sm:$0xff]  ;;  %v10435_v6 = vadd.f32 %v3532_v59, %v3531_v35 }
 0x394   : > { %3327 = vst.msk [vmem:[#allocation3 + $0x108] sm:$0xff] %vm228_vm1, %v9087_v2  ;;  %v3566_v47 = vrot.slane %v3565_v44, 2  ;;  %v3498_v22 = vadd.f32 %v3497_v27, %v3474_v3  ;;  %v3574_v57 = vsel %vm228_vm1, %v10433_v11, 0.0  ;;  %v3584_v18 = vmul.f32 %v10433_v11, %v10433_v11 }
 0x395   : > { %v10441_v19 = vadd.f32 %v3544_v46, %v3543_v36  ;;  %v3585_v28 = vsel %vm228_vm1, %v3583_v5, 0.0  ;;  %v3575_v24 = vadd.f32 %v3574_v57, %v3573_v25  ;;  %v10444_v34 = vld [vmem:[#allocation3 + $0xd8] sm:$0xff]  ;;  %v10446_v51 = vld [vmem:[#allocation3 + $0xc6] sm:$0xff]  ;;  %v10448_v37 = vld [vmem:[#allocation3 + $0xce] sm:$0xff]  ;;  %v3510_v35 = vadd.f32 %v3509_v7, %v3486_v0 }
 0x396   : > { %v3567_v32 = vadd.f32 %v3566_v47, %v3565_v44  ;;  %11674 = vst [vmem:[#allocation6_spill] sm:$0xff] %v10444_v34  ;;  %v3521_v39 = vadd.f32 %v3520_v13, %v3519_v60  ;;  %v3586_v31 = vsel %vm228_vm1, %v3584_v18, 0.0  ;;  %v3597_v42 = vsel %vm228_vm1, %v10446_v51, 0.0 }
 0x397   : > { %v3556_v56 = vrot.slane %v3555_v33, 1  ;;  %v3576_v36 = vrot.slane %v3575_v24, 4  ;;  %v3587_v61 = vadd.f32 %v3586_v31, %v3585_v28  ;;  %v3631_v29 = vmul.f32 %v10444_v34, %v10444_v34  ;;  %v10455_v63 = vld [vmem:[#allocation3 + $0xe0] sm:$0xff]  ;;  %v10465_v41 = vld [vmem:[#allocation3 + $0xf2] sm:$0xff] }
 0x398   : > { %11675 = vst [vmem:[#allocation7_spill] sm:$0xff] %v10455_v63  ;;  %v3621_v4 = vsel %vm228_vm1, %v10444_v34, 0.0  ;;  %v3598_v16 = vsel %vm228_vm1, %v10448_v37, 0.0  ;;  %v3607_v60 = vmul.f32 %v10446_v51, %v10446_v51  ;;  %v3608_v43 = vmul.f32 %v10448_v37, %v10448_v37  ;;  %11676 = vst [vmem:[#allocation8_spill] sm:$0xff] %v10465_v41  ;;  %v10474_v27 = vld [vmem:[#allocation3 + $0xea] sm:$0xff] }
 0x399   : > { %v3568_v62 = vrot.slane %v3567_v32, 1  ;;  %v3577_v15 = vadd.f32 %v3576_v36, %v3575_v24  ;;  %v3588_v52 = vrot.slane %v3587_v61, 4  ;;  %v3599_v38 = vadd.f32 %v3598_v16, %v3597_v42  ;;  %11677 = vst [vmem:[#allocation9_spill] sm:$0xff] %v10474_v27 }
 0x39a   : > { %v3609_v3 = vsel %vm228_vm1, %v3607_v60, 0.0  ;;  %v3610_v59 = vsel %vm228_vm1, %v3608_v43, 0.0  ;;  %v3622_v58 = vsel %vm228_vm1, %v10455_v63, 0.0  ;;  %v3632_v2 = vmul.f32 %v10455_v63, %v10455_v63 }
 0x39b   : > { %v3578_v8 = vrot.slane %v3577_v15, 2  ;;  %v3589_v46 = vadd.f32 %v3588_v52, %v3587_v61  ;;  %v3633_v5 = vsel %vm228_vm1, %v3631_v29, 0.0  ;;  %v3600_v44 = vrot.slane %v3599_v38, 4 }
 0x39c   : > { %v3611_v7 = vadd.f32 %v3610_v59, %v3609_v3  ;;  %v3623_v13 = vadd.f32 %v3622_v58, %v3621_v4  ;;  %v3634_v0 = vsel %vm228_vm1, %v3632_v2, 0.0  ;;  %v3646_v25 = vsel %vm228_vm1, %v10465_v41, 0.0 }
 0x39d   : > { %v3579_v47 = vadd.f32 %v3578_v8, %v3577_v15  ;;  %v3590_v57 = vrot.slane %v3589_v46, 2  ;;  %v3601_v18 = vadd.f32 %v3600_v44, %v3599_v38  ;;  %v3635_v28 = vadd.f32 %v3634_v0, %v3633_v5 }
 0x39e   : > { %v3612_v24 = vrot.slane %v3611_v7, 4  ;;  %v3624_v31 = vrot.slane %v3623_v13, 4  ;;  %v3656_v42 = vmul.f32 %v10465_v41, %v10465_v41  ;;  %v3645_v36 = vsel %vm228_vm1, %v10474_v27, 0.0 }
 0x39f   : > { %v3580_v61 = vrot.slane %v3579_v47, 1  ;;  %v3591_v29 = vadd.f32 %v3590_v57, %v3589_v46  ;;  %v3602_v4 = vrot.slane %v3601_v18, 2  ;;  %v3636_v16 = vrot.slane %v3635_v28, 4 }
 0x3a0   : > { %v3522_v60 = vadd.f32 %v3521_v39, %v3498_v22  ;;  %v3613_v43 = vadd.f32 %v3612_v24, %v3611_v7  ;;  %v3625_v52 = vadd.f32 %v3624_v31, %v3623_v13  ;;  %v3647_v3 = vadd.f32 %v3646_v25, %v3645_v36  ;;  %v10489_v24 = vld [vmem:[#allocation3 + $0xfc] sm:$0xff] }
 0x3a1   : > { %v3557_v15 = vadd.f32 %v3556_v56, %v3555_v33  ;;  %v3603_v59 = vadd.f32 %v3602_v4, %v3601_v18  ;;  %v3637_v38 = vadd.f32 %v3636_v16, %v3635_v28  ;;  %v3658_v58 = vsel %vm228_vm1, %v3656_v42, 0.0  ;;  %11678 = vst [vmem:[#allocation10_spill] sm:$0xff] %v10489_v24  ;;  %v10491_v31 = vld [vmem:[#allocation3 + $0x116] sm:$0xff] }
 0x3a2   : > { %v3614_v2 = vrot.slane %v3613_v43, 2  ;;  %v3626_v8 = vrot.slane %v3625_v52, 2  ;;  %v3648_v5 = vrot.slane %v3647_v3, 4  ;;  %v3655_v44 = vmul.f32 %v10474_v27, %v10474_v27  ;;  %11679 = vst [vmem:[#allocation11_spill] sm:$0xff] %v10491_v31 }
 0x3a3   : > { %v3534_v0 = vadd.f32 %v10435_v6, %v3510_v35  ;;  %v3569_v46 = vadd.f32 %v3568_v62, %v3567_v32  ;;  %v3581_v57 = vadd.f32 %v3580_v61, %v3579_v47  ;;  %v3592_v41 = vrot.slane %v3591_v29, 1  ;;  %v10493_v35 = vld [vmem:[#allocation3 + $0x104] sm:$0xff] }
 0x3a4   : > { %v3604_v22 = vrot.slane %v3603_v59, 1  ;;  %v3638_v39 = vrot.slane %v3637_v38, 2  ;;  %v3649_v7 = vadd.f32 %v3648_v5, %v3647_v3  ;;  %v3657_v33 = vsel %vm228_vm1, %v3655_v44, 0.0 }
 0x3a5   : > { %v3546_v56 = vadd.f32 %v10441_v19, %v3522_v60  ;;  %v3615_v13 = vadd.f32 %v3614_v2, %v3613_v43  ;;  %v3659_v25 = vadd.f32 %v3658_v58, %v3657_v33  ;;  %v3558_v18 = vadd.f32 %v3557_v15, %v3534_v0  ;;  %v10499_v43 = vld [vmem:[#allocation3 + $0x10e] sm:$0xff] }
 0x3a6   : > { %v3627_v28 = vadd.f32 %v3626_v8, %v3625_v52  ;;  %v3650_v6 = vrot.slane %v3649_v7, 2  ;;  %v3593_v47 = vadd.f32 %v3592_v41, %v3591_v29  ;;  %v3605_v36 = vadd.f32 %v3604_v22, %v3603_v59 }
 0x3a7   : > { %v3570_v42 = vadd.f32 %v3569_v46, %v3546_v56  ;;  %v3660_v32 = vrot.slane %v3659_v25, 4  ;;  %v3582_v62 = vadd.f32 %v3581_v57, %v3558_v18  ;;  %v3639_v61 = vadd.f32 %v3638_v39, %v3637_v38 }
 0x3a8   : > { %v3616_v4 = vrot.slane %v3615_v13, 1  ;;  %v3679_v19 = vmul.f32 %v10489_v24, %v10489_v24  ;;  %v3704_v60 = vmul.f32 %v10491_v31, %v10491_v31  ;;  %v3628_v52 = vrot.slane %v3627_v28, 1 }
 0x3a9   : > { %v3661_v16 = vadd.f32 %v3660_v32, %v3659_v25  ;;  %v3669_v3 = vsel %vm228_vm1, %v10489_v24, 0.0  ;;  %v3694_v15 = vsel %vm228_vm1, %v10491_v31, 0.0  ;;  %v3670_v41 = vsel %vm228_vm1, %v10493_v35, 0.0 }
 0x3aa   : > { %v3651_v29 = vadd.f32 %v3650_v6, %v3649_v7  ;;  %v3671_v38 = vadd.f32 %v3670_v41, %v3669_v3  ;;  %v3680_v58 = vmul.f32 %v10493_v35, %v10493_v35  ;;  %v3640_v2 = vrot.slane %v3639_v61, 1 }
 0x3ab   : > { %v3662_v59 = vrot.slane %v3661_v16, 2  ;;  %v3706_v8 = vsel %vm228_vm1, %v3704_v60, 0.0  ;;  %v3693_v5 = vsel %vm228_vm1, %v10499_v43, 0.0  ;;  %v3703_v44 = vmul.f32 %v10499_v43, %v10499_v43 }
 0x3ac   : > { %v3681_v0 = vsel %vm228_vm1, %v3679_v19, 0.0  ;;  %v3672_v46 = vrot.slane %v3671_v38, 4  ;;  %v3682_v57 = vsel %vm228_vm1, %v3680_v58, 0.0  ;;  %v3695_v22 = vadd.f32 %v3694_v15, %v3693_v5 }
 0x3ad   : > { %v3629_v39 = vadd.f32 %v3628_v52, %v3627_v28  ;;  %v3663_v7 = vadd.f32 %v3662_v59, %v3661_v16  ;;  %v3683_v33 = vadd.f32 %v3682_v57, %v3681_v0  ;;  %v3705_v56 = vsel %vm228_vm1, %v3703_v44, 0.0 }
 0x3ae   : > { %v3652_v25 = vrot.slane %v3651_v29, 1  ;;  %v3673_v18 = vadd.f32 %v3672_v46, %v3671_v38  ;;  %v3696_v6 = vrot.slane %v3695_v22, 4  ;;  %v3707_v32 = vadd.f32 %v3706_v8, %v3705_v56 }
 0x3af   : > { %v3594_v60 = vadd.f32 %v3593_v47, %v3570_v42  ;;  %v3606_v3 = vadd.f32 %v3605_v36, %v3582_v62  ;;  %v3617_v41 = vadd.f32 %v3616_v4, %v3615_v13  ;;  %v3684_v31 = vrot.slane %v3683_v33, 4 }
 0x3b0   : > { %v3674_v24 = vrot.slane %v3673_v18, 2  ;;  %v3697_v27 = vadd.f32 %v3696_v6, %v3695_v22  ;;  %v3708_v19 = vrot.slane %v3707_v32, 4  ;;  %v3641_v34 = vadd.f32 %v3640_v2, %v3639_v61 }
 0x3b1   : > { %v3630_v63 = vadd.f32 %v3629_v39, %v3606_v3  ;;  %v3664_v58 = vrot.slane %v3663_v7, 1  ;;  %v3685_v15 = vadd.f32 %v3684_v31, %v3683_v33  ;;  %v3653_v28 = vadd.f32 %v3652_v25, %v3651_v29 }
 0x3b2   : > { %v3675_v16 = vadd.f32 %v3674_v24, %v3673_v18  ;;  %v3698_v52 = vrot.slane %v3697_v27, 2  ;;  %v3709_v59 = vadd.f32 %v3708_v19, %v3707_v32  ;;  %v3618_v5 = vadd.f32 %v3617_v41, %v3594_v60 }
 0x3b3   : > { %v3686_v44 = vrot.slane %v3685_v15, 2  ;;  %v3665_v62 = vadd.f32 %v3664_v58, %v3663_v7  ;;  %v3654_v47 = vadd.f32 %v3653_v28, %v3630_v63 }
 0x3b4   : > { %v3676_v38 = vrot.slane %v3675_v16, 1  ;;  %v3699_v0 = vadd.f32 %v3698_v52, %v3697_v27  ;;  %v3710_v8 = vrot.slane %v3709_v59, 2  ;;  %v3642_v42 = vadd.f32 %v3641_v34, %v3618_v5 }
 0x3b5   : > { %v3687_v13 = vadd.f32 %v3686_v44, %v3685_v15  ;;  %v11683_v44 = vld [vmem:[#allocation7_spill] sm:$0xff] }
 0x3b6   : > { %v3677_v36 = vadd.f32 %v3676_v38, %v3675_v16  ;;  %v3700_v4 = vrot.slane %v3699_v0, 1  ;;  %v3711_v46 = vadd.f32 %v3710_v8, %v3709_v59  ;;  %v3666_v29 = vadd.f32 %v3665_v62, %v3642_v42  ;;  %v11682_v59 = vld [vmem:[#allocation6_spill] sm:$0xff]  ;;  %v11684_v8 = vld [vmem:[#allocation9_spill] sm:$0xff]  ;;  %v11685_v62 = vld [vmem:[#allocation8_spill] sm:$0xff] }
 0x3b7   : > { %v3688_v57 = vrot.slane %v3687_v13, 1 }
 0x3b8   : > { %v3678_v61 = vadd.f32 %v3677_v36, %v3654_v47  ;;  %v3701_v2 = vadd.f32 %v3700_v4, %v3699_v0  ;;  %v3712_v31 = vrot.slane %v3711_v46, 1  ;;  %v11686_v47 = vld [vmem:[#allocation10_spill] sm:$0xff]  ;;  %v11687_v4 = vld [vmem:[#allocation11_spill] sm:$0xff] }
 0x3b9   : > { %v3689_v24 = vadd.f32 %v3688_v57, %v3687_v13 }
 0x3ba   : > { %v3702_v22 = vadd.f32 %v3701_v2, %v3678_v61  ;;  %v3713_v33 = vadd.f32 %v3712_v31, %v3711_v46 }
 0x3bb   : > { %v3690_v39 = vadd.f32 %v3689_v24, %v3666_v29 }
 0x3bc   : > { %v10517_v56 = vmul.f32 0.00390625, %v3702_v22 }
 0x3bd   : > { %v3714_v27 = vadd.f32 %v3713_v33, %v3690_v39 }
 0x3be   : > { %v3717_v34 = vmul.f32 %v10517_v56, %v10517_v56  ;;  %v3890_v18 = vsub.f32 %v10493_v35, %v10517_v56  ;;  %v3901_v6 = vsub.f32 %v10499_v43, %v10517_v56  ;;  %v3721_v32 = vsub.f32 %v10171_v17, %v10517_v56 }
 0x3bf   : > { %v3716_v7 = vmul.f32 0.00390625, %v3714_v27  ;;  %v3722_v60 = vsub.f32 %v10177_v21, %v10517_v56  ;;  %v3733_v3 = vsub.f32 %v10189_v30, %v10517_v56  ;;  %v3734_v41 = vsub.f32 %v10199_v40, %v10517_v56 }
 0x3c0   : > { %v3745_v19 = vsub.f32 %v10209_v48, %v10517_v56  ;;  %v3746_v35 = vsub.f32 %v10211_v49, %v10517_v56  ;;  %v3757_v43 = vsub.f32 %v10225_v1, %v10517_v56  ;;  %v3758_v17 = vsub.f32 %v10230_v9, %v10517_v56 }
 0x3c1   : > { %v3718_v63 = vsub.f32 %v3716_v7, %v3717_v34  ;;  %v3769_v21 = vsub.f32 %v10241_v20, %v10517_v56  ;;  %v3770_v30 = vsub.f32 %v10232_v14, %v10517_v56  ;;  %v3781_v40 = vsub.f32 %v10289_v45, %v10517_v56  ;;  %v11680_v14 = vld [vmem:[#allocation4_spill] sm:$0xff]  ;;  %v11681_v45 = vld [vmem:[#allocation5_spill] sm:$0xff] }
 0x3c2   : > { %v3782_v48 = vsub.f32 %v10306_v54, %v10517_v56  ;;  %v3793_v49 = vsub.f32 %v10308_v55, %v10517_v56  ;;  %v3794_v1 = vsub.f32 %v10304_v53, %v10517_v56  ;;  %v3805_v9 = vsub.f32 %v10341_v10, %v10517_v56 }
 0x3c3   : > { %v3719_v25 = vadd.f32 1e-05, %v3718_v63  ;;  %v3806_v20 = vsub.f32 %v10343_v26, %v10517_v56  ;;  %v3817_v58 = vsub.f32 %v11680_v14, %v10517_v56  ;;  %v3818_v15 = vsub.f32 %v11681_v45, %v10517_v56 }
 0x3c4   : > { %v3829_v54 = vsub.f32 %v10377_v12, %v10517_v56  ;;  %v3830_v55 = vsub.f32 %v10381_v23, %v10517_v56  ;;  %v3841_v53 = vsub.f32 %v10406_v50, %v10517_v56  ;;  %v3842_v28 = vsub.f32 %v10433_v11, %v10517_v56 }
 0x3c5   : > { %9726 = vrsqrt.f32 %v3719_v25  ;;  %v3853_v16 = vsub.f32 %v10446_v51, %v10517_v56  ;;  %v3854_v52 = vsub.f32 %v10448_v37, %v10517_v56  ;;  %v3865_v5 = vsub.f32 %v11682_v59, %v10517_v56 }
 0x3c6   : > { %v3866_v38 = vsub.f32 %v11683_v44, %v10517_v56  ;;  %v3877_v42 = vsub.f32 %v11684_v8, %v10517_v56  ;;  %v3878_v13 = vsub.f32 %v11685_v62, %v10517_v56  ;;  %v3889_v36 = vsub.f32 %v11686_v47, %v10517_v56 }
 0x3c7   : > { %v3902_v46 = vsub.f32 %v11687_v4, %v10517_v56 }
 0x3cf   : > { %v10577_v0 = vpop.eup %9726 }
 0x3d0   : > { %v3892_v57 = vmul.f32 %v10577_v0, %v3890_v18  ;;  %v3903_v61 = vmul.f32 %v10577_v0, %v3901_v6  ;;  %v3723_v2 = vmul.f32 %v10577_v0, %v3721_v32  ;;  %v3724_v31 = vmul.f32 %v10577_v0, %v3722_v60 }
 0x3d1   : > { %v3735_v29 = vmul.f32 %v10577_v0, %v3733_v3  ;;  %v3736_v24 = vmul.f32 %v10577_v0, %v3734_v41  ;;  %v3747_v22 = vmul.f32 %v10577_v0, %v3745_v19  ;;  %v3748_v39 = vmul.f32 %v10577_v0, %v3746_v35 }
 0x3d2   : > { %v3894_v33 = vmax.f32 %v3892_v57, 0.0  ;;  %v3905_v27 = vmax.f32 %v3903_v61, 0.0  ;;  %v3725_v34 = vmax.f32 %v3723_v2, 0.0  ;;  %v3726_v7 = vmax.f32 %v3724_v31, 0.0 }
 0x3d3   : > { %v3737_v63 = vmax.f32 %v3735_v29, 0.0  ;;  %v3738_v25 = vmax.f32 %v3736_v24, 0.0  ;;  %v3749_v18 = vmax.f32 %v3747_v22, 0.0  ;;  %v3750_v6 = vmax.f32 %v3748_v39, 0.0 }
 0x3d4   : > { %3896 = vst.msk [vmem:[#allocation2 + $0x117] sm:$0xff] %vm228_vm1, %v3894_v33  ;;  %3907 = vst.msk [vmem:[#allocation2 + $0x121] sm:$0xff] %vm228_vm1, %v3905_v27  ;;  %v3759_v32 = vmul.f32 %v10577_v0, %v3757_v43  ;;  %v3760_v60 = vmul.f32 %v10577_v0, %v3758_v17  ;;  %v3771_v3 = vmul.f32 %v10577_v0, %v3769_v21 }
 0x3d5   : > { %3898 = vst.msk [vmem:[#allocation2 + $0x119] sm:$0x40] %vm233_vm3, %v3894_v33  ;;  %v3772_v41 = vmul.f32 %v10577_v0, %v3770_v30  ;;  %3730 = vst.msk [vmem:[#allocation2 + $0x1d] sm:$0x40] %vm233_vm3, %v3726_v7  ;;  %v3783_v19 = vmul.f32 %v10577_v0, %v3781_v40  ;;  %v3784_v35 = vmul.f32 %v10577_v0, %v3782_v48 }
 0x3d6   : > { %3909 = vst.msk [vmem:[#allocation2 + $0x11f] sm:$0x2] %vm231_vm2, %v3905_v27  ;;  %3729 = vst.msk [vmem:[#allocation2 + $0x11] sm:$0x2] %vm231_vm2, %v3725_v34  ;;  %v3795_v43 = vmul.f32 %v10577_v0, %v3793_v49  ;;  %v3796_v17 = vmul.f32 %v10577_v0, %v3794_v1  ;;  %v3761_v21 = vmax.f32 %v3759_v32, 0.0  ;;  %v3762_v30 = vmax.f32 %v3760_v60, 0.0 }
 0x3d7   : > { %3727 = vst.msk [vmem:[#allocation2 + $0x13] sm:$0xff] %vm228_vm1, %v3725_v34  ;;  %3728 = vst.msk [vmem:[#allocation2 + $0x1b] sm:$0xff] %vm228_vm1, %v3726_v7  ;;  %v3773_v40 = vmax.f32 %v3771_v3, 0.0  ;;  %v3774_v48 = vmax.f32 %v3772_v41, 0.0  ;;  %v3785_v49 = vmax.f32 %v3783_v19, 0.0  ;;  %v3786_v1 = vmax.f32 %v3784_v35, 0.0 }
 0x3d8   : > { %3739 = vst.msk [vmem:[#allocation2 + $0x25] sm:$0xff] %vm228_vm1, %v3737_v63  ;;  %3740 = vst.msk [vmem:[#allocation2 + $0x2d] sm:$0xff] %vm228_vm1, %v3738_v25  ;;  %v3797_v57 = vmax.f32 %v3795_v43, 0.0  ;;  %v3798_v61 = vmax.f32 %v3796_v17, 0.0  ;;  %v3807_v2 = vmul.f32 %v10577_v0, %v3805_v9  ;;  %v3808_v31 = vmul.f32 %v10577_v0, %v3806_v20 }
 0x3d9   : > { %3741 = vst.msk [vmem:[#allocation2 + $0x23] sm:$0x2] %vm231_vm2, %v3737_v63  ;;  %3753 = vst.msk [vmem:[#allocation2 + $0x35] sm:$0x2] %vm231_vm2, %v3749_v18  ;;  %v3819_v29 = vmul.f32 %v10577_v0, %v3817_v58  ;;  %v3820_v24 = vmul.f32 %v10577_v0, %v3818_v15  ;;  %v3831_v10 = vmul.f32 %v10577_v0, %v3829_v54  ;;  %v9730_v63 = vld [vmem:[%s11637_s3 + $0x2] sm:$0x3] }
 0x3da   : > { %3742 = vst.msk [vmem:[#allocation2 + $0x2f] sm:$0x40] %vm233_vm3, %v3738_v25  ;;  %3754 = vst.msk [vmem:[#allocation2 + $0x41] sm:$0x40] %vm233_vm3, %v3750_v6  ;;  %v3832_v26 = vmul.f32 %v10577_v0, %v3830_v55  ;;  %v3843_v9 = vmul.f32 %v10577_v0, %v3841_v53  ;;  %v3844_v20 = vmul.f32 %v10577_v0, %v3842_v28  ;;  %v3809_v12 = vmax.f32 %v3807_v2, 0.0 }
 0x3db   : > { %3751 = vst.msk [vmem:[#allocation2 + $0x37] sm:$0xff] %vm228_vm1, %v3749_v18  ;;  %3752 = vst.msk [vmem:[#allocation2 + $0x3f] sm:$0xff] %vm228_vm1, %v3750_v6  ;;  %v3810_v23 = vmax.f32 %v3808_v31, 0.0  ;;  %v3821_v50 = vmax.f32 %v3819_v29, 0.0  ;;  %v3822_v11 = vmax.f32 %v3820_v24, 0.0  ;;  %v3833_v14 = vmax.f32 %v3831_v10, 0.0 }
 0x3dc   : > { %3763 = vst.msk [vmem:[#allocation2 + $0x49] sm:$0xff] %vm228_vm1, %v3761_v21  ;;  %3764 = vst.msk [vmem:[#allocation2 + $0x51] sm:$0xff] %vm228_vm1, %v3762_v30  ;;  %v3834_v58 = vmax.f32 %v3832_v26, 0.0  ;;  %v3845_v45 = vmax.f32 %v3843_v9, 0.0  ;;  %v3846_v15 = vmax.f32 %v3844_v20, 0.0  ;;  %v3855_v54 = vmul.f32 %v10577_v0, %v3853_v16 }
 0x3dd   : > { %3765 = vst.msk [vmem:[#allocation2 + $0x47] sm:$0x2] %vm231_vm2, %v3761_v21  ;;  %3777 = vst.msk [vmem:[#allocation2 + $0x59] sm:$0x2] %vm231_vm2, %v3773_v40  ;;  %v3856_v55 = vmul.f32 %v10577_v0, %v3854_v52  ;;  %v3867_v53 = vmul.f32 %v10577_v0, %v3865_v5  ;;  %v3868_v28 = vmul.f32 %v10577_v0, %v3866_v38  ;;  %v4366_v25 = vsel %vm469_vm0, %v9730_v63, 0 }
 0x3de   : > { %3766 = vst.msk [vmem:[#allocation2 + $0x53] sm:$0x40] %vm233_vm3, %v3762_v30  ;;  %3778 = vst.msk [vmem:[#allocation2 + $0x65] sm:$0x40] %vm233_vm3, %v3774_v48  ;;  %v3879_v52 = vmul.f32 %v10577_v0, %v3877_v42  ;;  %v3880_v59 = vmul.f32 %v10577_v0, %v3878_v13  ;;  %v3891_v5 = vmul.f32 %v10577_v0, %v3889_v36  ;;  %v3857_v56 = vmax.f32 %v3855_v54, 0.0  ;;  %v3933_v4 = vld [vmem:[#allocation2 + $0x18] sm:$0xff] }
 0x3df   : > { %3775 = vst.msk [vmem:[#allocation2 + $0x5b] sm:$0xff] %vm228_vm1, %v3773_v40  ;;  %3776 = vst.msk [vmem:[#allocation2 + $0x63] sm:$0xff] %vm228_vm1, %v3774_v48  ;;  %v3912_v37 = vld [vmem:[#allocation2 + $0x2c] sm:$0xff]  ;;  %v3904_v44 = vmul.f32 %v10577_v0, %v3902_v46  ;;  %v3858_v38 = vmax.f32 %v3856_v55, 0.0  ;;  %v3869_v0 = vmax.f32 %v3867_v53, 0.0  ;;  %v3870_v8 = vmax.f32 %v3868_v28, 0.0 }
 0x3e0   : > { %3787 = vst.msk [vmem:[#allocation2 + $0x6d] sm:$0xff] %vm228_vm1, %v3785_v49  ;;  %3788 = vst.msk [vmem:[#allocation2 + $0x75] sm:$0xff] %vm228_vm1, %v3786_v1  ;;  %v3911_v51 = vld [vmem:[#allocation2 + $0x24] sm:$0xff]  ;;  %v3881_v42 = vmax.f32 %v3879_v52, 0.0  ;;  %v3882_v62 = vmax.f32 %v3880_v59, 0.0  ;;  %v3893_v13 = vmax.f32 %v3891_v5, 0.0 }
 0x3e1   : > { %3789 = vst.msk [vmem:[#allocation2 + $0x6b] sm:$0x2] %vm231_vm2, %v3785_v49  ;;  %3801 = vst.msk [vmem:[#allocation2 + $0x7d] sm:$0x2] %vm231_vm2, %v3797_v57  ;;  %v3913_v16 = vld [vmem:[#allocation2 + $0x34] sm:$0x3]  ;;  %v10726_v36 = vpack.c.bf16 %v3912_v37, %v3911_v51 }
 0x3e2   : > { %3790 = vst.msk [vmem:[#allocation2 + $0x77] sm:$0x40] %vm233_vm3, %v3786_v1  ;;  %3802 = vst.msk [vmem:[#allocation2 + $0x89] sm:$0x40] %vm233_vm3, %v3798_v61  ;;  %v3906_v47 = vmax.f32 %v3904_v44, 0.0  ;;  %v3934_v46 = vld [vmem:[#allocation2 + $0x20] sm:$0xff] }
 0x3e3   : > { %3799 = vst.msk [vmem:[#allocation2 + $0x7f] sm:$0xff] %vm228_vm1, %v3797_v57  ;;  %3800 = vst.msk [vmem:[#allocation2 + $0x87] sm:$0xff] %vm228_vm1, %v3798_v61  ;;  %v3935_v22 = vld [vmem:[#allocation2 + $0x28] sm:$0xff]  ;;  %v10744_v6 = vld [vmem:[%s11637_s3 + $0x4] sm:$0x3] }
 0x3e4   : > { %3811 = vst.msk [vmem:[#allocation2 + $0x91] sm:$0xff] %vm228_vm1, %v3809_v12  ;;  %3812 = vst.msk [vmem:[#allocation2 + $0x99] sm:$0xff] %vm228_vm1, %v3810_v23  ;;  %v3968_v18 = vpack.c.bf16 %v3935_v22, %v3934_v46  ;;  %v3936_v32 = vld [vmem:[#allocation2 + $0x30] sm:$0xff]  ;;  %v3937_v60 = vld [vmem:[#allocation2 + $0x38] sm:$0xff] }
 0x3e5   : > { %3813 = vst.msk [vmem:[#allocation2 + $0x8f] sm:$0x2] %vm231_vm2, %v3809_v12  ;;  %3825 = vst.msk [vmem:[#allocation2 + $0xa1] sm:$0x2] %vm231_vm2, %v3821_v50  ;;  %v3938_v3 = vld [vmem:[#allocation2 + $0x40] sm:$0xff]  ;;  %v3939_v41 = vld [vmem:[#allocation2 + $0x48] sm:$0xff]  ;;  %v3969_v19 = vpack.c.bf16 %v3937_v60, %v3936_v32 }
 0x3e6   : > { %3814 = vst.msk [vmem:[#allocation2 + $0x9b] sm:$0x40] %vm233_vm3, %v3810_v23  ;;  %3826 = vst.msk [vmem:[#allocation2 + $0xad] sm:$0x40] %vm233_vm3, %v3822_v11  ;;  %v3970_v35 = vpack.c.bf16 %v3939_v41, %v3938_v3  ;;  %v3940_v43 = vld [vmem:[#allocation2 + $0x50] sm:$0xff]  ;;  %v3941_v17 = vld [vmem:[#allocation2 + $0x58] sm:$0xff] }
 0x3e7   : > { %3823 = vst.msk [vmem:[#allocation2 + $0xa3] sm:$0xff] %vm228_vm1, %v3821_v50  ;;  %3824 = vst.msk [vmem:[#allocation2 + $0xab] sm:$0xff] %vm228_vm1, %v3822_v11  ;;  %v3942_v21 = vld [vmem:[#allocation2 + $0x60] sm:$0xff]  ;;  %v3971_v40 = vpack.c.bf16 %v3941_v17, %v3940_v43  ;;  %v3944_v49 = vld [vmem:[#allocation2 + $0x70] sm:$0xff] }
 0x3e8   : > { %3835 = vst.msk [vmem:[#allocation2 + $0xb5] sm:$0xff] %vm228_vm1, %v3833_v14  ;;  %3836 = vst.msk [vmem:[#allocation2 + $0xbd] sm:$0xff] %vm228_vm1, %v3834_v58  ;;  %v3943_v30 = vld [vmem:[#allocation2 + $0x68] sm:$0xff]  ;;  %v4261_v63 = vld [vmem:[#allocation2 + $0x31] sm:$0xff] }
 0x3e9   : > { %3837 = vst.msk [vmem:[#allocation2 + $0xb3] sm:$0x2] %vm231_vm2, %v3833_v14  ;;  %3849 = vst.msk [vmem:[#allocation2 + $0xc5] sm:$0x2] %vm231_vm2, %v3845_v45  ;;  %v3972_v48 = vpack.c.bf16 %v3943_v30, %v3942_v21  ;;  %v4259_v46 = vld [vmem:[#allocation2 + $0x21] sm:$0xff]  ;;  %v4260_v22 = vld [vmem:[#allocation2 + $0x29] sm:$0xff] }
 0x3ea   : > { %3838 = vst.msk [vmem:[#allocation2 + $0xbf] sm:$0x40] %vm233_vm3, %v3834_v58  ;;  %3850 = vst.msk [vmem:[#allocation2 + $0xd1] sm:$0x40] %vm233_vm3, %v3846_v15  ;;  %v3945_v1 = vld [vmem:[#allocation2 + $0x78] sm:$0xff]  ;;  %v3946_v57 = vld [vmem:[#allocation2 + $0x80] sm:$0xff] }
 0x3eb   : > { %3847 = vst.msk [vmem:[#allocation2 + $0xc7] sm:$0xff] %vm228_vm1, %v3845_v45  ;;  %3848 = vst.msk [vmem:[#allocation2 + $0xcf] sm:$0xff] %vm228_vm1, %v3846_v15  ;;  %v3947_v61 = vld [vmem:[#allocation2 + $0x88] sm:$0xff]  ;;  %v3973_v2 = vpack.c.bf16 %v3945_v1, %v3944_v49  ;;  %v3949_v24 = vld [vmem:[#allocation2 + $0x98] sm:$0xff] }
 0x3ec   : > { %3914 = vst.msk [vmem:[#allocation2] sm:$0xff] %vm228_vm1, %v3911_v51  ;;  %3915 = vst.msk [vmem:[#allocation2 + $0x8] sm:$0xff] %vm228_vm1, %v3912_v37  ;;  %v3974_v31 = vpack.c.bf16 %v3947_v61, %v3946_v57  ;;  %v3948_v29 = vld [vmem:[#allocation2 + $0x90] sm:$0xff]  ;;  %v4266_v41 = vld [vmem:[#allocation2 + $0x59] sm:$0xff] }
 0x3ed   : > { %3916 = vst.msk [vmem:[#allocation2 + $0x10] sm:$0x3] %vm345_vm4, %v3913_v16  ;;  %v3975_v9 = vpack.c.bf16 %v3949_v24, %v3948_v29  ;;  %v4264_v32 = vld [vmem:[#allocation2 + $0x49] sm:$0xff]  ;;  %v4265_v3 = vld [vmem:[#allocation2 + $0x51] sm:$0xff]  ;;  %v4270_v30 = vld [vmem:[#allocation2 + $0x79] sm:$0xff] }
 0x3ee   : > { %3859 = vst.msk [vmem:[#allocation2 + $0xd9] sm:$0xff] %vm228_vm1, %v3857_v56  ;;  %3860 = vst.msk [vmem:[#allocation2 + $0xe1] sm:$0xff] %vm228_vm1, %v3858_v38  ;;  %v3950_v10 = vld [vmem:[#allocation2 + $0xa0] sm:$0xff]  ;;  %v3951_v26 = vld [vmem:[#allocation2 + $0xa8] sm:$0xff]  ;;  %v4296_v43 = vpack.c.bf16 %v4266_v41, %v4265_v3 }
 0x3ef   : > { %3861 = vst.msk [vmem:[#allocation2 + $0xd7] sm:$0x2] %vm231_vm2, %v3857_v56  ;;  %3873 = vst.msk [vmem:[#allocation2 + $0xe9] sm:$0x2] %vm231_vm2, %v3869_v0  ;;  %v3976_v20 = vpack.c.bf16 %v3951_v26, %v3950_v10  ;;  %v3953_v23 = vld [vmem:[#allocation2 + $0xb8] sm:$0xff] }
 0x3f0   : > { %3862 = vst.msk [vmem:[#allocation2 + $0xe3] sm:$0x40] %vm233_vm3, %v3858_v38  ;;  %3874 = vst.msk [vmem:[#allocation2 + $0xf5] sm:$0x40] %vm233_vm3, %v3870_v8  ;;  %v3952_v12 = vld [vmem:[#allocation2 + $0xb0] sm:$0xff]  ;;  %v4274_v61 = vld [vmem:[#allocation2 + $0x99] sm:$0xff] }
 0x3f1   : > { %3871 = vst.msk [vmem:[#allocation2 + $0xeb] sm:$0xff] %vm228_vm1, %v3869_v0  ;;  %3872 = vst.msk [vmem:[#allocation2 + $0xf3] sm:$0xff] %vm228_vm1, %v3870_v8  ;;  %v3977_v14 = vpack.c.bf16 %v3953_v23, %v3952_v12  ;;  %v3965_v0 = vld [vmem:[#allocation2 + $0x118] sm:$0x3f] }
 0x3f2   : > { %3883 = vst.msk [vmem:[#allocation2 + $0xfd] sm:$0xff] %vm228_vm1, %v3881_v42  ;;  %3884 = vst.msk [vmem:[#allocation2 + $0x105] sm:$0xff] %vm228_vm1, %v3882_v62  ;;  %v3954_v50 = vld [vmem:[#allocation2 + $0xc0] sm:$0xff]  ;;  %v3955_v11 = vld [vmem:[#allocation2 + $0xc8] sm:$0xff] }
 0x3f3   : > { %3885 = vst.msk [vmem:[#allocation2 + $0xfb] sm:$0x2] %vm231_vm2, %v3881_v42  ;;  %3897 = vst.msk [vmem:[#allocation2 + $0x10d] sm:$0x2] %vm231_vm2, %v3893_v13  ;;  %v3930_v39 = vld [vmem:[#allocation2] sm:$0xff]  ;;  %v3931_v33 = vld [vmem:[#allocation2 + $0x8] sm:$0xff]  ;;  %v3978_v58 = vpack.c.bf16 %v3955_v11, %v3954_v50 }
 0x3f4   : > { %3886 = vst.msk [vmem:[#allocation2 + $0x107] sm:$0x40] %vm233_vm3, %v3882_v62  ;;  %3910 = vst.msk [vmem:[#allocation2 + $0x12b] sm:$0x40] %vm233_vm3, %v3906_v47  ;;  %v3932_v27 = vld [vmem:[#allocation2 + $0x10] sm:$0xff]  ;;  %v3966_v34 = vpack.c.bf16 %v3931_v33, %v3930_v39  ;;  %v4255_v8 = vld [vmem:[#allocation2 + $0x1] sm:$0xff] }
 0x3f5   : > { %3895 = vst.msk [vmem:[#allocation2 + $0x10f] sm:$0xff] %vm228_vm1, %v3893_v13  ;;  %3908 = vst.msk [vmem:[#allocation2 + $0x129] sm:$0xff] %vm228_vm1, %v3906_v47  ;;  %v3967_v7 = vpack.c.bf16 %v3933_v4, %v3932_v27  ;;  %v3956_v45 = vld [vmem:[#allocation2 + $0xd0] sm:$0xff]  ;;  %v3958_v54 = vld [vmem:[#allocation2 + $0xe0] sm:$0xff]  ;;  %v4692_v27 = vsel %vm469_vm0, %v10744_v6, 0 }
 0x3f6   : > { %8712 = vmatprep.mubr.msk.bf16.mxu1 %vm228_vm1, %v3966_v34  ;;  %v3957_v15 = vld [vmem:[#allocation2 + $0xd8] sm:$0xff]  ;;  %v4256_v42 = vld [vmem:[#allocation2 + $0x9] sm:$0xff]  ;;  %v4293_v34 = vpack.c.bf16 %v4260_v22, %v4259_v46 }
 0x3f7   : > { %8713 = vmatmul.mubr.msk.bf16.vlgmr.msra.gmra.mrb[0].mxu1 %vm228_vm1, %v3967_v7  ;;  %v3979_v53 = vpack.c.bf16 %v3957_v15, %v3956_v45  ;;  %v3919_v13 = vld [vmem:[#allocation2 + $0x11e] sm:$0x3]  ;;  %v4291_v47 = vpack.c.bf16 %v4256_v42, %v4255_v8  ;;  %v4257_v4 = vld [vmem:[#allocation2 + $0x11] sm:$0xff]  ;;  %v10780_v7 = vld [vmem:[%s11637_s3 + $0x6] sm:$0x3] }
 0x3f8   : > { %8749 = vmatpush3.bf16.msra.mxu1 %v4366_v25  ;;  %8716 = vmatprep.mubr.msk.bf16.mxu1 %vm228_vm1, %v3968_v18  ;;  %v3959_v55 = vld [vmem:[#allocation2 + $0xe8] sm:$0xff]  ;;  %v3960_v16 = vld [vmem:[#allocation2 + $0xf0] sm:$0xff]  ;;  %3922 = vst.msk [vmem:[#allocation2 + $0x142] sm:$0x3] %vm345_vm4, %v3919_v13  ;;  %v4258_v39 = vld [vmem:[#allocation2 + $0x19] sm:$0xff] }
 0x3f9   : > { %9711 = vmatprep.subr.msk.bf16.mxu1 %vm469_vm0, %v10744_v6  ;;  %v3980_v28 = vpack.c.bf16 %v3959_v55, %v3958_v54  ;;  %v3962_v59 = vld [vmem:[#allocation2 + $0x100] sm:$0xff]  ;;  %v4292_v33 = vpack.c.bf16 %v4258_v39, %v4257_v4  ;;  %v4269_v21 = vld [vmem:[#allocation2 + $0x71] sm:$0xff]  ;;  %v5018_v4 = vsel %vm469_vm0, %v10780_v7, 0  ;;  %v10811_v22 = vld [vmem:[%s11637_s3 + $0x8] sm:$0x3] }
 0x3fa   : > { %v3961_v52 = vld [vmem:[#allocation2 + $0xf8] sm:$0xff]  ;;  %v4263_v18 = vld [vmem:[#allocation2 + $0x41] sm:$0xff]  ;;  %v4298_v49 = vpack.c.bf16 %v4270_v30, %v4269_v21  ;;  %v4586_v13 = vld [vmem:[#allocation2 + $0x2a] sm:$0xff] }
 0x3fb   : > { %v3981_v44 = vpack.c.bf16 %v3961_v52, %v3960_v16  ;;  %v4262_v25 = vld [vmem:[#allocation2 + $0x39] sm:$0xff]  ;;  %v4295_v6 = vpack.c.bf16 %v4264_v32, %v4263_v18  ;;  %v4273_v57 = vld [vmem:[#allocation2 + $0x91] sm:$0xff]  ;;  %v4593_v32 = vld [vmem:[#allocation2 + $0x62] sm:$0xff] }
 0x3fc   : > { %v10762_v51 = vld [vmem:[#allocation2 + $0x10e] sm:$0xff]  ;;  %v10766_v37 = vld [vmem:[#allocation2 + $0x116] sm:$0xff]  ;;  %v4294_v60 = vpack.c.bf16 %v4262_v25, %v4261_v63  ;;  %v4300_v29 = vpack.c.bf16 %v4274_v61, %v4273_v57 }
 0x3fd   : > { %3920 = vst.msk [vmem:[#allocation2 + $0x132] sm:$0xff] %vm228_vm1, %v10762_v51  ;;  %3921 = vst.msk [vmem:[#allocation2 + $0x13a] sm:$0xff] %vm228_vm1, %v10766_v37  ;;  %v3963_v5 = vld [vmem:[#allocation2 + $0x108] sm:$0xff]  ;;  %v3964_v38 = vld [vmem:[#allocation2 + $0x110] sm:$0xff] }
 0x3fe   : > { %v3982_v56 = vpack.c.bf16 %v3963_v5, %v3962_v59  ;;  %v3983_v62 = vpack.c.bf16 %v3965_v0, %v3964_v38  ;;  %v4277_v10 = vld [vmem:[#allocation2 + $0xb1] sm:$0xff]  ;;  %v4278_v26 = vld [vmem:[#allocation2 + $0xb9] sm:$0xff] }
 0x3ff   : > { %8717 = vmatmul.mubr.msk.bf16.gmra.mrb[4].mxu1 %vm228_vm1, %v3969_v19  ;;  %v4267_v19 = vld [vmem:[#allocation2 + $0x61] sm:$0xff]  ;;  %v4302_v12 = vpack.c.bf16 %v4278_v26, %v4277_v10  ;;  %v4281_v50 = vld [vmem:[#allocation2 + $0xd1] sm:$0xff]  ;;  %v4282_v11 = vld [vmem:[#allocation2 + $0xd9] sm:$0xff] }
 0x400   : > { %8720 = vmatprep.mubr.msk.bf16.mxu1 %vm228_vm1, %v3970_v35  ;;  %v4268_v35 = vld [vmem:[#allocation2 + $0x69] sm:$0xff]  ;;  %v4304_v45 = vpack.c.bf16 %v4282_v11, %v4281_v50  ;;  %v4285_v54 = vld [vmem:[#allocation2 + $0xf1] sm:$0xff]  ;;  %v4286_v55 = vld [vmem:[#allocation2 + $0xf9] sm:$0xff] }
 0x401   : > { %v4297_v17 = vpack.c.bf16 %v4268_v35, %v4267_v19  ;;  %v4306_v16 = vpack.c.bf16 %v4286_v55, %v4285_v54  ;;  %v4289_v59 = vld [vmem:[#allocation2 + $0x111] sm:$0xff]  ;;  %v4290_v5 = vld [vmem:[#allocation2 + $0x119] sm:$0x3f]  ;;  %v4597_v35 = vld [vmem:[#allocation2 + $0x82] sm:$0xff] }
 0x402   : > { %v4308_v38 = vpack.c.bf16 %v4290_v5, %v4289_v59  ;;  %v4583_v8 = vld [vmem:[#allocation2 + $0x12] sm:$0xff]  ;;  %v4584_v42 = vld [vmem:[#allocation2 + $0x1a] sm:$0xff] }
 0x403   : > { %v4587_v39 = vld [vmem:[#allocation2 + $0x32] sm:$0xff]  ;;  %v4592_v18 = vld [vmem:[#allocation2 + $0x5a] sm:$0xff] }
 0x404   : > { %v4591_v25 = vld [vmem:[#allocation2 + $0x52] sm:$0xff]  ;;  %v4596_v19 = vld [vmem:[#allocation2 + $0x7a] sm:$0xff] }
 0x405   : > { %v4595_v41 = vld [vmem:[#allocation2 + $0x72] sm:$0xff]  ;;  %v4940_v59 = vld [vmem:[#allocation2 + $0x11a] sm:$0xff] }
 0x406   : > { %v4599_v30 = vld [vmem:[#allocation2 + $0x92] sm:$0xff] }
 0x407   : > { %8721 = vmatmul.mubr.msk.bf16.gmra.mrb[8].mxu1 %vm228_vm1, %v3971_v40  ;;  %v4271_v40 = vld [vmem:[#allocation2 + $0x81] sm:$0xff]  ;;  %v4603_v61 = vld [vmem:[#allocation2 + $0xb2] sm:$0xff] }
 0x408   : > { %8724 = vmatprep.mubr.msk.bf16.mxu1 %vm228_vm1, %v3972_v48  ;;  %v4272_v48 = vld [vmem:[#allocation2 + $0x89] sm:$0xff]  ;;  %v4607_v26 = vld [vmem:[#allocation2 + $0xd2] sm:$0xff] }
 0x409   : > { %v4299_v1 = vpack.c.bf16 %v4272_v48, %v4271_v40  ;;  %v4600_v40 = vld [vmem:[#allocation2 + $0x9a] sm:$0xff]  ;;  %v4601_v48 = vld [vmem:[#allocation2 + $0xa2] sm:$0xff]  ;;  %v4611_v11 = vld [vmem:[#allocation2 + $0xf2] sm:$0xff] }
 0x40a   : > { %v4615_v55 = vld [vmem:[#allocation2 + $0x112] sm:$0xff] }
 0x40b   : > { %v4959_v5 = vpack.c.bf16 %v4940_v59, %v4615_v55  ;;  %v5560_v59 = vld [vmem:[#allocation2 + $0x1c] sm:$0xff] }
 0x40f   : > { %8725 = vmatmul.mubr.msk.bf16.gmra.mrb[12].mxu1 %vm228_vm1, %v3973_v2  ;;  %v4275_v2 = vld [vmem:[#allocation2 + $0xa1] sm:$0xff] }
 0x410   : > { %8728 = vmatprep.mubr.msk.bf16.mxu1 %vm228_vm1, %v3974_v31  ;;  %v4276_v31 = vld [vmem:[#allocation2 + $0xa9] sm:$0xff] }
 0x411   : > { %v4301_v24 = vpack.c.bf16 %v4276_v31, %v4275_v2  ;;  %v4604_v2 = vld [vmem:[#allocation2 + $0xba] sm:$0xff]  ;;  %v4605_v31 = vld [vmem:[#allocation2 + $0xc2] sm:$0xff] }
 0x417   : > { %8729 = vmatmul.mubr.msk.bf16.gmra.mrb[16].mxu1 %vm228_vm1, %v3975_v9  ;;  %v4279_v9 = vld [vmem:[#allocation2 + $0xc1] sm:$0xff] }
 0x418   : > { %8732 = vmatprep.mubr.msk.bf16.mxu1 %vm228_vm1, %v3976_v20  ;;  %v4280_v20 = vld [vmem:[#allocation2 + $0xc9] sm:$0xff] }
 0x419   : > { %v4303_v23 = vpack.c.bf16 %v4280_v20, %v4279_v9  ;;  %v4608_v9 = vld [vmem:[#allocation2 + $0xda] sm:$0xff]  ;;  %v4609_v20 = vld [vmem:[#allocation2 + $0xe2] sm:$0xff] }
 0x41f   : > { %8733 = vmatmul.mubr.msk.bf16.gmra.mrb[20].mxu1 %vm228_vm1, %v3977_v14  ;;  %v4283_v14 = vld [vmem:[#allocation2 + $0xe1] sm:$0xff] }
 0x420   : > { %8736 = vmatprep.mubr.msk.bf16.mxu1 %vm228_vm1, %v3978_v58  ;;  %v4284_v58 = vld [vmem:[#allocation2 + $0xe9] sm:$0xff] }
 0x421   : > { %v4305_v15 = vpack.c.bf16 %v4284_v58, %v4283_v14  ;;  %v4612_v14 = vld [vmem:[#allocation2 + $0xfa] sm:$0xff]  ;;  %v4613_v58 = vld [vmem:[#allocation2 + $0x102] sm:$0xff] }
 0x427   : > { %8737 = vmatmul.mubr.msk.bf16.gmra.mrb[24].mxu1 %vm228_vm1, %v3979_v53  ;;  %v4287_v53 = vld [vmem:[#allocation2 + $0x101] sm:$0xff] }
 0x428   : > { %8740 = vmatprep.mubr.msk.bf16.mxu1 %vm228_vm1, %v3980_v28  ;;  %v4288_v28 = vld [vmem:[#allocation2 + $0x109] sm:$0xff] }
 0x429   : > { %v4307_v52 = vpack.c.bf16 %v4288_v28, %v4287_v53  ;;  %v4616_v53 = vld [vmem:[#allocation2 + $0x11a] sm:$0x3f] }
 0x42a   : > { %v4634_v28 = vpack.c.bf16 %v4616_v53, %v4615_v55 }
 0x42f   : > { %8741 = vmatmul.mubr.msk.bf16.gmra.mrb[28].mxu1 %vm228_vm1, %v3981_v44  ;;  %v4581_v44 = vld [vmem:[#allocation2 + $0x2] sm:$0xff] }
 0x430   : > { %8744 = vmatprep.mubr.msk.bf16.mxu1 %vm228_vm1, %v3982_v56  ;;  %v4582_v56 = vld [vmem:[#allocation2 + $0xa] sm:$0xff] }
 0x431   : > { %v4617_v0 = vpack.c.bf16 %v4582_v56, %v4581_v44  ;;  %v4941_v44 = vld [vmem:[#allocation2 + $0x122] sm:$0xff]  ;;  %v4942_v56 = vld [vmem:[#allocation2 + $0x12a] sm:$0x3f] }
 0x437   : > { %8745 = vmatmul.mubr.msk.bf16.gmra.mrb[32].mxu1 %vm228_vm1, %v3983_v62  ;;  %v4585_v62 = vld [vmem:[#allocation2 + $0x22] sm:$0xff] }
 0x438   : > { %8750 = vmatprep.mubr.msk.bf16.mxu1 %vm228_vm1, %v4291_v47  ;;  %v10802_v47 = vpack.c.bf16 %v4584_v42, %v4583_v8  ;;  %v10806_v46 = vpack.c.bf16 %v4586_v13, %v4585_v62  ;;  %v4960_v8 = vpack.c.bf16 %v4942_v56, %v4941_v44  ;;  %v5235_v62 = vld [vmem:[#allocation2 + $0x23] sm:$0xff]  ;;  %v5236_v13 = vld [vmem:[#allocation2 + $0x2b] sm:$0xff]  ;;  %v5563_v56 = vld [vmem:[#allocation2 + $0x34] sm:$0xff] }
 0x43f   : > { %8751 = vmatmul.mubr.msk.bf16.vlgmr.msra.gmra.mrb[0].mxu1 %vm228_vm1, %v4292_v33  ;;  %v4588_v33 = vld [vmem:[#allocation2 + $0x3a] sm:$0xff] }
 0x440   : > { %8787 = vmatpush3.bf16.msra.mxu1 %v4692_v27  ;;  %8754 = vmatprep.mubr.msk.bf16.mxu1 %vm228_vm1, %v4293_v34  ;;  %v4589_v27 = vld [vmem:[#allocation2 + $0x42] sm:$0xff]  ;;  %v4590_v34 = vld [vmem:[#allocation2 + $0x4a] sm:$0xff] }
 0x441   : > { %9712 = vmatprep.subr.msk.bf16.mxu1 %vm469_vm0, %v10780_v7  ;;  %v4620_v7 = vpack.c.bf16 %v4588_v33, %v4587_v39  ;;  %v4621_v63 = vpack.c.bf16 %v4590_v34, %v4589_v27  ;;  %v10865_v33 = vld [vmem:[%s11637_s3 + $0xc] sm:$0x3]  ;;  %v5239_v27 = vld [vmem:[#allocation2 + $0x43] sm:$0xff] }
 0x442   : > { %v5240_v34 = vld [vmem:[#allocation2 + $0x4b] sm:$0xff] }
 0x447   : > { %8755 = vmatmul.mubr.msk.bf16.gmra.mrb[4].mxu1 %vm228_vm1, %v4294_v60  ;;  %v4594_v60 = vld [vmem:[#allocation2 + $0x6a] sm:$0xff] }
 0x448   : > { %8758 = vmatprep.mubr.msk.bf16.mxu1 %vm228_vm1, %v4295_v6  ;;  %v4622_v6 = vpack.c.bf16 %v4592_v18, %v4591_v25  ;;  %v4623_v3 = vpack.c.bf16 %v4594_v60, %v4593_v32  ;;  %v5272_v25 = vpack.c.bf16 %v5240_v34, %v5239_v27  ;;  %v5243_v32 = vld [vmem:[#allocation2 + $0x63] sm:$0xff]  ;;  %v5244_v60 = vld [vmem:[#allocation2 + $0x6b] sm:$0xff]  ;;  %v5571_v27 = vld [vmem:[#allocation2 + $0x74] sm:$0xff] }
 0x449   : > { %v5572_v34 = vld [vmem:[#allocation2 + $0x7c] sm:$0xff] }
 0x44f   : > { %8759 = vmatmul.mubr.msk.bf16.gmra.mrb[8].mxu1 %vm228_vm1, %v4296_v43  ;;  %v4598_v43 = vld [vmem:[#allocation2 + $0x8a] sm:$0xff] }
 0x450   : > { %8762 = vmatprep.mubr.msk.bf16.mxu1 %vm228_vm1, %v4297_v17  ;;  %v4624_v17 = vpack.c.bf16 %v4596_v19, %v4595_v41  ;;  %v4625_v21 = vpack.c.bf16 %v4598_v43, %v4597_v35  ;;  %v5274_v41 = vpack.c.bf16 %v5244_v60, %v5243_v32  ;;  %v5247_v35 = vld [vmem:[#allocation2 + $0x83] sm:$0xff]  ;;  %v5248_v43 = vld [vmem:[#allocation2 + $0x8b] sm:$0xff]  ;;  %v5575_v32 = vld [vmem:[#allocation2 + $0x94] sm:$0xff] }
 0x451   : > { %v5576_v60 = vld [vmem:[#allocation2 + $0x9c] sm:$0xff] }
 0x457   : > { %8763 = vmatmul.mubr.msk.bf16.gmra.mrb[12].mxu1 %vm228_vm1, %v4298_v49  ;;  %v4602_v49 = vld [vmem:[#allocation2 + $0xaa] sm:$0xff] }
 0x458   : > { %8766 = vmatprep.mubr.msk.bf16.mxu1 %vm228_vm1, %v4299_v1  ;;  %v4626_v1 = vpack.c.bf16 %v4600_v40, %v4599_v30  ;;  %v4627_v57 = vpack.c.bf16 %v4602_v49, %v4601_v48  ;;  %v5276_v30 = vpack.c.bf16 %v5248_v43, %v5247_v35  ;;  %v5251_v48 = vld [vmem:[#allocation2 + $0xa3] sm:$0xff]  ;;  %v5252_v49 = vld [vmem:[#allocation2 + $0xab] sm:$0xff]  ;;  %v5579_v35 = vld [vmem:[#allocation2 + $0xb4] sm:$0xff] }
 0x459   : > { %v5580_v43 = vld [vmem:[#allocation2 + $0xbc] sm:$0xff] }
 0x45f   : > { %8767 = vmatmul.mubr.msk.bf16.gmra.mrb[16].mxu1 %vm228_vm1, %v4300_v29  ;;  %v4606_v29 = vld [vmem:[#allocation2 + $0xca] sm:$0xff] }
 0x460   : > { %8770 = vmatprep.mubr.msk.bf16.mxu1 %vm228_vm1, %v4301_v24  ;;  %v4628_v24 = vpack.c.bf16 %v4604_v2, %v4603_v61  ;;  %v4629_v10 = vpack.c.bf16 %v4606_v29, %v4605_v31  ;;  %v5278_v61 = vpack.c.bf16 %v5252_v49, %v5251_v48  ;;  %v5255_v31 = vld [vmem:[#allocation2 + $0xc3] sm:$0xff]  ;;  %v5256_v29 = vld [vmem:[#allocation2 + $0xcb] sm:$0xff]  ;;  %v5583_v48 = vld [vmem:[#allocation2 + $0xd4] sm:$0xff] }
 0x461   : > { %v5584_v49 = vld [vmem:[#allocation2 + $0xdc] sm:$0xff] }
 0x467   : > { %8771 = vmatmul.mubr.msk.bf16.gmra.mrb[20].mxu1 %vm228_vm1, %v4302_v12  ;;  %v4610_v12 = vld [vmem:[#allocation2 + $0xea] sm:$0xff] }
 0x468   : > { %8774 = vmatprep.mubr.msk.bf16.mxu1 %vm228_vm1, %v4303_v23  ;;  %v4630_v23 = vpack.c.bf16 %v4608_v9, %v4607_v26  ;;  %v4631_v50 = vpack.c.bf16 %v4610_v12, %v4609_v20  ;;  %v5280_v26 = vpack.c.bf16 %v5256_v29, %v5255_v31  ;;  %v5259_v20 = vld [vmem:[#allocation2 + $0xe3] sm:$0xff]  ;;  %v5260_v12 = vld [vmem:[#allocation2 + $0xeb] sm:$0xff]  ;;  %v5587_v31 = vld [vmem:[#allocation2 + $0xf4] sm:$0xff] }
 0x469   : > { %v5588_v29 = vld [vmem:[#allocation2 + $0xfc] sm:$0xff] }
 0x46f   : > { %8775 = vmatmul.mubr.msk.bf16.gmra.mrb[24].mxu1 %vm228_vm1, %v4304_v45  ;;  %v4614_v45 = vld [vmem:[#allocation2 + $0x10a] sm:$0xff] }
 0x470   : > { %8778 = vmatprep.mubr.msk.bf16.mxu1 %vm228_vm1, %v4305_v15  ;;  %v4632_v15 = vpack.c.bf16 %v4612_v14, %v4611_v11  ;;  %v4633_v54 = vpack.c.bf16 %v4614_v45, %v4613_v58  ;;  %v5282_v11 = vpack.c.bf16 %v5260_v12, %v5259_v20  ;;  %v5263_v58 = vld [vmem:[#allocation2 + $0x103] sm:$0xff]  ;;  %v5264_v45 = vld [vmem:[#allocation2 + $0x10b] sm:$0xff]  ;;  %v5591_v20 = vld [vmem:[#allocation2 + $0x114] sm:$0xff] }
 0x471   : > { %v5284_v55 = vpack.c.bf16 %v5264_v45, %v5263_v58  ;;  %v5592_v12 = vld [vmem:[#allocation2 + $0x11c] sm:$0xff] }
 0x477   : > { %8779 = vmatmul.mubr.msk.bf16.gmra.mrb[28].mxu1 %vm228_vm1, %v4306_v16  ;;  %v5344_v16 = vsel %vm469_vm0, %v10811_v22, 0 }
 0x478   : > { %8782 = vmatprep.mubr.msk.bf16.mxu1 %vm228_vm1, %v4307_v52  ;;  %v7886_v52 = vld [vmem:[%s11637_s3 + $0xa] sm:$0x3] }
 0x47f   : > { %8783 = vmatmul.mubr.msk.bf16.gmra.mrb[32].mxu1 %vm228_vm1, %v4308_v38  ;;  %v5233_v38 = vld [vmem:[#allocation2 + $0x13] sm:$0xff] }
 0x480   : > { %8788 = vmatprep.mubr.msk.bf16.mxu1 %vm228_vm1, %v4617_v0  ;;  %v5234_v0 = vld [vmem:[#allocation2 + $0x1b] sm:$0xff] }
 0x481   : > { %v5269_v42 = vpack.c.bf16 %v5234_v0, %v5233_v38  ;;  %v5564_v38 = vld [vmem:[#allocation2 + $0x3c] sm:$0xff]  ;;  %v5996_v0 = vsel %vm469_vm0, %v10865_v33, 0 }
 0x487   : > { %8789 = vmatmul.mubr.msk.bf16.vlgmr.msra.gmra.mrb[0].mxu1 %vm228_vm1, %v10802_v47 }
 0x488   : > { %8825 = vmatpush3.bf16.msra.mxu1 %v5018_v4  ;;  %8792 = vmatprep.mubr.msk.bf16.mxu1 %vm228_vm1, %v10806_v46  ;;  %v5238_v4 = vld [vmem:[#allocation2 + $0x3b] sm:$0xff] }
 0x489   : > { %9713 = vmatprep.subr.msk.bf16.mxu1 %vm469_vm0, %v10811_v22  ;;  %v5670_v22 = vsel %vm469_vm0, %v7886_v52, 0 }
 0x48f   : > { %8793 = vmatmul.mubr.msk.bf16.gmra.mrb[4].mxu1 %vm228_vm1, %v4620_v7 }
 0x490   : > { %8796 = vmatprep.mubr.msk.bf16.mxu1 %vm228_vm1, %v4621_v63 }
 0x497   : > { %8797 = vmatmul.mubr.msk.bf16.gmra.mrb[8].mxu1 %vm228_vm1, %v4622_v6 }
 0x498   : > { %8800 = vmatprep.mubr.msk.bf16.mxu1 %vm228_vm1, %v4623_v3 }
 0x49f   : > { %8801 = vmatmul.mubr.msk.bf16.gmra.mrb[12].mxu1 %vm228_vm1, %v4624_v17 }
 0x4a0   : > { %8804 = vmatprep.mubr.msk.bf16.mxu1 %vm228_vm1, %v4625_v21 }
 0x4a7   : > { %8805 = vmatmul.mubr.msk.bf16.gmra.mrb[16].mxu1 %vm228_vm1, %v4626_v1 }
 0x4a8   : > { %8808 = vmatprep.mubr.msk.bf16.mxu1 %vm228_vm1, %v4627_v57 }
 0x4af   : > { %8809 = vmatmul.mubr.msk.bf16.gmra.mrb[20].mxu1 %vm228_vm1, %v4628_v24 }
 0x4b0   : > { %8812 = vmatprep.mubr.msk.bf16.mxu1 %vm228_vm1, %v4629_v10 }
 0x4b7   : > { %8813 = vmatmul.mubr.msk.bf16.gmra.mrb[24].mxu1 %vm228_vm1, %v4630_v23 }
 0x4b8   : > { %8816 = vmatprep.mubr.msk.bf16.mxu1 %vm228_vm1, %v4631_v50 }
 0x4bf   : > { %8817 = vmatmul.mubr.msk.bf16.gmra.mrb[28].mxu1 %vm228_vm1, %v4632_v15 }
 0x4c0   : > { %8820 = vmatprep.mubr.msk.bf16.mxu1 %vm228_vm1, %v4633_v54 }
 0x4c7   : > { %8821 = vmatmul.mubr.msk.bf16.gmra.mrb[32].mxu1 %vm228_vm1, %v4634_v28  ;;  %v5267_v28 = vld [vmem:[#allocation2 + $0x123] sm:$0xff] }
 0x4c8   : > { %8826 = vmatprep.mubr.msk.bf16.mxu1 %vm228_vm1, %v10802_v47  ;;  %v5237_v47 = vld [vmem:[#allocation2 + $0x33] sm:$0xff] }
 0x4c9   : > { %v5271_v39 = vpack.c.bf16 %v5238_v4, %v5237_v47  ;;  %v5567_v47 = vld [vmem:[#allocation2 + $0x54] sm:$0xff]  ;;  %v5568_v4 = vld [vmem:[#allocation2 + $0x5c] sm:$0xff] }
 0x4cf   : > { %8827 = vmatmul.mubr.msk.bf16.vlgmr.msra.gmra.mrb[0].mxu1 %vm228_vm1, %v10806_v46  ;;  %v5270_v46 = vpack.c.bf16 %v5236_v13, %v5235_v62  ;;  %v5565_v62 = vld [vmem:[#allocation2 + $0x44] sm:$0xff]  ;;  %v5566_v13 = vld [vmem:[#allocation2 + $0x4c] sm:$0xff] }
 0x4d0   : > { %8863 = vmatpush3.bf16.msra.mxu1 %v5344_v16  ;;  %8830 = vmatprep.mubr.msk.bf16.mxu1 %vm228_vm1, %v4620_v7  ;;  %v5241_v7 = vld [vmem:[#allocation2 + $0x53] sm:$0xff]  ;;  %v5268_v16 = vld [vmem:[#allocation2 + $0x12b] sm:$0x3f] }
 0x4d1   : > { %9714 = vmatprep.subr.msk.bf16.mxu1 %vm469_vm0, %v7886_v52  ;;  %v5559_v52 = vld [vmem:[#allocation2 + $0x14] sm:$0xff] }
 0x4d2   : > { %v5595_v44 = vpack.c.bf16 %v5560_v59, %v5559_v52 }
 0x4d7   : > { %8831 = vmatmul.mubr.msk.bf16.gmra.mrb[4].mxu1 %vm228_vm1, %v4621_v63  ;;  %v5242_v63 = vld [vmem:[#allocation2 + $0x5b] sm:$0xff] }
 0x4d8   : > { %8834 = vmatprep.mubr.msk.bf16.mxu1 %vm228_vm1, %v4622_v6  ;;  %v5273_v18 = vpack.c.bf16 %v5242_v63, %v5241_v7  ;;  %v5245_v6 = vld [vmem:[#allocation2 + $0x73] sm:$0xff]  ;;  %v5601_v63 = vpack.c.bf16 %v5572_v34, %v5571_v27  ;;  %v6223_v27 = vld [vmem:[#allocation2 + $0x85] sm:$0xff] }
 0x4d9   : > { %v6224_v34 = vld [vmem:[#allocation2 + $0x8d] sm:$0xff] }
 0x4df   : > { %8835 = vmatmul.mubr.msk.bf16.gmra.mrb[8].mxu1 %vm228_vm1, %v4623_v3  ;;  %v5246_v3 = vld [vmem:[#allocation2 + $0x7b] sm:$0xff] }
 0x4e0   : > { %8838 = vmatprep.mubr.msk.bf16.mxu1 %vm228_vm1, %v4624_v17  ;;  %v5275_v19 = vpack.c.bf16 %v5246_v3, %v5245_v6  ;;  %v5249_v17 = vld [vmem:[#allocation2 + $0x93] sm:$0xff]  ;;  %v5603_v3 = vpack.c.bf16 %v5576_v60, %v5575_v32  ;;  %v6227_v32 = vld [vmem:[#allocation2 + $0xa5] sm:$0xff] }
 0x4e1   : > { %v6228_v60 = vld [vmem:[#allocation2 + $0xad] sm:$0xff] }
 0x4e7   : > { %8839 = vmatmul.mubr.msk.bf16.gmra.mrb[12].mxu1 %vm228_vm1, %v4625_v21  ;;  %v5250_v21 = vld [vmem:[#allocation2 + $0x9b] sm:$0xff] }
 0x4e8   : > { %8842 = vmatprep.mubr.msk.bf16.mxu1 %vm228_vm1, %v4626_v1  ;;  %v5277_v40 = vpack.c.bf16 %v5250_v21, %v5249_v17  ;;  %v5253_v1 = vld [vmem:[#allocation2 + $0xb3] sm:$0xff]  ;;  %v5605_v21 = vpack.c.bf16 %v5580_v43, %v5579_v35  ;;  %v6231_v35 = vld [vmem:[#allocation2 + $0xc5] sm:$0xff] }
 0x4e9   : > { %v6232_v43 = vld [vmem:[#allocation2 + $0xcd] sm:$0xff] }
 0x4ef   : > { %8843 = vmatmul.mubr.msk.bf16.gmra.mrb[16].mxu1 %vm228_vm1, %v4627_v57  ;;  %v5254_v57 = vld [vmem:[#allocation2 + $0xbb] sm:$0xff] }
 0x4f0   : > { %8846 = vmatprep.mubr.msk.bf16.mxu1 %vm228_vm1, %v4628_v24  ;;  %v5279_v2 = vpack.c.bf16 %v5254_v57, %v5253_v1  ;;  %v5257_v24 = vld [vmem:[#allocation2 + $0xd3] sm:$0xff]  ;;  %v5607_v57 = vpack.c.bf16 %v5584_v49, %v5583_v48  ;;  %v6235_v48 = vld [vmem:[#allocation2 + $0xe5] sm:$0xff] }
 0x4f1   : > { %v6236_v49 = vld [vmem:[#allocation2 + $0xed] sm:$0xff] }
 0x4f7   : > { %8847 = vmatmul.mubr.msk.bf16.gmra.mrb[20].mxu1 %vm228_vm1, %v4629_v10  ;;  %v5258_v10 = vld [vmem:[#allocation2 + $0xdb] sm:$0xff] }
 0x4f8   : > { %8850 = vmatprep.mubr.msk.bf16.mxu1 %vm228_vm1, %v4630_v23  ;;  %v5281_v9 = vpack.c.bf16 %v5258_v10, %v5257_v24  ;;  %v5261_v23 = vld [vmem:[#allocation2 + $0xf3] sm:$0xff]  ;;  %v5609_v10 = vpack.c.bf16 %v5588_v29, %v5587_v31  ;;  %v6239_v31 = vld [vmem:[#allocation2 + $0x105] sm:$0xff] }
 0x4f9   : > { %v6240_v29 = vld [vmem:[#allocation2 + $0x10d] sm:$0xff] }
 0x4ff   : > { %8851 = vmatmul.mubr.msk.bf16.gmra.mrb[24].mxu1 %vm228_vm1, %v4631_v50  ;;  %v5262_v50 = vld [vmem:[#allocation2 + $0xfb] sm:$0xff] }
 0x500   : > { %8854 = vmatprep.mubr.msk.bf16.mxu1 %vm228_vm1, %v4632_v15  ;;  %v5283_v14 = vpack.c.bf16 %v5262_v50, %v5261_v23  ;;  %v5265_v15 = vld [vmem:[#allocation2 + $0x113] sm:$0xff]  ;;  %v5611_v50 = vpack.c.bf16 %v5592_v12, %v5591_v20 }
 0x501   : > { %v6244_v20 = vld [vmem:[#allocation2 + $0x12d] sm:$0xff] }
 0x507   : > { %8855 = vmatmul.mubr.msk.bf16.gmra.mrb[28].mxu1 %vm228_vm1, %v4633_v54  ;;  %v5266_v54 = vld [vmem:[#allocation2 + $0x11b] sm:$0xff] }
 0x508   : > { %8858 = vmatprep.mubr.msk.bf16.mxu1 %vm228_vm1, %v4959_v5  ;;  %v5285_v53 = vpack.c.bf16 %v5266_v54, %v5265_v15  ;;  %v5286_v5 = vpack.c.bf16 %v5268_v16, %v5267_v28  ;;  %v7943_v15 = vld [vmem:[%s11637_s3 + $0x10] sm:$0x3]  ;;  %v6211_v28 = vld [vmem:[#allocation2 + $0x25] sm:$0xff] }
 0x509   : > { %v6212_v16 = vld [vmem:[#allocation2 + $0x2d] sm:$0xff] }
 0x50a   : > { %v6247_v59 = vpack.c.bf16 %v6212_v16, %v6211_v28  ;;  %v6542_v28 = vld [vmem:[#allocation2 + $0x4e] sm:$0xff] }
 0x50f   : > { %8859 = vmatmul.mubr.msk.bf16.gmra.mrb[32].mxu1 %vm228_vm1, %v4960_v8  ;;  %v10889_v8 = vpack.c.bf16 %v5564_v38, %v5563_v56  ;;  %v6215_v56 = vld [vmem:[#allocation2 + $0x45] sm:$0xff]  ;;  %v6216_v38 = vld [vmem:[#allocation2 + $0x4d] sm:$0xff] }
 0x510   : > { %8864 = vmatprep.mubr.msk.bf16.mxu1 %vm228_vm1, %v5269_v42  ;;  %v10894_v42 = vld [vmem:[%s11637_s3 + $0xe] sm:$0x3] }
 0x511   : > { %v6322_v45 = vsel %vm469_vm0, %v10894_v42, 0 }
 0x517   : > { %8865 = vmatmul.mubr.msk.bf16.vlgmr.msra.gmra.mrb[0].mxu1 %vm228_vm1, %v5270_v46  ;;  %v5598_v46 = vpack.c.bf16 %v5566_v13, %v5565_v62  ;;  %v6217_v62 = vld [vmem:[#allocation2 + $0x55] sm:$0xff]  ;;  %v6218_v13 = vld [vmem:[#allocation2 + $0x5d] sm:$0xff] }
 0x518   : > { %8901 = vmatpush3.bf16.msra.mxu1 %v5670_v22  ;;  %8868 = vmatprep.mubr.msk.bf16.mxu1 %vm228_vm1, %v5271_v39  ;;  %v5599_v22 = vpack.c.bf16 %v5568_v4, %v5567_v47  ;;  %v5569_v39 = vld [vmem:[#allocation2 + $0x64] sm:$0xff]  ;;  %v6220_v4 = vld [vmem:[#allocation2 + $0x6d] sm:$0xff] }
 0x519   : > { %9715 = vmatprep.subr.msk.bf16.mxu1 %vm469_vm0, %v10865_v33  ;;  %v5570_v33 = vld [vmem:[#allocation2 + $0x6c] sm:$0xff] }
 0x51a   : > { %v5600_v7 = vpack.c.bf16 %v5570_v33, %v5569_v39  ;;  %v6219_v47 = vld [vmem:[#allocation2 + $0x65] sm:$0xff]  ;;  %v6221_v39 = vld [vmem:[#allocation2 + $0x75] sm:$0xff]  ;;  %v6222_v33 = vld [vmem:[#allocation2 + $0x7d] sm:$0xff] }
 0x51f   : > { %8869 = vmatmul.mubr.msk.bf16.gmra.mrb[4].mxu1 %vm228_vm1, %v5272_v25  ;;  %v5573_v25 = vld [vmem:[#allocation2 + $0x84] sm:$0xff] }
 0x520   : > { %8872 = vmatprep.mubr.msk.bf16.mxu1 %vm228_vm1, %v5273_v18  ;;  %v5574_v18 = vld [vmem:[#allocation2 + $0x8c] sm:$0xff] }
 0x521   : > { %v5602_v6 = vpack.c.bf16 %v5574_v18, %v5573_v25  ;;  %v6225_v25 = vld [vmem:[#allocation2 + $0x95] sm:$0xff]  ;;  %v6226_v18 = vld [vmem:[#allocation2 + $0x9d] sm:$0xff] }
 0x527   : > { %8873 = vmatmul.mubr.msk.bf16.gmra.mrb[8].mxu1 %vm228_vm1, %v5274_v41  ;;  %v5577_v41 = vld [vmem:[#allocation2 + $0xa4] sm:$0xff] }
 0x528   : > { %8876 = vmatprep.mubr.msk.bf16.mxu1 %vm228_vm1, %v5275_v19  ;;  %v5578_v19 = vld [vmem:[#allocation2 + $0xac] sm:$0xff] }
 0x529   : > { %v5604_v17 = vpack.c.bf16 %v5578_v19, %v5577_v41  ;;  %v6229_v41 = vld [vmem:[#allocation2 + $0xb5] sm:$0xff]  ;;  %v6230_v19 = vld [vmem:[#allocation2 + $0xbd] sm:$0xff] }
 0x52f   : > { %8877 = vmatmul.mubr.msk.bf16.gmra.mrb[12].mxu1 %vm228_vm1, %v5276_v30  ;;  %v5581_v30 = vld [vmem:[#allocation2 + $0xc4] sm:$0xff] }
 0x530   : > { %8880 = vmatprep.mubr.msk.bf16.mxu1 %vm228_vm1, %v5277_v40  ;;  %v5582_v40 = vld [vmem:[#allocation2 + $0xcc] sm:$0xff] }
 0x531   : > { %v5606_v1 = vpack.c.bf16 %v5582_v40, %v5581_v30  ;;  %v6233_v30 = vld [vmem:[#allocation2 + $0xd5] sm:$0xff]  ;;  %v6234_v40 = vld [vmem:[#allocation2 + $0xdd] sm:$0xff] }
 0x537   : > { %8881 = vmatmul.mubr.msk.bf16.gmra.mrb[16].mxu1 %vm228_vm1, %v5278_v61  ;;  %v5585_v61 = vld [vmem:[#allocation2 + $0xe4] sm:$0xff] }
 0x538   : > { %8884 = vmatprep.mubr.msk.bf16.mxu1 %vm228_vm1, %v5279_v2  ;;  %v5586_v2 = vld [vmem:[#allocation2 + $0xec] sm:$0xff] }
 0x539   : > { %v5608_v24 = vpack.c.bf16 %v5586_v2, %v5585_v61  ;;  %v6237_v61 = vld [vmem:[#allocation2 + $0xf5] sm:$0xff]  ;;  %v6238_v2 = vld [vmem:[#allocation2 + $0xfd] sm:$0xff] }
 0x53f   : > { %8885 = vmatmul.mubr.msk.bf16.gmra.mrb[20].mxu1 %vm228_vm1, %v5280_v26  ;;  %v5589_v26 = vld [vmem:[#allocation2 + $0x104] sm:$0xff] }
 0x540   : > { %8888 = vmatprep.mubr.msk.bf16.mxu1 %vm228_vm1, %v5281_v9  ;;  %v5590_v9 = vld [vmem:[#allocation2 + $0x10c] sm:$0xff] }
 0x541   : > { %v5610_v23 = vpack.c.bf16 %v5590_v9, %v5589_v26  ;;  %v6241_v26 = vld [vmem:[#allocation2 + $0x115] sm:$0xff]  ;;  %v6242_v9 = vld [vmem:[#allocation2 + $0x11d] sm:$0xff] }
 0x542   : > { %v6262_v12 = vpack.c.bf16 %v6242_v9, %v6241_v26 }
 0x547   : > { %8889 = vmatmul.mubr.msk.bf16.gmra.mrb[24].mxu1 %vm228_vm1, %v5282_v11  ;;  %v5593_v11 = vld [vmem:[#allocation2 + $0x124] sm:$0xff] }
 0x548   : > { %8892 = vmatprep.mubr.msk.bf16.mxu1 %vm228_vm1, %v5283_v14  ;;  %v5594_v14 = vld [vmem:[#allocation2 + $0x12c] sm:$0x3f] }
 0x549   : > { %v5612_v58 = vpack.c.bf16 %v5594_v14, %v5593_v11  ;;  %v6246_v14 = vld [vmem:[#allocation2 + $0x13d] sm:$0x3f] }
 0x54f   : > { %8893 = vmatmul.mubr.msk.bf16.gmra.mrb[28].mxu1 %vm228_vm1, %v5284_v55  ;;  %v5919_v55 = vld [vmem:[#allocation2 + $0x134] sm:$0xff] }
 0x550   : > { %8896 = vmatprep.mubr.msk.bf16.mxu1 %vm228_vm1, %v5285_v53  ;;  %v5920_v53 = vld [vmem:[#allocation2 + $0x13c] sm:$0x3f] }
 0x551   : > { %v5938_v52 = vpack.c.bf16 %v5920_v53, %v5919_v55  ;;  %v6540_v55 = vld [vmem:[#allocation2 + $0x3e] sm:$0xff]  ;;  %v6541_v53 = vld [vmem:[#allocation2 + $0x46] sm:$0xff] }
 0x557   : > { %8897 = vmatmul.mubr.msk.bf16.gmra.mrb[32].mxu1 %vm228_vm1, %v5286_v5  ;;  %v6213_v5 = vld [vmem:[#allocation2 + $0x35] sm:$0xff] }
 0x558   : > { %8902 = vmatprep.mubr.msk.bf16.mxu1 %vm228_vm1, %v5595_v44  ;;  %v6214_v44 = vld [vmem:[#allocation2 + $0x3d] sm:$0xff] }
 0x55f   : > { %8903 = vmatmul.mubr.msk.bf16.vlgmr.msra.gmra.mrb[0].mxu1 %vm228_vm1, %v10726_v36 }
 0x560   : > { %8939 = vmatpush3.bf16.msra.mxu1 %v5996_v0  ;;  %8906 = vmatprep.mubr.msk.bf16.mxu1 %vm228_vm1, %v10889_v8  ;;  %v6248_v0 = vpack.c.bf16 %v6214_v44, %v6213_v5  ;;  %v6544_v5 = vld [vmem:[#allocation2 + $0x5e] sm:$0xff]  ;;  %v6545_v44 = vld [vmem:[#allocation2 + $0x66] sm:$0xff] }
 0x561   : > { %9716 = vmatprep.subr.msk.bf16.mxu1 %vm469_vm0, %v10894_v42  ;;  %v6249_v42 = vpack.c.bf16 %v6216_v38, %v6215_v56  ;;  %v6546_v56 = vld [vmem:[#allocation2 + $0x6e] sm:$0xff] }
 0x567   : > { %8907 = vmatmul.mubr.msk.bf16.gmra.mrb[4].mxu1 %vm228_vm1, %v5598_v46 }
 0x568   : > { %8910 = vmatprep.mubr.msk.bf16.mxu1 %vm228_vm1, %v5599_v22 }
 0x56f   : > { %8911 = vmatmul.mubr.msk.bf16.gmra.mrb[8].mxu1 %vm228_vm1, %v5600_v7 }
 0x570   : > { %8914 = vmatprep.mubr.msk.bf16.mxu1 %vm228_vm1, %v5601_v63 }
 0x577   : > { %8915 = vmatmul.mubr.msk.bf16.gmra.mrb[12].mxu1 %vm228_vm1, %v5602_v6 }
 0x578   : > { %8918 = vmatprep.mubr.msk.bf16.mxu1 %vm228_vm1, %v5603_v3 }
 0x57f   : > { %8919 = vmatmul.mubr.msk.bf16.gmra.mrb[16].mxu1 %vm228_vm1, %v5604_v17 }
 0x580   : > { %8922 = vmatprep.mubr.msk.bf16.mxu1 %vm228_vm1, %v5605_v21 }
 0x587   : > { %8923 = vmatmul.mubr.msk.bf16.gmra.mrb[20].mxu1 %vm228_vm1, %v5606_v1 }
 0x588   : > { %8926 = vmatprep.mubr.msk.bf16.mxu1 %vm228_vm1, %v5607_v57 }
 0x58f   : > { %8927 = vmatmul.mubr.msk.bf16.gmra.mrb[24].mxu1 %vm228_vm1, %v5608_v24 }
 0x590   : > { %8930 = vmatprep.mubr.msk.bf16.mxu1 %vm228_vm1, %v5609_v10 }
 0x597   : > { %8931 = vmatmul.mubr.msk.bf16.gmra.mrb[28].mxu1 %vm228_vm1, %v5610_v23 }
 0x598   : > { %8934 = vmatprep.mubr.msk.bf16.mxu1 %vm228_vm1, %v5611_v50 }
 0x59f   : > { %8935 = vmatmul.mubr.msk.bf16.gmra.mrb[32].mxu1 %vm228_vm1, %v5612_v58  ;;  %v6537_v58 = vld [vmem:[#allocation2 + $0x26] sm:$0xff] }
 0x5a0   : > { %8940 = vmatprep.mubr.msk.bf16.mxu1 %vm228_vm1, %v10726_v36  ;;  %v5918_v36 = vld [vmem:[#allocation2 + $0x12c] sm:$0xff] }
 0x5a1   : > { %v5937_v54 = vpack.c.bf16 %v5918_v36, %v5593_v11  ;;  %v6245_v11 = vld [vmem:[#allocation2 + $0x135] sm:$0xff] }
 0x5a7   : > { %8941 = vmatmul.mubr.msk.bf16.vlgmr.msra.gmra.mrb[0].mxu1 %vm228_vm1, %v10889_v8  ;;  %v6648_v8 = vsel %vm469_vm0, %v7943_v15, 0 }
 0x5a8   : > { %8977 = vmatpush3.bf16.msra.mxu1 %v6322_v45  ;;  %8944 = vmatprep.mubr.msk.bf16.mxu1 %vm228_vm1, %v5598_v46  ;;  %v6250_v46 = vpack.c.bf16 %v6218_v13, %v6217_v62  ;;  %v6538_v45 = vld [vmem:[#allocation2 + $0x2e] sm:$0xff]  ;;  %v6549_v62 = vld [vmem:[#allocation2 + $0x86] sm:$0xff] }
 0x5a9   : > { %9717 = vmatprep.subr.msk.bf16.mxu1 %vm469_vm0, %v7943_v15  ;;  %v6264_v15 = vpack.c.bf16 %v6246_v14, %v6245_v11  ;;  %v6573_v36 = vpack.c.bf16 %v6538_v45, %v6537_v58  ;;  %v6550_v13 = vld [vmem:[#allocation2 + $0x8e] sm:$0xff] }
 0x5af   : > { %8945 = vmatmul.mubr.msk.bf16.gmra.mrb[4].mxu1 %vm228_vm1, %v5599_v22  ;;  %v6251_v22 = vpack.c.bf16 %v6220_v4, %v6219_v47  ;;  %v6579_v4 = vpack.c.bf16 %v6550_v13, %v6549_v62 }
 0x5b0   : > { %8948 = vmatprep.mubr.msk.bf16.mxu1 %vm228_vm1, %v5600_v7  ;;  %v6252_v7 = vpack.c.bf16 %v6222_v33, %v6221_v39  ;;  %v6553_v39 = vld [vmem:[#allocation2 + $0xa6] sm:$0xff]  ;;  %v6554_v33 = vld [vmem:[#allocation2 + $0xae] sm:$0xff] }
 0x5b7   : > { %8949 = vmatmul.mubr.msk.bf16.gmra.mrb[8].mxu1 %vm228_vm1, %v5601_v63  ;;  %v6253_v63 = vpack.c.bf16 %v6224_v34, %v6223_v27  ;;  %v6581_v34 = vpack.c.bf16 %v6554_v33, %v6553_v39 }
 0x5b8   : > { %8952 = vmatprep.mubr.msk.bf16.mxu1 %vm228_vm1, %v5602_v6  ;;  %v6254_v6 = vpack.c.bf16 %v6226_v18, %v6225_v25  ;;  %v6557_v25 = vld [vmem:[#allocation2 + $0xc6] sm:$0xff]  ;;  %v6558_v18 = vld [vmem:[#allocation2 + $0xce] sm:$0xff] }
 0x5bf   : > { %8953 = vmatmul.mubr.msk.bf16.gmra.mrb[12].mxu1 %vm228_vm1, %v5603_v3  ;;  %v6255_v3 = vpack.c.bf16 %v6228_v60, %v6227_v32  ;;  %v6583_v60 = vpack.c.bf16 %v6558_v18, %v6557_v25 }
 0x5c0   : > { %8956 = vmatprep.mubr.msk.bf16.mxu1 %vm228_vm1, %v5604_v17  ;;  %v6256_v17 = vpack.c.bf16 %v6230_v19, %v6229_v41  ;;  %v6561_v41 = vld [vmem:[#allocation2 + $0xe6] sm:$0xff]  ;;  %v6562_v19 = vld [vmem:[#allocation2 + $0xee] sm:$0xff] }
 0x5c7   : > { %8957 = vmatmul.mubr.msk.bf16.gmra.mrb[16].mxu1 %vm228_vm1, %v5605_v21  ;;  %v6257_v21 = vpack.c.bf16 %v6232_v43, %v6231_v35  ;;  %v6585_v43 = vpack.c.bf16 %v6562_v19, %v6561_v41 }
 0x5c8   : > { %8960 = vmatprep.mubr.msk.bf16.mxu1 %vm228_vm1, %v5606_v1  ;;  %v6258_v1 = vpack.c.bf16 %v6234_v40, %v6233_v30  ;;  %v6565_v30 = vld [vmem:[#allocation2 + $0x106] sm:$0xff] }
 0x5cf   : > { %8961 = vmatmul.mubr.msk.bf16.gmra.mrb[20].mxu1 %vm228_vm1, %v5607_v57  ;;  %v6259_v57 = vpack.c.bf16 %v6236_v49, %v6235_v48  ;;  %v6587_v48 = vpack.c.bf16 %v10762_v51, %v6565_v30  ;;  %v6568_v49 = vld [vmem:[#allocation2 + $0x11e] sm:$0xff] }
 0x5d0   : > { %8964 = vmatprep.mubr.msk.bf16.mxu1 %vm228_vm1, %v5608_v24  ;;  %v6260_v24 = vpack.c.bf16 %v6238_v2, %v6237_v61  ;;  %v6569_v61 = vld [vmem:[#allocation2 + $0x126] sm:$0xff]  ;;  %v10985_v51 = vld [vmem:[%s11638_s4] ss:$0 sm:$0xff] }
 0x5d7   : > { %8965 = vmatmul.mubr.msk.bf16.gmra.mrb[24].mxu1 %vm228_vm1, %v5609_v10  ;;  %v6261_v10 = vpack.c.bf16 %v6240_v29, %v6239_v31  ;;  %v6571_v31 = vld [vmem:[#allocation2 + $0x136] sm:$0xff]  ;;  %v6572_v29 = vld [vmem:[#allocation2 + $0x13e] sm:$0x3f] }
 0x5d8   : > { %8968 = vmatprep.mubr.msk.bf16.mxu1 %vm228_vm1, %v5610_v23  ;;  %v6243_v23 = vld [vmem:[#allocation2 + $0x125] sm:$0xff] }
 0x5df   : > { %8969 = vmatmul.mubr.msk.bf16.gmra.mrb[28].mxu1 %vm228_vm1, %v5611_v50  ;;  %v6263_v50 = vpack.c.bf16 %v6244_v20, %v6243_v23 }
 0x5e0   : > { %8972 = vmatprep.mubr.msk.bf16.mxu1 %vm228_vm1, %v5937_v54  ;;  %v6539_v54 = vld [vmem:[#allocation2 + $0x36] sm:$0xff] }
 0x5e1   : > { %v6574_v16 = vpack.c.bf16 %v6540_v55, %v6539_v54 }
 0x5e7   : > { %8973 = vmatmul.mubr.msk.bf16.gmra.mrb[32].mxu1 %vm228_vm1, %v5938_v52  ;;  %v6575_v52 = vpack.c.bf16 %v6542_v28, %v6541_v53 }
 0x5e8   : > { %8978 = vmatprep.mubr.msk.bf16.mxu1 %vm228_vm1, %v6247_v59  ;;  %v6543_v59 = vld [vmem:[#allocation2 + $0x56] sm:$0xff] }
 0x5e9   : > { %v6576_v38 = vpack.c.bf16 %v6544_v5, %v6543_v59 }
 0x5ef   : > { %8979 = vmatmul.mubr.msk.bf16.vlgmr.msra.gmra.mrb[0].mxu1 %vm228_vm1, %v6248_v0  ;;  %v6577_v0 = vpack.c.bf16 %v6546_v56, %v6545_v44 }
 0x5f0   : > { %9015 = vmatpush3.bf16.msra.mxu1 %v6648_v8  ;;  %8982 = vmatprep.mubr.msk.bf16.mxu1 %vm228_vm1, %v6249_v42  ;;  %v6547_v8 = vld [vmem:[#allocation2 + $0x76] sm:$0xff]  ;;  %v6548_v42 = vld [vmem:[#allocation2 + $0x7e] sm:$0xff] }
 0x5f1   : > { %v6578_v47 = vpack.c.bf16 %v6548_v42, %v6547_v8 }
 0x5f7   : > { %8983 = vmatmul.mubr.msk.bf16.gmra.mrb[4].mxu1 %vm228_vm1, %v6250_v46  ;;  %v6551_v46 = vld [vmem:[#allocation2 + $0x96] sm:$0xff] }
 0x5f8   : > { %8986 = vmatprep.mubr.msk.bf16.mxu1 %vm228_vm1, %v6251_v22  ;;  %v6552_v22 = vld [vmem:[#allocation2 + $0x9e] sm:$0xff] }
 0x5f9   : > { %v6580_v27 = vpack.c.bf16 %v6552_v22, %v6551_v46 }
 0x5ff   : > { %8987 = vmatmul.mubr.msk.bf16.gmra.mrb[8].mxu1 %vm228_vm1, %v6252_v7  ;;  %v6555_v7 = vld [vmem:[#allocation2 + $0xb6] sm:$0xff] }
 0x600   : > { %8990 = vmatprep.mubr.msk.bf16.mxu1 %vm228_vm1, %v6253_v63  ;;  %v6556_v63 = vld [vmem:[#allocation2 + $0xbe] sm:$0xff] }
 0x601   : > { %v6582_v32 = vpack.c.bf16 %v6556_v63, %v6555_v7 }
 0x607   : > { %8991 = vmatmul.mubr.msk.bf16.gmra.mrb[12].mxu1 %vm228_vm1, %v6254_v6  ;;  %v6559_v6 = vld [vmem:[#allocation2 + $0xd6] sm:$0xff] }
 0x608   : > { %8994 = vmatprep.mubr.msk.bf16.mxu1 %vm228_vm1, %v6255_v3  ;;  %v6560_v3 = vld [vmem:[#allocation2 + $0xde] sm:$0xff] }
 0x609   : > { %v6584_v35 = vpack.c.bf16 %v6560_v3, %v6559_v6 }
 0x60f   : > { %8995 = vmatmul.mubr.msk.bf16.gmra.mrb[16].mxu1 %vm228_vm1, %v6256_v17  ;;  %v6563_v17 = vld [vmem:[#allocation2 + $0xf6] sm:$0xff] }
 0x610   : > { %8998 = vmatprep.mubr.msk.bf16.mxu1 %vm228_vm1, %v6257_v21  ;;  %v6564_v21 = vld [vmem:[#allocation2 + $0xfe] sm:$0xff] }
 0x611   : > { %v6586_v40 = vpack.c.bf16 %v6564_v21, %v6563_v17 }
 0x617   : > { %8999 = vmatmul.mubr.msk.bf16.gmra.mrb[20].mxu1 %vm228_vm1, %v6258_v1  ;;  %v6570_v1 = vld [vmem:[#allocation2 + $0x12e] sm:$0xff] }
 0x618   : > { %9002 = vmatprep.mubr.msk.bf16.mxu1 %vm228_vm1, %v6259_v57  ;;  %v6588_v57 = vpack.c.bf16 %v6568_v49, %v10766_v37  ;;  %v6589_v2 = vpack.c.bf16 %v6570_v1, %v6569_v61 }
 0x61f   : > { %9003 = vmatmul.mubr.msk.bf16.gmra.mrb[24].mxu1 %vm228_vm1, %v6260_v24  ;;  %v6590_v24 = vpack.c.bf16 %v6572_v29, %v6571_v31 }
 0x620   : > { %9006 = vmatprep.mubr.msk.bf16.mxu1 %vm228_vm1, %v6261_v10 }
 0x627   : > { %9007 = vmatmul.mubr.msk.bf16.gmra.mrb[28].mxu1 %vm228_vm1, %v6262_v12 }
 0x628   : > { %9010 = vmatprep.mubr.msk.bf16.mxu1 %vm228_vm1, %v6263_v50 }
 0x62f   : > { %9011 = vmatmul.mubr.msk.bf16.gmra.mrb[32].mxu1 %vm228_vm1, %v6264_v15 }
 0x630   : > { %9016 = vmatprep.mubr.msk.bf16.mxu1 %vm228_vm1, %v6573_v36 }
 0x637   : > { %9017 = vmatmul.mubr.msk.bf16.vlgmr.msra.gmra.mrb[0].mxu1 %vm228_vm1, %v6574_v16 }
 0x638   : > { %9020 = vmatprep.mubr.msk.bf16.mxu1 %vm228_vm1, %v6575_v52 }
 0x63f   : > { %9021 = vmatmul.mubr.msk.bf16.gmra.mrb[4].mxu1 %vm228_vm1, %v6576_v38 }
 0x640   : > { %9024 = vmatprep.mubr.msk.bf16.mxu1 %vm228_vm1, %v6577_v0 }
 0x647   : > { %9025 = vmatmul.mubr.msk.bf16.gmra.mrb[8].mxu1 %vm228_vm1, %v6578_v47 }
 0x648   : > { %9028 = vmatprep.mubr.msk.bf16.mxu1 %vm228_vm1, %v6579_v4 }
 0x64f   : > { %9029 = vmatmul.mubr.msk.bf16.gmra.mrb[12].mxu1 %vm228_vm1, %v6580_v27 }
 0x650   : > { %9032 = vmatprep.mubr.msk.bf16.mxu1 %vm228_vm1, %v6581_v34 }
 0x657   : > { %9033 = vmatmul.mubr.msk.bf16.gmra.mrb[16].mxu1 %vm228_vm1, %v6582_v32 }
 0x658   : > { %9036 = vmatprep.mubr.msk.bf16.mxu1 %vm228_vm1, %v6583_v60 }
 0x65f   : > { %9037 = vmatmul.mubr.msk.bf16.gmra.mrb[20].mxu1 %vm228_vm1, %v6584_v35 }
 0x660   : > { %9040 = vmatprep.mubr.msk.bf16.mxu1 %vm228_vm1, %v6585_v43 }
 0x667   : > { %9041 = vmatmul.mubr.msk.bf16.gmra.mrb[24].mxu1 %vm228_vm1, %v6586_v40 }
 0x668   : > { %9044 = vmatprep.mubr.msk.bf16.mxu1 %vm228_vm1, %v6587_v48 }
 0x66f   : > { %9045 = vmatmul.mubr.msk.bf16.gmra.mrb[28].mxu1 %vm228_vm1, %v6588_v57 }
 0x670   : > { %9048 = vmatprep.mubr.msk.bf16.mxu1 %vm228_vm1, %v6589_v2 }
 0x677   : > { %9049 = vmatmul.mubr.msk.bf16.gmra.mrb[32].mxu1 %vm228_vm1, %v6590_v24 }
 0x70a   : > { %v9018_v10 = vpop.f32.mrb[0].mxu1 }
 0x70b   : > { %v9088_v26 = vadd.f32 %v9018_v10, %v10985_v51  ;;  %v6684_v37 = vpop.f32.mrb[1].mxu1 }
 0x70c   : > { %v9089_v9 = vadd.f32 %v10985_v51, %v6684_v37  ;;  %v9019_v20 = vpop.f32.mrb[2].mxu1 }
 0x70d   : > { %6865 = vst.msk [vmem:[#allocation3 + $0x10] sm:$0xff] %vm228_vm1, %v9088_v26  ;;  %v9090_v12 = vadd.f32 %v9019_v20, %v10985_v51  ;;  %v6687_v23 = vpop.f32.mrb[3].mxu1 }
 0x70e   : > { %6863 = vst.msk [vmem:[#allocation3] sm:$0xff] %vm228_vm1, %v9089_v9  ;;  %v9091_v50 = vadd.f32 %v10985_v51, %v6687_v23 }
 0x70f   : > { %6866 = vst.msk [vmem:[#allocation3 + $0x18] sm:$0xff] %vm228_vm1, %v9090_v12 }
 0x710   : > { %6864 = vst.msk [vmem:[#allocation3 + $0x8] sm:$0xff] %vm228_vm1, %v9091_v50 }
 0x712   : > { %v9022_v11 = vpop.f32.mrb[4].mxu1 }
 0x713   : > { %v9092_v14 = vadd.f32 %v9022_v11, %v10985_v51  ;;  %v6700_v58 = vpop.f32.mrb[5].mxu1 }
 0x714   : > { %v9093_v45 = vadd.f32 %v10985_v51, %v6700_v58  ;;  %v9023_v15 = vpop.f32.mrb[6].mxu1 }
 0x715   : > { %v10997_v36 = vld [vmem:[#allocation3] sm:$0xff]  ;;  %6869 = vst.msk [vmem:[#allocation3 + $0x30] sm:$0xff] %vm228_vm1, %v9092_v14  ;;  %v9094_v54 = vadd.f32 %v9023_v15, %v10985_v51  ;;  %v6703_v55 = vpop.f32.mrb[7].mxu1 }
 0x716   : > { %6867 = vst.msk [vmem:[#allocation3 + $0x20] sm:$0xff] %vm228_vm1, %v9093_v45  ;;  %v9095_v53 = vadd.f32 %v10985_v51, %v6703_v55  ;;  %v6901_v16 = vsel %vm228_vm1, %v10997_v36, 0.0  ;;  %v6911_v52 = vmul.f32 %v10997_v36, %v10997_v36  ;;  %v11010_v59 = vld [vmem:[#allocation3 + $0x12] sm:$0xff] }
 0x717   : > { %v11003_v28 = vld [vmem:[#allocation3 + $0x8] sm:$0xff]  ;;  %6870 = vst.msk [vmem:[#allocation3 + $0x38] sm:$0xff] %vm228_vm1, %v9094_v54  ;;  %v6935_v8 = vmul.f32 %v11010_v59, %v11010_v59  ;;  %v6925_v34 = vsel %vm228_vm1, %v11010_v59, 0.0 }
 0x718   : > { %v6902_v5 = vsel %vm228_vm1, %v11003_v28, 0.0  ;;  %v6912_v44 = vmul.f32 %v11003_v28, %v11003_v28  ;;  %6868 = vst.msk [vmem:[#allocation3 + $0x28] sm:$0xff] %vm228_vm1, %v9095_v53  ;;  %v6913_v47 = vsel %vm228_vm1, %v6911_v52, 0.0 }
 0x719   : > { %v6903_v56 = vadd.f32 %v6902_v5, %v6901_v16  ;;  %v6937_v18 = vsel %vm228_vm1, %v6935_v8, 0.0 }
 0x71a   : > { %v6914_v38 = vsel %vm228_vm1, %v6912_v44, 0.0  ;;  %v9026_v0 = vpop.f32.mrb[8].mxu1 }
 0x71b   : > { %v6904_v42 = vrot.slane %v6903_v56, 4  ;;  %v9096_v62 = vadd.f32 %v9026_v0, %v10985_v51  ;;  %v6716_v13 = vpop.f32.mrb[9].mxu1  ;;  %v6915_v22 = vadd.f32 %v6914_v38, %v6913_v47 }
 0x71c   : > { %v9097_v4 = vadd.f32 %v10985_v51, %v6716_v13  ;;  %v9027_v46 = vpop.f32.mrb[10].mxu1 }
 0x71d   : > { %v11023_v39 = vld [vmem:[#allocation3 + $0x1a] sm:$0xff]  ;;  %6873 = vst.msk [vmem:[#allocation3 + $0x50] sm:$0xff] %vm228_vm1, %v9096_v62  ;;  %v9098_v33 = vadd.f32 %v9027_v46, %v10985_v51  ;;  %v6719_v27 = vpop.f32.mrb[11].mxu1  ;;  %v6905_v32 = vadd.f32 %v6904_v42, %v6903_v56  ;;  %v6916_v17 = vrot.slane %v6915_v22, 4 }
 0x71e   : > { %v6926_v7 = vsel %vm228_vm1, %v11023_v39, 0.0  ;;  %v6936_v63 = vmul.f32 %v11023_v39, %v11023_v39  ;;  %6871 = vst.msk [vmem:[#allocation3 + $0x40] sm:$0xff] %vm228_vm1, %v9097_v4  ;;  %v9099_v25 = vadd.f32 %v10985_v51, %v6719_v27  ;;  %v11051_v2 = vld [vmem:[#allocation3 + $0x36] sm:$0xff] }
 0x71f   : > { %v6927_v60 = vadd.f32 %v6926_v7, %v6925_v34  ;;  %v11036_v6 = vld [vmem:[#allocation3 + $0x24] sm:$0xff]  ;;  %v11038_v3 = vld [vmem:[#allocation3 + $0x2c] sm:$0xff]  ;;  %6874 = vst.msk [vmem:[#allocation3 + $0x58] sm:$0xff] %vm228_vm1, %v9098_v33  ;;  %v6906_v1 = vrot.slane %v6905_v32, 2  ;;  %v6917_v9 = vadd.f32 %v6916_v17, %v6915_v22  ;;  %v6973_v14 = vsel %vm228_vm1, %v11051_v2, 0.0 }
 0x720   : > { %v6938_v41 = vsel %vm228_vm1, %v6936_v63, 0.0  ;;  %v6949_v19 = vsel %vm228_vm1, %v11036_v6, 0.0  ;;  %v6950_v35 = vsel %vm228_vm1, %v11038_v3, 0.0  ;;  %v6959_v43 = vmul.f32 %v11036_v6, %v11036_v6  ;;  %6872 = vst.msk [vmem:[#allocation3 + $0x48] sm:$0xff] %vm228_vm1, %v9099_v25 }
 0x721   : > { %v6928_v21 = vrot.slane %v6927_v60, 4  ;;  %v6939_v30 = vadd.f32 %v6938_v41, %v6937_v18  ;;  %v6951_v40 = vadd.f32 %v6950_v35, %v6949_v19  ;;  %v6960_v48 = vmul.f32 %v11038_v3, %v11038_v3 }
 0x722   : > { %v9030_v49 = vpop.f32.mrb[12].mxu1  ;;  %v6961_v31 = vsel %vm228_vm1, %v6959_v43, 0.0  ;;  %v11063_v58 = vadd.f32 %v6906_v1, %v6905_v32  ;;  %v6983_v54 = vmul.f32 %v11051_v2, %v11051_v2  ;;  %v6918_v44 = vrot.slane %v6917_v9, 2 }
 0x723   : > { %v6929_v57 = vadd.f32 %v6928_v21, %v6927_v60  ;;  %v6940_v61 = vrot.slane %v6939_v30, 4  ;;  %v6732_v29 = vpop.f32.mrb[13].mxu1  ;;  %v6952_v24 = vrot.slane %v6951_v40, 4  ;;  %v6962_v10 = vsel %vm228_vm1, %v6960_v48, 0.0 }
 0x724   : > { %v9100_v26 = vadd.f32 %v9030_v49, %v10985_v51  ;;  %v9031_v37 = vpop.f32.mrb[14].mxu1  ;;  %v6963_v50 = vadd.f32 %v6962_v10, %v6961_v31  ;;  %v11058_v11 = vld [vmem:[#allocation3 + $0x50] sm:$0xff]  ;;  %v6985_v46 = vsel %vm228_vm1, %v6983_v54, 0.0  ;;  %v6908_v35 = vrot.slane %v11063_v58, 1 }
 0x725   : > { %v6941_v20 = vadd.f32 %v6940_v61, %v6939_v30  ;;  %v11056_v12 = vld [vmem:[#allocation3 + $0x3e] sm:$0xff]  ;;  %v6735_v23 = vpop.f32.mrb[15].mxu1  ;;  %v6930_v45 = vrot.slane %v6929_v57, 2  ;;  %v6953_v16 = vadd.f32 %v6952_v24, %v6951_v40  ;;  %v6998_v56 = vsel %vm228_vm1, %v11058_v11, 0.0 }
 0x726   : > { %6877 = vst.msk [vmem:[#allocation3 + $0x70] sm:$0xff] %vm228_vm1, %v9100_v26  ;;  %v6974_v15 = vsel %vm228_vm1, %v11056_v12, 0.0  ;;  %v6964_v52 = vrot.slane %v6963_v50, 4  ;;  %v6984_v38 = vmul.f32 %v11056_v12, %v11056_v12  ;;  %v7008_v42 = vmul.f32 %v11058_v11, %v11058_v11 }
 0x727   : > { %v11069_v55 = vld [vmem:[#allocation3 + $0x48] sm:$0xff]  ;;  %v6942_v53 = vrot.slane %v6941_v20, 2  ;;  %v6975_v5 = vadd.f32 %v6974_v15, %v6973_v14  ;;  %v6931_v4 = vadd.f32 %v6930_v45, %v6929_v57  ;;  %v6954_v7 = vrot.slane %v6953_v16, 2 }
 0x728   : > { %v6997_v0 = vsel %vm228_vm1, %v11069_v55, 0.0  ;;  %v6965_v8 = vadd.f32 %v6964_v52, %v6963_v50  ;;  %v6986_v22 = vsel %vm228_vm1, %v6984_v38, 0.0  ;;  %v7007_v33 = vmul.f32 %v11069_v55, %v11069_v55 }
 0x729   : > { %v6976_v62 = vrot.slane %v6975_v5, 4  ;;  %v6999_v13 = vadd.f32 %v6998_v56, %v6997_v0  ;;  %v6943_v34 = vadd.f32 %v6942_v53, %v6941_v20  ;;  %v6987_v25 = vadd.f32 %v6986_v22, %v6985_v46 }
 0x72a   : > { %v9034_v47 = vpop.f32.mrb[16].mxu1  ;;  %v6966_v32 = vrot.slane %v6965_v8, 2  ;;  %v7009_v41 = vsel %vm228_vm1, %v7007_v33, 0.0  ;;  %v7010_v43 = vsel %vm228_vm1, %v7008_v42, 0.0  ;;  %v6919_v30 = vadd.f32 %v6918_v44, %v6917_v9 }
 0x72b   : > { %v6748_v27 = vpop.f32.mrb[17].mxu1  ;;  %v6977_v63 = vadd.f32 %v6976_v62, %v6975_v5  ;;  %v7000_v60 = vrot.slane %v6999_v13, 4  ;;  %v6988_v21 = vrot.slane %v6987_v25, 4  ;;  %v7011_v48 = vadd.f32 %v7010_v43, %v7009_v41 }
 0x72c   : > { %v9035_v18 = vpop.f32.mrb[18].mxu1  ;;  %v9101_v49 = vadd.f32 %v10985_v51, %v6732_v29  ;;  %v6932_v1 = vrot.slane %v6931_v4, 1  ;;  %v6944_v57 = vrot.slane %v6943_v34, 1  ;;  %v6955_v61 = vadd.f32 %v6954_v7, %v6953_v16 }
 0x72d   : > { %v6751_v19 = vpop.f32.mrb[19].mxu1  ;;  %v6978_v17 = vrot.slane %v6977_v63, 2  ;;  %v7001_v40 = vadd.f32 %v7000_v60, %v6999_v13  ;;  %v6989_v31 = vadd.f32 %v6988_v21, %v6987_v25  ;;  %v6967_v24 = vadd.f32 %v6966_v32, %v6965_v8 }
 0x72e   : > { %v7012_v10 = vrot.slane %v7011_v48, 4  ;;  %6875 = vst.msk [vmem:[#allocation3 + $0x60] sm:$0xff] %vm228_vm1, %v9101_v49  ;;  %v9102_v26 = vadd.f32 %v9031_v37, %v10985_v51  ;;  %v9103_v20 = vadd.f32 %v10985_v51, %v6735_v23  ;;  %v9104_v9 = vadd.f32 %v9034_v47, %v10985_v51 }
 0x72f   : > { %v6979_v50 = vadd.f32 %v6978_v17, %v6977_v63  ;;  %v6990_v14 = vrot.slane %v6989_v31, 2  ;;  %v7002_v45 = vrot.slane %v7001_v40, 2  ;;  %v6920_v54 = vrot.slane %v6919_v30, 1 }
 0x730   : > { %v7013_v29 = vadd.f32 %v7012_v10, %v7011_v48  ;;  %6878 = vst.msk [vmem:[#allocation3 + $0x78] sm:$0xff] %vm228_vm1, %v9102_v26  ;;  %6876 = vst.msk [vmem:[#allocation3 + $0x68] sm:$0xff] %vm228_vm1, %v9103_v20  ;;  %v9105_v53 = vadd.f32 %v10985_v51, %v6748_v27  ;;  %v9106_v16 = vadd.f32 %v9035_v18, %v10985_v51  ;;  %v6956_v23 = vrot.slane %v6955_v61, 1 }
 0x731   : > { %v6933_v37 = vadd.f32 %v6932_v1, %v6931_v4  ;;  %v6945_v5 = vadd.f32 %v6944_v57, %v6943_v34  ;;  %6881 = vst.msk [vmem:[#allocation3 + $0x90] sm:$0xff] %vm228_vm1, %v9104_v9  ;;  %v9107_v44 = vadd.f32 %v10985_v51, %v6751_v19  ;;  %v6968_v38 = vrot.slane %v6967_v24, 1 }
 0x732   : > { %v9038_v15 = vpop.f32.mrb[20].mxu1  ;;  %v6991_v0 = vadd.f32 %v6990_v14, %v6989_v31  ;;  %6879 = vst.msk [vmem:[#allocation3 + $0x80] sm:$0xff] %vm228_vm1, %v9105_v53  ;;  %6882 = vst.msk [vmem:[#allocation3 + $0x98] sm:$0xff] %vm228_vm1, %v9106_v16  ;;  %v6980_v13 = vrot.slane %v6979_v50, 1  ;;  %v11101_v47 = vadd.f32 %v7002_v45, %v7001_v40  ;;  %v6909_v22 = vadd.f32 %v6908_v35, %v11063_v58 }
 0x733   : > { %v6764_v52 = vpop.f32.mrb[21].mxu1  ;;  %v9108_v8 = vadd.f32 %v9038_v15, %v10985_v51  ;;  %6880 = vst.msk [vmem:[#allocation3 + $0x88] sm:$0xff] %vm228_vm1, %v9107_v44  ;;  %v6921_v33 = vadd.f32 %v6920_v54, %v6919_v30  ;;  %v7014_v27 = vrot.slane %v7013_v29, 2  ;;  %v11117_v25 = vadd.f32 %v6956_v23, %v6955_v61 }
 0x734   : > { %v9039_v56 = vpop.f32.mrb[22].mxu1  ;;  %v9109_v42 = vadd.f32 %v10985_v51, %v6764_v52  ;;  %v11113_v7 = vadd.f32 %v6933_v37, %v6909_v22  ;;  %v6992_v18 = vrot.slane %v6991_v0, 1  ;;  %v11119_v58 = vadd.f32 %v6968_v38, %v6967_v24 }
 0x735   : > { %v6767_v62 = vpop.f32.mrb[23].mxu1  ;;  %v9110_v4 = vadd.f32 %v9039_v56, %v10985_v51  ;;  %6885 = vst.msk [vmem:[#allocation3 + $0xb0] sm:$0xff] %vm228_vm1, %v9108_v8  ;;  %v11109_v34 = vld [vmem:[#allocation3 + $0x5a] sm:$0xff]  ;;  %v11115_v63 = vadd.f32 %v6945_v5, %v6921_v33  ;;  %v11121_v32 = vadd.f32 %v6980_v13, %v6979_v50  ;;  %v7004_v60 = vrot.slane %v11101_v47, 1 }
 0x736   : > { %v9111_v46 = vadd.f32 %v10985_v51, %v6767_v62  ;;  %6883 = vst.msk [vmem:[#allocation3 + $0xa0] sm:$0xff] %vm228_vm1, %v9109_v42  ;;  %v7031_v41 = vmul.f32 %v11109_v34, %v11109_v34  ;;  %v11134_v21 = vadd.f32 %v7014_v27, %v7013_v29  ;;  %v7021_v30 = vsel %vm228_vm1, %v11109_v34, 0.0 }
 0x737   : > { %6886 = vst.msk [vmem:[#allocation3 + $0xb8] sm:$0xff] %vm228_vm1, %v9110_v4  ;;  %v11126_v19 = vld [vmem:[#allocation3 + $0x74] sm:$0xff]  ;;  %v11128_v35 = vld [vmem:[#allocation3 + $0x62] sm:$0xff]  ;;  %v11130_v43 = vld [vmem:[#allocation3 + $0x6c] sm:$0xff]  ;;  %v6993_v26 = vadd.f32 %v6992_v18, %v6991_v0 }
 0x738   : > { %6884 = vst.msk [vmem:[#allocation3 + $0xa8] sm:$0xff] %vm228_vm1, %v9111_v46  ;;  %v7046_v40 = vsel %vm228_vm1, %v11126_v19, 0.0  ;;  %v7056_v48 = vmul.f32 %v11126_v19, %v11126_v19  ;;  %v11142_v49 = vld [vmem:[#allocation3 + $0x90] sm:$0xff]  ;;  %v7022_v57 = vsel %vm228_vm1, %v11128_v35, 0.0  ;;  %v7032_v61 = vmul.f32 %v11128_v35, %v11128_v35 }
 0x739   : > { %v7045_v31 = vsel %vm228_vm1, %v11130_v43, 0.0  ;;  %v7055_v24 = vmul.f32 %v11130_v43, %v11130_v43  ;;  %v7023_v50 = vadd.f32 %v7022_v57, %v7021_v30  ;;  %v11157_v45 = vld [vmem:[#allocation3 + $0x98] sm:$0xff]  ;;  %v7033_v15 = vsel %vm228_vm1, %v7031_v41, 0.0 }
 0x73a   : > { %v11132_v17 = vpop.f32.mrb[24].mxu1  ;;  %v7058_v20 = vsel %vm228_vm1, %v7056_v48, 0.0  ;;  %v7047_v14 = vadd.f32 %v7046_v40, %v7045_v31  ;;  %v7034_v54 = vsel %vm228_vm1, %v7032_v61, 0.0  ;;  %v7103_v53 = vmul.f32 %v11142_v49, %v11142_v49  ;;  %v11166_v23 = vld [vmem:[#allocation3 + $0x7e] sm:$0xff]  ;;  %v11168_v44 = vld [vmem:[#allocation3 + $0x86] sm:$0xff] }
 0x73b   : > { %v11144_v1 = vpop.f32.mrb[25].mxu1  ;;  %v7057_v29 = vsel %vm228_vm1, %v7055_v24, 0.0  ;;  %v7024_v16 = vrot.slane %v7023_v50, 4  ;;  %v7035_v52 = vadd.f32 %v7034_v54, %v7033_v15  ;;  %v7093_v56 = vsel %vm228_vm1, %v11142_v49, 0.0 }
 0x73c   : > { %v11154_v10 = vpop.f32.mrb[26].mxu1  ;;  %v7048_v37 = vrot.slane %v7047_v14, 4  ;;  %v7059_v5 = vadd.f32 %v7058_v20, %v7057_v29  ;;  %v7105_v38 = vsel %vm228_vm1, %v7103_v53, 0.0  ;;  %v7094_v0 = vsel %vm228_vm1, %v11157_v45, 0.0 }
 0x73d   : > { %v11159_v9 = vpop.f32.mrb[27].mxu1  ;;  %v7104_v8 = vmul.f32 %v11157_v45, %v11157_v45  ;;  %v7025_v42 = vadd.f32 %v7024_v16, %v7023_v50  ;;  %v7036_v62 = vrot.slane %v7035_v52, 4  ;;  %v7095_v46 = vadd.f32 %v7094_v0, %v7093_v56 }
 0x73e   : > { %v7049_v13 = vadd.f32 %v7048_v37, %v7047_v14  ;;  %v7060_v4 = vrot.slane %v7059_v5, 4  ;;  %v7069_v33 = vsel %vm228_vm1, %v11166_v23, 0.0  ;;  %v7070_v27 = vsel %vm228_vm1, %v11168_v44, 0.0 }
 0x73f   : > { %v7106_v22 = vsel %vm228_vm1, %v7104_v8, 0.0  ;;  %v7026_v41 = vrot.slane %v7025_v42, 2  ;;  %v7037_v30 = vadd.f32 %v7036_v62, %v7035_v52  ;;  %v7016_v61 = vrot.slane %v11134_v21, 1 }
 0x740   : > { %v7061_v40 = vadd.f32 %v7060_v4, %v7059_v5  ;;  %v7107_v48 = vadd.f32 %v7106_v22, %v7105_v38  ;;  %v7096_v31 = vrot.slane %v7095_v46, 4  ;;  %v7071_v24 = vadd.f32 %v7070_v27, %v7069_v33 }
 0x741   : > { %v7080_v20 = vmul.f32 %v11168_v44, %v11168_v44  ;;  %v7027_v15 = vadd.f32 %v7026_v41, %v7025_v42  ;;  %v7050_v54 = vrot.slane %v7049_v13, 2  ;;  %v7079_v29 = vmul.f32 %v11166_v23, %v11166_v23 }
 0x742   : > { %v11182_v18 = vpop.f32.mrb[28].mxu1  ;;  %v7108_v14 = vrot.slane %v7107_v48, 4  ;;  %v6958_v16 = vadd.f32 %v11117_v25, %v11113_v7  ;;  %v7038_v52 = vrot.slane %v7037_v30, 2  ;;  %v7097_v37 = vadd.f32 %v7096_v31, %v7095_v46 }
 0x743   : > { %v11184_v57 = vpop.f32.mrb[29].mxu1  ;;  %v7072_v5 = vrot.slane %v7071_v24, 4  ;;  %v6970_v56 = vadd.f32 %v11119_v58, %v11115_v63  ;;  %v7028_v0 = vrot.slane %v7027_v15, 1  ;;  %v7062_v8 = vrot.slane %v7061_v40, 2 }
 0x744   : > { %v11189_v50 = vpop.f32.mrb[30].mxu1  ;;  %v7109_v38 = vadd.f32 %v7108_v14, %v7107_v48  ;;  %v6982_v42 = vadd.f32 %v11121_v32, %v6958_v16  ;;  %v7005_v62 = vadd.f32 %v7004_v60, %v11101_v47  ;;  %v7082_v22 = vsel %vm228_vm1, %v7080_v20, 0.0  ;;  %v11210_v14 = vld [vmem:[#allocation3 + $0xa2] sm:$0xff] }
 0x745   : > { %v11193_v53 = vpop.f32.mrb[31].mxu1  ;;  %v7073_v4 = vadd.f32 %v7072_v5, %v7071_v24  ;;  %v6994_v33 = vadd.f32 %v6993_v26, %v6970_v56  ;;  %v7017_v7 = vadd.f32 %v7016_v61, %v11134_v21  ;;  %v11205_v25 = vadd.f32 %v7050_v54, %v7049_v13  ;;  %v11212_v26 = vld [vmem:[#allocation3 + $0xaa] sm:$0xff] }
 0x746   : > { %v7081_v46 = vsel %vm228_vm1, %v7079_v29, 0.0  ;;  %v7098_v63 = vrot.slane %v7097_v37, 2  ;;  %v7039_v58 = vadd.f32 %v7038_v52, %v7037_v30  ;;  %v7110_v48 = vrot.slane %v7109_v38, 2 }
 0x747   : > { %v7083_v27 = vadd.f32 %v7082_v22, %v7081_v46  ;;  %v7029_v32 = vadd.f32 %v7028_v0, %v7027_v15  ;;  %v11208_v31 = vadd.f32 %v7062_v8, %v7061_v40  ;;  %v7074_v60 = vrot.slane %v7073_v4, 2 }
 0x748   : > { %v7006_v13 = vadd.f32 %v7005_v62, %v6982_v42  ;;  %v7018_v61 = vadd.f32 %v7017_v7, %v6994_v33  ;;  %v7052_v20 = vrot.slane %v11205_v25, 1  ;;  %v7099_v30 = vadd.f32 %v7098_v63, %v7097_v37 }
 0x749   : > { %v7084_v24 = vrot.slane %v7083_v27, 4  ;;  %v7040_v29 = vrot.slane %v7039_v58, 1  ;;  %v7117_v40 = vsel %vm228_vm1, %v11210_v14, 0.0  ;;  %v7111_v15 = vadd.f32 %v7110_v48, %v7109_v38 }
 0x74a   : > { %v9050_v41 = vpop.f32.mrb[32].mxu1  ;;  %v7030_v52 = vadd.f32 %v7029_v32, %v7006_v13  ;;  %v7064_v5 = vrot.slane %v11208_v31, 1  ;;  %v7118_v56 = vsel %vm228_vm1, %v11212_v26, 0.0  ;;  %v7075_v0 = vadd.f32 %v7074_v60, %v7073_v4  ;;  %v11241_v32 = vld [vmem:[#allocation3 + $0xb4] sm:$0xff] }
 0x74b   : > { %v6812_v47 = vpop.f32.mrb[33].mxu1  ;;  %v7085_v16 = vadd.f32 %v7084_v24, %v7083_v27  ;;  %v7119_v42 = vadd.f32 %v7118_v56, %v7117_v40  ;;  %v7127_v62 = vmul.f32 %v11210_v14, %v11210_v14  ;;  %v7128_v37 = vmul.f32 %v11212_v26, %v11212_v26 }
 0x74c   : > { %v9051_v21 = vpop.f32.mrb[34].mxu1  ;;  %v9112_v22 = vadd.f32 %v11132_v17, %v10985_v51  ;;  %v9113_v38 = vadd.f32 %v10985_v51, %v11144_v1  ;;  %v9114_v33 = vadd.f32 %v11154_v10, %v10985_v51  ;;  %v7100_v7 = vrot.slane %v7099_v30, 1 }
 0x74d   : > { %v6815_v54 = vpop.f32.mrb[35].mxu1  ;;  %v7086_v8 = vrot.slane %v7085_v16, 2  ;;  %v7041_v46 = vadd.f32 %v7040_v29, %v7039_v58  ;;  %v7120_v4 = vrot.slane %v7119_v42, 4  ;;  %v7129_v63 = vsel %vm228_vm1, %v7127_v62, 0.0 }
 0x74e   : > { %v7130_v27 = vsel %vm228_vm1, %v7128_v37, 0.0  ;;  %6889 = vst.msk [vmem:[#allocation3 + $0xd0] sm:$0xff] %vm228_vm1, %v9112_v22  ;;  %6887 = vst.msk [vmem:[#allocation3 + $0xc0] sm:$0xff] %vm228_vm1, %v9113_v38  ;;  %v9115_v17 = vadd.f32 %v10985_v51, %v11159_v9  ;;  %v9116_v1 = vadd.f32 %v11182_v18, %v10985_v51  ;;  %v9117_v10 = vadd.f32 %v10985_v51, %v11184_v57 }
 0x74f   : > { %6890 = vst.msk [vmem:[#allocation3 + $0xd8] sm:$0xff] %vm228_vm1, %v9114_v33  ;;  %v7076_v58 = vrot.slane %v7075_v0, 1  ;;  %v7087_v48 = vadd.f32 %v7086_v8, %v7085_v16  ;;  %v7121_v60 = vadd.f32 %v7120_v4, %v7119_v42  ;;  %v7131_v24 = vadd.f32 %v7130_v27, %v7129_v63 }
 0x750   : > { %6888 = vst.msk [vmem:[#allocation3 + $0xc8] sm:$0xff] %vm228_vm1, %v9115_v17  ;;  %6893 = vst.msk [vmem:[#allocation3 + $0xf0] sm:$0xff] %vm228_vm1, %v9116_v1  ;;  %v9118_v9 = vadd.f32 %v11189_v50, %v10985_v51  ;;  %v9119_v18 = vadd.f32 %v10985_v51, %v11193_v53  ;;  %v9120_v57 = vadd.f32 %v9050_v41, %v10985_v51  ;;  %v7112_v29 = vrot.slane %v7111_v15, 1 }
 0x751   : > { %6891 = vst.msk [vmem:[#allocation3 + $0xe0] sm:$0xff] %vm228_vm1, %v9117_v10  ;;  %v9121_v13 = vadd.f32 %v10985_v51, %v6812_v47  ;;  %v7122_v16 = vrot.slane %v7121_v60, 2  ;;  %v7132_v40 = vrot.slane %v7131_v24, 4  ;;  %v9122_v56 = vadd.f32 %v9051_v21, %v10985_v51 }
 0x752   : > { %v7042_v8 = vadd.f32 %v7041_v46, %v7018_v61  ;;  %v7151_v42 = vmul.f32 %v11241_v32, %v11241_v32  ;;  %6894 = vst.msk [vmem:[#allocation3 + $0xf8] sm:$0xff] %vm228_vm1, %v9118_v9  ;;  %6892 = vst.msk [vmem:[#allocation3 + $0xe8] sm:$0xff] %vm228_vm1, %v9119_v18  ;;  %v9123_v50 = vadd.f32 %v10985_v51, %v6815_v54  ;;  %v7088_v47 = vrot.slane %v7087_v48, 1 }
 0x753   : > { %6897 = vst.msk [vmem:[#allocation3 + $0x110] sm:$0xff] %vm228_vm1, %v9120_v57  ;;  %6895 = vst.msk [vmem:[#allocation3 + $0x100] sm:$0xff] %vm228_vm1, %v9121_v13  ;;  %v7053_v53 = vadd.f32 %v7052_v20, %v11205_v25  ;;  %v7077_v41 = vadd.f32 %v7076_v58, %v7075_v0  ;;  %v7133_v62 = vadd.f32 %v7132_v40, %v7131_v24  ;;  %v7141_v51 = vsel %vm228_vm1, %v11241_v32, 0.0 }
 0x754   : > { %6898 = vst.msk [vmem:[#allocation3 + $0x118] sm:$0x3f] %vm3329_vm5, %v9122_v56  ;;  %v7065_v21 = vadd.f32 %v7064_v5, %v11208_v31  ;;  %v11263_v61 = vadd.f32 %v7122_v16, %v7121_v60  ;;  %v11266_v37 = vadd.f32 %v7100_v7, %v7099_v30  ;;  %v11268_v22 = vadd.f32 %v7112_v29, %v7111_v15 }
 0x755   : > { %6896 = vst.msk [vmem:[#allocation3 + $0x108] sm:$0xff] %vm228_vm1, %v9123_v50  ;;  %v7054_v38 = vadd.f32 %v7053_v53, %v7030_v52  ;;  %v11272_v25 = vld [vmem:[#allocation3 + $0xbc] sm:$0xff]  ;;  %v7153_v54 = vsel %vm228_vm1, %v7151_v42, 0.0  ;;  %v7089_v15 = vadd.f32 %v7088_v47, %v7087_v48  ;;  %v7134_v33 = vrot.slane %v7133_v62, 2 }
 0x756   : > { %v7066_v20 = vadd.f32 %v7065_v21, %v7042_v8  ;;  %v7142_v31 = vsel %vm228_vm1, %v11272_v25, 0.0  ;;  %v7152_v5 = vmul.f32 %v11272_v25, %v11272_v25  ;;  %v11279_v0 = vld [vmem:[#allocation3 + $0xd8] sm:$0xff]  ;;  %v7124_v1 = vrot.slane %v11263_v61, 1 }
 0x757   : > { %11688 = vst [vmem:[#allocation4_spill] sm:$0xff] %v11279_v0  ;;  %v7078_v30 = vadd.f32 %v7077_v41, %v7054_v38  ;;  %v7143_v52 = vadd.f32 %v7142_v31, %v7141_v51  ;;  %v11281_v7 = vld [vmem:[#allocation3 + $0xc6] sm:$0xff]  ;;  %v11283_v46 = vld [vmem:[#allocation3 + $0xce] sm:$0xff]  ;;  %v7189_v24 = vsel %vm228_vm1, %v11279_v0, 0.0  ;;  %v7199_v9 = vmul.f32 %v11279_v0, %v11279_v0 }
 0x758   : > { %v11285_v4 = vld [vmem:[#allocation3 + $0xe0] sm:$0xff]  ;;  %v7154_v63 = vsel %vm228_vm1, %v7152_v5, 0.0  ;;  %v7165_v27 = vsel %vm228_vm1, %v11281_v7, 0.0  ;;  %v7166_v17 = vsel %vm228_vm1, %v11283_v46, 0.0  ;;  %v7175_v60 = vmul.f32 %v11281_v7, %v11281_v7 }
 0x759   : > { %11689 = vst [vmem:[#allocation5_spill] sm:$0xff] %v11285_v4  ;;  %v7144_v10 = vrot.slane %v7143_v52, 4  ;;  %v7155_v58 = vadd.f32 %v7154_v63, %v7153_v54  ;;  %v7167_v48 = vadd.f32 %v7166_v17, %v7165_v27  ;;  %v7176_v18 = vmul.f32 %v11283_v46, %v11283_v46  ;;  %v11304_v56 = vld [vmem:[#allocation3 + $0xea] sm:$0xff]  ;;  %v11309_v51 = vld [vmem:[#allocation3 + $0xf2] sm:$0xff] }
 0x75a   : > { %v7190_v57 = vsel %vm228_vm1, %v11285_v4, 0.0  ;;  %v7177_v40 = vsel %vm228_vm1, %v7175_v60, 0.0  ;;  %11690 = vst [vmem:[#allocation6_spill] sm:$0xff] %v11304_v56  ;;  %v7135_v8 = vadd.f32 %v7134_v33, %v7133_v62  ;;  %v7200_v53 = vmul.f32 %v11285_v4, %v11285_v4  ;;  %11691 = vst [vmem:[#allocation7_spill] sm:$0xff] %v11309_v51 }
 0x75b   : > { %v7145_v13 = vadd.f32 %v7144_v10, %v7143_v52  ;;  %v7156_v29 = vrot.slane %v7155_v58, 4  ;;  %v7168_v16 = vrot.slane %v7167_v48, 4  ;;  %v7178_v42 = vsel %vm228_vm1, %v7176_v18, 0.0 }
 0x75c   : > { %v7191_v50 = vadd.f32 %v7190_v57, %v7189_v24  ;;  %v7179_v38 = vadd.f32 %v7178_v42, %v7177_v40  ;;  %v7201_v54 = vsel %vm228_vm1, %v7199_v9, 0.0  ;;  %v7202_v5 = vsel %vm228_vm1, %v7200_v53, 0.0 }
 0x75d   : > { %v7146_v41 = vrot.slane %v7145_v13, 2  ;;  %v7157_v47 = vadd.f32 %v7156_v29, %v7155_v58  ;;  %v7169_v21 = vadd.f32 %v7168_v16, %v7167_v48  ;;  %v7213_v62 = vsel %vm228_vm1, %v11304_v56, 0.0 }
 0x75e   : > { %v7192_v31 = vrot.slane %v7191_v50, 4  ;;  %v7180_v52 = vrot.slane %v7179_v38, 4  ;;  %v7203_v10 = vadd.f32 %v7202_v5, %v7201_v54  ;;  %v7214_v58 = vsel %vm228_vm1, %v11309_v51, 0.0 }
 0x75f   : > { %v7158_v33 = vrot.slane %v7157_v47, 2  ;;  %v7147_v63 = vadd.f32 %v7146_v41, %v7145_v13  ;;  %v7170_v27 = vrot.slane %v7169_v21, 2  ;;  %v7223_v48 = vmul.f32 %v11304_v56, %v11304_v56 }
 0x760   : > { %v7193_v17 = vadd.f32 %v7192_v31, %v7191_v50  ;;  %v7181_v60 = vadd.f32 %v7180_v52, %v7179_v38  ;;  %v7136_v24 = vrot.slane %v7135_v8, 1  ;;  %v7204_v29 = vrot.slane %v7203_v10, 4 }
 0x761   : > { %v7148_v9 = vrot.slane %v7147_v63, 1  ;;  %v7159_v18 = vadd.f32 %v7158_v33, %v7157_v47  ;;  %v7215_v16 = vadd.f32 %v7214_v58, %v7213_v62  ;;  %v7224_v40 = vmul.f32 %v11309_v51, %v11309_v51 }
 0x762   : > { %v7194_v57 = vrot.slane %v7193_v17, 2  ;;  %v7090_v13 = vadd.f32 %v7089_v15, %v7066_v20  ;;  %v7125_v42 = vadd.f32 %v7124_v1, %v11263_v61  ;;  %v7171_v50 = vadd.f32 %v7170_v27, %v7169_v21  ;;  %v11326_v1 = vld [vmem:[#allocation3 + $0xfc] sm:$0xff] }
 0x763   : > { %v7182_v53 = vrot.slane %v7181_v60, 2  ;;  %v7205_v54 = vadd.f32 %v7204_v29, %v7203_v10  ;;  %v7216_v31 = vrot.slane %v7215_v16, 4  ;;  %v7225_v5 = vsel %vm228_vm1, %v7223_v48, 0.0  ;;  %11692 = vst [vmem:[#allocation9_spill] sm:$0xff] %v11326_v1  ;;  %v11328_v21 = vld [vmem:[#allocation3 + $0x116] sm:$0xff] }
 0x764   : > { %v7195_v41 = vadd.f32 %v7194_v57, %v7193_v17  ;;  %v7102_v38 = vadd.f32 %v11266_v37, %v7078_v30  ;;  %v7137_v52 = vadd.f32 %v7136_v24, %v7135_v8  ;;  %v7149_v47 = vadd.f32 %v7148_v9, %v7147_v63  ;;  %11693 = vst [vmem:[#allocation8_spill] sm:$0xff] %v11328_v21  ;;  %v11330_v37 = vld [vmem:[#allocation3 + $0x104] sm:$0xff] }
 0x765   : > { %v7160_v33 = vrot.slane %v7159_v18, 1  ;;  %v7206_v56 = vrot.slane %v7205_v54, 2  ;;  %v7217_v62 = vadd.f32 %v7216_v31, %v7215_v16  ;;  %v7226_v58 = vsel %vm228_vm1, %v7224_v40, 0.0  ;;  %11694 = vst [vmem:[#allocation10_spill] sm:$0xff] %v11330_v37  ;;  %v11338_v16 = vld [vmem:[#allocation3 + $0x10e] sm:$0xff] }
 0x766   : > { %v7114_v20 = vadd.f32 %v11268_v22, %v7090_v13  ;;  %v7126_v15 = vadd.f32 %v7125_v42, %v7102_v38  ;;  %v7227_v61 = vadd.f32 %v7226_v58, %v7225_v5  ;;  %v7172_v27 = vrot.slane %v7171_v50, 1  ;;  %11695 = vst [vmem:[#allocation11_spill] sm:$0xff] %v11338_v16 }
 0x767   : > { %v7183_v17 = vadd.f32 %v7182_v53, %v7181_v60  ;;  %v7196_v10 = vrot.slane %v7195_v41, 1  ;;  %v7218_v48 = vrot.slane %v7217_v62, 2  ;;  %v7161_v63 = vadd.f32 %v7160_v33, %v7159_v18 }
 0x768   : > { %v7138_v30 = vadd.f32 %v7137_v52, %v7114_v20  ;;  %v7150_v8 = vadd.f32 %v7149_v47, %v7126_v15  ;;  %v7228_v24 = vrot.slane %v7227_v61, 4  ;;  %v7207_v9 = vadd.f32 %v7206_v56, %v7205_v54 }
 0x769   : > { %v7237_v22 = vsel %vm228_vm1, %v11326_v1, 0.0  ;;  %v7247_v57 = vmul.f32 %v11326_v1, %v11326_v1  ;;  %v7272_v29 = vmul.f32 %v11328_v21, %v11328_v21  ;;  %v7219_v60 = vadd.f32 %v7218_v48, %v7217_v62 }
 0x76a   : > { %v7229_v40 = vadd.f32 %v7228_v24, %v7227_v61  ;;  %v7262_v13 = vsel %vm228_vm1, %v11328_v21, 0.0  ;;  %v7238_v18 = vsel %vm228_vm1, %v11330_v37, 0.0  ;;  %v7173_v56 = vadd.f32 %v7172_v27, %v7171_v50 }
 0x76b   : > { %v7184_v42 = vrot.slane %v7183_v17, 1  ;;  %v7197_v53 = vadd.f32 %v7196_v10, %v7195_v41  ;;  %v7239_v54 = vadd.f32 %v7238_v18, %v7237_v22  ;;  %v7248_v5 = vmul.f32 %v11330_v37, %v11330_v37 }
 0x76c   : > { %v7230_v31 = vrot.slane %v7229_v40, 2  ;;  %v7261_v38 = vsel %vm228_vm1, %v11338_v16, 0.0  ;;  %v7271_v52 = vmul.f32 %v11338_v16, %v11338_v16  ;;  %v7208_v47 = vrot.slane %v7207_v9, 1 }
 0x76d   : > { %v7274_v33 = vsel %vm228_vm1, %v7272_v29, 0.0  ;;  %v7240_v62 = vrot.slane %v7239_v54, 4  ;;  %v7263_v58 = vadd.f32 %v7262_v13, %v7261_v38  ;;  %v7220_v20 = vrot.slane %v7219_v60, 1 }
 0x76e   : > { %v7249_v50 = vsel %vm228_vm1, %v7247_v57, 0.0  ;;  %v7250_v41 = vsel %vm228_vm1, %v7248_v5, 0.0  ;;  %v7273_v15 = vsel %vm228_vm1, %v7271_v52, 0.0  ;;  %v7231_v61 = vadd.f32 %v7230_v31, %v7229_v40 }
 0x76f   : > { %v7241_v27 = vadd.f32 %v7240_v62, %v7239_v54  ;;  %v7251_v10 = vadd.f32 %v7250_v41, %v7249_v50  ;;  %v7264_v48 = vrot.slane %v7263_v58, 4  ;;  %v7162_v24 = vadd.f32 %v7161_v63, %v7138_v30 }
 0x770   : > { %v7174_v22 = vadd.f32 %v7173_v56, %v7150_v8  ;;  %v7185_v18 = vadd.f32 %v7184_v42, %v7183_v17  ;;  %v7275_v21 = vadd.f32 %v7274_v33, %v7273_v15  ;;  %v7209_v13 = vadd.f32 %v7208_v47, %v7207_v9 }
 0x771   : > { %v7242_v16 = vrot.slane %v7241_v27, 2  ;;  %v7252_v37 = vrot.slane %v7251_v10, 4  ;;  %v7265_v29 = vadd.f32 %v7264_v48, %v7263_v58  ;;  %v7221_v38 = vadd.f32 %v7220_v20, %v7219_v60 }
 0x772   : > { %v7198_v1 = vadd.f32 %v7197_v53, %v7174_v22  ;;  %v7276_v51 = vrot.slane %v7275_v21, 4  ;;  %v7232_v57 = vrot.slane %v7231_v61, 1  ;;  %v7186_v52 = vadd.f32 %v7185_v18, %v7162_v24 }
 0x773   : > { %v7243_v4 = vadd.f32 %v7242_v16, %v7241_v27  ;;  %v7253_v5 = vadd.f32 %v7252_v37, %v7251_v10  ;;  %v7266_v0 = vrot.slane %v7265_v29, 2 }
 0x774   : > { %v7277_v40 = vadd.f32 %v7276_v51, %v7275_v21  ;;  %v7210_v30 = vadd.f32 %v7209_v13, %v7186_v52  ;;  %v7222_v8 = vadd.f32 %v7221_v38, %v7198_v1  ;;  %v7233_v63 = vadd.f32 %v7232_v57, %v7231_v61 }
 0x775   : > { %v7244_v54 = vrot.slane %v7243_v4, 1  ;;  %v7254_v31 = vrot.slane %v7253_v5, 2  ;;  %v7267_v62 = vadd.f32 %v7266_v0, %v7265_v29 }
 0x776   : > { %v7278_v17 = vrot.slane %v7277_v40, 2  ;;  %v7234_v16 = vadd.f32 %v7233_v63, %v7210_v30  ;;  %v7294_v30 = vld [vmem:[%s9797_s27 + $0x8] sm:$0xff]  ;;  %v11697_v63 = vld [vmem:[#allocation5_spill] sm:$0xff] }
 0x777   : > { %v7245_v56 = vadd.f32 %v7244_v54, %v7243_v4  ;;  %v7255_v42 = vadd.f32 %v7254_v31, %v7253_v5  ;;  %v7268_v33 = vrot.slane %v7267_v62, 1  ;;  %v7971_v31 = vld [vmem:[%s9797_s27 + $0x38] sm:$0xff] }
 0x778   : > { %v7279_v53 = vadd.f32 %v7278_v17, %v7277_v40  ;;  %v7967_v17 = vld [vmem:[%s9797_s27 + $0x28] sm:$0xff] }
 0x779   : > { %v7246_v9 = vadd.f32 %v7245_v56, %v7222_v8  ;;  %v7256_v60 = vrot.slane %v7255_v42, 1  ;;  %v7269_v47 = vadd.f32 %v7268_v33, %v7267_v62  ;;  %v7293_v62 = vld [vmem:[%s9797_s27] sm:$0xff]  ;;  %v11696_v8 = vld [vmem:[#allocation4_spill] sm:$0xff] }
 0x77a   : > { %v7280_v58 = vrot.slane %v7279_v53, 1 }
 0x77b   : > { %v7257_v37 = vadd.f32 %v7256_v60, %v7255_v42  ;;  %v7270_v20 = vadd.f32 %v7269_v47, %v7246_v9  ;;  %v11698_v42 = vld [vmem:[#allocation6_spill] sm:$0xff]  ;;  %v7962_v47 = vld [vmem:[%s9797_s27 + $0x10] sm:$0xff] }
 0x77c   : > { %v7281_v51 = vadd.f32 %v7280_v58, %v7279_v53  ;;  %v11699_v53 = vld [vmem:[#allocation7_spill] sm:$0xff]  ;;  %v7963_v58 = vld [vmem:[%s9797_s27 + $0x18] sm:$0xff] }
 0x77d   : > { %v7258_v50 = vadd.f32 %v7257_v37, %v7234_v16  ;;  %v11354_v21 = vmul.f32 0.00390625, %v7270_v20  ;;  %v7966_v16 = vld [vmem:[%s9797_s27 + $0x20] sm:$0xff]  ;;  %v11700_v37 = vld [vmem:[#allocation9_spill] sm:$0xff] }
 0x77e   : > { %v7970_v20 = vld [vmem:[%s9797_s27 + $0x30] sm:$0xff] }
 0x77f   : > { %v7282_v0 = vadd.f32 %v7281_v51, %v7258_v50  ;;  %v7285_v1 = vmul.f32 %v11354_v21, %v11354_v21  ;;  %v7289_v61 = vsub.f32 %v10997_v36, %v11354_v21  ;;  %v7290_v27 = vsub.f32 %v11003_v28, %v11354_v21  ;;  %v11701_v50 = vld [vmem:[#allocation10_spill] sm:$0xff] }
 0x780   : > { %v7303_v10 = vsub.f32 %v11010_v59, %v11354_v21  ;;  %v7304_v48 = vsub.f32 %v11023_v39, %v11354_v21  ;;  %v7318_v24 = vsub.f32 %v11036_v6, %v11354_v21  ;;  %v7319_v22 = vsub.f32 %v11038_v3, %v11354_v21 }
 0x781   : > { %v7284_v41 = vmul.f32 0.00390625, %v7282_v0  ;;  %v7333_v18 = vsub.f32 %v11051_v2, %v11354_v21  ;;  %v7334_v36 = vsub.f32 %v11056_v12, %v11354_v21  ;;  %v7348_v28 = vsub.f32 %v11069_v55, %v11354_v21  ;;  %v11702_v0 = vld [vmem:[#allocation11_spill] sm:$0xff]  ;;  %v7987_v55 = vld [vmem:[%s9797_s27 + $0x78] sm:$0xff] }
 0x782   : > { %v7349_v59 = vsub.f32 %v11058_v11, %v11354_v21  ;;  %v7363_v39 = vsub.f32 %v11109_v34, %v11354_v21  ;;  %v7364_v6 = vsub.f32 %v11128_v35, %v11354_v21  ;;  %v7378_v3 = vsub.f32 %v11130_v43, %v11354_v21 }
 0x783   : > { %v7286_v4 = vsub.f32 %v7284_v41, %v7285_v1  ;;  %v7379_v2 = vsub.f32 %v11126_v19, %v11354_v21  ;;  %v7393_v12 = vsub.f32 %v11166_v23, %v11354_v21  ;;  %v7394_v29 = vsub.f32 %v11168_v44, %v11354_v21  ;;  %v11703_v41 = vld [vmem:[#allocation8_spill] sm:$0xff] }
 0x784   : > { %v7408_v13 = vsub.f32 %v11142_v49, %v11354_v21  ;;  %v7409_v38 = vsub.f32 %v11157_v45, %v11354_v21  ;;  %v7423_v57 = vsub.f32 %v11210_v14, %v11354_v21  ;;  %v7424_v5 = vsub.f32 %v11212_v26, %v11354_v21  ;;  %v8003_v49 = vld [vmem:[%s9797_s27 + $0xb8] sm:$0xff] }
 0x785   : > { %v7287_v15 = vadd.f32 1e-05, %v7286_v4  ;;  %v7438_v52 = vsub.f32 %v11241_v32, %v11354_v21  ;;  %v11704_v14 = vsub.f32 %v11272_v25, %v11354_v21 }
 0x787   : > { %9728 = vrsqrt.f32 %v7287_v15 }
 0x791   : > { %v11416_v60 = vpop.eup %9728 }
 0x792   : > { %v7291_v15 = vmul.f32 %v11416_v60, %v7289_v61  ;;  %v7292_v9 = vmul.f32 %v11416_v60, %v7290_v27  ;;  %v7305_v33 = vmul.f32 %v11416_v60, %v7303_v10  ;;  %v7306_v56 = vmul.f32 %v11416_v60, %v7304_v48 }
 0x793   : > { %v7320_v51 = vmul.f32 %v11416_v60, %v7318_v24  ;;  %v7321_v1 = vmul.f32 %v11416_v60, %v7319_v22  ;;  %v7335_v54 = vmul.f32 %v11416_v60, %v7333_v18  ;;  %v7336_v4 = vmul.f32 %v11416_v60, %v7334_v36  ;;  %v7974_v36 = vld [vmem:[%s9797_s27 + $0x40] sm:$0xff] }
 0x794   : > { %v7295_v61 = vadd.f32 %v7293_v62, %v7291_v15  ;;  %v7296_v27 = vadd.f32 %v7294_v30, %v7292_v9  ;;  %v7309_v40 = vadd.f32 %v7962_v47, %v7305_v33  ;;  %v7310_v10 = vadd.f32 %v7963_v58, %v7306_v56  ;;  %v7975_v9 = vld [vmem:[%s9797_s27 + $0x48] sm:$0xff]  ;;  %v7978_v47 = vld [vmem:[%s9797_s27 + $0x50] sm:$0xff] }
 0x795   : > { %v7324_v48 = vadd.f32 %v7966_v16, %v7320_v51  ;;  %v7325_v24 = vadd.f32 %v7967_v17, %v7321_v1  ;;  %v7339_v22 = vadd.f32 %v7970_v20, %v7335_v54  ;;  %v7340_v18 = vadd.f32 %v7971_v31, %v7336_v4  ;;  %v7979_v31 = vld [vmem:[%s9797_s27 + $0x58] sm:$0xff]  ;;  %v7982_v20 = vld [vmem:[%s9797_s27 + $0x60] sm:$0xff]  ;;  %v7983_v15 = vld [vmem:[%s9797_s27 + $0x68] sm:$0xff] }
 0x796   : > { %v7297_v62 = vmax.f32 %v7295_v61, 0.0  ;;  %v7298_v30 = vmax.f32 %v7296_v27, 0.0  ;;  %v7311_v56 = vmax.f32 %v7309_v40, 0.0  ;;  %v7312_v33 = vmax.f32 %v7310_v10, 0.0  ;;  %v7986_v61 = vld [vmem:[%s9797_s27 + $0x70] sm:$0xff] }
 0x797   : > { %v7326_v58 = vmax.f32 %v7324_v48, 0.0  ;;  %v7327_v16 = vmax.f32 %v7325_v24, 0.0  ;;  %v7341_v17 = vmax.f32 %v7339_v22, 0.0  ;;  %v7342_v54 = vmax.f32 %v7340_v18, 0.0  ;;  %v7994_v24 = vld [vmem:[%s9797_s27 + $0x90] sm:$0xff] }
 0x798   : > { %7299 = vst.msk [vmem:[%s11445_s25] sm:$0xff] %vm228_vm1, %v7297_v62  ;;  %7300 = vst.msk [vmem:[%s11445_s25 + $0x8] sm:$0xff] %vm228_vm1, %v7298_v30  ;;  %v7350_v40 = vmul.f32 %v11416_v60, %v7348_v28  ;;  %v7351_v51 = vmul.f32 %v11416_v60, %v7349_v59  ;;  %v7365_v1 = vmul.f32 %v11416_v60, %v7363_v39  ;;  %v7995_v30 = vld [vmem:[%s9797_s27 + $0x98] sm:$0xff] }
 0x799   : > { %7964 = vst.msk [vmem:[%s11445_s25 + $0x10] sm:$0xff] %vm228_vm1, %v7311_v56  ;;  %7965 = vst.msk [vmem:[%s11445_s25 + $0x18] sm:$0xff] %vm228_vm1, %v7312_v33  ;;  %v7366_v4 = vmul.f32 %v11416_v60, %v7364_v6  ;;  %v7380_v11 = vmul.f32 %v11416_v60, %v7378_v3  ;;  %v7381_v34 = vmul.f32 %v11416_v60, %v7379_v2  ;;  %v7998_v56 = vld [vmem:[%s9797_s27 + $0xa0] sm:$0xff] }
 0x79a   : > { %7968 = vst.msk [vmem:[%s11445_s25 + $0x20] sm:$0xff] %vm228_vm1, %v7326_v58  ;;  %7969 = vst.msk [vmem:[%s11445_s25 + $0x28] sm:$0xff] %vm228_vm1, %v7327_v16  ;;  %v7395_v35 = vmul.f32 %v11416_v60, %v7393_v12  ;;  %v7396_v28 = vmul.f32 %v11416_v60, %v7394_v29  ;;  %v7354_v43 = vadd.f32 %v7974_v36, %v7350_v40  ;;  %v7990_v12 = vld [vmem:[%s9797_s27 + $0x80] sm:$0xff]  ;;  %v7991_v29 = vld [vmem:[%s9797_s27 + $0x88] sm:$0xff] }
 0x79b   : > { %7972 = vst.msk [vmem:[%s11445_s25 + $0x30] sm:$0xff] %vm228_vm1, %v7341_v17  ;;  %7973 = vst.msk [vmem:[%s11445_s25 + $0x38] sm:$0xff] %vm228_vm1, %v7342_v54  ;;  %v7355_v59 = vadd.f32 %v7975_v9, %v7351_v51  ;;  %v7369_v39 = vadd.f32 %v7978_v47, %v7365_v1  ;;  %v7370_v6 = vadd.f32 %v7979_v31, %v7366_v4  ;;  %v7999_v16 = vld [vmem:[%s9797_s27 + $0xa8] sm:$0xff]  ;;  %v8002_v17 = vld [vmem:[%s9797_s27 + $0xb0] sm:$0xff] }
 0x79c   : > { %v7384_v19 = vadd.f32 %v7982_v20, %v7380_v11  ;;  %v7385_v3 = vadd.f32 %v7983_v15, %v7381_v34  ;;  %v7399_v2 = vadd.f32 %v7986_v61, %v7395_v35  ;;  %v7400_v23 = vadd.f32 %v7987_v55, %v7396_v28  ;;  %v8006_v51 = vld [vmem:[%s9797_s27 + $0xc0] sm:$0xff]  ;;  %v8007_v61 = vld [vmem:[%s9797_s27 + $0xc8] sm:$0xff]  ;;  %v8010_v55 = vld [vmem:[%s9797_s27 + $0xd0] sm:$0xff] }
 0x79d   : > { %v7356_v27 = vmax.f32 %v7354_v43, 0.0  ;;  %v7357_v44 = vmax.f32 %v7355_v59, 0.0  ;;  %v7371_v10 = vmax.f32 %v7369_v39, 0.0  ;;  %v7372_v48 = vmax.f32 %v7370_v6, 0.0  ;;  %v8011_v43 = vld [vmem:[%s9797_s27 + $0xd8] sm:$0xff]  ;;  %v8014_v59 = vld [vmem:[%s9797_s27 + $0xe0] sm:$0xff] }
 0x79e   : > { %v7386_v22 = vmax.f32 %v7384_v19, 0.0  ;;  %v7387_v18 = vmax.f32 %v7385_v3, 0.0  ;;  %v7401_v36 = vmax.f32 %v7399_v2, 0.0  ;;  %v7402_v62 = vmax.f32 %v7400_v23, 0.0 }
 0x79f   : > { %7976 = vst.msk [vmem:[%s11445_s25 + $0x40] sm:$0xff] %vm228_vm1, %v7356_v27  ;;  %7977 = vst.msk [vmem:[%s11445_s25 + $0x48] sm:$0xff] %vm228_vm1, %v7357_v44  ;;  %v7410_v33 = vmul.f32 %v11416_v60, %v7408_v13  ;;  %v7411_v9 = vmul.f32 %v11416_v60, %v7409_v38  ;;  %v7425_v47 = vmul.f32 %v11416_v60, %v7423_v57  ;;  %v8015_v44 = vld [vmem:[%s9797_s27 + $0xe8] sm:$0xff] }
 0x7a0   : > { %7980 = vst.msk [vmem:[%s11445_s25 + $0x50] sm:$0xff] %vm228_vm1, %v7371_v10  ;;  %7981 = vst.msk [vmem:[%s11445_s25 + $0x58] sm:$0xff] %vm228_vm1, %v7372_v48  ;;  %v7426_v58 = vmul.f32 %v11416_v60, %v7424_v5  ;;  %v7440_v45 = vmul.f32 %v11416_v60, %v7438_v52  ;;  %v7441_v26 = vmul.f32 %v11416_v60, %v11704_v14  ;;  %v8018_v10 = vld [vmem:[%s9797_s27 + $0xf0] sm:$0xff] }
 0x7a1   : > { %7984 = vst.msk [vmem:[%s11445_s25 + $0x60] sm:$0xff] %vm228_vm1, %v7386_v22  ;;  %7985 = vst.msk [vmem:[%s11445_s25 + $0x68] sm:$0xff] %vm228_vm1, %v7387_v18  ;;  %v11705_v13 = vsub.f32 %v11281_v7, %v11354_v21  ;;  %v11706_v57 = vsub.f32 %v11283_v46, %v11354_v21  ;;  %v7414_v32 = vadd.f32 %v7990_v12, %v7410_v33 }
 0x7a2   : > { %7988 = vst.msk [vmem:[%s11445_s25 + $0x70] sm:$0xff] %vm228_vm1, %v7401_v36  ;;  %7989 = vst.msk [vmem:[%s11445_s25 + $0x78] sm:$0xff] %vm228_vm1, %v7402_v62  ;;  %v7415_v54 = vadd.f32 %v7991_v29, %v7411_v9  ;;  %v7429_v52 = vadd.f32 %v7994_v24, %v7425_v47  ;;  %v7430_v31 = vadd.f32 %v7995_v30, %v7426_v58 }
 0x7a3   : > { %v7455_v38 = vmul.f32 %v11416_v60, %v11705_v13  ;;  %v7456_v5 = vmul.f32 %v11416_v60, %v11706_v57  ;;  %v7444_v25 = vadd.f32 %v7998_v56, %v7440_v45  ;;  %v7445_v20 = vadd.f32 %v7999_v16, %v7441_v26 }
 0x7a4   : > { %v7416_v1 = vmax.f32 %v7414_v32, 0.0  ;;  %v7417_v46 = vmax.f32 %v7415_v54, 0.0  ;;  %v7431_v4 = vmax.f32 %v7429_v52, 0.0  ;;  %v7432_v15 = vmax.f32 %v7430_v31, 0.0 }
 0x7a5   : > { %v7459_v40 = vadd.f32 %v8002_v17, %v7455_v38  ;;  %v7460_v7 = vadd.f32 %v8003_v49, %v7456_v5  ;;  %v7446_v11 = vmax.f32 %v7444_v25, 0.0  ;;  %v7447_v34 = vmax.f32 %v7445_v20, 0.0 }
 0x7a6   : > { %7992 = vst.msk [vmem:[%s11445_s25 + $0x80] sm:$0xff] %vm228_vm1, %v7416_v1  ;;  %7993 = vst.msk [vmem:[%s11445_s25 + $0x88] sm:$0xff] %vm228_vm1, %v7417_v46  ;;  %v11707_v39 = vsub.f32 %v11696_v8, %v11354_v21  ;;  %v11708_v19 = vsub.f32 %v11697_v63, %v11354_v21  ;;  %v11709_v2 = vsub.f32 %v11698_v42, %v11354_v21  ;;  %v8019_v8 = vld [vmem:[%s9797_s27 + $0xf8] sm:$0xff] }
 0x7a7   : > { %v7461_v35 = vmax.f32 %v7459_v40, 0.0  ;;  %v7462_v28 = vmax.f32 %v7460_v7, 0.0  ;;  %7996 = vst.msk [vmem:[%s11445_s25 + $0x90] sm:$0xff] %vm228_vm1, %v7431_v4  ;;  %7997 = vst.msk [vmem:[%s11445_s25 + $0x98] sm:$0xff] %vm228_vm1, %v7432_v15  ;;  %v11710_v12 = vsub.f32 %v11699_v53, %v11354_v21  ;;  %v11711_v63 = vsub.f32 %v11700_v37, %v11354_v21 }
 0x7a8   : > { %v7470_v6 = vmul.f32 %v11416_v60, %v11707_v39  ;;  %v7471_v3 = vmul.f32 %v11416_v60, %v11708_v19  ;;  %v7485_v23 = vmul.f32 %v11416_v60, %v11709_v2  ;;  %8000 = vst.msk [vmem:[%s11445_s25 + $0xa0] sm:$0xff] %vm228_vm1, %v7446_v11  ;;  %8001 = vst.msk [vmem:[%s11445_s25 + $0xa8] sm:$0xff] %vm228_vm1, %v7447_v34 }
 0x7a9   : > { %v7486_v27 = vmul.f32 %v11416_v60, %v11710_v12  ;;  %8004 = vst.msk [vmem:[%s11445_s25 + $0xb0] sm:$0xff] %vm228_vm1, %v7461_v35  ;;  %8005 = vst.msk [vmem:[%s11445_s25 + $0xb8] sm:$0xff] %vm228_vm1, %v7462_v28  ;;  %v7500_v42 = vmul.f32 %v11416_v60, %v11711_v63  ;;  %v11712_v53 = vsub.f32 %v11701_v50, %v11354_v21 }
 0x7aa   : > { %v11713_v29 = vsub.f32 %v11702_v0, %v11354_v21  ;;  %v11714_v22 = vsub.f32 %v11703_v41, %v11354_v21  ;;  %v7474_v36 = vadd.f32 %v8006_v51, %v7470_v6  ;;  %v7475_v37 = vadd.f32 %v8007_v61, %v7471_v3 }
 0x7ab   : > { %v7501_v48 = vmul.f32 %v11416_v60, %v11712_v53  ;;  %v7489_v62 = vadd.f32 %v8010_v55, %v7485_v23  ;;  %v7490_v30 = vadd.f32 %v8011_v43, %v7486_v27  ;;  %v7504_v50 = vadd.f32 %v8014_v59, %v7500_v42 }
 0x7ac   : > { %v7515_v24 = vmul.f32 %v11416_v60, %v11713_v29  ;;  %v7516_v18 = vmul.f32 %v11416_v60, %v11714_v22  ;;  %v7476_v9 = vmax.f32 %v7474_v36, 0.0  ;;  %v7477_v21 = vmax.f32 %v7475_v37, 0.0 }
 0x7ad   : > { %v7505_v56 = vadd.f32 %v8015_v44, %v7501_v48  ;;  %v7491_v41 = vmax.f32 %v7489_v62, 0.0  ;;  %v7492_v60 = vmax.f32 %v7490_v30, 0.0  ;;  %v7506_v47 = vmax.f32 %v7504_v50, 0.0 }
 0x7ae   : > { %v7519_v0 = vadd.f32 %v8018_v10, %v7515_v24  ;;  %v7520_v33 = vadd.f32 %v8019_v8, %v7516_v18  ;;  %8008 = vst.msk [vmem:[%s11445_s25 + $0xc0] sm:$0xff] %vm228_vm1, %v7476_v9  ;;  %8009 = vst.msk [vmem:[%s11445_s25 + $0xc8] sm:$0xff] %vm228_vm1, %v7477_v21 }
 0x7af   : > { %v7507_v58 = vmax.f32 %v7505_v56, 0.0  ;;  %8012 = vst.msk [vmem:[%s11445_s25 + $0xd0] sm:$0xff] %vm228_vm1, %v7491_v41  ;;  %8013 = vst.msk [vmem:[%s11445_s25 + $0xd8] sm:$0xff] %vm228_vm1, %v7492_v60 }
 0x7b0   : > { %v7521_v16 = vmax.f32 %v7519_v0, 0.0  ;;  %v7522_v17 = vmax.f32 %v7520_v33, 0.0  ;;  %8016 = vst.msk [vmem:[%s11445_s25 + $0xe0] sm:$0xff] %vm228_vm1, %v7506_v47 }
 0x7b1   : > { %8017 = vst.msk [vmem:[%s11445_s25 + $0xe8] sm:$0xff] %vm228_vm1, %v7507_v58 }
 0x7b2   : > { %8020 = vst.msk [vmem:[%s11445_s25 + $0xf0] sm:$0xff] %vm228_vm1, %v7521_v16  ;;  %8021 = vst.msk [vmem:[%s11445_s25 + $0xf8] sm:$0xff] %vm228_vm1, %v7522_v17 }
 0x7b3 PF: > { %s15_s18 = sadd.s32 1, %s9737_s18  }
 0x7b4   : > { %p12_p4 = scmp.ge.s32.totalorder %s15_s18, 4  }
 0x7b6   :  { %14 = sbr.rel (!%p12_p4) target bundleno = 1 (0x1), region = 116 }

</bundles_post_ra>
